<compile_context>
chip_gen: v7x
topology: tpu7x:2x2x1
jax: 0.10.0
libtpu: 0.0.40
codegen_flags: <defaults>
</compile_context>

<pallas_src>
import functools

import jax
import jax.numpy as jnp
import numpy as np
from jax.experimental import pallas as pl
from jax.experimental.pallas import tpu as pltpu


# ---------------------------------------------------------------------------
# Conv matmul kernel (single block, tiny M/K/N)
# ---------------------------------------------------------------------------
def _mm_bias_relu_kernel(x_ref, w_ref, b_ref, o_ref):
    y = jnp.dot(x_ref[...], w_ref[...], preferred_element_type=jnp.float32)
    o_ref[...] = jnp.maximum(y + b_ref[...], 0.0)


def matmul_bias_relu(x, w, b):
    """relu(x @ w + b).  x:(M,K) f32, w:(K,N) f32, b:(1,N) f32 -> (M,N) f32."""
    M, K = x.shape
    N = w.shape[1]
    return pl.pallas_call(
        _mm_bias_relu_kernel,
        out_shape=jax.ShapeDtypeStruct((M, N), jnp.float32),
        grid=(1,),
        in_specs=[
            pl.BlockSpec((M, K), lambda i: (0, 0)),
            pl.BlockSpec((K, N), lambda i: (0, 0)),
            pl.BlockSpec((1, N), lambda i: (0, 0)),
        ],
        out_specs=pl.BlockSpec((M, N), lambda i: (0, 0)),
    )(x, w, b)


# ---------------------------------------------------------------------------
# Fused dual-head MLP kernel: l1 + l2 for both heads in one pallas_call
# ---------------------------------------------------------------------------
def _mlp_kernel(x_ref, w1_ref, b1_ref, w2_ref, b2_ref, o_ref, acc_ref):
    # x_ref : (B, 3136)  bf16  shared across the whole grid
    # w1_ref: (3136, TN) bf16  N-tile j of group g's layer-1 weight
    # b1_ref: (1, TN)    f32
    # w2_ref: (TN, 1024) bf16  K-tile j of group g's layer-2 weight
    # b2_ref: (1, 1024)  f32
    # o_ref : (B, 1024)  bf16  group g's h2
    # acc_ref:(B, 1024)  f32   VMEM accumulator
    j = pl.program_id(1)

    @pl.when(j == 0)
    def _():
        acc_ref[...] = jnp.zeros_like(acc_ref)

    h1 = jnp.dot(x_ref[...], w1_ref[...], preferred_element_type=jnp.float32)
    h1 = jnp.maximum(h1 + b1_ref[...], 0.0).astype(jnp.bfloat16)
    acc_ref[...] += jnp.dot(h1, w2_ref[...], preferred_element_type=jnp.float32)

    @pl.when(j == pl.num_programs(1) - 1)
    def _():
        o_ref[...] = jnp.maximum(acc_ref[...] + b2_ref[...], 0.0).astype(o_ref.dtype)


def fused_mlp(x, w1, b1, w2, b2, *, tn=512):
    """h2[g] = relu(relu(x @ w1[g] + b1[g]) @ w2[g] + b2[g]) for g in {av, sv}.

    x : (B, 3136) bf16 (shared across groups)
    w1: (2, 3136, 1024) bf16, b1: (2, 1, 1024) f32
    w2: (2, 1024, 1024) bf16, b2: (2, 1, 1024) f32
    returns (2, B, 1024) bf16.
    """
    G, K1, N1 = w1.shape
    _, K2, N2 = w2.shape
    assert K2 == N1
    B = x.shape[0]
    if tn > N1:
        tn = N1
    assert N1 % tn == 0

    return pl.pallas_call(
        _mlp_kernel,
        out_shape=jax.ShapeDtypeStruct((G, B, N2), jnp.bfloat16),
        grid=(G, N1 // tn),
        in_specs=[
            pl.BlockSpec((B, K1), lambda g, j: (0, 0)),            # shared feat
            pl.BlockSpec((None, K1, tn), lambda g, j: (g, 0, j)),  # l1 weight N-tile
            pl.BlockSpec((None, 1, tn), lambda g, j: (g, 0, j)),   # l1 bias  N-tile
            pl.BlockSpec((None, tn, N2), lambda g, j: (g, j, 0)),  # l2 weight K-tile
            pl.BlockSpec((None, 1, N2), lambda g, j: (g, 0, 0)),   # l2 bias
        ],
        out_specs=pl.BlockSpec((None, B, N2), lambda g, j: (g, 0, 0)),
        scratch_shapes=[pltpu.VMEM((B, N2), jnp.float32)],
        compiler_params=pltpu.CompilerParams(
            dimension_semantics=("parallel", "arbitrary")),
    )(x, w1, b1, w2, b2)


# ---------------------------------------------------------------------------
# Dueling head: packed av3/sv3 matmul + dueling combine in one kernel
# ---------------------------------------------------------------------------
def _head_kernel(h_ref, w_ref, b_ref, o_ref, *, nb_actions, batch):
    # h_ref: (2B, 1024) bf16 -- rows [0:B] = action hidden, [B:2B] = state hidden
    # w_ref: (1024, A+1) bf16 -- cols [0:A] = av3 weight, col A = sv3 weight
    y = jnp.dot(h_ref[...], w_ref[...],
                preferred_element_type=jnp.float32) + b_ref[...]   # (2B, A+1)
    av = y[:batch, :nb_actions]                                    # (B, A)
    sv = jnp.maximum(y[batch:, nb_actions:nb_actions + 1], 0.0)    # (B, 1), ReLU(sv3)
    mean = jnp.sum(av) / float(batch * nb_actions)                 # torch .mean(): global
    o_ref[...] = (sv + (av - mean)).astype(o_ref.dtype)


def dueling_head(h2, w, b, *, nb_actions):
    """h2: (2B, 1024) bf16 -> Q-values (B, A) f32."""
    BB, K = h2.shape
    B = BB // 2
    return pl.pallas_call(
        functools.partial(_head_kernel, nb_actions=nb_actions, batch=B),
        out_shape=jax.ShapeDtypeStruct((B, nb_actions), jnp.float32),
        grid=(1,),
        in_specs=[
            pl.BlockSpec((BB, K), lambda i: (0, 0)),
            pl.BlockSpec((K, nb_actions + 1), lambda i: (0, 0)),
            pl.BlockSpec((1, nb_actions + 1), lambda i: (0, 0)),
        ],
        out_specs=pl.BlockSpec((B, nb_actions), lambda i: (0, 0)),
    )(h2, w, b)


# ---------------------------------------------------------------------------
# Conv-as-matmul glue (NHWC im2col, no per-layer layout transposes)
# ---------------------------------------------------------------------------
def im2col_nhwc(x, kh, kw, stride):
    """x: (B,H,W,C) -> (B*Ho*Wo, kh*kw*C), column order (kh, kw, C)."""
    B, H, W, C = x.shape
    Ho = (H - kh) // stride + 1
    Wo = (W - kw) // stride + 1
    parts = []
    for i in range(kh):
        for j in range(kw):
            parts.append(x[:, i:i + stride * Ho:stride,
                           j:j + stride * Wo:stride, :])      # (B, Ho, Wo, C)
    p = jnp.stack(parts, axis=3)                              # (B, Ho, Wo, kh*kw, C)
    return p.reshape(B * Ho * Wo, kh * kw * C), Ho, Wo


def conv2d_relu_nhwc(x, wmat, b, kh, kw, stride):
    """NHWC conv + ReLU via im2col + Pallas matmul.  wmat: (kh*kw*C, O)."""
    B = x.shape[0]
    out_c = wmat.shape[-1]
    patches, Ho, Wo = im2col_nhwc(x, kh, kw, stride)
    y = matmul_bias_relu(patches, wmat, b)                    # (B*Ho*Wo, O)
    return y.reshape(B, Ho, Wo, out_c)


# ---------------------------------------------------------------------------
# Parameter init (torch-style layouts) + packed kernel params
# ---------------------------------------------------------------------------
def init_conv(key, out_c, in_c, kh, kw):
    k1, k2 = jax.random.split(key)
    bound = 1.0 / np.sqrt(in_c * kh * kw)
    w = jax.random.uniform(k1, (out_c, in_c, kh, kw), jnp.float32, -bound, bound)
    b = jax.random.uniform(k2, (out_c,), jnp.float32, -bound, bound)
    return w, b


def init_linear(key, in_f, out_f):
    k1, k2 = jax.random.split(key)
    bound = 1.0 / np.sqrt(in_f)
    w = jax.random.uniform(k1, (in_f, out_f), jnp.float32, -bound, bound)
    b = jax.random.uniform(k2, (out_f,), jnp.float32, -bound, bound)
    return w, b


def init_params(seed=0, nb_actions=4):
    keys = jax.random.split(jax.random.PRNGKey(seed), 9)
    p = {}
    p["conv1"] = init_conv(keys[0], 32, 1, 8, 8)
    p["conv2"] = init_conv(keys[1], 64, 32, 4, 4)
    p["conv3"] = init_conv(keys[2], 64, 64, 3, 3)
    p["av1"] = init_linear(keys[3], 3136, 1024)
    p["av2"] = init_linear(keys[4], 1024, 1024)
    p["av3"] = init_linear(keys[5], 1024, nb_actions)
    p["sv1"] = init_linear(keys[6], 3136, 1024)
    p["sv2"] = init_linear(keys[7], 1024, 1024)
    p["sv3"] = init_linear(keys[8], 1024, 1)
    return p


def prepare_params(raw, nb_actions):
    """Pack raw torch-style params into the fused layouts the kernels use."""
    fp = {}

    def conv_pack(prefix, w, b):
        o, c, kh, kw = w.shape
        # (O,C,kh,kw) -> (kh,kw,C,O) -> (kh*kw*C, O): matches NHWC im2col column order
        fp[prefix + "_w"] = jnp.transpose(w, (2, 3, 1, 0)).reshape(kh * kw * c, o)
        fp[prefix + "_b"] = b.reshape(1, o)

    conv_pack("c1", *raw["conv1"])
    conv_pack("c2", *raw["conv2"])
    conv_pack("c3", *raw["conv3"])

    # Fold the torch (C,H,W) flatten permutation into the layer-1 weight rows so
    # the forward can use a plain NHWC reshape for feat (no runtime transpose).
    # torch row index: c*49 + h*7 + w  ->  kernel row index: h*7*64 + w*64 + c.
    def perm_rows(w):
        return w.reshape(64, 7, 7, -1).transpose(1, 2, 0, 3).reshape(3136, -1)

    # Group 0 = action-value head, group 1 = state-value head.
    fp["l1_w"] = jnp.stack([perm_rows(raw["av1"][0]),
                            perm_rows(raw["sv1"][0])]).astype(jnp.bfloat16)     # (2,3136,1024)
    fp["l1_b"] = jnp.stack([raw["av1"][1], raw["sv1"][1]]).reshape(2, 1, -1)    # f32
    fp["l2_w"] = jnp.stack([raw["av2"][0], raw["sv2"][0]]).astype(jnp.bfloat16) # (2,1024,1024)
    fp["l2_b"] = jnp.stack([raw["av2"][1], raw["sv2"][1]]).reshape(2, 1, -1)    # f32
    # Packed head weight: cols [0:A] = av3, col A = sv3.
    fp["head_w"] = jnp.concatenate([raw["av3"][0], raw["sv3"][0]],
                                   axis=1).astype(jnp.bfloat16)                 # (1024, A+1)
    fp["head_b"] = jnp.concatenate([raw["av3"][1],
                                    raw["sv3"][1]]).reshape(1, nb_actions + 1)  # f32
    return fp


# ---------------------------------------------------------------------------
# Forward pass
# ---------------------------------------------------------------------------
def namco_boi_forward(x, fp, *, nb_actions=4):
    B = x.shape[0]
    x = jnp.transpose(x, (0, 2, 3, 1))                            # NCHW -> NHWC (once)
    x = conv2d_relu_nhwc(x, fp["c1_w"], fp["c1_b"], 8, 8, 4)      # (B, 20, 20, 32)
    x = conv2d_relu_nhwc(x, fp["c2_w"], fp["c2_b"], 4, 4, 2)      # (B, 9, 9, 64)
    x = conv2d_relu_nhwc(x, fp["c3_w"], fp["c3_b"], 3, 3, 1)      # (B, 7, 7, 64)
    # Plain NHWC flatten; the torch (C,H,W) permutation lives in fp["l1_w"] rows.
    feat = x.reshape(B, -1).astype(jnp.bfloat16)                  # (B, 3136) bf16

    # Fused dual-head MLP (dropout == identity in eval): one pallas_call.
    h2 = fused_mlp(feat, fp["l1_w"], fp["l1_b"], fp["l2_w"], fp["l2_b"], tn=512)
    h2 = h2.reshape(2 * B, -1)                                    # rows: [av hid; sv hid]

    # Packed av3 + relu(sv3) + dueling combine.
    return dueling_head(h2, fp["head_w"], fp["head_b"], nb_actions=nb_actions)


# ---------------------------------------------------------------------------
# Pure-JAX reference (same bf16 weight rounding, f32 accumulation)
# ---------------------------------------------------------------------------
def reference_forward(x, raw):
    def conv(x, w, b, s):
        y = jax.lax.conv_general_dilated(
            x, w, (s, s), "VALID",
            dimension_numbers=("NCHW", "OIHW", "NCHW"))
        return jnp.maximum(y + b[None, :, None, None], 0.0)

    x = conv(x, *raw["conv1"], 4)
    x = conv(x, *raw["conv2"], 2)
    x = conv(x, *raw["conv3"], 1)
    feat = x.reshape(x.shape[0], -1)                              # torch (C,H,W) flatten

    def lin(h, w, b, relu):
        y = jnp.dot(h.astype(jnp.bfloat16), w.astype(jnp.bfloat16),
                    preferred_element_type=jnp.float32) + b
        return jnp.maximum(y, 0.0) if relu else y

    sv = lin(lin(lin(feat, *raw["sv1"], True), *raw["sv2"], True),
             *raw["sv3"], True)
    av = lin(lin(lin(feat, *raw["av1"], True), *raw["av2"], True),
             *raw["av3"], False)
    return sv + (av - jnp.mean(av))


# ---------------------------------------------------------------------------
if __name__ == "__main__":
    nb_actions = 4
    raw = init_params(seed=0, nb_actions=nb_actions)
    fp = prepare_params(raw, nb_actions)

    # batch=2, single-channel 84x84 frames (required by the 3136-wide Linear)
    x = jax.random.normal(jax.random.PRNGKey(0), (2, 1, 84, 84), jnp.float32)

    fwd = jax.jit(functools.partial(namco_boi_forward, nb_actions=nb_actions))
    out = jax.block_until_ready(fwd(x, fp))

    ref = reference_forward(x, raw)
    assert out.shape == (2, nb_actions), out.shape
    np.testing.assert_allclose(np.asarray(out), np.asarray(ref),
                               rtol=2e-2, atol=2e-2)
    print("KERNEL_OK")
</pallas_src>

<mosaic_0001>
module attributes {stable_mosaic.version = 11 : i64} {
  func.func @_mm_bias_relu_kernel(%arg0: i32, %arg1: memref<800x64xf32, #tpu.memory_space<vmem>>, %arg2: memref<64x32xf32, #tpu.memory_space<vmem>>, %arg3: memref<1x32xf32, #tpu.memory_space<vmem>>, %arg4: memref<800x32xf32, #tpu.memory_space<vmem>>) attributes {dimension_semantics = [#tpu.dimension_semantics<arbitrary>], iteration_bounds = array<i64: 1>, scalar_prefetch = 0 : i64, scratch_operands = 0 : i64, tpu.core_type = #tpu.core_type<tc>, window_params = [{pipeline_mode = #tpu.pipeline_mode<synchronous>, transform_indices = @transform_0, window_bounds = array<i64: 800, 64>}, {pipeline_mode = #tpu.pipeline_mode<synchronous>, transform_indices = @transform_1, window_bounds = array<i64: 64, 32>}, {pipeline_mode = #tpu.pipeline_mode<synchronous>, transform_indices = @transform_2, window_bounds = array<i64: 1, 32>}, {pipeline_mode = #tpu.pipeline_mode<synchronous>, transform_indices = @transform_3, window_bounds = array<i64: 800, 32>}]} {
    %c0 = arith.constant 0 : index
    %c0_0 = arith.constant 0 : index
    %0 = vector.load %arg1[%c0, %c0_0] : memref<800x64xf32, #tpu.memory_space<vmem>>, vector<800x64xf32>
    %c0_1 = arith.constant 0 : index
    %c0_2 = arith.constant 0 : index
    %1 = vector.load %arg2[%c0_1, %c0_2] : memref<64x32xf32, #tpu.memory_space<vmem>>, vector<64x32xf32>
    %cst = arith.constant dense<0.000000e+00> : vector<800x32xf32>
    %2 = tpu.matmul %0, %1, %cst {dimension_numbers = #tpu.dot_dimension_numbers<[1], [0], [0], [1], [0, 0, 1, 1], [], []>} : vector<800x64xf32>, vector<64x32xf32>, vector<800x32xf32> -> vector<800x32xf32>
    %c0_3 = arith.constant 0 : index
    %c0_4 = arith.constant 0 : index
    %3 = vector.load %arg3[%c0_3, %c0_4] : memref<1x32xf32, #tpu.memory_space<vmem>>, vector<1x32xf32>
    %4 = vector.broadcast %3 : vector<1x32xf32> to vector<800x32xf32>
    %5 = arith.addf %2, %4 : vector<800x32xf32>
    %cst_5 = arith.constant 0.000000e+00 : f32
    %6 = vector.broadcast %cst_5 : f32 to vector<800x32xf32>
    %7 = arith.maximumf %5, %6 : vector<800x32xf32>
    %c0_6 = arith.constant 0 : index
    %c0_7 = arith.constant 0 : index
    %8 = vector.load %arg4[%c0_6, %c0_7] : memref<800x32xf32, #tpu.memory_space<vmem>>, vector<800x32xf32>
    tpu.vector_store %arg4[%c0_6, %c0_7], %7 {strides = array<i32>} : memref<800x32xf32, #tpu.memory_space<vmem>>, vector<800x32xf32>,
    return
  }
  func.func @transform_0(%arg0: i32) -> (i32, i32) {
    %c0_i32 = arith.constant 0 : i32
    %c0_i32_0 = arith.constant 0 : i32
    %c0_i32_1 = arith.constant 0 : i32
    return %c0_i32, %c0_i32_0 : i32, i32
  }
  func.func @transform_1(%arg0: i32) -> (i32, i32) {
    %c0_i32 = arith.constant 0 : i32
    %c0_i32_0 = arith.constant 0 : i32
    %c0_i32_1 = arith.constant 0 : i32
    return %c0_i32, %c0_i32_0 : i32, i32
  }
  func.func @transform_2(%arg0: i32) -> (i32, i32) {
    %c0_i32 = arith.constant 0 : i32
    %c0_i32_0 = arith.constant 0 : i32
    %c0_i32_1 = arith.constant 0 : i32
    return %c0_i32, %c0_i32_0 : i32, i32
  }
  func.func @transform_3(%arg0: i32) -> (i32, i32) {
    %c0_i32 = arith.constant 0 : i32
    %c0_i32_0 = arith.constant 0 : i32
    %c0_i32_1 = arith.constant 0 : i32
    return %c0_i32, %c0_i32_0 : i32, i32
  }
}

module attributes {stable_mosaic.version = 11 : i64} {
  func.func @_mm_bias_relu_kernel(%arg0: i32, %arg1: memref<162x512xf32, #tpu.memory_space<vmem>>, %arg2: memref<512x64xf32, #tpu.memory_space<vmem>>, %arg3: memref<1x64xf32, #tpu.memory_space<vmem>>, %arg4: memref<162x64xf32, #tpu.memory_space<vmem>>) attributes {dimension_semantics = [#tpu.dimension_semantics<arbitrary>], iteration_bounds = array<i64: 1>, scalar_prefetch = 0 : i64, scratch_operands = 0 : i64, tpu.core_type = #tpu.core_type<tc>, window_params = [{pipeline_mode = #tpu.pipeline_mode<synchronous>, transform_indices = @transform_0, window_bounds = array<i64: 162, 512>}, {pipeline_mode = #tpu.pipeline_mode<synchronous>, transform_indices = @transform_1, window_bounds = array<i64: 512, 64>}, {pipeline_mode = #tpu.pipeline_mode<synchronous>, transform_indices = @transform_2, window_bounds = array<i64: 1, 64>}, {pipeline_mode = #tpu.pipeline_mode<synchronous>, transform_indices = @transform_3, window_bounds = array<i64: 162, 64>}]} {
    %c0 = arith.constant 0 : index
    %c0_0 = arith.constant 0 : index
    %0 = vector.load %arg1[%c0, %c0_0] : memref<162x512xf32, #tpu.memory_space<vmem>>, vector<162x512xf32>
    %c0_1 = arith.constant 0 : index
    %c0_2 = arith.constant 0 : index
    %1 = vector.load %arg2[%c0_1, %c0_2] : memref<512x64xf32, #tpu.memory_space<vmem>>, vector<512x64xf32>
    %cst = arith.constant dense<0.000000e+00> : vector<162x64xf32>
    %2 = tpu.matmul %0, %1, %cst {dimension_numbers = #tpu.dot_dimension_numbers<[1], [0], [0], [1], [0, 0, 1, 1], [], []>} : vector<162x512xf32>, vector<512x64xf32>, vector<162x64xf32> -> vector<162x64xf32>
    %c0_3 = arith.constant 0 : index
    %c0_4 = arith.constant 0 : index
    %3 = vector.load %arg3[%c0_3, %c0_4] : memref<1x64xf32, #tpu.memory_space<vmem>>, vector<1x64xf32>
    %4 = vector.broadcast %3 : vector<1x64xf32> to vector<162x64xf32>
    %5 = arith.addf %2, %4 : vector<162x64xf32>
    %cst_5 = arith.constant 0.000000e+00 : f32
    %6 = vector.broadcast %cst_5 : f32 to vector<162x64xf32>
    %7 = arith.maximumf %5, %6 : vector<162x64xf32>
    %c0_6 = arith.constant 0 : index
    %c0_7 = arith.constant 0 : index
    %8 = vector.load %arg4[%c0_6, %c0_7] : memref<162x64xf32, #tpu.memory_space<vmem>>, vector<162x64xf32>
    tpu.vector_store %arg4[%c0_6, %c0_7], %7 {strides = array<i32>} : memref<162x64xf32, #tpu.memory_space<vmem>>, vector<162x64xf32>,
    return
  }
  func.func @transform_0(%arg0: i32) -> (i32, i32) {
    %c0_i32 = arith.constant 0 : i32
    %c0_i32_0 = arith.constant 0 : i32
    %c0_i32_1 = arith.constant 0 : i32
    return %c0_i32, %c0_i32_0 : i32, i32
  }
  func.func @transform_1(%arg0: i32) -> (i32, i32) {
    %c0_i32 = arith.constant 0 : i32
    %c0_i32_0 = arith.constant 0 : i32
    %c0_i32_1 = arith.constant 0 : i32
    return %c0_i32, %c0_i32_0 : i32, i32
  }
  func.func @transform_2(%arg0: i32) -> (i32, i32) {
    %c0_i32 = arith.constant 0 : i32
    %c0_i32_0 = arith.constant 0 : i32
    %c0_i32_1 = arith.constant 0 : i32
    return %c0_i32, %c0_i32_0 : i32, i32
  }
  func.func @transform_3(%arg0: i32) -> (i32, i32) {
    %c0_i32 = arith.constant 0 : i32
    %c0_i32_0 = arith.constant 0 : i32
    %c0_i32_1 = arith.constant 0 : i32
    return %c0_i32, %c0_i32_0 : i32, i32
  }
}

module attributes {stable_mosaic.version = 11 : i64} {
  func.func @_mm_bias_relu_kernel(%arg0: i32, %arg1: memref<98x576xf32, #tpu.memory_space<vmem>>, %arg2: memref<576x64xf32, #tpu.memory_space<vmem>>, %arg3: memref<1x64xf32, #tpu.memory_space<vmem>>, %arg4: memref<98x64xf32, #tpu.memory_space<vmem>>) attributes {dimension_semantics = [#tpu.dimension_semantics<arbitrary>], iteration_bounds = array<i64: 1>, scalar_prefetch = 0 : i64, scratch_operands = 0 : i64, tpu.core_type = #tpu.core_type<tc>, window_params = [{pipeline_mode = #tpu.pipeline_mode<synchronous>, transform_indices = @transform_0, window_bounds = array<i64: 98, 576>}, {pipeline_mode = #tpu.pipeline_mode<synchronous>, transform_indices = @transform_1, window_bounds = array<i64: 576, 64>}, {pipeline_mode = #tpu.pipeline_mode<synchronous>, transform_indices = @transform_2, window_bounds = array<i64: 1, 64>}, {pipeline_mode = #tpu.pipeline_mode<synchronous>, transform_indices = @transform_3, window_bounds = array<i64: 98, 64>}]} {
    %c0 = arith.constant 0 : index
    %c0_0 = arith.constant 0 : index
    %0 = vector.load %arg1[%c0, %c0_0] : memref<98x576xf32, #tpu.memory_space<vmem>>, vector<98x576xf32>
    %c0_1 = arith.constant 0 : index
    %c0_2 = arith.constant 0 : index
    %1 = vector.load %arg2[%c0_1, %c0_2] : memref<576x64xf32, #tpu.memory_space<vmem>>, vector<576x64xf32>
    %cst = arith.constant dense<0.000000e+00> : vector<98x64xf32>
    %2 = tpu.matmul %0, %1, %cst {dimension_numbers = #tpu.dot_dimension_numbers<[1], [0], [0], [1], [0, 0, 1, 1], [], []>} : vector<98x576xf32>, vector<576x64xf32>, vector<98x64xf32> -> vector<98x64xf32>
    %c0_3 = arith.constant 0 : index
    %c0_4 = arith.constant 0 : index
    %3 = vector.load %arg3[%c0_3, %c0_4] : memref<1x64xf32, #tpu.memory_space<vmem>>, vector<1x64xf32>
    %4 = vector.broadcast %3 : vector<1x64xf32> to vector<98x64xf32>
    %5 = arith.addf %2, %4 : vector<98x64xf32>
    %cst_5 = arith.constant 0.000000e+00 : f32
    %6 = vector.broadcast %cst_5 : f32 to vector<98x64xf32>
    %7 = arith.maximumf %5, %6 : vector<98x64xf32>
    %c0_6 = arith.constant 0 : index
    %c0_7 = arith.constant 0 : index
    %8 = vector.load %arg4[%c0_6, %c0_7] : memref<98x64xf32, #tpu.memory_space<vmem>>, vector<98x64xf32>
    tpu.vector_store %arg4[%c0_6, %c0_7], %7 {strides = array<i32>} : memref<98x64xf32, #tpu.memory_space<vmem>>, vector<98x64xf32>,
    return
  }
  func.func @transform_0(%arg0: i32) -> (i32, i32) {
    %c0_i32 = arith.constant 0 : i32
    %c0_i32_0 = arith.constant 0 : i32
    %c0_i32_1 = arith.constant 0 : i32
    return %c0_i32, %c0_i32_0 : i32, i32
  }
  func.func @transform_1(%arg0: i32) -> (i32, i32) {
    %c0_i32 = arith.constant 0 : i32
    %c0_i32_0 = arith.constant 0 : i32
    %c0_i32_1 = arith.constant 0 : i32
    return %c0_i32, %c0_i32_0 : i32, i32
  }
  func.func @transform_2(%arg0: i32) -> (i32, i32) {
    %c0_i32 = arith.constant 0 : i32
    %c0_i32_0 = arith.constant 0 : i32
    %c0_i32_1 = arith.constant 0 : i32
    return %c0_i32, %c0_i32_0 : i32, i32
  }
  func.func @transform_3(%arg0: i32) -> (i32, i32) {
    %c0_i32 = arith.constant 0 : i32
    %c0_i32_0 = arith.constant 0 : i32
    %c0_i32_1 = arith.constant 0 : i32
    return %c0_i32, %c0_i32_0 : i32, i32
  }
}

module attributes {stable_mosaic.version = 11 : i64} {
  func.func @_mlp_kernel(%arg0: i32, %arg1: i32, %arg2: memref<2x3136xbf16, #tpu.memory_space<vmem>>, %arg3: memref<1x3136x512xbf16, #tpu.memory_space<vmem>>, %arg4: memref<1x1x512xf32, #tpu.memory_space<vmem>>, %arg5: memref<1x512x1024xbf16, #tpu.memory_space<vmem>>, %arg6: memref<1x1x1024xf32, #tpu.memory_space<vmem>>, %arg7: memref<1x2x1024xbf16, #tpu.memory_space<vmem>>, %arg8: memref<2x1024xf32, #tpu.memory_space<vmem>>) attributes {dimension_semantics = [#tpu.dimension_semantics<parallel>, #tpu.dimension_semantics<arbitrary>], iteration_bounds = array<i64: 2, 2>, scalar_prefetch = 0 : i64, scratch_operands = 1 : i64, tpu.core_type = #tpu.core_type<tc>, window_params = [{pipeline_mode = #tpu.pipeline_mode<synchronous>, transform_indices = @transform_0, window_bounds = array<i64: 2, 3136>}, {transform_indices = @transform_1, window_bounds = array<i64: 1, 3136, 512>}, {transform_indices = @transform_2, window_bounds = array<i64: 1, 1, 512>}, {transform_indices = @transform_3, window_bounds = array<i64: 1, 512, 1024>}, {transform_indices = @transform_4, window_bounds = array<i64: 1, 1, 1024>}, {transform_indices = @transform_5, window_bounds = array<i64: 1, 2, 1024>}]} {
    %c0_i32 = arith.constant 0 : i32
    %0 = arith.cmpi eq, %arg1, %c0_i32 : i32
    %1 = arith.extui %0 : i1 to i32
    %c0_i32_0 = arith.constant 0 : i32
    %2 = arith.cmpi ne, %1, %c0_i32_0 : i32
    scf.if %2 {
      %cst_18 = arith.constant 0.000000e+00 : f32
      %23 = vector.broadcast %cst_18 : f32 to vector<2x1024xf32>
      %c0_19 = arith.constant 0 : index
      %c0_20 = arith.constant 0 : index
      %24 = vector.load %arg8[%c0_19, %c0_20] : memref<2x1024xf32, #tpu.memory_space<vmem>>, vector<2x1024xf32>
      tpu.vector_store %arg8[%c0_19, %c0_20], %23 {strides = array<i32>} : memref<2x1024xf32, #tpu.memory_space<vmem>>, vector<2x1024xf32>,
    } else {
    }
    %c0 = arith.constant 0 : index
    %c0_1 = arith.constant 0 : index
    %3 = vector.load %arg2[%c0, %c0_1] : memref<2x3136xbf16, #tpu.memory_space<vmem>>, vector<2x3136xbf16>
    %c0_2 = arith.constant 0 : index
    %c0_3 = arith.constant 0 : index
    %c0_4 = arith.constant 0 : index
    %4 = vector.load %arg3[%c0_2, %c0_3, %c0_4] : memref<1x3136x512xbf16, #tpu.memory_space<vmem>>, vector<1x3136x512xbf16>
    %5 = vector.shape_cast %4 : vector<1x3136x512xbf16> to vector<3136x512xbf16>
    %cst = arith.constant dense<0.000000e+00> : vector<2x512xf32>
    %6 = tpu.matmul %3, %5, %cst {dimension_numbers = #tpu.dot_dimension_numbers<[1], [0], [0], [1], [0, 0, 1, 1], [], []>} : vector<2x3136xbf16>, vector<3136x512xbf16>, vector<2x512xf32> -> vector<2x512xf32>
    %c0_5 = arith.constant 0 : index
    %c0_6 = arith.constant 0 : index
    %c0_7 = arith.constant 0 : index
    %7 = vector.load %arg4[%c0_5, %c0_6, %c0_7] : memref<1x1x512xf32, #tpu.memory_space<vmem>>, vector<1x1x512xf32>
    %8 = vector.shape_cast %7 : vector<1x1x512xf32> to vector<1x512xf32>
    %9 = vector.broadcast %8 : vector<1x512xf32> to vector<2x512xf32>
    %10 = arith.addf %6, %9 : vector<2x512xf32>
    %cst_8 = arith.constant 0.000000e+00 : f32
    %11 = vector.broadcast %cst_8 : f32 to vector<2x512xf32>
    %12 = arith.maximumf %10, %11 : vector<2x512xf32>
    %13 = arith.truncf %12 : vector<2x512xf32> to vector<2x512xbf16>
    %c0_9 = arith.constant 0 : index
    %c0_10 = arith.constant 0 : index
    %14 = vector.load %arg8[%c0_9, %c0_10] : memref<2x1024xf32, #tpu.memory_space<vmem>>, vector<2x1024xf32>
    %c0_11 = arith.constant 0 : index
    %c0_12 = arith.constant 0 : index
    %c0_13 = arith.constant 0 : index
    %15 = vector.load %arg5[%c0_11, %c0_12, %c0_13] : memref<1x512x1024xbf16, #tpu.memory_space<vmem>>, vector<1x512x1024xbf16>
    %16 = vector.shape_cast %15 : vector<1x512x1024xbf16> to vector<512x1024xbf16>
    %cst_14 = arith.constant dense<0.000000e+00> : vector<2x1024xf32>
    %17 = tpu.matmul %13, %16, %cst_14 {dimension_numbers = #tpu.dot_dimension_numbers<[1], [0], [0], [1], [0, 0, 1, 1], [], []>} : vector<2x512xbf16>, vector<512x1024xbf16>, vector<2x1024xf32> -> vector<2x1024xf32>
    %18 = arith.addf %14, %17 : vector<2x1024xf32>
    %c0_15 = arith.constant 0 : index
    %c0_16 = arith.constant 0 : index
    %19 = vector.load %arg8[%c0_15, %c0_16] : memref<2x1024xf32, #tpu.memory_space<vmem>>, vector<2x1024xf32>
    tpu.vector_store %arg8[%c0_15, %c0_16], %18 {strides = array<i32>} : memref<2x1024xf32, #tpu.memory_space<vmem>>, vector<2x1024xf32>,
    %c1_i32 = arith.constant 1 : i32
    %20 = arith.cmpi eq, %arg1, %c1_i32 : i32
    %21 = arith.extui %20 : i1 to i32
    %c0_i32_17 = arith.constant 0 : i32
    %22 = arith.cmpi ne, %21, %c0_i32_17 : i32
    scf.if %22 {
      %c0_18 = arith.constant 0 : index
      %c0_19 = arith.constant 0 : index
      %23 = vector.load %arg8[%c0_18, %c0_19] : memref<2x1024xf32, #tpu.memory_space<vmem>>, vector<2x1024xf32>
      %c0_20 = arith.constant 0 : index
      %c0_21 = arith.constant 0 : index
      %c0_22 = arith.constant 0 : index
      %24 = vector.load %arg6[%c0_20, %c0_21, %c0_22] : memref<1x1x1024xf32, #tpu.memory_space<vmem>>, vector<1x1x1024xf32>
      %25 = vector.shape_cast %24 : vector<1x1x1024xf32> to vector<1x1024xf32>
      %26 = vector.broadcast %25 : vector<1x1024xf32> to vector<2x1024xf32>
      %27 = arith.addf %23, %26 : vector<2x1024xf32>
      %cst_23 = arith.constant 0.000000e+00 : f32
      %28 = vector.broadcast %cst_23 : f32 to vector<2x1024xf32>
      %29 = arith.maximumf %27, %28 : vector<2x1024xf32>
      %30 = arith.truncf %29 : vector<2x1024xf32> to vector<2x1024xbf16>
      %c0_24 = arith.constant 0 : index
      %c0_25 = arith.constant 0 : index
      %c0_26 = arith.constant 0 : index
      %31 = vector.load %arg7[%c0_24, %c0_25, %c0_26] : memref<1x2x1024xbf16, #tpu.memory_space<vmem>>, vector<1x2x1024xbf16>
      %32 = vector.shape_cast %31 : vector<1x2x1024xbf16> to vector<2x1024xbf16>
      %33 = vector.shape_cast %30 : vector<2x1024xbf16> to vector<1x2x1024xbf16>
      tpu.vector_store %arg7[%c0_24, %c0_25, %c0_26], %33 {strides = array<i32>} : memref<1x2x1024xbf16, #tpu.memory_space<vmem>>, vector<1x2x1024xbf16>,
    } else {
    }
    return
  }
  func.func @transform_0(%arg0: i32, %arg1: i32) -> (i32, i32) {
    %c0_i32 = arith.constant 0 : i32
    %c0_i32_0 = arith.constant 0 : i32
    %c0_i32_1 = arith.constant 0 : i32
    return %c0_i32, %c0_i32_0 : i32, i32
  }
  func.func @transform_1(%arg0: i32, %arg1: i32) -> (i32, i32, i32) {
    %c0_i32 = arith.constant 0 : i32
    %c0_i32_0 = arith.constant 0 : i32
    return %arg0, %c0_i32, %arg1 : i32, i32, i32
  }
  func.func @transform_2(%arg0: i32, %arg1: i32) -> (i32, i32, i32) {
    %c0_i32 = arith.constant 0 : i32
    %c0_i32_0 = arith.constant 0 : i32
    return %arg0, %c0_i32, %arg1 : i32, i32, i32
  }
  func.func @transform_3(%arg0: i32, %arg1: i32) -> (i32, i32, i32) {
    %c0_i32 = arith.constant 0 : i32
    %c0_i32_0 = arith.constant 0 : i32
    return %arg0, %arg1, %c0_i32 : i32, i32, i32
  }
  func.func @transform_4(%arg0: i32, %arg1: i32) -> (i32, i32, i32) {
    %c0_i32 = arith.constant 0 : i32
    %c0_i32_0 = arith.constant 0 : i32
    %c0_i32_1 = arith.constant 0 : i32
    return %arg0, %c0_i32, %c0_i32_0 : i32, i32, i32
  }
  func.func @transform_5(%arg0: i32, %arg1: i32) -> (i32, i32, i32) {
    %c0_i32 = arith.constant 0 : i32
    %c0_i32_0 = arith.constant 0 : i32
    %c0_i32_1 = arith.constant 0 : i32
    return %arg0, %c0_i32, %c0_i32_0 : i32, i32, i32
  }
}

module attributes {stable_mosaic.version = 11 : i64} {
  func.func @_head_kernel(%arg0: i32, %arg1: memref<4x1024xbf16, #tpu.memory_space<vmem>>, %arg2: memref<1024x5xbf16, #tpu.memory_space<vmem>>, %arg3: memref<1x5xf32, #tpu.memory_space<vmem>>, %arg4: memref<2x4xf32, #tpu.memory_space<vmem>>) attributes {dimension_semantics = [#tpu.dimension_semantics<arbitrary>], iteration_bounds = array<i64: 1>, scalar_prefetch = 0 : i64, scratch_operands = 0 : i64, tpu.core_type = #tpu.core_type<tc>, window_params = [{pipeline_mode = #tpu.pipeline_mode<synchronous>, transform_indices = @transform_0, window_bounds = array<i64: 4, 1024>}, {pipeline_mode = #tpu.pipeline_mode<synchronous>, transform_indices = @transform_1, window_bounds = array<i64: 1024, 5>}, {pipeline_mode = #tpu.pipeline_mode<synchronous>, transform_indices = @transform_2, window_bounds = array<i64: 1, 5>}, {pipeline_mode = #tpu.pipeline_mode<synchronous>, transform_indices = @transform_3, window_bounds = array<i64: 2, 4>}]} {
    %c0 = arith.constant 0 : index
    %c0_0 = arith.constant 0 : index
    %0 = vector.load %arg1[%c0, %c0_0] : memref<4x1024xbf16, #tpu.memory_space<vmem>>, vector<4x1024xbf16>
    %c0_1 = arith.constant 0 : index
    %c0_2 = arith.constant 0 : index
    %1 = vector.load %arg2[%c0_1, %c0_2] : memref<1024x5xbf16, #tpu.memory_space<vmem>>, vector<1024x5xbf16>
    %cst = arith.constant dense<0.000000e+00> : vector<4x5xf32>
    %2 = tpu.matmul %0, %1, %cst {dimension_numbers = #tpu.dot_dimension_numbers<[1], [0], [0], [1], [0, 0, 1, 1], [], []>} : vector<4x1024xbf16>, vector<1024x5xbf16>, vector<4x5xf32> -> vector<4x5xf32>
    %c0_3 = arith.constant 0 : index
    %c0_4 = arith.constant 0 : index
    %3 = vector.load %arg3[%c0_3, %c0_4] : memref<1x5xf32, #tpu.memory_space<vmem>>, vector<1x5xf32>
    %4 = vector.broadcast %3 : vector<1x5xf32> to vector<4x5xf32>
    %5 = arith.addf %2, %4 : vector<4x5xf32>
    %6 = vector.extract_strided_slice %5 {offsets = [0, 0], sizes = [2, 4], strides = [1, 1]} : vector<4x5xf32> to vector<2x4xf32>
    %7 = vector.extract_strided_slice %5 {offsets = [2, 4], sizes = [2, 1], strides = [1, 1]} : vector<4x5xf32> to vector<2x1xf32>
    %cst_5 = arith.constant 0.000000e+00 : f32
    %8 = vector.broadcast %cst_5 : f32 to vector<2x1xf32>
    %9 = arith.maximumf %7, %8 : vector<2x1xf32>
    %10 = vector.shape_cast %6 : vector<2x4xf32> to vector<1x2x4xf32>
    %cst_6 = arith.constant dense<0.000000e+00> : vector<1xf32>
    %11 = vector.multi_reduction <add>, %10, %cst_6 [1, 2] : vector<1x2x4xf32> to vector<1xf32>
    %12 = vector.shape_cast %11 : vector<1xf32> to vector<1x1x1xf32>
    %13 = vector.extract %12[0, 0, 0] : f32 from vector<1x1x1xf32>
    %cst_7 = arith.constant 8.000000e+00 : f32
    %14 = arith.divf %13, %cst_7 : f32
    %15 = vector.broadcast %14 : f32 to vector<2x4xf32>
    %16 = arith.subf %6, %15 : vector<2x4xf32>
    %17 = vector.broadcast %9 : vector<2x1xf32> to vector<2x4xf32>
    %18 = arith.addf %17, %16 : vector<2x4xf32>
    %c0_8 = arith.constant 0 : index
    %c0_9 = arith.constant 0 : index
    %19 = vector.load %arg4[%c0_8, %c0_9] : memref<2x4xf32, #tpu.memory_space<vmem>>, vector<2x4xf32>
    tpu.vector_store %arg4[%c0_8, %c0_9], %18 {strides = array<i32>} : memref<2x4xf32, #tpu.memory_space<vmem>>, vector<2x4xf32>,
    return
  }
  func.func @transform_0(%arg0: i32) -> (i32, i32) {
    %c0_i32 = arith.constant 0 : i32
    %c0_i32_0 = arith.constant 0 : i32
    %c0_i32_1 = arith.constant 0 : i32
    return %c0_i32, %c0_i32_0 : i32, i32
  }
  func.func @transform_1(%arg0: i32) -> (i32, i32) {
    %c0_i32 = arith.constant 0 : i32
    %c0_i32_0 = arith.constant 0 : i32
    %c0_i32_1 = arith.constant 0 : i32
    return %c0_i32, %c0_i32_0 : i32, i32
  }
  func.func @transform_2(%arg0: i32) -> (i32, i32) {
    %c0_i32 = arith.constant 0 : i32
    %c0_i32_0 = arith.constant 0 : i32
    %c0_i32_1 = arith.constant 0 : i32
    return %c0_i32, %c0_i32_0 : i32, i32
  }
  func.func @transform_3(%arg0: i32) -> (i32, i32) {
    %c0_i32 = arith.constant 0 : i32
    %c0_i32_0 = arith.constant 0 : i32
    %c0_i32_1 = arith.constant 0 : i32
    return %c0_i32, %c0_i32_0 : i32, i32
  }
}

</mosaic_0001>

<bundles_post_ra>
// kernel: namco_boi_forward.5
= control target key start
LH: loop header
LB: loop body
LE: loop exit
PB: predicated region body
PF: predicated region fallthrough
CT: control target
= control target key end

     0   :  { %8 = vsyncpa [#allocation3], 0  ;;  %s1641_s12 = smov [#allocation2]   ;;  %s2305_s0 = inlined_call_operand.hbm [shape: f32[800,64], index: 0, kind: input, shape index: {}]   ;;  %s2306_s1 = inlined_call_operand.vmem [shape: f32[64,32], index: 1, kind: input, shape index: {}]   ;;  %s2307_s2 = inlined_call_operand.vmem [shape: f32[1,32], index: 2, kind: input, shape index: {}]   ;;  %s2308_s3 = inlined_call_operand.vmem [shape: f32[800,32], index: 3, kind: output, shape index: {}]  }
   0x1   :  { %s14_s13 = sshll.u32 %s1641_s12, 4  ;;  %s1617_s16 = scalar_lea.hbm %s2305_s0, 12800  ;;  %s15_s13 = int_to_ptr.vmem [resolvable:$true] %s14_s13 }
   0x2   :  { %p1618_p0 = scmp.ne.s32.totalorder %s2305_s0, %s1617_s16  ;;  %p1621_p1 = scmp.lt.u32.totalorder %s1617_s16, %s2305_s0 }
   0x4   :  { %p1623_p2 = pnand %p1621_p1, %p1618_p0 }
   0x6   :  { %1626 = shalt.err (!%p1623_p2)
}
   0x7   :  { %s1627_s21 = scalar_lea.vmem %s15_s13, 12800  ;;  %p1632_p4 = scmp.lt.s32.totalorder %s15_s13, %s15_s13 }
   0x8   :  { %p1628_p3 = scmp.ne.s32.totalorder %s15_s13, %s1627_s21  ;;  %p1633_p5 = scmp.lt.s32.totalorder %s1627_s21, %s1627_s21 }
   0xa   :  { %p1634_p6 = por %p1633_p5, %p1632_p4 }
   0xc   :  { %p1635_p7 = pnand %p1634_p6, %p1628_p3 }
   0xe   :  { %1638 = shalt.err (!%p1635_p7)
}
   0xf   :  { %s1642_s22 = smov 128   ;;  %s1643_s23 = smov 8  }
  0x10   :  { %20 = dma.hbm_to_vmem [thread:$0]  %s2305_s0, 12800, %s15_s13, [#allocation3], %s1642_s22, %s1642_s22, %s1643_s23  }
  0x11   :  { %1639 = dma.done.wait [#allocation3], 12800  }
  0x12   :  { %1640 = vsyncadd [#allocation3], 4294954496  ;;  %v128_v0 = vld [vmem:[%s2306_s1] sm:$0xff]  ;;  %v129_v1 = vld [vmem:[%s2306_s1 + $0x8] sm:$0xff]  ;;  %vm143_vm0 = vcmask 523264   ;;  %vm1109_vm1 = vcmask 261120  }
  0x13   :  { %v130_v2 = vld [vmem:[%s2306_s1 + $0x10] sm:$0xff]  ;;  %v1590_v3 = vpack.c.bf16 %v129_v1, %v128_v0  ;;  %v131_v4 = vld [vmem:[%s2306_s1 + $0x18] sm:$0xff]  ;;  %v132_v6 = vld [vmem:[%s2306_s1 + $0x20] sm:$0xff] }
  0x14   :  { %v1594_v5 = vpack.c.bf16 %v131_v4, %v130_v2  ;;  %v133_v7 = vld [vmem:[%s2306_s1 + $0x28] sm:$0xff]  ;;  %v78_v9 = vld [vmem:[#allocation2 + $0x190] sm:$0xff]  ;;  %v134_v11 = vld [vmem:[%s2306_s1 + $0x30] sm:$0xff] }
  0x15   :  { %1591 = vmatprep.subr.bf16.mxu0 %v1590_v3  ;;  %1606 = vmatprep.subr.bf16.mxu1 %v1590_v3  ;;  %v28_v8 = vld [vmem:[#allocation2] sm:$0xff]  ;;  %v1598_v10 = vpack.c.bf16 %v133_v7, %v132_v6  ;;  %v135_v12 = vld [vmem:[%s2306_s1 + $0x38] sm:$0xff]  ;;  %v29_v14 = vld [vmem:[#allocation2 + $0x8] sm:$0xff] }
  0x16   :  { %1593 = vmatpush3.bf16.msra.mxu0 %v1590_v3  ;;  %1610 = vmatpush3.bf16.msra.mxu1 %v1590_v3  ;;  %v1602_v13 = vpack.c.bf16 %v135_v12, %v134_v11  ;;  %v79_v15 = vld [vmem:[#allocation2 + $0x198] sm:$0xff]  ;;  %v30_v16 = vld [vmem:[#allocation2 + $0x10] sm:$0xff]  ;;  %v80_v17 = vld [vmem:[#allocation2 + $0x1a0] sm:$0xff] }
  0x17   :  { %1595 = vmatprep.subr.bf16.mxu0 %v1594_v5  ;;  %1607 = vmatprep.subr.bf16.mxu1 %v1594_v5  ;;  %v31_v18 = vld [vmem:[#allocation2 + $0x18] sm:$0xff]  ;;  %v81_v19 = vld [vmem:[#allocation2 + $0x1a8] sm:$0xff]  ;;  %v32_v20 = vld [vmem:[#allocation2 + $0x20] sm:$0xff] }
  0x18   :  { %1440 = vmatprep.mubr.msk.f32.mxu0 %vm143_vm0, %v28_v8  ;;  %1515 = vmatprep.mubr.msk.f32.mxu1 %vm143_vm0, %v78_v9  ;;  %v82_v21 = vld [vmem:[#allocation2 + $0x1b0] sm:$0xff]  ;;  %v33_v22 = vld [vmem:[#allocation2 + $0x28] sm:$0xff]  ;;  %v83_v23 = vld [vmem:[#allocation2 + $0x1b8] sm:$0xff] }
  0x19   :  { %v34_v24 = vld [vmem:[#allocation2 + $0x30] sm:$0xff]  ;;  %v84_v25 = vld [vmem:[#allocation2 + $0x1c0] sm:$0xff]  ;;  %v35_v26 = vld [vmem:[#allocation2 + $0x38] sm:$0xff] }
  0x1a   :  { %1597 = vmatpush3.bf16.msra.mxu0 %v1594_v5  ;;  %1611 = vmatpush3.bf16.msra.mxu1 %v1594_v5  ;;  %v85_v27 = vld [vmem:[#allocation2 + $0x1c8] sm:$0xff]  ;;  %v36_v28 = vld [vmem:[#allocation2 + $0x40] sm:$0xff]  ;;  %v86_v29 = vld [vmem:[#allocation2 + $0x1d0] sm:$0xff] }
  0x1b   :  { %1599 = vmatprep.subr.bf16.mxu0 %v1598_v10  ;;  %1608 = vmatprep.subr.bf16.mxu1 %v1598_v10  ;;  %v37_v30 = vld [vmem:[#allocation2 + $0x48] sm:$0xff]  ;;  %v87_v31 = vld [vmem:[#allocation2 + $0x1d8] sm:$0xff]  ;;  %v38_v32 = vld [vmem:[#allocation2 + $0x50] sm:$0xff] }
  0x1c   :  { %v88_v33 = vld [vmem:[#allocation2 + $0x1e0] sm:$0xff]  ;;  %v39_v34 = vld [vmem:[#allocation2 + $0x58] sm:$0xff]  ;;  %v89_v35 = vld [vmem:[#allocation2 + $0x1e8] sm:$0xff] }
  0x1d   :  { %v40_v36 = vld [vmem:[#allocation2 + $0x60] sm:$0xff]  ;;  %v90_v37 = vld [vmem:[#allocation2 + $0x1f0] sm:$0xff]  ;;  %v41_v38 = vld [vmem:[#allocation2 + $0x68] sm:$0xff] }
  0x1e   :  { %1601 = vmatpush3.bf16.msra.mxu0 %v1598_v10  ;;  %1612 = vmatpush3.bf16.msra.mxu1 %v1598_v10  ;;  %v91_v39 = vld [vmem:[#allocation2 + $0x1f8] sm:$0xff]  ;;  %v42_v40 = vld [vmem:[#allocation2 + $0x70] sm:$0xff]  ;;  %v92_v41 = vld [vmem:[#allocation2 + $0x200] sm:$0xff] }
  0x1f   :  { %1603 = vmatprep.subr.bf16.mxu0 %v1602_v13  ;;  %1609 = vmatprep.subr.bf16.mxu1 %v1602_v13  ;;  %v43_v42 = vld [vmem:[#allocation2 + $0x78] sm:$0xff]  ;;  %v93_v43 = vld [vmem:[#allocation2 + $0x208] sm:$0xff]  ;;  %v44_v44 = vld [vmem:[#allocation2 + $0x80] sm:$0xff] }
  0x20   :  { %v94_v45 = vld [vmem:[#allocation2 + $0x210] sm:$0xff]  ;;  %v45_v46 = vld [vmem:[#allocation2 + $0x88] sm:$0xff]  ;;  %v95_v47 = vld [vmem:[#allocation2 + $0x218] sm:$0xff] }
  0x21   :  { %v46_v48 = vld [vmem:[#allocation2 + $0x90] sm:$0xff]  ;;  %v96_v49 = vld [vmem:[#allocation2 + $0x220] sm:$0xff]  ;;  %v47_v50 = vld [vmem:[#allocation2 + $0x98] sm:$0xff] }
  0x22   :  { %1605 = vmatpush3.bf16.msra.mxu0 %v1602_v13  ;;  %1613 = vmatpush3.bf16.msra.mxu1 %v1602_v13  ;;  %v97_v51 = vld [vmem:[#allocation2 + $0x228] sm:$0xff]  ;;  %v48_v52 = vld [vmem:[#allocation2 + $0xa0] sm:$0xff]  ;;  %v98_v53 = vld [vmem:[#allocation2 + $0x230] sm:$0xff] }
  0x23   :  { %v49_v54 = vld [vmem:[#allocation2 + $0xa8] sm:$0xff]  ;;  %v99_v55 = vld [vmem:[#allocation2 + $0x238] sm:$0xff]  ;;  %v50_v56 = vld [vmem:[#allocation2 + $0xb0] sm:$0xff] }
  0x24   :  { %v100_v57 = vld [vmem:[#allocation2 + $0x240] sm:$0xff]  ;;  %v51_v58 = vld [vmem:[#allocation2 + $0xb8] sm:$0xff]  ;;  %v101_v59 = vld [vmem:[#allocation2 + $0x248] sm:$0xff] }
  0x25   :  { %1441 = vmatmul.mubr.msk.f32.vlgmr.msra.gmra.mrb[0].mxu0 %vm143_vm0, %v29_v14  ;;  %1516 = vmatmul.mubr.msk.f32.vlgmr.msra.gmra.mrb[0].mxu1 %vm143_vm0, %v79_v15  ;;  %v52_v60 = vld [vmem:[#allocation2 + $0xc0] sm:$0xff]  ;;  %v102_v61 = vld [vmem:[#allocation2 + $0x250] sm:$0xff]  ;;  %v53_v62 = vld [vmem:[#allocation2 + $0xc8] sm:$0xff] }
  0x26   :  { %1443 = vmatprep.mubr.msk.f32.mxu0 %vm143_vm0, %v30_v16  ;;  %1518 = vmatprep.mubr.msk.f32.mxu1 %vm143_vm0, %v80_v17  ;;  %v103_v63 = vld [vmem:[#allocation2 + $0x258] sm:$0xff]  ;;  %v54_v0 = vld [vmem:[#allocation2 + $0xd0] sm:$0xff]  ;;  %v104_v1 = vld [vmem:[#allocation2 + $0x260] sm:$0xff] }
  0x27   :  { %v55_v2 = vld [vmem:[#allocation2 + $0xd8] sm:$0xff]  ;;  %v105_v3 = vld [vmem:[#allocation2 + $0x268] sm:$0xff]  ;;  %v56_v4 = vld [vmem:[#allocation2 + $0xe0] sm:$0xff] }
  0x28   :  { %v106_v5 = vld [vmem:[#allocation2 + $0x270] sm:$0xff]  ;;  %v57_v6 = vld [vmem:[#allocation2 + $0xe8] sm:$0xff]  ;;  %v107_v7 = vld [vmem:[#allocation2 + $0x278] sm:$0xff] }
  0x29   :  { %1444 = vmatmul.mubr.msk.f32.gmra.mrb[2].mxu0 %vm143_vm0, %v31_v18  ;;  %1519 = vmatmul.mubr.msk.f32.gmra.mrb[2].mxu1 %vm143_vm0, %v81_v19  ;;  %v58_v8 = vld [vmem:[#allocation2 + $0xf0] sm:$0xff]  ;;  %v108_v9 = vld [vmem:[#allocation2 + $0x280] sm:$0xff]  ;;  %v59_v10 = vld [vmem:[#allocation2 + $0xf8] sm:$0xff] }
  0x2a   :  { %1446 = vmatprep.mubr.msk.f32.mxu0 %vm143_vm0, %v32_v20  ;;  %1521 = vmatprep.mubr.msk.f32.mxu1 %vm143_vm0, %v82_v21  ;;  %v109_v11 = vld [vmem:[#allocation2 + $0x288] sm:$0xff]  ;;  %v60_v12 = vld [vmem:[#allocation2 + $0x100] sm:$0xff]  ;;  %v110_v13 = vld [vmem:[#allocation2 + $0x290] sm:$0xff] }
  0x2b   :  { %v61_v14 = vld [vmem:[#allocation2 + $0x108] sm:$0xff]  ;;  %v111_v15 = vld [vmem:[#allocation2 + $0x298] sm:$0xff]  ;;  %v62_v16 = vld [vmem:[#allocation2 + $0x110] sm:$0xff] }
  0x2c   :  { %v112_v17 = vld [vmem:[#allocation2 + $0x2a0] sm:$0xff]  ;;  %v63_v18 = vld [vmem:[#allocation2 + $0x118] sm:$0xff]  ;;  %v113_v19 = vld [vmem:[#allocation2 + $0x2a8] sm:$0xff] }
  0x2d   :  { %1447 = vmatmul.mubr.msk.f32.gmra.mrb[4].mxu0 %vm143_vm0, %v33_v22  ;;  %1522 = vmatmul.mubr.msk.f32.gmra.mrb[4].mxu1 %vm143_vm0, %v83_v23  ;;  %v64_v20 = vld [vmem:[#allocation2 + $0x120] sm:$0xff]  ;;  %v114_v21 = vld [vmem:[#allocation2 + $0x2b0] sm:$0xff]  ;;  %v65_v22 = vld [vmem:[#allocation2 + $0x128] sm:$0xff] }
  0x2e   :  { %1449 = vmatprep.mubr.msk.f32.mxu0 %vm143_vm0, %v34_v24  ;;  %1524 = vmatprep.mubr.msk.f32.mxu1 %vm143_vm0, %v84_v25  ;;  %v115_v23 = vld [vmem:[#allocation2 + $0x2b8] sm:$0xff]  ;;  %v66_v24 = vld [vmem:[#allocation2 + $0x130] sm:$0xff]  ;;  %v116_v25 = vld [vmem:[#allocation2 + $0x2c0] sm:$0xff] }
  0x31   :  { %1450 = vmatmul.mubr.msk.f32.gmra.mrb[6].mxu0 %vm143_vm0, %v35_v26  ;;  %1525 = vmatmul.mubr.msk.f32.gmra.mrb[6].mxu1 %vm143_vm0, %v85_v27  ;;  %v67_v26 = vld [vmem:[#allocation2 + $0x138] sm:$0xff]  ;;  %v117_v27 = vld [vmem:[#allocation2 + $0x2c8] sm:$0xff] }
  0x32   :  { %1452 = vmatprep.mubr.msk.f32.mxu0 %vm143_vm0, %v36_v28  ;;  %1527 = vmatprep.mubr.msk.f32.mxu1 %vm143_vm0, %v86_v29  ;;  %v68_v28 = vld [vmem:[#allocation2 + $0x140] sm:$0xff]  ;;  %v118_v29 = vld [vmem:[#allocation2 + $0x2d0] sm:$0xff] }
  0x35   :  { %1453 = vmatmul.mubr.msk.f32.gmra.mrb[8].mxu0 %vm143_vm0, %v37_v30  ;;  %1528 = vmatmul.mubr.msk.f32.gmra.mrb[8].mxu1 %vm143_vm0, %v87_v31  ;;  %v69_v30 = vld [vmem:[#allocation2 + $0x148] sm:$0xff]  ;;  %v119_v31 = vld [vmem:[#allocation2 + $0x2d8] sm:$0xff] }
  0x36   :  { %1455 = vmatprep.mubr.msk.f32.mxu0 %vm143_vm0, %v38_v32  ;;  %1530 = vmatprep.mubr.msk.f32.mxu1 %vm143_vm0, %v88_v33  ;;  %v70_v32 = vld [vmem:[#allocation2 + $0x150] sm:$0xff]  ;;  %v120_v33 = vld [vmem:[#allocation2 + $0x2e0] sm:$0xff] }
  0x39   :  { %1456 = vmatmul.mubr.msk.f32.gmra.mrb[10].mxu0 %vm143_vm0, %v39_v34  ;;  %1531 = vmatmul.mubr.msk.f32.gmra.mrb[10].mxu1 %vm143_vm0, %v89_v35  ;;  %v71_v34 = vld [vmem:[#allocation2 + $0x158] sm:$0xff]  ;;  %v121_v35 = vld [vmem:[#allocation2 + $0x2e8] sm:$0xff] }
  0x3a   :  { %1458 = vmatprep.mubr.msk.f32.mxu0 %vm143_vm0, %v40_v36  ;;  %1533 = vmatprep.mubr.msk.f32.mxu1 %vm143_vm0, %v90_v37  ;;  %v72_v36 = vld [vmem:[#allocation2 + $0x160] sm:$0xff]  ;;  %v122_v37 = vld [vmem:[#allocation2 + $0x2f0] sm:$0xff] }
  0x3d   :  { %1459 = vmatmul.mubr.msk.f32.gmra.mrb[12].mxu0 %vm143_vm0, %v41_v38  ;;  %1534 = vmatmul.mubr.msk.f32.gmra.mrb[12].mxu1 %vm143_vm0, %v91_v39  ;;  %v73_v38 = vld [vmem:[#allocation2 + $0x168] sm:$0xff]  ;;  %v123_v39 = vld [vmem:[#allocation2 + $0x2f8] sm:$0xff] }
  0x3e   :  { %1461 = vmatprep.mubr.msk.f32.mxu0 %vm143_vm0, %v42_v40  ;;  %1536 = vmatprep.mubr.msk.f32.mxu1 %vm143_vm0, %v92_v41  ;;  %v74_v40 = vld [vmem:[#allocation2 + $0x170] sm:$0xff]  ;;  %v124_v41 = vld [vmem:[#allocation2 + $0x300] sm:$0xff] }
  0x41   :  { %1462 = vmatmul.mubr.msk.f32.gmra.mrb[14].mxu0 %vm143_vm0, %v43_v42  ;;  %1537 = vmatmul.mubr.msk.f32.gmra.mrb[14].mxu1 %vm143_vm0, %v93_v43  ;;  %v75_v42 = vld [vmem:[#allocation2 + $0x178] sm:$0xff]  ;;  %v125_v43 = vld [vmem:[#allocation2 + $0x308] sm:$0xff] }
  0x42   :  { %1464 = vmatprep.mubr.msk.f32.mxu0 %vm143_vm0, %v44_v44  ;;  %1539 = vmatprep.mubr.msk.f32.mxu1 %vm143_vm0, %v94_v45  ;;  %v76_v44 = vld [vmem:[#allocation2 + $0x180] sm:$0xff]  ;;  %v126_v45 = vld [vmem:[#allocation2 + $0x310] sm:$0xff] }
  0x45   :  { %1465 = vmatmul.mubr.msk.f32.gmra.mrb[16].mxu0 %vm143_vm0, %v45_v46  ;;  %1540 = vmatmul.mubr.msk.f32.gmra.mrb[16].mxu1 %vm143_vm0, %v95_v47  ;;  %v77_v46 = vld [vmem:[#allocation2 + $0x188] sm:$0xff]  ;;  %v127_v47 = vld [vmem:[#allocation2 + $0x318] sm:$0xff] }
  0x46   :  { %1467 = vmatprep.mubr.msk.f32.mxu0 %vm143_vm0, %v46_v48  ;;  %1542 = vmatprep.mubr.msk.f32.mxu1 %vm143_vm0, %v96_v49  ;;  %v1803_v48 = vld [vmem:[%s2307_s2] ss:$0 sm:$0xff] }
  0x49   :  { %1468 = vmatmul.mubr.msk.f32.gmra.mrb[18].mxu0 %vm143_vm0, %v47_v50  ;;  %1543 = vmatmul.mubr.msk.f32.gmra.mrb[18].mxu1 %vm143_vm0, %v97_v51 }
  0x4a   :  { %1470 = vmatprep.mubr.msk.f32.mxu0 %vm143_vm0, %v48_v52  ;;  %1545 = vmatprep.mubr.msk.f32.mxu1 %vm143_vm0, %v98_v53 }
  0x4d   :  { %1471 = vmatmul.mubr.msk.f32.gmra.mrb[20].mxu0 %vm143_vm0, %v49_v54  ;;  %1546 = vmatmul.mubr.msk.f32.gmra.mrb[20].mxu1 %vm143_vm0, %v99_v55 }
  0x4e   :  { %1473 = vmatprep.mubr.msk.f32.mxu0 %vm143_vm0, %v50_v56  ;;  %1548 = vmatprep.mubr.msk.f32.mxu1 %vm143_vm0, %v100_v57 }
  0x51   :  { %1474 = vmatmul.mubr.msk.f32.gmra.mrb[22].mxu0 %vm143_vm0, %v51_v58  ;;  %1549 = vmatmul.mubr.msk.f32.gmra.mrb[22].mxu1 %vm143_vm0, %v101_v59 }
  0x52   :  { %1476 = vmatprep.mubr.msk.f32.mxu0 %vm143_vm0, %v52_v60  ;;  %1551 = vmatprep.mubr.msk.f32.mxu1 %vm143_vm0, %v102_v61 }
  0x55   :  { %1477 = vmatmul.mubr.msk.f32.gmra.mrb[24].mxu0 %vm143_vm0, %v53_v62  ;;  %1552 = vmatmul.mubr.msk.f32.gmra.mrb[24].mxu1 %vm143_vm0, %v103_v63 }
  0x56   :  { %1479 = vmatprep.mubr.msk.f32.mxu0 %vm143_vm0, %v54_v0  ;;  %1554 = vmatprep.mubr.msk.f32.mxu1 %vm143_vm0, %v104_v1 }
  0x59   :  { %1480 = vmatmul.mubr.msk.f32.gmra.mrb[26].mxu0 %vm143_vm0, %v55_v2  ;;  %1555 = vmatmul.mubr.msk.f32.gmra.mrb[26].mxu1 %vm143_vm0, %v105_v3 }
  0x5a   :  { %1482 = vmatprep.mubr.msk.f32.mxu0 %vm143_vm0, %v56_v4  ;;  %1557 = vmatprep.mubr.msk.f32.mxu1 %vm143_vm0, %v106_v5 }
  0x5d   :  { %1483 = vmatmul.mubr.msk.f32.gmra.mrb[28].mxu0 %vm143_vm0, %v57_v6  ;;  %1558 = vmatmul.mubr.msk.f32.gmra.mrb[28].mxu1 %vm143_vm0, %v107_v7 }
  0x5e   :  { %1485 = vmatprep.mubr.msk.f32.mxu0 %vm143_vm0, %v58_v8  ;;  %1560 = vmatprep.mubr.msk.f32.mxu1 %vm143_vm0, %v108_v9 }
  0x61   :  { %1486 = vmatmul.mubr.msk.f32.gmra.mrb[30].mxu0 %vm143_vm0, %v59_v10  ;;  %1561 = vmatmul.mubr.msk.f32.gmra.mrb[30].mxu1 %vm143_vm0, %v109_v11 }
  0x62   :  { %1488 = vmatprep.mubr.msk.f32.mxu0 %vm143_vm0, %v60_v12  ;;  %1563 = vmatprep.mubr.msk.f32.mxu1 %vm143_vm0, %v110_v13 }
  0x65   :  { %1489 = vmatmul.mubr.msk.f32.gmra.mrb[32].mxu0 %vm143_vm0, %v61_v14  ;;  %1564 = vmatmul.mubr.msk.f32.gmra.mrb[32].mxu1 %vm143_vm0, %v111_v15 }
  0x66   :  { %1491 = vmatprep.mubr.msk.f32.mxu0 %vm143_vm0, %v62_v16  ;;  %1566 = vmatprep.mubr.msk.f32.mxu1 %vm143_vm0, %v112_v17 }
  0x69   :  { %1492 = vmatmul.mubr.msk.f32.gmra.mrb[34].mxu0 %vm143_vm0, %v63_v18  ;;  %1567 = vmatmul.mubr.msk.f32.gmra.mrb[34].mxu1 %vm143_vm0, %v113_v19 }
  0x6a   :  { %1494 = vmatprep.mubr.msk.f32.mxu0 %vm143_vm0, %v64_v20  ;;  %1569 = vmatprep.mubr.msk.f32.mxu1 %vm143_vm0, %v114_v21 }
  0x6d   :  { %1495 = vmatmul.mubr.msk.f32.gmra.mrb[36].mxu0 %vm143_vm0, %v65_v22  ;;  %1570 = vmatmul.mubr.msk.f32.gmra.mrb[36].mxu1 %vm143_vm0, %v115_v23 }
  0x6e   :  { %1497 = vmatprep.mubr.msk.f32.mxu0 %vm143_vm0, %v66_v24  ;;  %1572 = vmatprep.mubr.msk.f32.mxu1 %vm143_vm0, %v116_v25 }
  0x71   :  { %1498 = vmatmul.mubr.msk.f32.gmra.mrb[38].mxu0 %vm143_vm0, %v67_v26  ;;  %1573 = vmatmul.mubr.msk.f32.gmra.mrb[38].mxu1 %vm143_vm0, %v117_v27 }
  0x72   :  { %1500 = vmatprep.mubr.msk.f32.mxu0 %vm143_vm0, %v68_v28  ;;  %1575 = vmatprep.mubr.msk.f32.mxu1 %vm143_vm0, %v118_v29 }
  0x75   :  { %1501 = vmatmul.mubr.msk.f32.gmra.mrb[40].mxu0 %vm143_vm0, %v69_v30  ;;  %1576 = vmatmul.mubr.msk.f32.gmra.mrb[40].mxu1 %vm143_vm0, %v119_v31 }
  0x76   :  { %1503 = vmatprep.mubr.msk.f32.mxu0 %vm143_vm0, %v70_v32  ;;  %1578 = vmatprep.mubr.msk.f32.mxu1 %vm143_vm0, %v120_v33 }
  0x79   :  { %1504 = vmatmul.mubr.msk.f32.gmra.mrb[42].mxu0 %vm143_vm0, %v71_v34  ;;  %1579 = vmatmul.mubr.msk.f32.gmra.mrb[42].mxu1 %vm143_vm0, %v121_v35 }
  0x7a   :  { %1506 = vmatprep.mubr.msk.f32.mxu0 %vm143_vm0, %v72_v36  ;;  %1581 = vmatprep.mubr.msk.f32.mxu1 %vm143_vm0, %v122_v37 }
  0x7d   :  { %1507 = vmatmul.mubr.msk.f32.gmra.mrb[44].mxu0 %vm143_vm0, %v73_v38  ;;  %1582 = vmatmul.mubr.msk.f32.gmra.mrb[44].mxu1 %vm143_vm0, %v123_v39 }
  0x7e   :  { %1509 = vmatprep.mubr.msk.f32.mxu0 %vm143_vm0, %v74_v40  ;;  %1584 = vmatprep.mubr.msk.f32.mxu1 %vm143_vm0, %v124_v41 }
  0x81   :  { %1510 = vmatmul.mubr.msk.f32.gmra.mrb[46].mxu0 %vm143_vm0, %v75_v42  ;;  %1585 = vmatmul.mubr.msk.f32.gmra.mrb[46].mxu1 %vm143_vm0, %v125_v43 }
  0x82   :  { %1512 = vmatprep.mubr.msk.f32.mxu0 %vm143_vm0, %v76_v44  ;;  %1587 = vmatprep.mubr.msk.f32.mxu1 %vm143_vm0, %v126_v45 }
  0x85   :  { %1513 = vmatmul.mubr.msk.f32.gmra.mrb[48].mxu0 %vm143_vm0, %v77_v46  ;;  %1588 = vmatmul.mubr.msk.f32.gmra.mrb[48].mxu1 %vm143_vm0, %v127_v47 }
  0xf8   :  { %v1442_v49 = vpop.f32.mrb[0].mxu0  ;;  %v1517_v50 = vpop.f32.mrb[0].mxu1 }
  0xf9   :  { %v516_v51 = vadd.f32 %v1442_v49, %v1803_v48  ;;  %v766_v52 = vadd.f32 %v1517_v50, %v1803_v48  ;;  %v510_v53 = vpop.f32.mrb[1].mxu0  ;;  %v760_v54 = vpop.f32.mrb[1].mxu1 }
  0xfa   :  { %v511_v55 = vadd.f32 %v1803_v48, %v510_v53  ;;  %v761_v56 = vadd.f32 %v1803_v48, %v760_v54 }
  0xfb   :  { %v1010_v57 = vmax.f32 %v516_v51, 0.0  ;;  %v1060_v58 = vmax.f32 %v766_v52, 0.0 }
  0xfc   :  { %v1009_v59 = vmax.f32 %v511_v55, 0.0  ;;  %v1059_v60 = vmax.f32 %v761_v56, 0.0  ;;  %v1445_v61 = vpop.f32.mrb[2].mxu0  ;;  %v1520_v62 = vpop.f32.mrb[2].mxu1 }
  0xfd   :  { %1111 = vst.msk [vmem:[%s2308_s3 + $0x8] sm:$0xff] %vm1109_vm1, %v1010_v57  ;;  %1161 = vst.msk [vmem:[%s2308_s3 + $0x198] sm:$0xff] %vm1109_vm1, %v1060_v58  ;;  %v526_v63 = vadd.f32 %v1445_v61, %v1803_v48  ;;  %v776_v0 = vadd.f32 %v1520_v62, %v1803_v48  ;;  %v520_v1 = vpop.f32.mrb[3].mxu0  ;;  %v770_v2 = vpop.f32.mrb[3].mxu1 }
  0xfe   :  { %1110 = vst.msk [vmem:[%s2308_s3] sm:$0xff] %vm1109_vm1, %v1009_v59  ;;  %1160 = vst.msk [vmem:[%s2308_s3 + $0x190] sm:$0xff] %vm1109_vm1, %v1059_v60  ;;  %v521_v3 = vadd.f32 %v1803_v48, %v520_v1  ;;  %v771_v4 = vadd.f32 %v1803_v48, %v770_v2 }
  0xff   :  { %v1012_v5 = vmax.f32 %v526_v63, 0.0  ;;  %v1062_v6 = vmax.f32 %v776_v0, 0.0 }
 0x100   :  { %v1011_v7 = vmax.f32 %v521_v3, 0.0  ;;  %v1061_v8 = vmax.f32 %v771_v4, 0.0  ;;  %v1448_v9 = vpop.f32.mrb[4].mxu0  ;;  %v1523_v10 = vpop.f32.mrb[4].mxu1 }
 0x101   :  { %1113 = vst.msk [vmem:[%s2308_s3 + $0x18] sm:$0xff] %vm1109_vm1, %v1012_v5  ;;  %1163 = vst.msk [vmem:[%s2308_s3 + $0x1a8] sm:$0xff] %vm1109_vm1, %v1062_v6  ;;  %v536_v11 = vadd.f32 %v1448_v9, %v1803_v48  ;;  %v786_v12 = vadd.f32 %v1523_v10, %v1803_v48  ;;  %v530_v13 = vpop.f32.mrb[5].mxu0  ;;  %v780_v14 = vpop.f32.mrb[5].mxu1 }
 0x102   :  { %1112 = vst.msk [vmem:[%s2308_s3 + $0x10] sm:$0xff] %vm1109_vm1, %v1011_v7  ;;  %1162 = vst.msk [vmem:[%s2308_s3 + $0x1a0] sm:$0xff] %vm1109_vm1, %v1061_v8  ;;  %v531_v15 = vadd.f32 %v1803_v48, %v530_v13  ;;  %v781_v16 = vadd.f32 %v1803_v48, %v780_v14 }
 0x103   :  { %v1014_v17 = vmax.f32 %v536_v11, 0.0  ;;  %v1064_v18 = vmax.f32 %v786_v12, 0.0 }
 0x104   :  { %v1013_v19 = vmax.f32 %v531_v15, 0.0  ;;  %v1063_v20 = vmax.f32 %v781_v16, 0.0  ;;  %v1451_v21 = vpop.f32.mrb[6].mxu0  ;;  %v1526_v22 = vpop.f32.mrb[6].mxu1 }
 0x105   :  { %1115 = vst.msk [vmem:[%s2308_s3 + $0x28] sm:$0xff] %vm1109_vm1, %v1014_v17  ;;  %1165 = vst.msk [vmem:[%s2308_s3 + $0x1b8] sm:$0xff] %vm1109_vm1, %v1064_v18  ;;  %v546_v23 = vadd.f32 %v1451_v21, %v1803_v48  ;;  %v796_v24 = vadd.f32 %v1526_v22, %v1803_v48  ;;  %v540_v25 = vpop.f32.mrb[7].mxu0  ;;  %v790_v26 = vpop.f32.mrb[7].mxu1 }
 0x106   :  { %1114 = vst.msk [vmem:[%s2308_s3 + $0x20] sm:$0xff] %vm1109_vm1, %v1013_v19  ;;  %1164 = vst.msk [vmem:[%s2308_s3 + $0x1b0] sm:$0xff] %vm1109_vm1, %v1063_v20  ;;  %v541_v27 = vadd.f32 %v1803_v48, %v540_v25  ;;  %v791_v28 = vadd.f32 %v1803_v48, %v790_v26 }
 0x107   :  { %v1016_v29 = vmax.f32 %v546_v23, 0.0  ;;  %v1066_v30 = vmax.f32 %v796_v24, 0.0 }
 0x108   :  { %v1015_v31 = vmax.f32 %v541_v27, 0.0  ;;  %v1065_v32 = vmax.f32 %v791_v28, 0.0  ;;  %v1454_v33 = vpop.f32.mrb[8].mxu0  ;;  %v1529_v34 = vpop.f32.mrb[8].mxu1 }
 0x109   :  { %1117 = vst.msk [vmem:[%s2308_s3 + $0x38] sm:$0xff] %vm1109_vm1, %v1016_v29  ;;  %1167 = vst.msk [vmem:[%s2308_s3 + $0x1c8] sm:$0xff] %vm1109_vm1, %v1066_v30  ;;  %v556_v35 = vadd.f32 %v1454_v33, %v1803_v48  ;;  %v806_v36 = vadd.f32 %v1529_v34, %v1803_v48  ;;  %v550_v37 = vpop.f32.mrb[9].mxu0  ;;  %v800_v38 = vpop.f32.mrb[9].mxu1 }
 0x10a   :  { %1116 = vst.msk [vmem:[%s2308_s3 + $0x30] sm:$0xff] %vm1109_vm1, %v1015_v31  ;;  %1166 = vst.msk [vmem:[%s2308_s3 + $0x1c0] sm:$0xff] %vm1109_vm1, %v1065_v32  ;;  %v551_v39 = vadd.f32 %v1803_v48, %v550_v37  ;;  %v801_v40 = vadd.f32 %v1803_v48, %v800_v38 }
 0x10b   :  { %v1018_v41 = vmax.f32 %v556_v35, 0.0  ;;  %v1068_v42 = vmax.f32 %v806_v36, 0.0 }
 0x10c   :  { %v1017_v43 = vmax.f32 %v551_v39, 0.0  ;;  %v1067_v44 = vmax.f32 %v801_v40, 0.0  ;;  %v1457_v45 = vpop.f32.mrb[10].mxu0  ;;  %v1532_v46 = vpop.f32.mrb[10].mxu1 }
 0x10d   :  { %1119 = vst.msk [vmem:[%s2308_s3 + $0x48] sm:$0xff] %vm1109_vm1, %v1018_v41  ;;  %1169 = vst.msk [vmem:[%s2308_s3 + $0x1d8] sm:$0xff] %vm1109_vm1, %v1068_v42  ;;  %v566_v47 = vadd.f32 %v1457_v45, %v1803_v48  ;;  %v816_v49 = vadd.f32 %v1532_v46, %v1803_v48  ;;  %v560_v50 = vpop.f32.mrb[11].mxu0  ;;  %v810_v51 = vpop.f32.mrb[11].mxu1 }
 0x10e   :  { %1118 = vst.msk [vmem:[%s2308_s3 + $0x40] sm:$0xff] %vm1109_vm1, %v1017_v43  ;;  %1168 = vst.msk [vmem:[%s2308_s3 + $0x1d0] sm:$0xff] %vm1109_vm1, %v1067_v44  ;;  %v561_v52 = vadd.f32 %v1803_v48, %v560_v50  ;;  %v811_v53 = vadd.f32 %v1803_v48, %v810_v51 }
 0x10f   :  { %v1020_v54 = vmax.f32 %v566_v47, 0.0  ;;  %v1070_v55 = vmax.f32 %v816_v49, 0.0 }
 0x110   :  { %v1019_v56 = vmax.f32 %v561_v52, 0.0  ;;  %v1069_v57 = vmax.f32 %v811_v53, 0.0  ;;  %v1460_v58 = vpop.f32.mrb[12].mxu0  ;;  %v1535_v59 = vpop.f32.mrb[12].mxu1 }
 0x111   :  { %1121 = vst.msk [vmem:[%s2308_s3 + $0x58] sm:$0xff] %vm1109_vm1, %v1020_v54  ;;  %1171 = vst.msk [vmem:[%s2308_s3 + $0x1e8] sm:$0xff] %vm1109_vm1, %v1070_v55  ;;  %v576_v60 = vadd.f32 %v1460_v58, %v1803_v48  ;;  %v826_v61 = vadd.f32 %v1535_v59, %v1803_v48  ;;  %v570_v62 = vpop.f32.mrb[13].mxu0  ;;  %v820_v63 = vpop.f32.mrb[13].mxu1 }
 0x112   :  { %1120 = vst.msk [vmem:[%s2308_s3 + $0x50] sm:$0xff] %vm1109_vm1, %v1019_v56  ;;  %1170 = vst.msk [vmem:[%s2308_s3 + $0x1e0] sm:$0xff] %vm1109_vm1, %v1069_v57  ;;  %v571_v0 = vadd.f32 %v1803_v48, %v570_v62  ;;  %v821_v1 = vadd.f32 %v1803_v48, %v820_v63 }
 0x113   :  { %v1022_v2 = vmax.f32 %v576_v60, 0.0  ;;  %v1072_v3 = vmax.f32 %v826_v61, 0.0 }
 0x114   :  { %v1021_v4 = vmax.f32 %v571_v0, 0.0  ;;  %v1071_v5 = vmax.f32 %v821_v1, 0.0  ;;  %v1463_v6 = vpop.f32.mrb[14].mxu0  ;;  %v1538_v7 = vpop.f32.mrb[14].mxu1 }
 0x115   :  { %1123 = vst.msk [vmem:[%s2308_s3 + $0x68] sm:$0xff] %vm1109_vm1, %v1022_v2  ;;  %1173 = vst.msk [vmem:[%s2308_s3 + $0x1f8] sm:$0xff] %vm1109_vm1, %v1072_v3  ;;  %v586_v8 = vadd.f32 %v1463_v6, %v1803_v48  ;;  %v836_v9 = vadd.f32 %v1538_v7, %v1803_v48  ;;  %v580_v10 = vpop.f32.mrb[15].mxu0  ;;  %v830_v11 = vpop.f32.mrb[15].mxu1 }
 0x116   :  { %1122 = vst.msk [vmem:[%s2308_s3 + $0x60] sm:$0xff] %vm1109_vm1, %v1021_v4  ;;  %1172 = vst.msk [vmem:[%s2308_s3 + $0x1f0] sm:$0xff] %vm1109_vm1, %v1071_v5  ;;  %v581_v12 = vadd.f32 %v1803_v48, %v580_v10  ;;  %v831_v13 = vadd.f32 %v1803_v48, %v830_v11 }
 0x117   :  { %v1024_v14 = vmax.f32 %v586_v8, 0.0  ;;  %v1074_v15 = vmax.f32 %v836_v9, 0.0 }
 0x118   :  { %v1023_v16 = vmax.f32 %v581_v12, 0.0  ;;  %v1073_v17 = vmax.f32 %v831_v13, 0.0  ;;  %v1466_v18 = vpop.f32.mrb[16].mxu0  ;;  %v1541_v19 = vpop.f32.mrb[16].mxu1 }
 0x119   :  { %1125 = vst.msk [vmem:[%s2308_s3 + $0x78] sm:$0xff] %vm1109_vm1, %v1024_v14  ;;  %1175 = vst.msk [vmem:[%s2308_s3 + $0x208] sm:$0xff] %vm1109_vm1, %v1074_v15  ;;  %v596_v20 = vadd.f32 %v1466_v18, %v1803_v48  ;;  %v846_v21 = vadd.f32 %v1541_v19, %v1803_v48  ;;  %v590_v22 = vpop.f32.mrb[17].mxu0  ;;  %v840_v23 = vpop.f32.mrb[17].mxu1 }
 0x11a   :  { %1124 = vst.msk [vmem:[%s2308_s3 + $0x70] sm:$0xff] %vm1109_vm1, %v1023_v16  ;;  %1174 = vst.msk [vmem:[%s2308_s3 + $0x200] sm:$0xff] %vm1109_vm1, %v1073_v17  ;;  %v591_v24 = vadd.f32 %v1803_v48, %v590_v22  ;;  %v841_v25 = vadd.f32 %v1803_v48, %v840_v23 }
 0x11b   :  { %v1026_v26 = vmax.f32 %v596_v20, 0.0  ;;  %v1076_v27 = vmax.f32 %v846_v21, 0.0 }
 0x11c   :  { %v1025_v28 = vmax.f32 %v591_v24, 0.0  ;;  %v1075_v29 = vmax.f32 %v841_v25, 0.0  ;;  %v1469_v30 = vpop.f32.mrb[18].mxu0  ;;  %v1544_v31 = vpop.f32.mrb[18].mxu1 }
 0x11d   :  { %1127 = vst.msk [vmem:[%s2308_s3 + $0x88] sm:$0xff] %vm1109_vm1, %v1026_v26  ;;  %1177 = vst.msk [vmem:[%s2308_s3 + $0x218] sm:$0xff] %vm1109_vm1, %v1076_v27  ;;  %v606_v32 = vadd.f32 %v1469_v30, %v1803_v48  ;;  %v856_v33 = vadd.f32 %v1544_v31, %v1803_v48  ;;  %v600_v34 = vpop.f32.mrb[19].mxu0  ;;  %v850_v35 = vpop.f32.mrb[19].mxu1 }
 0x11e   :  { %1126 = vst.msk [vmem:[%s2308_s3 + $0x80] sm:$0xff] %vm1109_vm1, %v1025_v28  ;;  %1176 = vst.msk [vmem:[%s2308_s3 + $0x210] sm:$0xff] %vm1109_vm1, %v1075_v29  ;;  %v601_v36 = vadd.f32 %v1803_v48, %v600_v34  ;;  %v851_v37 = vadd.f32 %v1803_v48, %v850_v35 }
 0x11f   :  { %v1028_v38 = vmax.f32 %v606_v32, 0.0  ;;  %v1078_v39 = vmax.f32 %v856_v33, 0.0 }
 0x120   :  { %v1027_v40 = vmax.f32 %v601_v36, 0.0  ;;  %v1077_v41 = vmax.f32 %v851_v37, 0.0  ;;  %v1472_v42 = vpop.f32.mrb[20].mxu0  ;;  %v1547_v43 = vpop.f32.mrb[20].mxu1 }
 0x121   :  { %1129 = vst.msk [vmem:[%s2308_s3 + $0x98] sm:$0xff] %vm1109_vm1, %v1028_v38  ;;  %1179 = vst.msk [vmem:[%s2308_s3 + $0x228] sm:$0xff] %vm1109_vm1, %v1078_v39  ;;  %v616_v44 = vadd.f32 %v1472_v42, %v1803_v48  ;;  %v866_v45 = vadd.f32 %v1547_v43, %v1803_v48  ;;  %v610_v46 = vpop.f32.mrb[21].mxu0  ;;  %v860_v47 = vpop.f32.mrb[21].mxu1 }
 0x122   :  { %1128 = vst.msk [vmem:[%s2308_s3 + $0x90] sm:$0xff] %vm1109_vm1, %v1027_v40  ;;  %1178 = vst.msk [vmem:[%s2308_s3 + $0x220] sm:$0xff] %vm1109_vm1, %v1077_v41  ;;  %v611_v49 = vadd.f32 %v1803_v48, %v610_v46  ;;  %v861_v50 = vadd.f32 %v1803_v48, %v860_v47 }
 0x123   :  { %v1030_v51 = vmax.f32 %v616_v44, 0.0  ;;  %v1080_v52 = vmax.f32 %v866_v45, 0.0 }
 0x124   :  { %v1029_v53 = vmax.f32 %v611_v49, 0.0  ;;  %v1079_v54 = vmax.f32 %v861_v50, 0.0  ;;  %v1475_v55 = vpop.f32.mrb[22].mxu0  ;;  %v1550_v56 = vpop.f32.mrb[22].mxu1 }
 0x125   :  { %1131 = vst.msk [vmem:[%s2308_s3 + $0xa8] sm:$0xff] %vm1109_vm1, %v1030_v51  ;;  %1181 = vst.msk [vmem:[%s2308_s3 + $0x238] sm:$0xff] %vm1109_vm1, %v1080_v52  ;;  %v626_v57 = vadd.f32 %v1475_v55, %v1803_v48  ;;  %v876_v58 = vadd.f32 %v1550_v56, %v1803_v48  ;;  %v620_v59 = vpop.f32.mrb[23].mxu0  ;;  %v870_v60 = vpop.f32.mrb[23].mxu1 }
 0x126   :  { %1130 = vst.msk [vmem:[%s2308_s3 + $0xa0] sm:$0xff] %vm1109_vm1, %v1029_v53  ;;  %1180 = vst.msk [vmem:[%s2308_s3 + $0x230] sm:$0xff] %vm1109_vm1, %v1079_v54  ;;  %v621_v61 = vadd.f32 %v1803_v48, %v620_v59  ;;  %v871_v62 = vadd.f32 %v1803_v48, %v870_v60 }
 0x127   :  { %v1032_v63 = vmax.f32 %v626_v57, 0.0  ;;  %v1082_v0 = vmax.f32 %v876_v58, 0.0 }
 0x128   :  { %v1031_v1 = vmax.f32 %v621_v61, 0.0  ;;  %v1081_v2 = vmax.f32 %v871_v62, 0.0  ;;  %v1478_v3 = vpop.f32.mrb[24].mxu0  ;;  %v1553_v4 = vpop.f32.mrb[24].mxu1 }
 0x129   :  { %1133 = vst.msk [vmem:[%s2308_s3 + $0xb8] sm:$0xff] %vm1109_vm1, %v1032_v63  ;;  %1183 = vst.msk [vmem:[%s2308_s3 + $0x248] sm:$0xff] %vm1109_vm1, %v1082_v0  ;;  %v636_v5 = vadd.f32 %v1478_v3, %v1803_v48  ;;  %v886_v6 = vadd.f32 %v1553_v4, %v1803_v48  ;;  %v630_v7 = vpop.f32.mrb[25].mxu0  ;;  %v880_v8 = vpop.f32.mrb[25].mxu1 }
 0x12a   :  { %1132 = vst.msk [vmem:[%s2308_s3 + $0xb0] sm:$0xff] %vm1109_vm1, %v1031_v1  ;;  %1182 = vst.msk [vmem:[%s2308_s3 + $0x240] sm:$0xff] %vm1109_vm1, %v1081_v2  ;;  %v631_v9 = vadd.f32 %v1803_v48, %v630_v7  ;;  %v881_v10 = vadd.f32 %v1803_v48, %v880_v8 }
 0x12b   :  { %v1034_v11 = vmax.f32 %v636_v5, 0.0  ;;  %v1084_v12 = vmax.f32 %v886_v6, 0.0 }
 0x12c   :  { %v1033_v13 = vmax.f32 %v631_v9, 0.0  ;;  %v1083_v14 = vmax.f32 %v881_v10, 0.0  ;;  %v1481_v15 = vpop.f32.mrb[26].mxu0  ;;  %v1556_v16 = vpop.f32.mrb[26].mxu1 }
 0x12d   :  { %1135 = vst.msk [vmem:[%s2308_s3 + $0xc8] sm:$0xff] %vm1109_vm1, %v1034_v11  ;;  %1185 = vst.msk [vmem:[%s2308_s3 + $0x258] sm:$0xff] %vm1109_vm1, %v1084_v12  ;;  %v646_v17 = vadd.f32 %v1481_v15, %v1803_v48  ;;  %v896_v18 = vadd.f32 %v1556_v16, %v1803_v48  ;;  %v640_v19 = vpop.f32.mrb[27].mxu0  ;;  %v890_v20 = vpop.f32.mrb[27].mxu1 }
 0x12e   :  { %1134 = vst.msk [vmem:[%s2308_s3 + $0xc0] sm:$0xff] %vm1109_vm1, %v1033_v13  ;;  %1184 = vst.msk [vmem:[%s2308_s3 + $0x250] sm:$0xff] %vm1109_vm1, %v1083_v14  ;;  %v641_v21 = vadd.f32 %v1803_v48, %v640_v19  ;;  %v891_v22 = vadd.f32 %v1803_v48, %v890_v20 }
 0x12f   :  { %v1036_v23 = vmax.f32 %v646_v17, 0.0  ;;  %v1086_v24 = vmax.f32 %v896_v18, 0.0 }
 0x130   :  { %v1035_v25 = vmax.f32 %v641_v21, 0.0  ;;  %v1085_v26 = vmax.f32 %v891_v22, 0.0  ;;  %v1484_v27 = vpop.f32.mrb[28].mxu0  ;;  %v1559_v28 = vpop.f32.mrb[28].mxu1 }
 0x131   :  { %1137 = vst.msk [vmem:[%s2308_s3 + $0xd8] sm:$0xff] %vm1109_vm1, %v1036_v23  ;;  %1187 = vst.msk [vmem:[%s2308_s3 + $0x268] sm:$0xff] %vm1109_vm1, %v1086_v24  ;;  %v656_v29 = vadd.f32 %v1484_v27, %v1803_v48  ;;  %v906_v30 = vadd.f32 %v1559_v28, %v1803_v48  ;;  %v650_v31 = vpop.f32.mrb[29].mxu0  ;;  %v900_v32 = vpop.f32.mrb[29].mxu1 }
 0x132   :  { %1136 = vst.msk [vmem:[%s2308_s3 + $0xd0] sm:$0xff] %vm1109_vm1, %v1035_v25  ;;  %1186 = vst.msk [vmem:[%s2308_s3 + $0x260] sm:$0xff] %vm1109_vm1, %v1085_v26  ;;  %v651_v33 = vadd.f32 %v1803_v48, %v650_v31  ;;  %v901_v34 = vadd.f32 %v1803_v48, %v900_v32 }
 0x133   :  { %v1038_v35 = vmax.f32 %v656_v29, 0.0  ;;  %v1088_v36 = vmax.f32 %v906_v30, 0.0 }
 0x134   :  { %v1037_v37 = vmax.f32 %v651_v33, 0.0  ;;  %v1087_v38 = vmax.f32 %v901_v34, 0.0  ;;  %v1487_v39 = vpop.f32.mrb[30].mxu0  ;;  %v1562_v40 = vpop.f32.mrb[30].mxu1 }
 0x135   :  { %1139 = vst.msk [vmem:[%s2308_s3 + $0xe8] sm:$0xff] %vm1109_vm1, %v1038_v35  ;;  %1189 = vst.msk [vmem:[%s2308_s3 + $0x278] sm:$0xff] %vm1109_vm1, %v1088_v36  ;;  %v666_v41 = vadd.f32 %v1487_v39, %v1803_v48  ;;  %v916_v42 = vadd.f32 %v1562_v40, %v1803_v48  ;;  %v660_v43 = vpop.f32.mrb[31].mxu0  ;;  %v910_v44 = vpop.f32.mrb[31].mxu1 }
 0x136   :  { %1138 = vst.msk [vmem:[%s2308_s3 + $0xe0] sm:$0xff] %vm1109_vm1, %v1037_v37  ;;  %1188 = vst.msk [vmem:[%s2308_s3 + $0x270] sm:$0xff] %vm1109_vm1, %v1087_v38  ;;  %v661_v45 = vadd.f32 %v1803_v48, %v660_v43  ;;  %v911_v46 = vadd.f32 %v1803_v48, %v910_v44 }
 0x137   :  { %v1040_v47 = vmax.f32 %v666_v41, 0.0  ;;  %v1090_v49 = vmax.f32 %v916_v42, 0.0 }
 0x138   :  { %v1039_v50 = vmax.f32 %v661_v45, 0.0  ;;  %v1089_v51 = vmax.f32 %v911_v46, 0.0  ;;  %v1490_v52 = vpop.f32.mrb[32].mxu0  ;;  %v1565_v53 = vpop.f32.mrb[32].mxu1 }
 0x139   :  { %1141 = vst.msk [vmem:[%s2308_s3 + $0xf8] sm:$0xff] %vm1109_vm1, %v1040_v47  ;;  %1191 = vst.msk [vmem:[%s2308_s3 + $0x288] sm:$0xff] %vm1109_vm1, %v1090_v49  ;;  %v676_v54 = vadd.f32 %v1490_v52, %v1803_v48  ;;  %v926_v55 = vadd.f32 %v1565_v53, %v1803_v48  ;;  %v670_v56 = vpop.f32.mrb[33].mxu0  ;;  %v920_v57 = vpop.f32.mrb[33].mxu1 }
 0x13a   :  { %1140 = vst.msk [vmem:[%s2308_s3 + $0xf0] sm:$0xff] %vm1109_vm1, %v1039_v50  ;;  %1190 = vst.msk [vmem:[%s2308_s3 + $0x280] sm:$0xff] %vm1109_vm1, %v1089_v51  ;;  %v671_v58 = vadd.f32 %v1803_v48, %v670_v56  ;;  %v921_v59 = vadd.f32 %v1803_v48, %v920_v57 }
 0x13b   :  { %v1042_v60 = vmax.f32 %v676_v54, 0.0  ;;  %v1092_v61 = vmax.f32 %v926_v55, 0.0 }
 0x13c   :  { %v1041_v62 = vmax.f32 %v671_v58, 0.0  ;;  %v1091_v63 = vmax.f32 %v921_v59, 0.0  ;;  %v1493_v0 = vpop.f32.mrb[34].mxu0  ;;  %v1568_v1 = vpop.f32.mrb[34].mxu1 }
 0x13d   :  { %1143 = vst.msk [vmem:[%s2308_s3 + $0x108] sm:$0xff] %vm1109_vm1, %v1042_v60  ;;  %1193 = vst.msk [vmem:[%s2308_s3 + $0x298] sm:$0xff] %vm1109_vm1, %v1092_v61  ;;  %v686_v2 = vadd.f32 %v1493_v0, %v1803_v48  ;;  %v936_v3 = vadd.f32 %v1568_v1, %v1803_v48  ;;  %v680_v4 = vpop.f32.mrb[35].mxu0  ;;  %v930_v5 = vpop.f32.mrb[35].mxu1 }
 0x13e   :  { %1142 = vst.msk [vmem:[%s2308_s3 + $0x100] sm:$0xff] %vm1109_vm1, %v1041_v62  ;;  %1192 = vst.msk [vmem:[%s2308_s3 + $0x290] sm:$0xff] %vm1109_vm1, %v1091_v63  ;;  %v681_v6 = vadd.f32 %v1803_v48, %v680_v4  ;;  %v931_v7 = vadd.f32 %v1803_v48, %v930_v5 }
 0x13f   :  { %v1044_v8 = vmax.f32 %v686_v2, 0.0  ;;  %v1094_v9 = vmax.f32 %v936_v3, 0.0 }
 0x140   :  { %v1043_v10 = vmax.f32 %v681_v6, 0.0  ;;  %v1093_v11 = vmax.f32 %v931_v7, 0.0  ;;  %v1496_v12 = vpop.f32.mrb[36].mxu0  ;;  %v1571_v13 = vpop.f32.mrb[36].mxu1 }
 0x141   :  { %1145 = vst.msk [vmem:[%s2308_s3 + $0x118] sm:$0xff] %vm1109_vm1, %v1044_v8  ;;  %1195 = vst.msk [vmem:[%s2308_s3 + $0x2a8] sm:$0xff] %vm1109_vm1, %v1094_v9  ;;  %v696_v14 = vadd.f32 %v1496_v12, %v1803_v48  ;;  %v946_v15 = vadd.f32 %v1571_v13, %v1803_v48  ;;  %v690_v16 = vpop.f32.mrb[37].mxu0  ;;  %v940_v17 = vpop.f32.mrb[37].mxu1 }
 0x142   :  { %1144 = vst.msk [vmem:[%s2308_s3 + $0x110] sm:$0xff] %vm1109_vm1, %v1043_v10  ;;  %1194 = vst.msk [vmem:[%s2308_s3 + $0x2a0] sm:$0xff] %vm1109_vm1, %v1093_v11  ;;  %v691_v18 = vadd.f32 %v1803_v48, %v690_v16  ;;  %v941_v19 = vadd.f32 %v1803_v48, %v940_v17 }
 0x143   :  { %v1046_v20 = vmax.f32 %v696_v14, 0.0  ;;  %v1096_v21 = vmax.f32 %v946_v15, 0.0 }
 0x144   :  { %v1045_v22 = vmax.f32 %v691_v18, 0.0  ;;  %v1095_v23 = vmax.f32 %v941_v19, 0.0  ;;  %v1499_v24 = vpop.f32.mrb[38].mxu0  ;;  %v1574_v25 = vpop.f32.mrb[38].mxu1 }
 0x145   :  { %1147 = vst.msk [vmem:[%s2308_s3 + $0x128] sm:$0xff] %vm1109_vm1, %v1046_v20  ;;  %1197 = vst.msk [vmem:[%s2308_s3 + $0x2b8] sm:$0xff] %vm1109_vm1, %v1096_v21  ;;  %v706_v26 = vadd.f32 %v1499_v24, %v1803_v48  ;;  %v956_v27 = vadd.f32 %v1574_v25, %v1803_v48  ;;  %v700_v28 = vpop.f32.mrb[39].mxu0  ;;  %v950_v29 = vpop.f32.mrb[39].mxu1 }
 0x146   :  { %1146 = vst.msk [vmem:[%s2308_s3 + $0x120] sm:$0xff] %vm1109_vm1, %v1045_v22  ;;  %1196 = vst.msk [vmem:[%s2308_s3 + $0x2b0] sm:$0xff] %vm1109_vm1, %v1095_v23  ;;  %v701_v30 = vadd.f32 %v1803_v48, %v700_v28  ;;  %v951_v31 = vadd.f32 %v1803_v48, %v950_v29 }
 0x147   :  { %v1048_v32 = vmax.f32 %v706_v26, 0.0  ;;  %v1098_v33 = vmax.f32 %v956_v27, 0.0 }
 0x148   :  { %v1047_v34 = vmax.f32 %v701_v30, 0.0  ;;  %v1097_v35 = vmax.f32 %v951_v31, 0.0  ;;  %v1502_v36 = vpop.f32.mrb[40].mxu0  ;;  %v1577_v37 = vpop.f32.mrb[40].mxu1 }
 0x149   :  { %1149 = vst.msk [vmem:[%s2308_s3 + $0x138] sm:$0xff] %vm1109_vm1, %v1048_v32  ;;  %1199 = vst.msk [vmem:[%s2308_s3 + $0x2c8] sm:$0xff] %vm1109_vm1, %v1098_v33  ;;  %v716_v38 = vadd.f32 %v1502_v36, %v1803_v48  ;;  %v966_v39 = vadd.f32 %v1577_v37, %v1803_v48  ;;  %v710_v40 = vpop.f32.mrb[41].mxu0  ;;  %v960_v41 = vpop.f32.mrb[41].mxu1 }
 0x14a   :  { %1148 = vst.msk [vmem:[%s2308_s3 + $0x130] sm:$0xff] %vm1109_vm1, %v1047_v34  ;;  %1198 = vst.msk [vmem:[%s2308_s3 + $0x2c0] sm:$0xff] %vm1109_vm1, %v1097_v35  ;;  %v711_v42 = vadd.f32 %v1803_v48, %v710_v40  ;;  %v961_v43 = vadd.f32 %v1803_v48, %v960_v41 }
 0x14b   :  { %v1050_v44 = vmax.f32 %v716_v38, 0.0  ;;  %v1100_v45 = vmax.f32 %v966_v39, 0.0 }
 0x14c   :  { %v1049_v46 = vmax.f32 %v711_v42, 0.0  ;;  %v1099_v47 = vmax.f32 %v961_v43, 0.0  ;;  %v1505_v49 = vpop.f32.mrb[42].mxu0  ;;  %v1580_v50 = vpop.f32.mrb[42].mxu1 }
 0x14d   :  { %1151 = vst.msk [vmem:[%s2308_s3 + $0x148] sm:$0xff] %vm1109_vm1, %v1050_v44  ;;  %1201 = vst.msk [vmem:[%s2308_s3 + $0x2d8] sm:$0xff] %vm1109_vm1, %v1100_v45  ;;  %v726_v51 = vadd.f32 %v1505_v49, %v1803_v48  ;;  %v976_v52 = vadd.f32 %v1580_v50, %v1803_v48  ;;  %v720_v53 = vpop.f32.mrb[43].mxu0  ;;  %v970_v54 = vpop.f32.mrb[43].mxu1 }
 0x14e   :  { %1150 = vst.msk [vmem:[%s2308_s3 + $0x140] sm:$0xff] %vm1109_vm1, %v1049_v46  ;;  %1200 = vst.msk [vmem:[%s2308_s3 + $0x2d0] sm:$0xff] %vm1109_vm1, %v1099_v47  ;;  %v721_v55 = vadd.f32 %v1803_v48, %v720_v53  ;;  %v971_v56 = vadd.f32 %v1803_v48, %v970_v54 }
 0x14f   :  { %v1052_v57 = vmax.f32 %v726_v51, 0.0  ;;  %v1102_v58 = vmax.f32 %v976_v52, 0.0 }
 0x150   :  { %v1051_v59 = vmax.f32 %v721_v55, 0.0  ;;  %v1101_v60 = vmax.f32 %v971_v56, 0.0  ;;  %v1508_v61 = vpop.f32.mrb[44].mxu0  ;;  %v1583_v62 = vpop.f32.mrb[44].mxu1 }
 0x151   :  { %1153 = vst.msk [vmem:[%s2308_s3 + $0x158] sm:$0xff] %vm1109_vm1, %v1052_v57  ;;  %1203 = vst.msk [vmem:[%s2308_s3 + $0x2e8] sm:$0xff] %vm1109_vm1, %v1102_v58  ;;  %v736_v63 = vadd.f32 %v1508_v61, %v1803_v48  ;;  %v986_v0 = vadd.f32 %v1583_v62, %v1803_v48  ;;  %v730_v1 = vpop.f32.mrb[45].mxu0  ;;  %v980_v2 = vpop.f32.mrb[45].mxu1 }
 0x152   :  { %1152 = vst.msk [vmem:[%s2308_s3 + $0x150] sm:$0xff] %vm1109_vm1, %v1051_v59  ;;  %1202 = vst.msk [vmem:[%s2308_s3 + $0x2e0] sm:$0xff] %vm1109_vm1, %v1101_v60  ;;  %v731_v3 = vadd.f32 %v1803_v48, %v730_v1  ;;  %v981_v4 = vadd.f32 %v1803_v48, %v980_v2 }
 0x153   :  { %v1054_v5 = vmax.f32 %v736_v63, 0.0  ;;  %v1104_v6 = vmax.f32 %v986_v0, 0.0 }
 0x154   :  { %v1053_v7 = vmax.f32 %v731_v3, 0.0  ;;  %v1103_v8 = vmax.f32 %v981_v4, 0.0  ;;  %v1511_v9 = vpop.f32.mrb[46].mxu0  ;;  %v1586_v10 = vpop.f32.mrb[46].mxu1 }
 0x155   :  { %1155 = vst.msk [vmem:[%s2308_s3 + $0x168] sm:$0xff] %vm1109_vm1, %v1054_v5  ;;  %1205 = vst.msk [vmem:[%s2308_s3 + $0x2f8] sm:$0xff] %vm1109_vm1, %v1104_v6  ;;  %v746_v11 = vadd.f32 %v1511_v9, %v1803_v48  ;;  %v996_v12 = vadd.f32 %v1586_v10, %v1803_v48  ;;  %v740_v13 = vpop.f32.mrb[47].mxu0  ;;  %v990_v14 = vpop.f32.mrb[47].mxu1 }
 0x156   :  { %1154 = vst.msk [vmem:[%s2308_s3 + $0x160] sm:$0xff] %vm1109_vm1, %v1053_v7  ;;  %1204 = vst.msk [vmem:[%s2308_s3 + $0x2f0] sm:$0xff] %vm1109_vm1, %v1103_v8  ;;  %v741_v15 = vadd.f32 %v1803_v48, %v740_v13  ;;  %v991_v16 = vadd.f32 %v1803_v48, %v990_v14 }
 0x157   :  { %v1056_v17 = vmax.f32 %v746_v11, 0.0  ;;  %v1106_v18 = vmax.f32 %v996_v12, 0.0 }
 0x158   :  { %v1055_v19 = vmax.f32 %v741_v15, 0.0  ;;  %v1105_v20 = vmax.f32 %v991_v16, 0.0  ;;  %v1514_v21 = vpop.f32.mrb[48].mxu0  ;;  %v1589_v22 = vpop.f32.mrb[48].mxu1 }
 0x159   :  { %1157 = vst.msk [vmem:[%s2308_s3 + $0x178] sm:$0xff] %vm1109_vm1, %v1056_v17  ;;  %1207 = vst.msk [vmem:[%s2308_s3 + $0x308] sm:$0xff] %vm1109_vm1, %v1106_v18  ;;  %v756_v23 = vadd.f32 %v1514_v21, %v1803_v48  ;;  %v1006_v24 = vadd.f32 %v1589_v22, %v1803_v48  ;;  %v750_v25 = vpop.f32.mrb[49].mxu0  ;;  %v1000_v26 = vpop.f32.mrb[49].mxu1 }
 0x15a   :  { %1156 = vst.msk [vmem:[%s2308_s3 + $0x170] sm:$0xff] %vm1109_vm1, %v1055_v19  ;;  %1206 = vst.msk [vmem:[%s2308_s3 + $0x300] sm:$0xff] %vm1109_vm1, %v1105_v20  ;;  %v751_v27 = vadd.f32 %v1803_v48, %v750_v25  ;;  %v1001_v28 = vadd.f32 %v1803_v48, %v1000_v26 }
 0x15b   :  { %v1058_v29 = vmax.f32 %v756_v23, 0.0  ;;  %v1108_v30 = vmax.f32 %v1006_v24, 0.0 }
 0x15c   :  { %v1057_v31 = vmax.f32 %v751_v27, 0.0  ;;  %v1107_v32 = vmax.f32 %v1001_v28, 0.0 }
 0x15d   :  { %1159 = vst.msk [vmem:[%s2308_s3 + $0x188] sm:$0xff] %vm1109_vm1, %v1058_v29  ;;  %1209 = vst.msk [vmem:[%s2308_s3 + $0x318] sm:$0xff] %vm1109_vm1, %v1108_v30 }
 0x15e   :  { %1158 = vst.msk [vmem:[%s2308_s3 + $0x180] sm:$0xff] %vm1109_vm1, %v1057_v31  ;;  %1208 = vst.msk [vmem:[%s2308_s3 + $0x310] sm:$0xff] %vm1109_vm1, %v1107_v32 }
 0x15f   :  { %1214 = vsyncpa [#allocation3], 1 }

// kernel: namco_boi_forward.6
= control target key start
LH: loop header
LB: loop body
LE: loop exit
PB: predicated region body
PF: predicated region fallthrough
CT: control target
= control target key end

     0   :  { %v697_v0 = vmov 0.0|0.0   ;;  %vm530_vm0 = vcmask 523264   ;;  %vm551_vm1 = vcmask 517120   ;;  %s1303_s1 = inlined_call_operand.vmem [shape: f32[512,64], index: 1, kind: input, shape index: {}]   ;;  %s1304_s0 = inlined_call_operand.vmem [shape: f32[162,512], index: 0, kind: input, shape index: {}]   ;;  %s1305_s2 = inlined_call_operand.vmem [shape: f32[1,64], index: 2, kind: input, shape index: {}]   ;;  %s1306_s3 = inlined_call_operand.vmem [shape: f32[162,64], index: 3, kind: output, shape index: {}]  }
   0x1   :  { %558 = vmatprep.subr.bf16.mxu1 %v697_v0  ;;  %v98_v1 = vld [vmem:[%s1303_s1] sm:$0xff]  ;;  %v99_v2 = vld [vmem:[%s1303_s1 + $0x8] sm:$0xff]  ;;  %606 = vmatprep.subr.bf16.mxu0 %v697_v0  ;;  %v100_v6 = vld [vmem:[%s1303_s1 + $0x10] sm:$0xff] }
   0x2   :  { %v130_v3 = vld [vmem:[%s1303_s1 + $0x100] sm:$0xff]  ;;  %v559_v4 = vpack.c.bf16 %v99_v2, %v98_v1  ;;  %v131_v5 = vld [vmem:[%s1303_s1 + $0x108] sm:$0xff]  ;;  %v101_v7 = vld [vmem:[%s1303_s1 + $0x18] sm:$0xff] }
   0x3   :  { %v607_v8 = vpack.c.bf16 %v131_v5, %v130_v3  ;;  %v132_v9 = vld [vmem:[%s1303_s1 + $0x110] sm:$0xff]  ;;  %v133_v10 = vld [vmem:[%s1303_s1 + $0x118] sm:$0xff]  ;;  %v562_v11 = vpack.c.bf16 %v101_v7, %v100_v6  ;;  %v102_v13 = vld [vmem:[%s1303_s1 + $0x20] sm:$0xff] }
   0x4   :  { %560 = vmatpush1.bf16.msra.mxu1 %v559_v4  ;;  %v610_v12 = vpack.c.bf16 %v133_v10, %v132_v9  ;;  %v103_v14 = vld [vmem:[%s1303_s1 + $0x28] sm:$0xff]  ;;  %v134_v15 = vld [vmem:[%s1303_s1 + $0x120] sm:$0xff]  ;;  %v104_v19 = vld [vmem:[%s1303_s1 + $0x30] sm:$0xff] }
   0x5   :  { %608 = vmatpush1.bf16.msra.mxu0 %v607_v8  ;;  %561 = vmatprep.subr.bf16.mxu1 %v697_v0  ;;  %v135_v16 = vld [vmem:[%s1303_s1 + $0x128] sm:$0xff]  ;;  %v565_v17 = vpack.c.bf16 %v103_v14, %v102_v13  ;;  %v105_v20 = vld [vmem:[%s1303_s1 + $0x38] sm:$0xff]  ;;  %v136_v21 = vld [vmem:[%s1303_s1 + $0x130] sm:$0xff] }
   0x6   :  { %609 = vmatprep.subr.bf16.mxu0 %v697_v0  ;;  %v613_v18 = vpack.c.bf16 %v135_v16, %v134_v15  ;;  %v137_v22 = vld [vmem:[%s1303_s1 + $0x138] sm:$0xff]  ;;  %v568_v23 = vpack.c.bf16 %v105_v20, %v104_v19  ;;  %v106_v25 = vld [vmem:[%s1303_s1 + $0x40] sm:$0xff]  ;;  %v107_v26 = vld [vmem:[%s1303_s1 + $0x48] sm:$0xff] }
   0x7   :  { %v616_v24 = vpack.c.bf16 %v137_v22, %v136_v21  ;;  %v138_v27 = vld [vmem:[%s1303_s1 + $0x140] sm:$0xff]  ;;  %v139_v28 = vld [vmem:[%s1303_s1 + $0x148] sm:$0xff]  ;;  %v571_v29 = vpack.c.bf16 %v107_v26, %v106_v25  ;;  %v108_v31 = vld [vmem:[%s1303_s1 + $0x50] sm:$0xff] }
   0x8   :  { %563 = vmatpush1.bf16.msra.mxu1 %v562_v11  ;;  %v619_v30 = vpack.c.bf16 %v139_v28, %v138_v27  ;;  %v109_v32 = vld [vmem:[%s1303_s1 + $0x58] sm:$0xff]  ;;  %v140_v33 = vld [vmem:[%s1303_s1 + $0x150] sm:$0xff]  ;;  %v110_v37 = vld [vmem:[%s1303_s1 + $0x60] sm:$0xff] }
   0x9   :  { %611 = vmatpush1.bf16.msra.mxu0 %v610_v12  ;;  %564 = vmatprep.subr.bf16.mxu1 %v697_v0  ;;  %v141_v34 = vld [vmem:[%s1303_s1 + $0x158] sm:$0xff]  ;;  %v574_v35 = vpack.c.bf16 %v109_v32, %v108_v31  ;;  %v111_v38 = vld [vmem:[%s1303_s1 + $0x68] sm:$0xff]  ;;  %v142_v39 = vld [vmem:[%s1303_s1 + $0x160] sm:$0xff] }
   0xa   :  { %612 = vmatprep.subr.bf16.mxu0 %v697_v0  ;;  %v622_v36 = vpack.c.bf16 %v141_v34, %v140_v33  ;;  %v143_v40 = vld [vmem:[%s1303_s1 + $0x168] sm:$0xff]  ;;  %v17_v42 = vld [vmem:[%s1304_s0 + $0x18] sm:$0xff]  ;;  %v577_v43 = vpack.c.bf16 %v111_v38, %v110_v37  ;;  %v112_v45 = vld [vmem:[%s1303_s1 + $0x70] sm:$0xff] }
   0xb   :  { %v15_v41 = vld [vmem:[%s1304_s0 + $0x8] sm:$0xff]  ;;  %403 = vmatprep.mubr.f32.mxu0 %v17_v42  ;;  %v625_v44 = vpack.c.bf16 %v143_v40, %v142_v39  ;;  %v113_v46 = vld [vmem:[%s1303_s1 + $0x78] sm:$0xff]  ;;  %v144_v47 = vld [vmem:[%s1303_s1 + $0x170] sm:$0xff] }
   0xc   :  { %566 = vmatpush1.bf16.msra.mxu1 %v565_v17  ;;  %233 = vmatprep.mubr.f32.mxu1 %v15_v41  ;;  %v145_v48 = vld [vmem:[%s1303_s1 + $0x178] sm:$0xff]  ;;  %v580_v49 = vpack.c.bf16 %v113_v46, %v112_v45  ;;  %v114_v51 = vld [vmem:[%s1303_s1 + $0x80] sm:$0xff]  ;;  %v115_v52 = vld [vmem:[%s1303_s1 + $0x88] sm:$0xff] }
   0xd   :  { %614 = vmatpush1.bf16.msra.mxu0 %v613_v18  ;;  %567 = vmatprep.subr.bf16.mxu1 %v697_v0  ;;  %v628_v50 = vpack.c.bf16 %v145_v48, %v144_v47  ;;  %v146_v53 = vld [vmem:[%s1303_s1 + $0x180] sm:$0xff]  ;;  %v147_v54 = vld [vmem:[%s1303_s1 + $0x188] sm:$0xff]  ;;  %v583_v55 = vpack.c.bf16 %v115_v52, %v114_v51  ;;  %v116_v57 = vld [vmem:[%s1303_s1 + $0x90] sm:$0xff] }
   0xe   :  { %615 = vmatprep.subr.bf16.mxu0 %v697_v0  ;;  %v631_v56 = vpack.c.bf16 %v147_v54, %v146_v53  ;;  %v117_v58 = vld [vmem:[%s1303_s1 + $0x98] sm:$0xff]  ;;  %v148_v59 = vld [vmem:[%s1303_s1 + $0x190] sm:$0xff]  ;;  %v118_v63 = vld [vmem:[%s1303_s1 + $0xa0] sm:$0xff] }
   0xf   :  { %v149_v60 = vld [vmem:[%s1303_s1 + $0x198] sm:$0xff]  ;;  %v586_v61 = vpack.c.bf16 %v117_v58, %v116_v57  ;;  %v119_v1 = vld [vmem:[%s1303_s1 + $0xa8] sm:$0xff]  ;;  %v150_v2 = vld [vmem:[%s1303_s1 + $0x1a0] sm:$0xff] }
  0x10   :  { %569 = vmatpush1.bf16.msra.mxu1 %v568_v23  ;;  %v634_v62 = vpack.c.bf16 %v149_v60, %v148_v59  ;;  %v151_v3 = vld [vmem:[%s1303_s1 + $0x1a8] sm:$0xff]  ;;  %v589_v4 = vpack.c.bf16 %v119_v1, %v118_v63  ;;  %v120_v6 = vld [vmem:[%s1303_s1 + $0xb0] sm:$0xff]  ;;  %v121_v7 = vld [vmem:[%s1303_s1 + $0xb8] sm:$0xff] }
  0x11   :  { %617 = vmatpush1.bf16.msra.mxu0 %v616_v24  ;;  %570 = vmatprep.subr.bf16.mxu1 %v697_v0  ;;  %v637_v5 = vpack.c.bf16 %v151_v3, %v150_v2  ;;  %v152_v8 = vld [vmem:[%s1303_s1 + $0x1b0] sm:$0xff]  ;;  %v153_v9 = vld [vmem:[%s1303_s1 + $0x1b8] sm:$0xff]  ;;  %v592_v10 = vpack.c.bf16 %v121_v7, %v120_v6  ;;  %v122_v12 = vld [vmem:[%s1303_s1 + $0xc0] sm:$0xff] }
  0x12   :  { %618 = vmatprep.subr.bf16.mxu0 %v697_v0  ;;  %v640_v11 = vpack.c.bf16 %v153_v9, %v152_v8  ;;  %v123_v13 = vld [vmem:[%s1303_s1 + $0xc8] sm:$0xff]  ;;  %v154_v14 = vld [vmem:[%s1303_s1 + $0x1c0] sm:$0xff]  ;;  %v124_v18 = vld [vmem:[%s1303_s1 + $0xd0] sm:$0xff] }
  0x13   :  { %v155_v15 = vld [vmem:[%s1303_s1 + $0x1c8] sm:$0xff]  ;;  %v595_v16 = vpack.c.bf16 %v123_v13, %v122_v12  ;;  %v125_v19 = vld [vmem:[%s1303_s1 + $0xd8] sm:$0xff]  ;;  %v156_v20 = vld [vmem:[%s1303_s1 + $0x1d0] sm:$0xff] }
  0x14   :  { %572 = vmatpush1.bf16.msra.mxu1 %v571_v29  ;;  %v643_v17 = vpack.c.bf16 %v155_v15, %v154_v14  ;;  %v157_v21 = vld [vmem:[%s1303_s1 + $0x1d8] sm:$0xff]  ;;  %v598_v22 = vpack.c.bf16 %v125_v19, %v124_v18  ;;  %v126_v24 = vld [vmem:[%s1303_s1 + $0xe0] sm:$0xff]  ;;  %v127_v25 = vld [vmem:[%s1303_s1 + $0xe8] sm:$0xff] }
  0x15   :  { %620 = vmatpush1.bf16.msra.mxu0 %v619_v30  ;;  %573 = vmatprep.subr.bf16.mxu1 %v697_v0  ;;  %v646_v23 = vpack.c.bf16 %v157_v21, %v156_v20  ;;  %v158_v26 = vld [vmem:[%s1303_s1 + $0x1e0] sm:$0xff]  ;;  %v159_v27 = vld [vmem:[%s1303_s1 + $0x1e8] sm:$0xff]  ;;  %v601_v28 = vpack.c.bf16 %v127_v25, %v126_v24  ;;  %v128_v30 = vld [vmem:[%s1303_s1 + $0xf0] sm:$0xff] }
  0x16   :  { %621 = vmatprep.subr.bf16.mxu0 %v697_v0  ;;  %v649_v29 = vpack.c.bf16 %v159_v27, %v158_v26  ;;  %v129_v31 = vld [vmem:[%s1303_s1 + $0xf8] sm:$0xff]  ;;  %v160_v32 = vld [vmem:[%s1303_s1 + $0x1f0] sm:$0xff]  ;;  %v19_v38 = vld [vmem:[%s1304_s0 + $0x28] sm:$0xff] }
  0x17   :  { %v161_v33 = vld [vmem:[%s1303_s1 + $0x1f8] sm:$0xff]  ;;  %v604_v34 = vpack.c.bf16 %v129_v31, %v128_v30  ;;  %v16_v37 = vld [vmem:[%s1304_s0 + $0x10] sm:$0xff]  ;;  %v23_v41 = vld [vmem:[%s1304_s0 + $0x48] sm:$0xff] }
  0x18   :  { %575 = vmatpush1.bf16.msra.mxu1 %v574_v35  ;;  %v652_v35 = vpack.c.bf16 %v161_v33, %v160_v32  ;;  %v21_v39 = vld [vmem:[%s1304_s0 + $0x38] sm:$0xff]  ;;  %v20_v40 = vld [vmem:[%s1304_s0 + $0x30] sm:$0xff]  ;;  %v27_v45 = vld [vmem:[%s1304_s0 + $0x68] sm:$0xff] }
  0x19   :  { %623 = vmatpush1.bf16.msra.mxu0 %v622_v36  ;;  %576 = vmatprep.subr.bf16.mxu1 %v697_v0  ;;  %v14_v36 = vld [vmem:[%s1304_s0] sm:$0xff]  ;;  %v25_v42 = vld [vmem:[%s1304_s0 + $0x58] sm:$0xff]  ;;  %v28_v48 = vld [vmem:[%s1304_s0 + $0x70] sm:$0xff] }
  0x1a   :  { %624 = vmatprep.subr.bf16.mxu0 %v697_v0  ;;  %v29_v46 = vld [vmem:[%s1304_s0 + $0x78] sm:$0xff]  ;;  %v26_v47 = vld [vmem:[%s1304_s0 + $0x60] sm:$0xff]  ;;  %v32_v52 = vld [vmem:[%s1304_s0 + $0x90] sm:$0xff] }
  0x1b   :  { %v30_v51 = vld [vmem:[%s1304_s0 + $0x80] sm:$0xff]  ;;  %v35_v53 = vld [vmem:[%s1304_s0 + $0xa8] sm:$0xff]  ;;  %v37_v54 = vld [vmem:[%s1304_s0 + $0xb8] sm:$0xff] }
  0x1c   :  { %578 = vmatpush1.bf16.msra.mxu1 %v577_v43  ;;  %v22_v43 = vld [vmem:[%s1304_s0 + $0x40] sm:$0xff]  ;;  %v39_v57 = vld [vmem:[%s1304_s0 + $0xc8] sm:$0xff]  ;;  %v41_v58 = vld [vmem:[%s1304_s0 + $0xd8] sm:$0xff] }
  0x1d   :  { %626 = vmatpush1.bf16.msra.mxu0 %v625_v44  ;;  %579 = vmatprep.subr.bf16.mxu1 %v697_v0  ;;  %v24_v44 = vld [vmem:[%s1304_s0 + $0x50] sm:$0xff]  ;;  %v38_v59 = vld [vmem:[%s1304_s0 + $0xc0] sm:$0xff]  ;;  %v47_v2 = vld [vmem:[%s1304_s0 + $0x108] sm:$0xff] }
  0x1e   :  { %627 = vmatprep.subr.bf16.mxu0 %v697_v0  ;;  %v40_v60 = vld [vmem:[%s1304_s0 + $0xd0] sm:$0xff]  ;;  %v42_v63 = vld [vmem:[%s1304_s0 + $0xe0] sm:$0xff]  ;;  %v49_v3 = vld [vmem:[%s1304_s0 + $0x118] sm:$0xff] }
  0x1f   :  { %v44_v1 = vld [vmem:[%s1304_s0 + $0xf0] sm:$0xff]  ;;  %v51_v6 = vld [vmem:[%s1304_s0 + $0x128] sm:$0xff]  ;;  %v53_v7 = vld [vmem:[%s1304_s0 + $0x138] sm:$0xff] }
  0x20   :  { %581 = vmatpush1.bf16.msra.mxu1 %v580_v49  ;;  %v31_v49 = vld [vmem:[%s1304_s0 + $0x88] sm:$0xff]  ;;  %v50_v8 = vld [vmem:[%s1304_s0 + $0x120] sm:$0xff]  ;;  %v52_v9 = vld [vmem:[%s1304_s0 + $0x130] sm:$0xff] }
  0x21   :  { %629 = vmatpush1.bf16.msra.mxu0 %v628_v50  ;;  %582 = vmatprep.subr.bf16.mxu1 %v697_v0  ;;  %v33_v50 = vld [vmem:[%s1304_s0 + $0x98] sm:$0xff]  ;;  %v54_v12 = vld [vmem:[%s1304_s0 + $0x140] sm:$0xff]  ;;  %v56_v13 = vld [vmem:[%s1304_s0 + $0x150] sm:$0xff] }
  0x22   :  { %630 = vmatprep.subr.bf16.mxu0 %v697_v0  ;;  %v59_v14 = vld [vmem:[%s1304_s0 + $0x168] sm:$0xff]  ;;  %v61_v15 = vld [vmem:[%s1304_s0 + $0x178] sm:$0xff]  ;;  %v62_v20 = vld [vmem:[%s1304_s0 + $0x180] sm:$0xff] }
  0x23   :  { %v63_v18 = vld [vmem:[%s1304_s0 + $0x188] sm:$0xff]  ;;  %v65_v19 = vld [vmem:[%s1304_s0 + $0x198] sm:$0xff]  ;;  %v64_v21 = vld [vmem:[%s1304_s0 + $0x190] sm:$0xff] }
  0x24   :  { %584 = vmatpush1.bf16.msra.mxu1 %v583_v55  ;;  %v34_v55 = vld [vmem:[%s1304_s0 + $0xa0] sm:$0xff]  ;;  %v68_v25 = vld [vmem:[%s1304_s0 + $0x1b0] sm:$0xff]  ;;  %v71_v26 = vld [vmem:[%s1304_s0 + $0x1c8] sm:$0xff] }
  0x25   :  { %632 = vmatpush1.bf16.msra.mxu0 %v631_v56  ;;  %585 = vmatprep.subr.bf16.mxu1 %v697_v0  ;;  %v36_v56 = vld [vmem:[%s1304_s0 + $0xb0] sm:$0xff]  ;;  %v66_v24 = vld [vmem:[%s1304_s0 + $0x1a0] sm:$0xff]  ;;  %v73_v27 = vld [vmem:[%s1304_s0 + $0x1d8] sm:$0xff] }
  0x26   :  { %633 = vmatprep.subr.bf16.mxu0 %v697_v0  ;;  %v75_v30 = vld [vmem:[%s1304_s0 + $0x1e8] sm:$0xff]  ;;  %v77_v31 = vld [vmem:[%s1304_s0 + $0x1f8] sm:$0xff]  ;;  %v74_v32 = vld [vmem:[%s1304_s0 + $0x1e0] sm:$0xff] }
  0x27   :  { %v76_v33 = vld [vmem:[%s1304_s0 + $0x1f0] sm:$0xff] }
  0x28   :  { %587 = vmatpush1.bf16.msra.mxu1 %v586_v61  ;;  %v43_v61 = vld [vmem:[%s1304_s0 + $0xe8] sm:$0xff] }
  0x29   :  { %635 = vmatpush1.bf16.msra.mxu0 %v634_v62  ;;  %588 = vmatprep.subr.bf16.mxu1 %v697_v0  ;;  %v45_v62 = vld [vmem:[%s1304_s0 + $0xf8] sm:$0xff] }
  0x2a   :  { %636 = vmatprep.subr.bf16.mxu0 %v697_v0 }
  0x2c   :  { %590 = vmatpush1.bf16.msra.mxu1 %v589_v4  ;;  %v46_v4 = vld [vmem:[%s1304_s0 + $0x100] sm:$0xff] }
  0x2d   :  { %638 = vmatpush1.bf16.msra.mxu0 %v637_v5  ;;  %591 = vmatprep.subr.bf16.mxu1 %v697_v0  ;;  %v48_v5 = vld [vmem:[%s1304_s0 + $0x110] sm:$0xff] }
  0x2e   :  { %639 = vmatprep.subr.bf16.mxu0 %v697_v0 }
  0x30   :  { %593 = vmatpush1.bf16.msra.mxu1 %v592_v10  ;;  %v55_v10 = vld [vmem:[%s1304_s0 + $0x148] sm:$0xff] }
  0x31   :  { %641 = vmatpush1.bf16.msra.mxu0 %v640_v11  ;;  %594 = vmatprep.subr.bf16.mxu1 %v697_v0  ;;  %v57_v11 = vld [vmem:[%s1304_s0 + $0x158] sm:$0xff] }
  0x32   :  { %642 = vmatprep.subr.bf16.mxu0 %v697_v0 }
  0x34   :  { %596 = vmatpush1.bf16.msra.mxu1 %v595_v16  ;;  %v58_v16 = vld [vmem:[%s1304_s0 + $0x160] sm:$0xff] }
  0x35   :  { %644 = vmatpush1.bf16.msra.mxu0 %v643_v17  ;;  %597 = vmatprep.subr.bf16.mxu1 %v697_v0  ;;  %v60_v17 = vld [vmem:[%s1304_s0 + $0x170] sm:$0xff] }
  0x36   :  { %645 = vmatprep.subr.bf16.mxu0 %v697_v0 }
  0x38   :  { %599 = vmatpush1.bf16.msra.mxu1 %v598_v22  ;;  %v67_v22 = vld [vmem:[%s1304_s0 + $0x1a8] sm:$0xff] }
  0x39   :  { %647 = vmatpush1.bf16.msra.mxu0 %v646_v23  ;;  %600 = vmatprep.subr.bf16.mxu1 %v697_v0  ;;  %v69_v23 = vld [vmem:[%s1304_s0 + $0x1b8] sm:$0xff] }
  0x3a   :  { %648 = vmatprep.subr.bf16.mxu0 %v697_v0 }
  0x3c   :  { %602 = vmatpush1.bf16.msra.mxu1 %v601_v28  ;;  %v70_v28 = vld [vmem:[%s1304_s0 + $0x1c0] sm:$0xff] }
  0x3d   :  { %650 = vmatpush1.bf16.msra.mxu0 %v649_v29  ;;  %603 = vmatprep.subr.bf16.mxu1 %v697_v0  ;;  %v72_v29 = vld [vmem:[%s1304_s0 + $0x1d0] sm:$0xff] }
  0x3e   :  { %651 = vmatprep.subr.bf16.mxu0 %v697_v0  ;;  %v18_v0 = vld [vmem:[%s1304_s0 + $0x20] sm:$0xff] }
  0x40   :  { %605 = vmatpush1.bf16.msra.mxu1 %v604_v34  ;;  %v79_v34 = vld [vmem:[%s1304_s0 + $0x208] sm:$0xff] }
  0x41   :  { %653 = vmatpush1.bf16.msra.mxu0 %v652_v35  ;;  %v81_v35 = vld [vmem:[%s1304_s0 + $0x218] sm:$0xff] }
  0x43   :  { %234 = vmatmul.mubr.f32.vlgmr.msra.gmra.mrb[0].mxu1 %v14_v36  ;;  %v78_v36 = vld [vmem:[%s1304_s0 + $0x200] sm:$0xff] }
  0x44   :  { %404 = vmatmul.mubr.f32.vlgmr.msra.gmra.mrb[0].mxu0 %v16_v37  ;;  %238 = vmatprep.mubr.f32.mxu1 %v19_v38  ;;  %v80_v37 = vld [vmem:[%s1304_s0 + $0x210] sm:$0xff]  ;;  %v83_v38 = vld [vmem:[%s1304_s0 + $0x228] sm:$0xff] }
  0x45   :  { %408 = vmatprep.mubr.f32.mxu0 %v21_v39  ;;  %v85_v39 = vld [vmem:[%s1304_s0 + $0x238] sm:$0xff] }
  0x47   :  { %239 = vmatmul.mubr.f32.gmra.mrb[2].mxu1 %v18_v0  ;;  %v82_v0 = vld [vmem:[%s1304_s0 + $0x220] sm:$0xff] }
  0x48   :  { %409 = vmatmul.mubr.f32.gmra.mrb[2].mxu0 %v20_v40  ;;  %243 = vmatprep.mubr.f32.mxu1 %v23_v41  ;;  %v84_v40 = vld [vmem:[%s1304_s0 + $0x230] sm:$0xff]  ;;  %v87_v41 = vld [vmem:[%s1304_s0 + $0x248] sm:$0xff] }
  0x49   :  { %413 = vmatprep.mubr.f32.mxu0 %v25_v42  ;;  %v89_v42 = vld [vmem:[%s1304_s0 + $0x258] sm:$0xff] }
  0x4b   :  { %244 = vmatmul.mubr.f32.gmra.mrb[4].mxu1 %v22_v43  ;;  %v86_v43 = vld [vmem:[%s1304_s0 + $0x240] sm:$0xff] }
  0x4c   :  { %414 = vmatmul.mubr.f32.gmra.mrb[4].mxu0 %v24_v44  ;;  %248 = vmatprep.mubr.f32.mxu1 %v27_v45  ;;  %v88_v44 = vld [vmem:[%s1304_s0 + $0x250] sm:$0xff]  ;;  %v91_v45 = vld [vmem:[%s1304_s0 + $0x268] sm:$0xff] }
  0x4d   :  { %418 = vmatprep.mubr.f32.mxu0 %v29_v46  ;;  %v93_v46 = vld [vmem:[%s1304_s0 + $0x278] sm:$0xff] }
  0x4f   :  { %249 = vmatmul.mubr.f32.gmra.mrb[6].mxu1 %v26_v47  ;;  %v90_v47 = vld [vmem:[%s1304_s0 + $0x260] sm:$0xff] }
  0x50   :  { %419 = vmatmul.mubr.f32.gmra.mrb[6].mxu0 %v28_v48  ;;  %253 = vmatprep.mubr.f32.mxu1 %v31_v49  ;;  %v92_v48 = vld [vmem:[%s1304_s0 + $0x270] sm:$0xff]  ;;  %v95_v49 = vld [vmem:[%s1304_s0 + $0x288] sm:$0x3] }
  0x51   :  { %423 = vmatprep.mubr.f32.mxu0 %v33_v50  ;;  %v97_v50 = vld [vmem:[%s1304_s0 + $0x298] sm:$0x3] }
  0x53   :  { %254 = vmatmul.mubr.f32.gmra.mrb[8].mxu1 %v30_v51  ;;  %v94_v51 = vld [vmem:[%s1304_s0 + $0x280] sm:$0x3] }
  0x54   :  { %424 = vmatmul.mubr.f32.gmra.mrb[8].mxu0 %v32_v52  ;;  %258 = vmatprep.mubr.f32.mxu1 %v35_v53  ;;  %v96_v52 = vld [vmem:[%s1304_s0 + $0x290] sm:$0x3]  ;;  %v1197_v53 = vld [vmem:[%s1305_s2] ss:$0 sm:$0xff] }
  0x55   :  { %428 = vmatprep.mubr.f32.mxu0 %v37_v54 }
  0x57   :  { %259 = vmatmul.mubr.f32.gmra.mrb[10].mxu1 %v34_v55 }
  0x58   :  { %429 = vmatmul.mubr.f32.gmra.mrb[10].mxu0 %v36_v56  ;;  %263 = vmatprep.mubr.f32.mxu1 %v39_v57 }
  0x59   :  { %433 = vmatprep.mubr.f32.mxu0 %v41_v58 }
  0x5b   :  { %264 = vmatmul.mubr.f32.gmra.mrb[12].mxu1 %v38_v59 }
  0x5c   :  { %434 = vmatmul.mubr.f32.gmra.mrb[12].mxu0 %v40_v60  ;;  %268 = vmatprep.mubr.f32.mxu1 %v43_v61 }
  0x5d   :  { %438 = vmatprep.mubr.f32.mxu0 %v45_v62 }
  0x5f   :  { %269 = vmatmul.mubr.f32.gmra.mrb[14].mxu1 %v42_v63 }
  0x60   :  { %439 = vmatmul.mubr.f32.gmra.mrb[14].mxu0 %v44_v1  ;;  %273 = vmatprep.mubr.f32.mxu1 %v47_v2 }
  0x61   :  { %443 = vmatprep.mubr.f32.mxu0 %v49_v3 }
  0x63   :  { %274 = vmatmul.mubr.f32.gmra.mrb[16].mxu1 %v46_v4 }
  0x64   :  { %444 = vmatmul.mubr.f32.gmra.mrb[16].mxu0 %v48_v5  ;;  %278 = vmatprep.mubr.f32.mxu1 %v51_v6 }
  0x65   :  { %448 = vmatprep.mubr.f32.mxu0 %v53_v7 }
  0x67   :  { %279 = vmatmul.mubr.f32.gmra.mrb[18].mxu1 %v50_v8 }
  0x68   :  { %449 = vmatmul.mubr.f32.gmra.mrb[18].mxu0 %v52_v9  ;;  %283 = vmatprep.mubr.f32.mxu1 %v55_v10 }
  0x69   :  { %453 = vmatprep.mubr.f32.mxu0 %v57_v11 }
  0x6b   :  { %284 = vmatmul.mubr.f32.gmra.mrb[20].mxu1 %v54_v12 }
  0x6c   :  { %454 = vmatmul.mubr.f32.gmra.mrb[20].mxu0 %v56_v13  ;;  %288 = vmatprep.mubr.f32.mxu1 %v59_v14 }
  0x6d   :  { %458 = vmatprep.mubr.f32.mxu0 %v61_v15 }
  0x6f   :  { %289 = vmatmul.mubr.f32.gmra.mrb[22].mxu1 %v58_v16 }
  0x70   :  { %459 = vmatmul.mubr.f32.gmra.mrb[22].mxu0 %v60_v17  ;;  %293 = vmatprep.mubr.f32.mxu1 %v63_v18 }
  0x71   :  { %463 = vmatprep.mubr.f32.mxu0 %v65_v19 }
  0x73   :  { %294 = vmatmul.mubr.f32.gmra.mrb[24].mxu1 %v62_v20 }
  0x74   :  { %464 = vmatmul.mubr.f32.gmra.mrb[24].mxu0 %v64_v21  ;;  %298 = vmatprep.mubr.f32.mxu1 %v67_v22 }
  0x75   :  { %468 = vmatprep.mubr.f32.mxu0 %v69_v23 }
  0x77   :  { %299 = vmatmul.mubr.f32.gmra.mrb[26].mxu1 %v66_v24 }
  0x78   :  { %469 = vmatmul.mubr.f32.gmra.mrb[26].mxu0 %v68_v25  ;;  %303 = vmatprep.mubr.f32.mxu1 %v71_v26 }
  0x79   :  { %473 = vmatprep.mubr.f32.mxu0 %v73_v27 }
  0x7b   :  { %304 = vmatmul.mubr.f32.gmra.mrb[28].mxu1 %v70_v28 }
  0x7c   :  { %474 = vmatmul.mubr.f32.gmra.mrb[28].mxu0 %v72_v29  ;;  %308 = vmatprep.mubr.f32.mxu1 %v75_v30 }
  0x7d   :  { %478 = vmatprep.mubr.f32.mxu0 %v77_v31 }
  0x7f   :  { %309 = vmatmul.mubr.f32.gmra.mrb[30].mxu1 %v74_v32 }
  0x80   :  { %479 = vmatmul.mubr.f32.gmra.mrb[30].mxu0 %v76_v33  ;;  %313 = vmatprep.mubr.f32.mxu1 %v79_v34 }
  0x81   :  { %483 = vmatprep.mubr.f32.mxu0 %v81_v35 }
  0x83   :  { %314 = vmatmul.mubr.f32.gmra.mrb[32].mxu1 %v78_v36 }
  0x84   :  { %484 = vmatmul.mubr.f32.gmra.mrb[32].mxu0 %v80_v37  ;;  %318 = vmatprep.mubr.f32.mxu1 %v83_v38 }
  0x85   :  { %488 = vmatprep.mubr.f32.mxu0 %v85_v39 }
  0x87   :  { %319 = vmatmul.mubr.f32.gmra.mrb[34].mxu1 %v82_v0 }
  0x88   :  { %489 = vmatmul.mubr.f32.gmra.mrb[34].mxu0 %v84_v40  ;;  %323 = vmatprep.mubr.f32.mxu1 %v87_v41 }
  0x89   :  { %493 = vmatprep.mubr.f32.mxu0 %v89_v42 }
  0x8b   :  { %324 = vmatmul.mubr.f32.gmra.mrb[36].mxu1 %v86_v43 }
  0x8c   :  { %494 = vmatmul.mubr.f32.gmra.mrb[36].mxu0 %v88_v44  ;;  %328 = vmatprep.mubr.f32.mxu1 %v91_v45 }
  0x8d   :  { %498 = vmatprep.mubr.f32.mxu0 %v93_v46 }
  0x8f   :  { %329 = vmatmul.mubr.f32.gmra.mrb[38].mxu1 %v90_v47 }
  0x90   :  { %499 = vmatmul.mubr.f32.gmra.mrb[38].mxu0 %v92_v48  ;;  %333 = vmatprep.mubr.f32.mxu1 %v95_v49 }
  0x91   :  { %503 = vmatprep.mubr.f32.mxu0 %v97_v50 }
  0x93   :  { %334 = vmatmul.mubr.f32.gmra.mrb[40].mxu1 %v94_v51 }
  0x94   :  { %504 = vmatmul.mubr.f32.gmra.mrb[40].mxu0 %v96_v52 }
 0x116   :  { %v235_v54 = vpop.f32.mrb[0].mxu1 }
 0x117   :  { %v236_v55 = vadd.f32 %v1197_v53, %v235_v54  ;;  %v237_v56 = vpop.f32.mrb[1].mxu1  ;;  %v405_v57 = vpop.f32.mrb[0].mxu0 }
 0x118   :  { %v407_v58 = vpop.f32.mrb[1].mxu0 }
 0x119   :  { %v406_v59 = vadd.f32 %v405_v57, %v236_v55 }
 0x11a   :  { %v240_v60 = vpop.f32.mrb[2].mxu1 }
 0x11b   :  { %v509_v61 = vmax.f32 %v406_v59, 0.0  ;;  %v241_v62 = vadd.f32 %v1197_v53, %v240_v60  ;;  %v242_v63 = vpop.f32.mrb[3].mxu1  ;;  %v410_v1 = vpop.f32.mrb[2].mxu0 }
 0x11c   :  { %v412_v2 = vpop.f32.mrb[3].mxu0 }
 0x11d   :  { %531 = vst.msk [vmem:[%s1306_s3] sm:$0xff] %vm530_vm0, %v509_v61  ;;  %v411_v3 = vadd.f32 %v410_v1, %v241_v62 }
 0x11e   :  { %v245_v4 = vpop.f32.mrb[4].mxu1 }
 0x11f   :  { %v510_v5 = vmax.f32 %v411_v3, 0.0  ;;  %v246_v6 = vadd.f32 %v1197_v53, %v245_v4  ;;  %v247_v7 = vpop.f32.mrb[5].mxu1  ;;  %v415_v8 = vpop.f32.mrb[4].mxu0 }
 0x120   :  { %v417_v9 = vpop.f32.mrb[5].mxu0 }
 0x121   :  { %532 = vst.msk [vmem:[%s1306_s3 + $0x8] sm:$0xff] %vm530_vm0, %v510_v5  ;;  %v416_v10 = vadd.f32 %v415_v8, %v246_v6 }
 0x122   :  { %v250_v11 = vpop.f32.mrb[6].mxu1 }
 0x123   :  { %v511_v12 = vmax.f32 %v416_v10, 0.0  ;;  %v251_v13 = vadd.f32 %v1197_v53, %v250_v11  ;;  %v252_v14 = vpop.f32.mrb[7].mxu1  ;;  %v420_v15 = vpop.f32.mrb[6].mxu0 }
 0x124   :  { %v422_v16 = vpop.f32.mrb[7].mxu0 }
 0x125   :  { %533 = vst.msk [vmem:[%s1306_s3 + $0x10] sm:$0xff] %vm530_vm0, %v511_v12  ;;  %v421_v17 = vadd.f32 %v420_v15, %v251_v13 }
 0x126   :  { %v255_v18 = vpop.f32.mrb[8].mxu1 }
 0x127   :  { %v512_v19 = vmax.f32 %v421_v17, 0.0  ;;  %v256_v20 = vadd.f32 %v1197_v53, %v255_v18  ;;  %v257_v21 = vpop.f32.mrb[9].mxu1  ;;  %v425_v22 = vpop.f32.mrb[8].mxu0 }
 0x128   :  { %v427_v23 = vpop.f32.mrb[9].mxu0 }
 0x129   :  { %534 = vst.msk [vmem:[%s1306_s3 + $0x18] sm:$0xff] %vm530_vm0, %v512_v19  ;;  %v426_v24 = vadd.f32 %v425_v22, %v256_v20 }
 0x12a   :  { %v260_v25 = vpop.f32.mrb[10].mxu1 }
 0x12b   :  { %v513_v26 = vmax.f32 %v426_v24, 0.0  ;;  %v261_v27 = vadd.f32 %v1197_v53, %v260_v25  ;;  %v262_v28 = vpop.f32.mrb[11].mxu1  ;;  %v430_v29 = vpop.f32.mrb[10].mxu0 }
 0x12c   :  { %v432_v30 = vpop.f32.mrb[11].mxu0 }
 0x12d   :  { %535 = vst.msk [vmem:[%s1306_s3 + $0x20] sm:$0xff] %vm530_vm0, %v513_v26  ;;  %v431_v31 = vadd.f32 %v430_v29, %v261_v27 }
 0x12e   :  { %v265_v32 = vpop.f32.mrb[12].mxu1 }
 0x12f   :  { %v514_v33 = vmax.f32 %v431_v31, 0.0  ;;  %v266_v34 = vadd.f32 %v1197_v53, %v265_v32  ;;  %v267_v35 = vpop.f32.mrb[13].mxu1  ;;  %v435_v36 = vpop.f32.mrb[12].mxu0 }
 0x130   :  { %v437_v37 = vpop.f32.mrb[13].mxu0 }
 0x131   :  { %536 = vst.msk [vmem:[%s1306_s3 + $0x28] sm:$0xff] %vm530_vm0, %v514_v33  ;;  %v436_v38 = vadd.f32 %v435_v36, %v266_v34 }
 0x132   :  { %v270_v39 = vpop.f32.mrb[14].mxu1 }
 0x133   :  { %v515_v0 = vmax.f32 %v436_v38, 0.0  ;;  %v271_v40 = vadd.f32 %v1197_v53, %v270_v39  ;;  %v272_v41 = vpop.f32.mrb[15].mxu1  ;;  %v440_v42 = vpop.f32.mrb[14].mxu0 }
 0x134   :  { %v442_v43 = vpop.f32.mrb[15].mxu0 }
 0x135   :  { %537 = vst.msk [vmem:[%s1306_s3 + $0x30] sm:$0xff] %vm530_vm0, %v515_v0  ;;  %v441_v44 = vadd.f32 %v440_v42, %v271_v40 }
 0x136   :  { %v275_v45 = vpop.f32.mrb[16].mxu1 }
 0x137   :  { %v516_v46 = vmax.f32 %v441_v44, 0.0  ;;  %v276_v47 = vadd.f32 %v1197_v53, %v275_v45  ;;  %v277_v48 = vpop.f32.mrb[17].mxu1  ;;  %v445_v49 = vpop.f32.mrb[16].mxu0 }
 0x138   :  { %v447_v50 = vpop.f32.mrb[17].mxu0 }
 0x139   :  { %538 = vst.msk [vmem:[%s1306_s3 + $0x38] sm:$0xff] %vm530_vm0, %v516_v46  ;;  %v446_v51 = vadd.f32 %v445_v49, %v276_v47 }
 0x13a   :  { %v280_v52 = vpop.f32.mrb[18].mxu1 }
 0x13b   :  { %v517_v54 = vmax.f32 %v446_v51, 0.0  ;;  %v281_v55 = vadd.f32 %v1197_v53, %v280_v52  ;;  %v282_v56 = vpop.f32.mrb[19].mxu1  ;;  %v450_v57 = vpop.f32.mrb[18].mxu0 }
 0x13c   :  { %v452_v58 = vpop.f32.mrb[19].mxu0 }
 0x13d   :  { %539 = vst.msk [vmem:[%s1306_s3 + $0x40] sm:$0xff] %vm530_vm0, %v517_v54  ;;  %v451_v59 = vadd.f32 %v450_v57, %v281_v55 }
 0x13e   :  { %v285_v60 = vpop.f32.mrb[20].mxu1 }
 0x13f   :  { %v518_v61 = vmax.f32 %v451_v59, 0.0  ;;  %v286_v62 = vadd.f32 %v1197_v53, %v285_v60  ;;  %v287_v63 = vpop.f32.mrb[21].mxu1  ;;  %v455_v1 = vpop.f32.mrb[20].mxu0 }
 0x140   :  { %v457_v2 = vpop.f32.mrb[21].mxu0 }
 0x141   :  { %540 = vst.msk [vmem:[%s1306_s3 + $0x48] sm:$0xff] %vm530_vm0, %v518_v61  ;;  %v456_v3 = vadd.f32 %v455_v1, %v286_v62 }
 0x142   :  { %v290_v4 = vpop.f32.mrb[22].mxu1 }
 0x143   :  { %v519_v5 = vmax.f32 %v456_v3, 0.0  ;;  %v291_v6 = vadd.f32 %v1197_v53, %v290_v4  ;;  %v292_v7 = vpop.f32.mrb[23].mxu1  ;;  %v460_v8 = vpop.f32.mrb[22].mxu0 }
 0x144   :  { %v462_v9 = vpop.f32.mrb[23].mxu0 }
 0x145   :  { %541 = vst.msk [vmem:[%s1306_s3 + $0x50] sm:$0xff] %vm530_vm0, %v519_v5  ;;  %v461_v10 = vadd.f32 %v460_v8, %v291_v6 }
 0x146   :  { %v295_v11 = vpop.f32.mrb[24].mxu1 }
 0x147   :  { %v520_v12 = vmax.f32 %v461_v10, 0.0  ;;  %v296_v13 = vadd.f32 %v1197_v53, %v295_v11  ;;  %v297_v14 = vpop.f32.mrb[25].mxu1  ;;  %v465_v15 = vpop.f32.mrb[24].mxu0 }
 0x148   :  { %v467_v16 = vpop.f32.mrb[25].mxu0 }
 0x149   :  { %542 = vst.msk [vmem:[%s1306_s3 + $0x58] sm:$0xff] %vm530_vm0, %v520_v12  ;;  %v466_v17 = vadd.f32 %v465_v15, %v296_v13 }
 0x14a   :  { %v300_v18 = vpop.f32.mrb[26].mxu1 }
 0x14b   :  { %v521_v19 = vmax.f32 %v466_v17, 0.0  ;;  %v301_v20 = vadd.f32 %v1197_v53, %v300_v18  ;;  %v302_v21 = vpop.f32.mrb[27].mxu1  ;;  %v470_v22 = vpop.f32.mrb[26].mxu0 }
 0x14c   :  { %v472_v23 = vpop.f32.mrb[27].mxu0 }
 0x14d   :  { %543 = vst.msk [vmem:[%s1306_s3 + $0x60] sm:$0xff] %vm530_vm0, %v521_v19  ;;  %v471_v24 = vadd.f32 %v470_v22, %v301_v20 }
 0x14e   :  { %v305_v25 = vpop.f32.mrb[28].mxu1 }
 0x14f   :  { %v522_v26 = vmax.f32 %v471_v24, 0.0  ;;  %v306_v27 = vadd.f32 %v1197_v53, %v305_v25  ;;  %v307_v28 = vpop.f32.mrb[29].mxu1  ;;  %v475_v29 = vpop.f32.mrb[28].mxu0 }
 0x150   :  { %v477_v30 = vpop.f32.mrb[29].mxu0 }
 0x151   :  { %544 = vst.msk [vmem:[%s1306_s3 + $0x68] sm:$0xff] %vm530_vm0, %v522_v26  ;;  %v476_v31 = vadd.f32 %v475_v29, %v306_v27 }
 0x152   :  { %v310_v32 = vpop.f32.mrb[30].mxu1 }
 0x153   :  { %v523_v33 = vmax.f32 %v476_v31, 0.0  ;;  %v311_v34 = vadd.f32 %v1197_v53, %v310_v32  ;;  %v312_v35 = vpop.f32.mrb[31].mxu1  ;;  %v480_v36 = vpop.f32.mrb[30].mxu0 }
 0x154   :  { %v482_v37 = vpop.f32.mrb[31].mxu0 }
 0x155   :  { %545 = vst.msk [vmem:[%s1306_s3 + $0x70] sm:$0xff] %vm530_vm0, %v523_v33  ;;  %v481_v38 = vadd.f32 %v480_v36, %v311_v34 }
 0x156   :  { %v315_v39 = vpop.f32.mrb[32].mxu1 }
 0x157   :  { %v524_v0 = vmax.f32 %v481_v38, 0.0  ;;  %v316_v40 = vadd.f32 %v1197_v53, %v315_v39  ;;  %v317_v41 = vpop.f32.mrb[33].mxu1  ;;  %v485_v42 = vpop.f32.mrb[32].mxu0 }
 0x158   :  { %v487_v43 = vpop.f32.mrb[33].mxu0 }
 0x159   :  { %546 = vst.msk [vmem:[%s1306_s3 + $0x78] sm:$0xff] %vm530_vm0, %v524_v0  ;;  %v486_v44 = vadd.f32 %v485_v42, %v316_v40 }
 0x15a   :  { %v320_v45 = vpop.f32.mrb[34].mxu1 }
 0x15b   :  { %v525_v46 = vmax.f32 %v486_v44, 0.0  ;;  %v321_v47 = vadd.f32 %v1197_v53, %v320_v45  ;;  %v322_v48 = vpop.f32.mrb[35].mxu1  ;;  %v490_v49 = vpop.f32.mrb[34].mxu0 }
 0x15c   :  { %v492_v50 = vpop.f32.mrb[35].mxu0 }
 0x15d   :  { %547 = vst.msk [vmem:[%s1306_s3 + $0x80] sm:$0xff] %vm530_vm0, %v525_v46  ;;  %v491_v51 = vadd.f32 %v490_v49, %v321_v47 }
 0x15e   :  { %v325_v52 = vpop.f32.mrb[36].mxu1 }
 0x15f   :  { %v526_v54 = vmax.f32 %v491_v51, 0.0  ;;  %v326_v55 = vadd.f32 %v1197_v53, %v325_v52  ;;  %v327_v56 = vpop.f32.mrb[37].mxu1  ;;  %v495_v57 = vpop.f32.mrb[36].mxu0 }
 0x160   :  { %v497_v58 = vpop.f32.mrb[37].mxu0 }
 0x161   :  { %548 = vst.msk [vmem:[%s1306_s3 + $0x88] sm:$0xff] %vm530_vm0, %v526_v54  ;;  %v496_v59 = vadd.f32 %v495_v57, %v326_v55 }
 0x162   :  { %v330_v60 = vpop.f32.mrb[38].mxu1 }
 0x163   :  { %v527_v61 = vmax.f32 %v496_v59, 0.0  ;;  %v331_v62 = vadd.f32 %v1197_v53, %v330_v60  ;;  %v332_v63 = vpop.f32.mrb[39].mxu1  ;;  %v500_v1 = vpop.f32.mrb[38].mxu0 }
 0x164   :  { %v502_v2 = vpop.f32.mrb[39].mxu0 }
 0x165   :  { %549 = vst.msk [vmem:[%s1306_s3 + $0x90] sm:$0xff] %vm530_vm0, %v527_v61  ;;  %v501_v3 = vadd.f32 %v500_v1, %v331_v62 }
 0x166   :  { %v335_v4 = vpop.f32.mrb[40].mxu1 }
 0x167   :  { %v528_v5 = vmax.f32 %v501_v3, 0.0  ;;  %v336_v6 = vadd.f32 %v1197_v53, %v335_v4  ;;  %v337_v7 = vpop.f32.mrb[41].mxu1  ;;  %v505_v8 = vpop.f32.mrb[40].mxu0 }
 0x168   :  { %v507_v9 = vpop.f32.mrb[41].mxu0 }
 0x169   :  { %550 = vst.msk [vmem:[%s1306_s3 + $0x98] sm:$0xff] %vm530_vm0, %v528_v5  ;;  %v506_v10 = vadd.f32 %v505_v8, %v336_v6 }
 0x16b   :  { %v529_v11 = vmax.f32 %v506_v10, 0.0 }
 0x16d   :  { %552 = vst.msk [vmem:[%s1306_s3 + $0xa0] sm:$0x3] %vm551_vm1, %v529_v11 }

// kernel: namco_boi_forward.7
= control target key start
LH: loop header
LB: loop body
LE: loop exit
PB: predicated region body
PF: predicated region fallthrough
CT: control target
= control target key end

     0   :  { %vm939_vm0 = vmmov 0   ;;  %vm158_vm1 = vcmask 523264   ;;  %vm613_vm2 = vcmask 517120   ;;  %s1488_s1 = inlined_call_operand.vmem [shape: f32[576,64], index: 1, kind: input, shape index: {}]   ;;  %s1489_s0 = inlined_call_operand.vmem [shape: f32[98,576], index: 0, kind: input, shape index: {}]   ;;  %s1490_s2 = inlined_call_operand.vmem [shape: f32[1,64], index: 2, kind: input, shape index: {}]   ;;  %s1491_s3 = inlined_call_operand.vmem [shape: f32[98,64], index: 3, kind: output, shape index: {}]  }
   0x1   :  { %v95_v0 = vld [vmem:[%s1488_s1 + $0x80] sm:$0xff]  ;;  %v96_v1 = vld [vmem:[%s1488_s1 + $0x88] sm:$0xff]  ;;  %v97_v11 = vld [vmem:[%s1488_s1 + $0x90] sm:$0xff] }
   0x2   :  { %v127_v2 = vld [vmem:[%s1488_s1 + $0x180] sm:$0xff]  ;;  %v851_v3 = vpack.c.bf16 %v96_v1, %v95_v0  ;;  %v128_v4 = vld [vmem:[%s1488_s1 + $0x188] sm:$0xff]  ;;  %v98_v13 = vld [vmem:[%s1488_s1 + $0x98] sm:$0xff] }
   0x3   :  { %v79_v5 = vld [vmem:[%s1488_s1] sm:$0xff]  ;;  %v80_v6 = vld [vmem:[%s1488_s1 + $0x8] sm:$0xff]  ;;  %v883_v7 = vpack.c.bf16 %v128_v4, %v127_v2  ;;  %v129_v14 = vld [vmem:[%s1488_s1 + $0x190] sm:$0xff]  ;;  %v855_v16 = vpack.c.bf16 %v98_v13, %v97_v11 }
   0x4   :  { %v853_v8 = vpack.c.bf16 %v80_v6, %v79_v5  ;;  %v111_v9 = vld [vmem:[%s1488_s1 + $0x100] sm:$0xff]  ;;  %v112_v10 = vld [vmem:[%s1488_s1 + $0x108] sm:$0xff]  ;;  %852 = vmatprep.subr.bf16.mxu0 %v851_v3  ;;  %v130_v15 = vld [vmem:[%s1488_s1 + $0x198] sm:$0xff] }
   0x5   :  { %v885_v12 = vpack.c.bf16 %v112_v10, %v111_v9  ;;  %884 = vmatprep.subr.bf16.mxu1 %v883_v7  ;;  %v887_v17 = vpack.c.bf16 %v130_v15, %v129_v14  ;;  %v81_v18 = vld [vmem:[%s1488_s1 + $0x10] sm:$0xff]  ;;  %v82_v19 = vld [vmem:[%s1488_s1 + $0x18] sm:$0xff]  ;;  %v99_v23 = vld [vmem:[%s1488_s1 + $0xa0] sm:$0xff] }
   0x6   :  { %854 = vmatpush3.bf16.msra.mxu0 %v853_v8  ;;  %v113_v20 = vld [vmem:[%s1488_s1 + $0x110] sm:$0xff]  ;;  %v857_v21 = vpack.c.bf16 %v82_v19, %v81_v18  ;;  %v114_v22 = vld [vmem:[%s1488_s1 + $0x118] sm:$0xff]  ;;  %v100_v24 = vld [vmem:[%s1488_s1 + $0xa8] sm:$0xff] }
   0x7   :  { %886 = vmatpush3.bf16.msra.mxu1 %v885_v12  ;;  %856 = vmatprep.subr.bf16.mxu0 %v855_v16  ;;  %v889_v25 = vpack.c.bf16 %v114_v22, %v113_v20  ;;  %v859_v26 = vpack.c.bf16 %v100_v24, %v99_v23  ;;  %v131_v27 = vld [vmem:[%s1488_s1 + $0x1a0] sm:$0xff]  ;;  %v132_v28 = vld [vmem:[%s1488_s1 + $0x1a8] sm:$0xff]  ;;  %v101_v35 = vld [vmem:[%s1488_s1 + $0xb0] sm:$0xff] }
   0x8   :  { %888 = vmatprep.subr.bf16.mxu1 %v887_v17  ;;  %v83_v29 = vld [vmem:[%s1488_s1 + $0x20] sm:$0xff]  ;;  %v891_v30 = vpack.c.bf16 %v132_v28, %v131_v27  ;;  %v84_v31 = vld [vmem:[%s1488_s1 + $0x28] sm:$0xff]  ;;  %v102_v36 = vld [vmem:[%s1488_s1 + $0xb8] sm:$0xff] }
   0x9   :  { %v115_v32 = vld [vmem:[%s1488_s1 + $0x120] sm:$0xff]  ;;  %v116_v33 = vld [vmem:[%s1488_s1 + $0x128] sm:$0xff]  ;;  %v861_v34 = vpack.c.bf16 %v84_v31, %v83_v29  ;;  %v133_v37 = vld [vmem:[%s1488_s1 + $0x1b0] sm:$0xff]  ;;  %v863_v39 = vpack.c.bf16 %v102_v36, %v101_v35 }
   0xa   :  { %858 = vmatpush3.bf16.msra.mxu0 %v857_v21  ;;  %v893_v38 = vpack.c.bf16 %v116_v33, %v115_v32  ;;  %v134_v40 = vld [vmem:[%s1488_s1 + $0x1b8] sm:$0xff]  ;;  %v85_v41 = vld [vmem:[%s1488_s1 + $0x30] sm:$0xff]  ;;  %v103_v46 = vld [vmem:[%s1488_s1 + $0xc0] sm:$0xff] }
   0xb   :  { %890 = vmatpush3.bf16.msra.mxu1 %v889_v25  ;;  %860 = vmatprep.subr.bf16.mxu0 %v859_v26  ;;  %v86_v42 = vld [vmem:[%s1488_s1 + $0x38] sm:$0xff]  ;;  %v895_v43 = vpack.c.bf16 %v134_v40, %v133_v37  ;;  %v117_v44 = vld [vmem:[%s1488_s1 + $0x130] sm:$0xff]  ;;  %v104_v47 = vld [vmem:[%s1488_s1 + $0xc8] sm:$0xff] }
   0xc   :  { %892 = vmatprep.subr.bf16.mxu1 %v891_v30  ;;  %v118_v45 = vld [vmem:[%s1488_s1 + $0x138] sm:$0xff]  ;;  %v135_v48 = vld [vmem:[%s1488_s1 + $0x1c0] sm:$0xff]  ;;  %v136_v49 = vld [vmem:[%s1488_s1 + $0x1c8] sm:$0xff]  ;;  %v865_v50 = vpack.c.bf16 %v86_v42, %v85_v41  ;;  %v867_v52 = vpack.c.bf16 %v104_v47, %v103_v46 }
   0xd   :  { %v897_v51 = vpack.c.bf16 %v118_v45, %v117_v44  ;;  %v87_v53 = vld [vmem:[%s1488_s1 + $0x40] sm:$0xff]  ;;  %v88_v54 = vld [vmem:[%s1488_s1 + $0x48] sm:$0xff]  ;;  %v899_v56 = vpack.c.bf16 %v136_v49, %v135_v48  ;;  %v105_v58 = vld [vmem:[%s1488_s1 + $0xd0] sm:$0xff] }
   0xe   :  { %862 = vmatpush3.bf16.msra.mxu0 %v861_v34  ;;  %v119_v55 = vld [vmem:[%s1488_s1 + $0x140] sm:$0xff]  ;;  %v120_v57 = vld [vmem:[%s1488_s1 + $0x148] sm:$0xff]  ;;  %v106_v59 = vld [vmem:[%s1488_s1 + $0xd8] sm:$0xff]  ;;  %v869_v62 = vpack.c.bf16 %v88_v54, %v87_v53 }
   0xf   :  { %894 = vmatpush3.bf16.msra.mxu1 %v893_v38  ;;  %864 = vmatprep.subr.bf16.mxu0 %v863_v39  ;;  %v137_v60 = vld [vmem:[%s1488_s1 + $0x1d0] sm:$0xff]  ;;  %v138_v61 = vld [vmem:[%s1488_s1 + $0x1d8] sm:$0xff]  ;;  %v901_v63 = vpack.c.bf16 %v120_v57, %v119_v55  ;;  %v871_v0 = vpack.c.bf16 %v106_v59, %v105_v58  ;;  %v107_v6 = vld [vmem:[%s1488_s1 + $0xe0] sm:$0xff]  ;;  %v938_v39 = vmov 0.0|0.0  }
  0x10   :  { %896 = vmatprep.subr.bf16.mxu1 %v895_v43  ;;  %v89_v1 = vld [vmem:[%s1488_s1 + $0x50] sm:$0xff]  ;;  %v90_v2 = vld [vmem:[%s1488_s1 + $0x58] sm:$0xff]  ;;  %v903_v4 = vpack.c.bf16 %v138_v61, %v137_v60  ;;  %v108_v7 = vld [vmem:[%s1488_s1 + $0xe8] sm:$0xff] }
  0x11   :  { %v121_v3 = vld [vmem:[%s1488_s1 + $0x150] sm:$0xff]  ;;  %v122_v5 = vld [vmem:[%s1488_s1 + $0x158] sm:$0xff]  ;;  %v139_v8 = vld [vmem:[%s1488_s1 + $0x1e0] sm:$0xff]  ;;  %v873_v10 = vpack.c.bf16 %v90_v2, %v89_v1  ;;  %v875_v14 = vpack.c.bf16 %v108_v7, %v107_v6 }
  0x12   :  { %866 = vmatpush3.bf16.msra.mxu0 %v865_v50  ;;  %v140_v9 = vld [vmem:[%s1488_s1 + $0x1e8] sm:$0xff]  ;;  %v91_v11 = vld [vmem:[%s1488_s1 + $0x60] sm:$0xff]  ;;  %v905_v13 = vpack.c.bf16 %v122_v5, %v121_v3  ;;  %v17_v17 = vld [vmem:[%s1489_s0 + $0x18] sm:$0xff] }
  0x13   :  { %898 = vmatpush3.bf16.msra.mxu1 %v897_v51  ;;  %868 = vmatprep.subr.bf16.mxu0 %v867_v52  ;;  %v92_v12 = vld [vmem:[%s1488_s1 + $0x68] sm:$0xff]  ;;  %v123_v15 = vld [vmem:[%s1488_s1 + $0x160] sm:$0xff]  ;;  %v907_v18 = vpack.c.bf16 %v140_v9, %v139_v8  ;;  %v109_v20 = vld [vmem:[%s1488_s1 + $0xf0] sm:$0xff] }
  0x14   :  { %900 = vmatprep.subr.bf16.mxu1 %v899_v56  ;;  %v15_v16 = vld [vmem:[%s1489_s0 + $0x8] sm:$0xff]  ;;  %v110_v21 = vld [vmem:[%s1488_s1 + $0xf8] sm:$0xff]  ;;  %v141_v22 = vld [vmem:[%s1488_s1 + $0x1f0] sm:$0xff]  ;;  %392 = vmatprep.mubr.f32.mxu1 %v17_v17  ;;  %v877_v24 = vpack.c.bf16 %v92_v12, %v91_v11 }
  0x15   :  { %v124_v19 = vld [vmem:[%s1488_s1 + $0x168] sm:$0xff]  ;;  %262 = vmatprep.mubr.f32.mxu0 %v15_v16  ;;  %v142_v23 = vld [vmem:[%s1488_s1 + $0x1f8] sm:$0xff]  ;;  %v879_v26 = vpack.c.bf16 %v110_v21, %v109_v20  ;;  %v93_v27 = vld [vmem:[%s1488_s1 + $0x70] sm:$0xff] }
  0x16   :  { %870 = vmatpush3.bf16.msra.mxu0 %v869_v62  ;;  %v909_v25 = vpack.c.bf16 %v124_v19, %v123_v15  ;;  %v94_v28 = vld [vmem:[%s1488_s1 + $0x78] sm:$0xff]  ;;  %v911_v29 = vpack.c.bf16 %v142_v23, %v141_v22  ;;  %v125_v30 = vld [vmem:[%s1488_s1 + $0x170] sm:$0xff]  ;;  %v143_v34 = vld [vmem:[%s1488_s1 + $0x200] sm:$0xff] }
  0x17   :  { %902 = vmatpush3.bf16.msra.mxu1 %v901_v63  ;;  %872 = vmatprep.subr.bf16.mxu0 %v871_v0  ;;  %v126_v31 = vld [vmem:[%s1488_s1 + $0x178] sm:$0xff]  ;;  %v881_v32 = vpack.c.bf16 %v94_v28, %v93_v27  ;;  %v144_v35 = vld [vmem:[%s1488_s1 + $0x208] sm:$0xff]  ;;  %v14_v36 = vld [vmem:[%s1489_s0] sm:$0xff] }
  0x18   :  { %904 = vmatprep.subr.bf16.mxu1 %v903_v4  ;;  %v913_v33 = vpack.c.bf16 %v126_v31, %v125_v30  ;;  %v916_v37 = vpack.c.bf16 %v144_v35, %v143_v34  ;;  %v16_v38 = vld [vmem:[%s1489_s0 + $0x10] sm:$0xff]  ;;  %v22_v41 = vld [vmem:[%s1489_s0 + $0x40] sm:$0xff]  ;;  %v146_v43 = vld [vmem:[%s1488_s1 + $0x218] sm:$0xff] }
  0x19   :  { %v20_v40 = vld [vmem:[%s1489_s0 + $0x30] sm:$0xff]  ;;  %v19_v44 = vld [vmem:[%s1489_s0 + $0x28] sm:$0xff]  ;;  %v21_v45 = vld [vmem:[%s1489_s0 + $0x38] sm:$0xff] }
  0x1a   :  { %874 = vmatpush3.bf16.msra.mxu0 %v873_v10  ;;  %v145_v42 = vld [vmem:[%s1488_s1 + $0x210] sm:$0xff]  ;;  %v25_v46 = vld [vmem:[%s1489_s0 + $0x58] sm:$0xff]  ;;  %v27_v48 = vld [vmem:[%s1489_s0 + $0x68] sm:$0xff] }
  0x1b   :  { %906 = vmatpush3.bf16.msra.mxu1 %v905_v13  ;;  %876 = vmatprep.subr.bf16.mxu0 %v875_v14  ;;  %v919_v47 = vpack.c.bf16 %v146_v43, %v145_v42  ;;  %v147_v49 = vld [vmem:[%s1488_s1 + $0x220] sm:$0xff]  ;;  %v148_v50 = vld [vmem:[%s1488_s1 + $0x228] sm:$0xff]  ;;  %v24_v51 = vld [vmem:[%s1489_s0 + $0x50] sm:$0xff] }
  0x1c   :  { %908 = vmatprep.subr.bf16.mxu1 %v907_v18  ;;  %v26_v52 = vld [vmem:[%s1489_s0 + $0x60] sm:$0xff]  ;;  %v922_v54 = vpack.c.bf16 %v148_v50, %v147_v49  ;;  %v32_v55 = vld [vmem:[%s1489_s0 + $0x90] sm:$0xff]  ;;  %v150_v57 = vld [vmem:[%s1488_s1 + $0x238] sm:$0xff] }
  0x1d   :  { %v30_v53 = vld [vmem:[%s1489_s0 + $0x80] sm:$0xff]  ;;  %v149_v56 = vld [vmem:[%s1488_s1 + $0x230] sm:$0xff]  ;;  %v29_v58 = vld [vmem:[%s1489_s0 + $0x78] sm:$0xff] }
  0x1e   :  { %878 = vmatpush3.bf16.msra.mxu0 %v877_v24  ;;  %v31_v59 = vld [vmem:[%s1489_s0 + $0x88] sm:$0xff]  ;;  %v925_v61 = vpack.c.bf16 %v150_v57, %v149_v56  ;;  %v37_v62 = vld [vmem:[%s1489_s0 + $0xb8] sm:$0xff]  ;;  %v34_v63 = vld [vmem:[%s1489_s0 + $0xa0] sm:$0xff] }
  0x1f   :  { %910 = vmatpush3.bf16.msra.mxu1 %v909_v25  ;;  %880 = vmatprep.subr.bf16.mxu0 %v879_v26  ;;  %v35_v60 = vld [vmem:[%s1489_s0 + $0xa8] sm:$0xff]  ;;  %v36_v0 = vld [vmem:[%s1489_s0 + $0xb0] sm:$0xff]  ;;  %v42_v2 = vld [vmem:[%s1489_s0 + $0xe0] sm:$0xff] }
  0x20   :  { %912 = vmatprep.subr.bf16.mxu1 %v911_v29  ;;  %v40_v1 = vld [vmem:[%s1489_s0 + $0xd0] sm:$0xff]  ;;  %v39_v3 = vld [vmem:[%s1489_s0 + $0xc8] sm:$0xff]  ;;  %v41_v4 = vld [vmem:[%s1489_s0 + $0xd8] sm:$0xff] }
  0x21   :  { %v45_v5 = vld [vmem:[%s1489_s0 + $0xf8] sm:$0xff]  ;;  %v47_v6 = vld [vmem:[%s1489_s0 + $0x108] sm:$0xff]  ;;  %v44_v7 = vld [vmem:[%s1489_s0 + $0xf0] sm:$0xff] }
  0x22   :  { %882 = vmatpush3.bf16.msra.mxu0 %v881_v32  ;;  %v46_v8 = vld [vmem:[%s1489_s0 + $0x100] sm:$0xff]  ;;  %v52_v10 = vld [vmem:[%s1489_s0 + $0x130] sm:$0xff]  ;;  %v49_v11 = vld [vmem:[%s1489_s0 + $0x118] sm:$0xff] }
  0x23   :  { %914 = vmatpush3.bf16.msra.mxu1 %v913_v33  ;;  %915 = vmatprep.subr.bf16.mxu0 %v938_v39  ;;  %v50_v9 = vld [vmem:[%s1489_s0 + $0x120] sm:$0xff]  ;;  %v51_v12 = vld [vmem:[%s1489_s0 + $0x128] sm:$0xff]  ;;  %v57_v14 = vld [vmem:[%s1489_s0 + $0x158] sm:$0xff]  ;;  %v940_v33 = vmov 0.0  }
  0x24   :  { %927 = vmatprep.subr.bf16.mxu1 %v938_v39  ;;  %v55_v13 = vld [vmem:[%s1489_s0 + $0x148] sm:$0xff]  ;;  %v54_v15 = vld [vmem:[%s1489_s0 + $0x140] sm:$0xff]  ;;  %v56_v16 = vld [vmem:[%s1489_s0 + $0x150] sm:$0xff] }
  0x25   :  { %263 = vmatmul.mubr.f32.vlgmr.msra.gmra.mrb[0].mxu0 %v14_v36  ;;  %v60_v17 = vld [vmem:[%s1489_s0 + $0x170] sm:$0xff]  ;;  %v62_v18 = vld [vmem:[%s1489_s0 + $0x180] sm:$0xff]  ;;  %v59_v19 = vld [vmem:[%s1489_s0 + $0x168] sm:$0xff] }
  0x26   :  { %393 = vmatmul.mubr.f32.vlgmr.msra.gmra.mrb[0].mxu1 %v16_v38  ;;  %917 = vmatpush3.bf16.msra.mxu0 %v916_v37  ;;  %v61_v20 = vld [vmem:[%s1489_s0 + $0x178] sm:$0xff]  ;;  %v67_v22 = vld [vmem:[%s1489_s0 + $0x1a8] sm:$0xff]  ;;  %v64_v23 = vld [vmem:[%s1489_s0 + $0x190] sm:$0xff] }
  0x27   :  { %267 = vmatprep.mubr.f32.mxu0 %v20_v40  ;;  %397 = vmatprep.mubr.f32.mxu1 %v22_v41  ;;  %v65_v21 = vld [vmem:[%s1489_s0 + $0x198] sm:$0xff]  ;;  %v66_v24 = vld [vmem:[%s1489_s0 + $0x1a0] sm:$0xff]  ;;  %v72_v26 = vld [vmem:[%s1489_s0 + $0x1d0] sm:$0xff] }
  0x28   :  { %931 = vmatpush3.bf16.msra.mxu1 %v916_v37  ;;  %918 = vmatprep.subr.bf16.mxu0 %v938_v39  ;;  %v70_v25 = vld [vmem:[%s1489_s0 + $0x1c0] sm:$0xff]  ;;  %v69_v27 = vld [vmem:[%s1489_s0 + $0x1b8] sm:$0xff]  ;;  %v71_v28 = vld [vmem:[%s1489_s0 + $0x1c8] sm:$0xff] }
  0x29   :  { %268 = vmatmul.mubr.f32.gmra.mrb[2].mxu0 %v19_v44  ;;  %928 = vmatprep.subr.bf16.mxu1 %v938_v39  ;;  %v75_v29 = vld [vmem:[%s1489_s0 + $0x1e8] sm:$0x3]  ;;  %v77_v30 = vld [vmem:[%s1489_s0 + $0x1f8] sm:$0x3]  ;;  %v74_v31 = vld [vmem:[%s1489_s0 + $0x1e0] sm:$0x3] }
  0x2a   :  { %398 = vmatmul.mubr.f32.gmra.mrb[2].mxu1 %v21_v45  ;;  %272 = vmatprep.mubr.f32.mxu0 %v25_v46  ;;  %v76_v32 = vld [vmem:[%s1489_s0 + $0x1f0] sm:$0x3]  ;;  %v18_v34 = vld [vmem:[%s1489_s0 + $0x20] sm:$0xff]  ;;  %v53_v35 = vld [vmem:[%s1489_s0 + $0x138] sm:$0xff] }
  0x2b   :  { %402 = vmatprep.mubr.f32.mxu1 %v27_v48  ;;  %920 = vmatpush3.bf16.msra.mxu0 %v919_v47  ;;  %v23_v36 = vld [vmem:[%s1489_s0 + $0x48] sm:$0xff]  ;;  %v58_v37 = vld [vmem:[%s1489_s0 + $0x160] sm:$0xff]  ;;  %v28_v38 = vld [vmem:[%s1489_s0 + $0x70] sm:$0xff] }
  0x2c   :  { %932 = vmatpush3.bf16.msra.mxu1 %v919_v47  ;;  %921 = vmatprep.subr.bf16.mxu0 %v938_v39  ;;  %v33_v40 = vld [vmem:[%s1489_s0 + $0x98] sm:$0xff]  ;;  %v68_v41 = vld [vmem:[%s1489_s0 + $0x1b0] sm:$0xff]  ;;  %v38_v42 = vld [vmem:[%s1489_s0 + $0xc0] sm:$0xff] }
  0x2d   :  { %273 = vmatmul.mubr.f32.gmra.mrb[4].mxu0 %v24_v51  ;;  %929 = vmatprep.subr.bf16.mxu1 %v938_v39  ;;  %v73_v43 = vld [vmem:[%s1489_s0 + $0x1d8] sm:$0xff]  ;;  %v43_v44 = vld [vmem:[%s1489_s0 + $0xe8] sm:$0xff]  ;;  %v78_v45 = vld [vmem:[%s1489_s0 + $0x200] sm:$0x3] }
  0x2e   :  { %403 = vmatmul.mubr.f32.gmra.mrb[4].mxu1 %v26_v52  ;;  %277 = vmatprep.mubr.f32.mxu0 %v30_v53  ;;  %v48_v46 = vld [vmem:[%s1489_s0 + $0x110] sm:$0xff]  ;;  %v1401_v48 = vld [vmem:[%s1490_s2] ss:$0 sm:$0xff] }
  0x2f   :  { %407 = vmatprep.mubr.f32.mxu1 %v32_v55  ;;  %923 = vmatpush3.bf16.msra.mxu0 %v922_v54 }
  0x30   :  { %933 = vmatpush3.bf16.msra.mxu1 %v922_v54  ;;  %924 = vmatprep.subr.bf16.mxu0 %v938_v39 }
  0x31   :  { %278 = vmatmul.mubr.f32.gmra.mrb[6].mxu0 %v29_v58  ;;  %930 = vmatprep.subr.bf16.mxu1 %v938_v39  ;;  %v63_v39 = vld [vmem:[%s1489_s0 + $0x188] sm:$0xff] }
  0x32   :  { %408 = vmatmul.mubr.f32.gmra.mrb[6].mxu1 %v31_v59  ;;  %282 = vmatprep.mubr.f32.mxu0 %v35_v60 }
  0x33   :  { %412 = vmatprep.mubr.f32.mxu1 %v37_v62  ;;  %926 = vmatpush3.bf16.msra.mxu0 %v925_v61 }
  0x34   :  { %934 = vmatpush3.bf16.msra.mxu1 %v925_v61 }
  0x35   :  { %283 = vmatmul.mubr.f32.gmra.mrb[8].mxu0 %v34_v63 }
  0x36   :  { %413 = vmatmul.mubr.f32.gmra.mrb[8].mxu1 %v36_v0  ;;  %287 = vmatprep.mubr.f32.mxu0 %v40_v1 }
  0x37   :  { %417 = vmatprep.mubr.f32.mxu1 %v42_v2 }
  0x39   :  { %288 = vmatmul.mubr.f32.gmra.mrb[10].mxu0 %v39_v3 }
  0x3a   :  { %418 = vmatmul.mubr.f32.gmra.mrb[10].mxu1 %v41_v4  ;;  %292 = vmatprep.mubr.f32.mxu0 %v45_v5 }
  0x3b   :  { %422 = vmatprep.mubr.f32.mxu1 %v47_v6 }
  0x3d   :  { %293 = vmatmul.mubr.f32.gmra.mrb[12].mxu0 %v44_v7 }
  0x3e   :  { %423 = vmatmul.mubr.f32.gmra.mrb[12].mxu1 %v46_v8  ;;  %297 = vmatprep.mubr.f32.mxu0 %v50_v9 }
  0x3f   :  { %427 = vmatprep.mubr.f32.mxu1 %v52_v10 }
  0x41   :  { %298 = vmatmul.mubr.f32.gmra.mrb[14].mxu0 %v49_v11 }
  0x42   :  { %428 = vmatmul.mubr.f32.gmra.mrb[14].mxu1 %v51_v12  ;;  %302 = vmatprep.mubr.f32.mxu0 %v55_v13 }
  0x43   :  { %432 = vmatprep.mubr.f32.mxu1 %v57_v14 }
  0x45   :  { %303 = vmatmul.mubr.f32.gmra.mrb[16].mxu0 %v54_v15 }
  0x46   :  { %433 = vmatmul.mubr.f32.gmra.mrb[16].mxu1 %v56_v16  ;;  %307 = vmatprep.mubr.f32.mxu0 %v60_v17 }
  0x47   :  { %437 = vmatprep.mubr.f32.mxu1 %v62_v18 }
  0x49   :  { %308 = vmatmul.mubr.f32.gmra.mrb[18].mxu0 %v59_v19 }
  0x4a   :  { %438 = vmatmul.mubr.f32.gmra.mrb[18].mxu1 %v61_v20  ;;  %312 = vmatprep.mubr.f32.mxu0 %v65_v21 }
  0x4b   :  { %442 = vmatprep.mubr.f32.mxu1 %v67_v22 }
  0x4d   :  { %313 = vmatmul.mubr.f32.gmra.mrb[20].mxu0 %v64_v23 }
  0x4e   :  { %443 = vmatmul.mubr.f32.gmra.mrb[20].mxu1 %v66_v24  ;;  %317 = vmatprep.mubr.f32.mxu0 %v70_v25 }
  0x4f   :  { %447 = vmatprep.mubr.f32.mxu1 %v72_v26 }
  0x51   :  { %318 = vmatmul.mubr.f32.gmra.mrb[22].mxu0 %v69_v27 }
  0x52   :  { %448 = vmatmul.mubr.f32.gmra.mrb[22].mxu1 %v71_v28  ;;  %322 = vmatprep.mubr.f32.mxu0 %v75_v29 }
  0x53   :  { %452 = vmatprep.mubr.f32.mxu1 %v77_v30 }
  0x55   :  { %323 = vmatmul.mubr.f32.gmra.mrb[24].mxu0 %v74_v31 }
  0x56   :  { %453 = vmatmul.mubr.f32.gmra.mrb[24].mxu1 %v76_v32  ;;  %812 = vmatprep.mubr.msk.f32.mxu0 %vm939_vm0, %v940_v33 }
  0x57   :  { %833 = vmatprep.mubr.msk.f32.mxu1 %vm939_vm0, %v940_v33 }
  0x59   :  { %813 = vmatmul.mubr.msk.f32.vlgmr.msra.gmra.mrb[26].mxu0 %vm158_vm1, %v18_v34 }
  0x5a   :  { %834 = vmatmul.mubr.msk.f32.vlgmr.msra.gmra.mrb[26].mxu1 %vm158_vm1, %v53_v35  ;;  %815 = vmatprep.mubr.msk.f32.mxu0 %vm939_vm0, %v940_v33 }
  0x5b   :  { %836 = vmatprep.mubr.msk.f32.mxu1 %vm939_vm0, %v940_v33 }
  0x5d   :  { %816 = vmatmul.mubr.msk.f32.gmra.mrb[28].mxu0 %vm158_vm1, %v23_v36 }
  0x5e   :  { %837 = vmatmul.mubr.msk.f32.gmra.mrb[28].mxu1 %vm158_vm1, %v58_v37  ;;  %818 = vmatprep.mubr.msk.f32.mxu0 %vm939_vm0, %v940_v33 }
  0x5f   :  { %839 = vmatprep.mubr.msk.f32.mxu1 %vm939_vm0, %v940_v33 }
  0x61   :  { %819 = vmatmul.mubr.msk.f32.gmra.mrb[30].mxu0 %vm158_vm1, %v28_v38 }
  0x62   :  { %840 = vmatmul.mubr.msk.f32.gmra.mrb[30].mxu1 %vm158_vm1, %v63_v39  ;;  %821 = vmatprep.mubr.msk.f32.mxu0 %vm939_vm0, %v940_v33 }
  0x63   :  { %842 = vmatprep.mubr.msk.f32.mxu1 %vm939_vm0, %v940_v33 }
  0x65   :  { %822 = vmatmul.mubr.msk.f32.gmra.mrb[32].mxu0 %vm158_vm1, %v33_v40 }
  0x66   :  { %843 = vmatmul.mubr.msk.f32.gmra.mrb[32].mxu1 %vm158_vm1, %v68_v41  ;;  %824 = vmatprep.mubr.msk.f32.mxu0 %vm939_vm0, %v940_v33 }
  0x67   :  { %845 = vmatprep.mubr.msk.f32.mxu1 %vm939_vm0, %v940_v33 }
  0x69   :  { %825 = vmatmul.mubr.msk.f32.gmra.mrb[34].mxu0 %vm158_vm1, %v38_v42 }
  0x6a   :  { %846 = vmatmul.mubr.msk.f32.gmra.mrb[34].mxu1 %vm158_vm1, %v73_v43  ;;  %827 = vmatprep.mubr.msk.f32.mxu0 %vm939_vm0, %v940_v33 }
  0x6b   :  { %848 = vmatprep.mubr.msk.f32.mxu1 %vm939_vm0, %v940_v33 }
  0x6d   :  { %828 = vmatmul.mubr.msk.f32.gmra.mrb[36].mxu0 %vm158_vm1, %v43_v44 }
  0x6e   :  { %849 = vmatmul.mubr.msk.f32.gmra.mrb[36].mxu1 %vm158_vm1, %v78_v45  ;;  %830 = vmatprep.mubr.msk.f32.mxu0 %vm939_vm0, %v940_v33 }
  0x71   :  { %831 = vmatmul.mubr.msk.f32.gmra.mrb[38].mxu0 %vm158_vm1, %v48_v46 }
  0xf8   :  { %v665_v47 = vpop.f32.mrb[0].mxu0 }
  0xf9   :  { %v666_v49 = vpop.f32.mrb[1].mxu0  ;;  %v736_v50 = vpop.f32.mrb[0].mxu1 }
  0xfa   :  { %v667_v51 = vadd.f32 %v666_v49, %v665_v47  ;;  %v737_v52 = vpop.f32.mrb[1].mxu1 }
  0xfb   :  { %v738_v53 = vadd.f32 %v737_v52, %v736_v50 }
  0xfc   :  { %v265_v54 = vadd.f32 %v667_v51, %v1401_v48  ;;  %v668_v55 = vpop.f32.mrb[2].mxu0 }
  0xfd   :  { %v669_v56 = vpop.f32.mrb[3].mxu0  ;;  %v739_v57 = vpop.f32.mrb[2].mxu1 }
  0xfe   :  { %v670_v58 = vadd.f32 %v669_v56, %v668_v55  ;;  %v740_v59 = vpop.f32.mrb[3].mxu1  ;;  %v1404_v60 = vadd.f32 %v738_v53, %v265_v54 }
  0xff   :  { %v741_v61 = vadd.f32 %v740_v59, %v739_v57 }
 0x100   :  { %v270_v62 = vadd.f32 %v670_v58, %v1401_v48  ;;  %v671_v63 = vpop.f32.mrb[4].mxu0 }
 0x101   :  { %v672_v0 = vpop.f32.mrb[5].mxu0  ;;  %v742_v1 = vpop.f32.mrb[4].mxu1 }
 0x102   :  { %v673_v2 = vadd.f32 %v672_v0, %v671_v63  ;;  %v743_v3 = vpop.f32.mrb[5].mxu1  ;;  %v1407_v4 = vadd.f32 %v741_v61, %v270_v62 }
 0x103   :  { %v744_v5 = vadd.f32 %v743_v3, %v742_v1 }
 0x104   :  { %v275_v6 = vadd.f32 %v673_v2, %v1401_v48  ;;  %v674_v7 = vpop.f32.mrb[6].mxu0 }
 0x105   :  { %v675_v8 = vpop.f32.mrb[7].mxu0  ;;  %v745_v9 = vpop.f32.mrb[6].mxu1 }
 0x106   :  { %v676_v10 = vadd.f32 %v675_v8, %v674_v7  ;;  %v746_v11 = vpop.f32.mrb[7].mxu1  ;;  %v1410_v12 = vadd.f32 %v744_v5, %v275_v6 }
 0x107   :  { %v747_v13 = vadd.f32 %v746_v11, %v745_v9 }
 0x108   :  { %v280_v14 = vadd.f32 %v676_v10, %v1401_v48  ;;  %v677_v15 = vpop.f32.mrb[8].mxu0 }
 0x109   :  { %v678_v16 = vpop.f32.mrb[9].mxu0  ;;  %v748_v17 = vpop.f32.mrb[8].mxu1 }
 0x10a   :  { %v679_v18 = vadd.f32 %v678_v16, %v677_v15  ;;  %v749_v19 = vpop.f32.mrb[9].mxu1  ;;  %v1413_v20 = vadd.f32 %v747_v13, %v280_v14 }
 0x10b   :  { %v750_v21 = vadd.f32 %v749_v19, %v748_v17 }
 0x10c   :  { %v285_v22 = vadd.f32 %v679_v18, %v1401_v48  ;;  %v680_v23 = vpop.f32.mrb[10].mxu0 }
 0x10d   :  { %v681_v24 = vpop.f32.mrb[11].mxu0  ;;  %v751_v25 = vpop.f32.mrb[10].mxu1 }
 0x10e   :  { %v682_v26 = vadd.f32 %v681_v24, %v680_v23  ;;  %v752_v27 = vpop.f32.mrb[11].mxu1  ;;  %v1416_v28 = vadd.f32 %v750_v21, %v285_v22 }
 0x10f   :  { %v753_v29 = vadd.f32 %v752_v27, %v751_v25 }
 0x110   :  { %v290_v30 = vadd.f32 %v682_v26, %v1401_v48  ;;  %v683_v31 = vpop.f32.mrb[12].mxu0 }
 0x111   :  { %v684_v32 = vpop.f32.mrb[13].mxu0  ;;  %v754_v33 = vpop.f32.mrb[12].mxu1 }
 0x112   :  { %v685_v34 = vadd.f32 %v684_v32, %v683_v31  ;;  %v755_v35 = vpop.f32.mrb[13].mxu1  ;;  %v1419_v36 = vadd.f32 %v753_v29, %v290_v30 }
 0x113   :  { %v756_v37 = vadd.f32 %v755_v35, %v754_v33 }
 0x114   :  { %v295_v38 = vadd.f32 %v685_v34, %v1401_v48  ;;  %v686_v39 = vpop.f32.mrb[14].mxu0 }
 0x115   :  { %v687_v40 = vpop.f32.mrb[15].mxu0  ;;  %v757_v41 = vpop.f32.mrb[14].mxu1 }
 0x116   :  { %v688_v42 = vadd.f32 %v687_v40, %v686_v39  ;;  %v758_v43 = vpop.f32.mrb[15].mxu1  ;;  %v1422_v44 = vadd.f32 %v756_v37, %v295_v38 }
 0x117   :  { %v759_v45 = vadd.f32 %v758_v43, %v757_v41 }
 0x118   :  { %v300_v46 = vadd.f32 %v688_v42, %v1401_v48  ;;  %v689_v47 = vpop.f32.mrb[16].mxu0 }
 0x119   :  { %v690_v49 = vpop.f32.mrb[17].mxu0  ;;  %v760_v50 = vpop.f32.mrb[16].mxu1 }
 0x11a   :  { %v691_v51 = vadd.f32 %v690_v49, %v689_v47  ;;  %v761_v52 = vpop.f32.mrb[17].mxu1  ;;  %v430_v53 = vadd.f32 %v759_v45, %v300_v46 }
 0x11b   :  { %v762_v54 = vadd.f32 %v761_v52, %v760_v50 }
 0x11c   :  { %v305_v55 = vadd.f32 %v691_v51, %v1401_v48  ;;  %v692_v56 = vpop.f32.mrb[18].mxu0 }
 0x11d   :  { %v693_v57 = vpop.f32.mrb[19].mxu0  ;;  %v763_v58 = vpop.f32.mrb[18].mxu1 }
 0x11e   :  { %v694_v59 = vadd.f32 %v693_v57, %v692_v56  ;;  %v764_v61 = vpop.f32.mrb[19].mxu1  ;;  %v435_v62 = vadd.f32 %v762_v54, %v305_v55 }
 0x11f   :  { %v765_v63 = vadd.f32 %v764_v61, %v763_v58 }
 0x120   :  { %v310_v0 = vadd.f32 %v694_v59, %v1401_v48  ;;  %v695_v1 = vpop.f32.mrb[20].mxu0 }
 0x121   :  { %v696_v2 = vpop.f32.mrb[21].mxu0  ;;  %v766_v3 = vpop.f32.mrb[20].mxu1 }
 0x122   :  { %v697_v5 = vadd.f32 %v696_v2, %v695_v1  ;;  %v767_v6 = vpop.f32.mrb[21].mxu1  ;;  %v440_v7 = vadd.f32 %v765_v63, %v310_v0 }
 0x123   :  { %v768_v8 = vadd.f32 %v767_v6, %v766_v3 }
 0x124   :  { %v315_v9 = vadd.f32 %v697_v5, %v1401_v48  ;;  %v698_v10 = vpop.f32.mrb[22].mxu0 }
 0x125   :  { %v699_v11 = vpop.f32.mrb[23].mxu0  ;;  %v769_v13 = vpop.f32.mrb[22].mxu1 }
 0x126   :  { %v700_v14 = vadd.f32 %v699_v11, %v698_v10  ;;  %v770_v15 = vpop.f32.mrb[23].mxu1  ;;  %v445_v16 = vadd.f32 %v768_v8, %v315_v9 }
 0x127   :  { %v771_v17 = vadd.f32 %v770_v15, %v769_v13 }
 0x128   :  { %v320_v18 = vadd.f32 %v700_v14, %v1401_v48  ;;  %v701_v19 = vpop.f32.mrb[24].mxu0 }
 0x129   :  { %v702_v21 = vpop.f32.mrb[25].mxu0  ;;  %v772_v22 = vpop.f32.mrb[24].mxu1 }
 0x12a   :  { %v703_v23 = vadd.f32 %v702_v21, %v701_v19  ;;  %v773_v24 = vpop.f32.mrb[25].mxu1  ;;  %v450_v25 = vadd.f32 %v771_v17, %v320_v18 }
 0x12b   :  { %v774_v26 = vadd.f32 %v773_v24, %v772_v22 }
 0x12c   :  { %v325_v27 = vadd.f32 %v703_v23, %v1401_v48  ;;  %v524_v29 = vpop.f32.mrb[26].mxu0 }
 0x12d   :  { %v525_v30 = vadd.f32 %v524_v29, %v1404_v60  ;;  %v559_v31 = vpop.f32.mrb[26].mxu1  ;;  %v814_v32 = vpop.f32.mrb[27].mxu0 }
 0x12e   :  { %v560_v33 = vadd.f32 %v559_v31, %v430_v53  ;;  %v835_v34 = vpop.f32.mrb[27].mxu1  ;;  %v455_v35 = vadd.f32 %v774_v26, %v325_v27 }
 0x12f   :  { %v588_v37 = vmax.f32 %v525_v30, 0.0 }
 0x130   :  { %v595_v38 = vmax.f32 %v560_v33, 0.0  ;;  %v529_v39 = vpop.f32.mrb[28].mxu0 }
 0x131   :  { %601 = vst.msk [vmem:[%s1491_s3] sm:$0xff] %vm158_vm1, %v588_v37  ;;  %v530_v40 = vadd.f32 %v529_v39, %v1407_v4  ;;  %v564_v41 = vpop.f32.mrb[28].mxu1  ;;  %v817_v48 = vpop.f32.mrb[29].mxu0 }
 0x132   :  { %608 = vst.msk [vmem:[%s1491_s3 + $0x38] sm:$0xff] %vm158_vm1, %v595_v38  ;;  %v565_v60 = vadd.f32 %v564_v41, %v435_v62  ;;  %v838_v42 = vpop.f32.mrb[29].mxu1 }
 0x133   :  { %v589_v43 = vmax.f32 %v530_v40, 0.0 }
 0x134   :  { %v596_v45 = vmax.f32 %v565_v60, 0.0  ;;  %v534_v46 = vpop.f32.mrb[30].mxu0 }
 0x135   :  { %602 = vst.msk [vmem:[%s1491_s3 + $0x8] sm:$0xff] %vm158_vm1, %v589_v43  ;;  %v535_v47 = vadd.f32 %v534_v46, %v1410_v12  ;;  %v569_v4 = vpop.f32.mrb[30].mxu1  ;;  %v820_v49 = vpop.f32.mrb[31].mxu0 }
 0x136   :  { %609 = vst.msk [vmem:[%s1491_s3 + $0x40] sm:$0xff] %vm158_vm1, %v596_v45  ;;  %v570_v50 = vadd.f32 %v569_v4, %v440_v7  ;;  %v841_v51 = vpop.f32.mrb[31].mxu1 }
 0x137   :  { %v590_v52 = vmax.f32 %v535_v47, 0.0 }
 0x138   :  { %v597_v53 = vmax.f32 %v570_v50, 0.0  ;;  %v539_v54 = vpop.f32.mrb[32].mxu0 }
 0x139   :  { %603 = vst.msk [vmem:[%s1491_s3 + $0x10] sm:$0xff] %vm158_vm1, %v590_v52  ;;  %v540_v55 = vadd.f32 %v539_v54, %v1413_v20  ;;  %v574_v12 = vpop.f32.mrb[32].mxu1  ;;  %v823_v56 = vpop.f32.mrb[33].mxu0 }
 0x13a   :  { %610 = vst.msk [vmem:[%s1491_s3 + $0x48] sm:$0xff] %vm158_vm1, %v597_v53  ;;  %v575_v57 = vadd.f32 %v574_v12, %v445_v16  ;;  %v844_v58 = vpop.f32.mrb[33].mxu1 }
 0x13b   :  { %v591_v59 = vmax.f32 %v540_v55, 0.0 }
 0x13c   :  { %v598_v61 = vmax.f32 %v575_v57, 0.0  ;;  %v544_v62 = vpop.f32.mrb[34].mxu0 }
 0x13d   :  { %604 = vst.msk [vmem:[%s1491_s3 + $0x18] sm:$0xff] %vm158_vm1, %v591_v59  ;;  %v545_v63 = vadd.f32 %v544_v62, %v1416_v28  ;;  %v579_v20 = vpop.f32.mrb[34].mxu1  ;;  %v826_v0 = vpop.f32.mrb[35].mxu0 }
 0x13e   :  { %611 = vst.msk [vmem:[%s1491_s3 + $0x50] sm:$0xff] %vm158_vm1, %v598_v61  ;;  %v580_v1 = vadd.f32 %v579_v20, %v450_v25  ;;  %v847_v2 = vpop.f32.mrb[35].mxu1 }
 0x13f   :  { %v592_v3 = vmax.f32 %v545_v63, 0.0 }
 0x140   :  { %v599_v5 = vmax.f32 %v580_v1, 0.0  ;;  %v549_v6 = vpop.f32.mrb[36].mxu0 }
 0x141   :  { %605 = vst.msk [vmem:[%s1491_s3 + $0x20] sm:$0xff] %vm158_vm1, %v592_v3  ;;  %v550_v7 = vadd.f32 %v549_v6, %v1419_v36  ;;  %v584_v28 = vpop.f32.mrb[36].mxu1  ;;  %v829_v8 = vpop.f32.mrb[37].mxu0 }
 0x142   :  { %612 = vst.msk [vmem:[%s1491_s3 + $0x58] sm:$0xff] %vm158_vm1, %v599_v5  ;;  %v585_v9 = vadd.f32 %v584_v28, %v455_v35  ;;  %v850_v10 = vpop.f32.mrb[37].mxu1 }
 0x143   :  { %v593_v11 = vmax.f32 %v550_v7, 0.0 }
 0x144   :  { %v600_v13 = vmax.f32 %v585_v9, 0.0  ;;  %v554_v14 = vpop.f32.mrb[38].mxu0 }
 0x145   :  { %606 = vst.msk [vmem:[%s1491_s3 + $0x28] sm:$0xff] %vm158_vm1, %v593_v11  ;;  %v555_v36 = vadd.f32 %v554_v14, %v1422_v44  ;;  %v832_v15 = vpop.f32.mrb[39].mxu0 }
 0x146   :  { %614 = vst.msk [vmem:[%s1491_s3 + $0x60] sm:$0x3] %vm613_vm2, %v600_v13 }
 0x147   :  { %v594_v16 = vmax.f32 %v555_v36, 0.0 }
 0x149   :  { %607 = vst.msk [vmem:[%s1491_s3 + $0x30] sm:$0xff] %vm158_vm1, %v594_v16 }

// kernel: namco_boi_forward.9
= control target key start
LH: loop header
LB: loop body
LE: loop exit
PB: predicated region body
PF: predicated region fallthrough
CT: control target
= control target key end

     0   :  { %v159_v28 = vlaneseq  ;;  %v1032_v36 = vmov 1983009808   ;;  %s1274_s0 = inlined_call_operand.vmem [shape: bf16[4,1024], index: 0, kind: input, shape index: {}]   ;;  %s1275_s1 = inlined_call_operand.vmem [shape: bf16[1024,5], index: 1, kind: input, shape index: {}]   ;;  %s1276_s2 = inlined_call_operand.vmem [shape: f32[1,5], index: 2, kind: input, shape index: {}]   ;;  %s1277_s3 = inlined_call_operand.hbm [shape: f32[2,4], index: 3, kind: output, shape index: {}]  }
   0x1   :  { %v942_v0 = vld [vmem:[%s1275_s1 + $0x40] sm:$0xff]   ;;  %v946_v4 = vld [vmem:[%s1275_s1 + $0x48] sm:$0xff]   ;;  %v950_v8 = vld [vmem:[%s1275_s1 + $0x50] sm:$0xff]   ;;  %v157_v37 = vunpack.c.l.s4 %v1032_v36 }
   0x2   :  { %v943_v1 = vld [vmem:[%s1275_s1 + $0xc0] sm:$0xff]   ;;  %848 = vmatprep.subr.bf16.mxu0 %v942_v0  ;;  %v947_v5 = vld [vmem:[%s1275_s1 + $0xc8] sm:$0xff]   ;;  %v951_v9 = vld [vmem:[%s1275_s1 + $0xd0] sm:$0xff]   ;;  %v160_v33 = vshrl.u32 %v159_v28, 7 }
   0x3   :  { %v944_v2 = vld [vmem:[%s1275_s1] sm:$0xff]   ;;  %870 = vmatprep.subr.bf16.mxu1 %v943_v1  ;;  %v948_v6 = vld [vmem:[%s1275_s1 + $0x8] sm:$0xff]   ;;  %v952_v10 = vld [vmem:[%s1275_s1 + $0x10] sm:$0xff]   ;;  %v158_v39 = vunpack.c.0.s8 %v157_v37 }
   0x4   :  { %v945_v3 = vld [vmem:[%s1275_s1 + $0x80] sm:$0xff]   ;;  %849 = vmatpush3.bf16.msra.mxu0 %v944_v2  ;;  %v949_v7 = vld [vmem:[%s1275_s1 + $0x88] sm:$0xff]   ;;  %v953_v11 = vld [vmem:[%s1275_s1 + $0x90] sm:$0xff]  }
   0x5   :  { %871 = vmatpush3.bf16.msra.mxu1 %v945_v3  ;;  %850 = vmatprep.subr.bf16.mxu0 %v946_v4  ;;  %v954_v12 = vld [vmem:[%s1275_s1 + $0x58] sm:$0xff]   ;;  %v958_v16 = vld [vmem:[%s1275_s1 + $0x60] sm:$0xff]   ;;  %v962_v20 = vld [vmem:[%s1275_s1 + $0x68] sm:$0xff]   ;;  %v1160_v41 = vsub.s32 %v158_v39, %v160_v33 }
   0x6   :  { %872 = vmatprep.subr.bf16.mxu1 %v947_v5  ;;  %v955_v13 = vld [vmem:[%s1275_s1 + $0xd8] sm:$0xff]   ;;  %v959_v17 = vld [vmem:[%s1275_s1 + $0xe0] sm:$0xff]   ;;  %v963_v21 = vld [vmem:[%s1275_s1 + $0xe8] sm:$0xff]  }
   0x7   :  { %v956_v14 = vld [vmem:[%s1275_s1 + $0x18] sm:$0xff]   ;;  %v960_v18 = vld [vmem:[%s1275_s1 + $0x20] sm:$0xff]   ;;  %v964_v22 = vld [vmem:[%s1275_s1 + $0x28] sm:$0xff]  }
   0x8   :  { %851 = vmatpush3.bf16.msra.mxu0 %v948_v6  ;;  %v957_v15 = vld [vmem:[%s1275_s1 + $0x98] sm:$0xff]   ;;  %v961_v19 = vld [vmem:[%s1275_s1 + $0xa0] sm:$0xff]   ;;  %v965_v23 = vld [vmem:[%s1275_s1 + $0xa8] sm:$0xff]  }
   0x9   :  { %873 = vmatpush3.bf16.msra.mxu1 %v949_v7  ;;  %852 = vmatprep.subr.bf16.mxu0 %v950_v8  ;;  %v966_v24 = vld [vmem:[%s1275_s1 + $0x70] sm:$0xff]   ;;  %v970_v29 = vld [vmem:[%s1275_s1 + $0x78] sm:$0xff]   ;;  %v16_v34 = vld [vmem:[%s1274_s0] sm:$0xff] }
   0xa   :  { %874 = vmatprep.subr.bf16.mxu1 %v951_v9  ;;  %v967_v25 = vld [vmem:[%s1275_s1 + $0xf0] sm:$0xff]   ;;  %v971_v30 = vld [vmem:[%s1275_s1 + $0xf8] sm:$0xff]   ;;  %v975_v35 = vld [vmem:[%s1275_s1 + $0x140] sm:$0xff]   ;;  %v155_v40 = vcombine.high %v16_v34, %v16_v34  ;;  %v162_v42 = vrot.slane %v16_v34, %v1160_v41 }
   0xb   :  { %v968_v26 = vld [vmem:[%s1275_s1 + $0x30] sm:$0xff]   ;;  %v972_v31 = vld [vmem:[%s1275_s1 + $0x38] sm:$0xff]   ;;  %v976_v38 = vld [vmem:[%s1275_s1 + $0x1c0] sm:$0xff]  }
   0xc   :  { %853 = vmatpush3.bf16.msra.mxu0 %v952_v10  ;;  %v969_v27 = vld [vmem:[%s1275_s1 + $0xb0] sm:$0xff]   ;;  %v973_v32 = vld [vmem:[%s1275_s1 + $0xb8] sm:$0xff]   ;;  %v169_v43 = vrot.slane %v155_v40, %v1160_v41  ;;  %v977_v44 = vld [vmem:[%s1275_s1 + $0x100] sm:$0xff]   ;;  %v170_v46 = vcombine.high %v162_v42, %v162_v42 }
   0xd   :  { %875 = vmatpush3.bf16.msra.mxu1 %v953_v11  ;;  %854 = vmatprep.subr.bf16.mxu0 %v954_v12  ;;  %v978_v45 = vld [vmem:[%s1275_s1 + $0x180] sm:$0xff]   ;;  %v979_v48 = vld [vmem:[%s1275_s1 + $0x148] sm:$0xff]   ;;  %v983_v52 = vld [vmem:[%s1275_s1 + $0x150] sm:$0xff]  }
   0xe   :  { %876 = vmatprep.subr.bf16.mxu1 %v955_v13  ;;  %v171_v47 = vcombine.high %v169_v43, %v169_v43  ;;  %v980_v49 = vld [vmem:[%s1275_s1 + $0x1c8] sm:$0xff]   ;;  %613 = vmatprep.mubr.bf16.mxu0 %v170_v46  ;;  %v984_v53 = vld [vmem:[%s1275_s1 + $0x1d0] sm:$0xff]   ;;  %v987_v56 = vld [vmem:[%s1275_s1 + $0x158] sm:$0xff]  }
   0xf   :  { %v981_v50 = vld [vmem:[%s1275_s1 + $0x108] sm:$0xff]   ;;  %v985_v54 = vld [vmem:[%s1275_s1 + $0x110] sm:$0xff]   ;;  %v988_v57 = vld [vmem:[%s1275_s1 + $0x1d8] sm:$0xff]  }
  0x10   :  { %855 = vmatpush3.bf16.msra.mxu0 %v956_v14  ;;  %653 = vmatprep.mubr.bf16.mxu1 %v171_v47  ;;  %v982_v51 = vld [vmem:[%s1275_s1 + $0x188] sm:$0xff]   ;;  %v986_v55 = vld [vmem:[%s1275_s1 + $0x190] sm:$0xff]   ;;  %v989_v58 = vld [vmem:[%s1275_s1 + $0x118] sm:$0xff]  }
  0x11   :  { %877 = vmatpush3.bf16.msra.mxu1 %v957_v15  ;;  %856 = vmatprep.subr.bf16.mxu0 %v958_v16  ;;  %v990_v59 = vld [vmem:[%s1275_s1 + $0x198] sm:$0xff]   ;;  %v991_v60 = vld [vmem:[%s1275_s1 + $0x160] sm:$0xff]   ;;  %v995_v0 = vld [vmem:[%s1275_s1 + $0x168] sm:$0xff]  }
  0x12   :  { %878 = vmatprep.subr.bf16.mxu1 %v959_v17  ;;  %v992_v61 = vld [vmem:[%s1275_s1 + $0x1e0] sm:$0xff]   ;;  %v996_v1 = vld [vmem:[%s1275_s1 + $0x1e8] sm:$0xff]   ;;  %v999_v4 = vld [vmem:[%s1275_s1 + $0x170] sm:$0xff]  }
  0x13   :  { %v993_v62 = vld [vmem:[%s1275_s1 + $0x120] sm:$0xff]   ;;  %v997_v2 = vld [vmem:[%s1275_s1 + $0x128] sm:$0xff]   ;;  %v1000_v5 = vld [vmem:[%s1275_s1 + $0x1f0] sm:$0xff]  }
  0x14   :  { %857 = vmatpush3.bf16.msra.mxu0 %v960_v18  ;;  %v994_v63 = vld [vmem:[%s1275_s1 + $0x1a0] sm:$0xff]   ;;  %v998_v3 = vld [vmem:[%s1275_s1 + $0x1a8] sm:$0xff]  }
  0x15   :  { %879 = vmatpush3.bf16.msra.mxu1 %v961_v19  ;;  %858 = vmatprep.subr.bf16.mxu0 %v962_v20  ;;  %v17_v6 = vld [vmem:[%s1274_s0 + $0x8] sm:$0xff] }
  0x16   :  { %880 = vmatprep.subr.bf16.mxu1 %v963_v21 }
  0x18   :  { %859 = vmatpush3.bf16.msra.mxu0 %v964_v22 }
  0x19   :  { %881 = vmatpush3.bf16.msra.mxu1 %v965_v23  ;;  %860 = vmatprep.subr.bf16.mxu0 %v966_v24 }
  0x1a   :  { %882 = vmatprep.subr.bf16.mxu1 %v967_v25 }
  0x1c   :  { %861 = vmatpush3.bf16.msra.mxu0 %v968_v26 }
  0x1d   :  { %883 = vmatpush3.bf16.msra.mxu1 %v969_v27  ;;  %862 = vmatprep.subr.bf16.mxu0 %v970_v29 }
  0x1e   :  { %884 = vmatprep.subr.bf16.mxu1 %v971_v30 }
  0x20   :  { %863 = vmatpush3.bf16.msra.mxu0 %v972_v31 }
  0x21   :  { %885 = vmatpush3.bf16.msra.mxu1 %v973_v32  ;;  %892 = vmatprep.subr.bf16.mxu0 %v975_v35 }
  0x22   :  { %914 = vmatprep.subr.bf16.mxu1 %v976_v38 }
  0x23   :  { %614 = vmatmul.mubr.bf16.vlgmr.msra.gmra.mrb[0].mxu0 %v162_v42 }
  0x24   :  { %654 = vmatmul.mubr.bf16.vlgmr.msra.gmra.mrb[0].mxu1 %v169_v43  ;;  %893 = vmatpush3.bf16.msra.mxu0 %v977_v44 }
  0x25   :  { %915 = vmatpush3.bf16.msra.mxu1 %v978_v45  ;;  %894 = vmatprep.subr.bf16.mxu0 %v979_v48 }
  0x26   :  { %916 = vmatprep.subr.bf16.mxu1 %v980_v49 }
  0x28   :  { %895 = vmatpush3.bf16.msra.mxu0 %v981_v50 }
  0x29   :  { %917 = vmatpush3.bf16.msra.mxu1 %v982_v51  ;;  %896 = vmatprep.subr.bf16.mxu0 %v983_v52 }
  0x2a   :  { %918 = vmatprep.subr.bf16.mxu1 %v984_v53 }
  0x2c   :  { %897 = vmatpush3.bf16.msra.mxu0 %v985_v54 }
  0x2d   :  { %919 = vmatpush3.bf16.msra.mxu1 %v986_v55  ;;  %898 = vmatprep.subr.bf16.mxu0 %v987_v56 }
  0x2e   :  { %920 = vmatprep.subr.bf16.mxu1 %v988_v57 }
  0x30   :  { %899 = vmatpush3.bf16.msra.mxu0 %v989_v58 }
  0x31   :  { %921 = vmatpush3.bf16.msra.mxu1 %v990_v59  ;;  %900 = vmatprep.subr.bf16.mxu0 %v991_v60 }
  0x32   :  { %922 = vmatprep.subr.bf16.mxu1 %v992_v61 }
  0x34   :  { %901 = vmatpush3.bf16.msra.mxu0 %v993_v62 }
  0x35   :  { %923 = vmatpush3.bf16.msra.mxu1 %v994_v63  ;;  %902 = vmatprep.subr.bf16.mxu0 %v995_v0 }
  0x36   :  { %924 = vmatprep.subr.bf16.mxu1 %v996_v1 }
  0x37   :  { %8 = vsyncpa [#allocation3], 0  ;;  %v1001_v7 = vld [vmem:[%s1275_s1 + $0x130] sm:$0xff]   ;;  %v179_v9 = vrot.slane %v17_v6, %v1160_v41  ;;  %v172_v10 = vcombine.high %v17_v6, %v17_v6  ;;  %v1003_v11 = vld [vmem:[%s1275_s1 + $0x178] sm:$0xff]   ;;  %v1033_v18 = vmov 4   ;;  %vm742_vm0 = vcmask 25600  }
  0x38   :  { %903 = vmatpush3.bf16.msra.mxu0 %v997_v2  ;;  %v1002_v8 = vld [vmem:[%s1275_s1 + $0x1b0] sm:$0xff]   ;;  %v1004_v12 = vld [vmem:[%s1275_s1 + $0x1f8] sm:$0xff]   ;;  %941 = vset.pattern.permute.xlu0 %v1033_v18  ;;  %v783_v21 = vld [vmem:[%s1276_s2] ss:$0 sm:$0xff]  ;;  %s1034_s10 = smov [#allocation2]   ;;  %vm767_vm1 = vcmask 27650  }
  0x39   :  { %925 = vmatpush3.bf16.msra.mxu1 %v998_v3  ;;  %904 = vmatprep.subr.bf16.mxu0 %v999_v4  ;;  %v187_v13 = vcombine.high %v179_v9, %v179_v9  ;;  %v186_v14 = vrot.slane %v172_v10, %v1160_v41  ;;  %v1005_v15 = vld [vmem:[%s1275_s1 + $0x138] sm:$0xff]   ;;  %s775_s11 = sshll.u32 %s1034_s10, 4  ;;  %s776_s11 = int_to_ptr.vmem [resolvable:$true] %s775_s11 }
  0x3a   :  { %926 = vmatprep.subr.bf16.mxu1 %v1000_v5  ;;  %v1006_v16 = vld [vmem:[%s1275_s1 + $0x1b8] sm:$0xff]   ;;  %s1008_s12 = scalar_lea.vmem %s776_s11, 32  ;;  %p1013_p1 = scmp.lt.s32.totalorder %s776_s11, %s776_s11 }
  0x3b   :  { %v188_v17 = vcombine.high %v186_v14, %v186_v14  ;;  %693 = vmatprep.mubr.bf16.mxu0 %v187_v13  ;;  %p1009_p0 = scmp.ne.s32.totalorder %s776_s11, %s1008_s12  ;;  %p1014_p2 = scmp.lt.s32.totalorder %s1008_s12, %s1008_s12 }
  0x3c   :  { %905 = vmatpush3.bf16.msra.mxu0 %v1001_v7 }
  0x3d   :  { %927 = vmatpush3.bf16.msra.mxu1 %v1002_v8  ;;  %906 = vmatprep.subr.bf16.mxu0 %v1003_v11  ;;  %p1015_p3 = por %p1014_p2, %p1013_p1 }
  0x3e   :  { %928 = vmatprep.subr.bf16.mxu1 %v1004_v12  ;;  %733 = vmatprep.mubr.bf16.mxu1 %v188_v17 }
  0x3f   :  { %p1016_p4 = pnand %p1015_p3, %p1009_p0 }
  0x40   :  { %907 = vmatpush3.bf16.msra.mxu0 %v1005_v15 }
  0x41   :  { %929 = vmatpush3.bf16.msra.mxu1 %v1006_v16 }
  0x43   :  { %694 = vmatmul.mubr.bf16.vlgmr.msra.gmra.mrb[4].mxu0 %v179_v9 }
  0x44   :  { %734 = vmatmul.mubr.bf16.vlgmr.msra.gmra.mrb[4].mxu1 %v186_v14 }
  0xf6   :  { %v864_v19 = vpop.f32.mrb[0].mxu0 }
  0xf7   :  { %v886_v20 = vpop.f32.mrb[0].mxu1  ;;  %v865_v22 = vpop.f32.mrb[1].mxu0 }
  0xf8   :  { %v887_v23 = vpop.f32.mrb[1].mxu1  ;;  %v866_v24 = vadd.f32 %v865_v22, %v864_v19  ;;  %v867_v26 = vpop.f32.mrb[2].mxu0 }
  0xf9   :  { %v888_v25 = vadd.f32 %v887_v23, %v886_v20  ;;  %v889_v27 = vpop.f32.mrb[2].mxu1  ;;  %v868_v28 = vpop.f32.mrb[3].mxu0 }
  0xfa   :  { %v890_v29 = vpop.f32.mrb[3].mxu1  ;;  %v616_v30 = vadd.f32 %v866_v24, %v783_v21 }
  0xfc   :  { %v656_v31 = vadd.f32 %v888_v25, %v616_v30 }
 0x116   :  { %v908_v32 = vpop.f32.mrb[4].mxu0 }
 0x117   :  { %v930_v33 = vpop.f32.mrb[4].mxu1  ;;  %v909_v34 = vpop.f32.mrb[5].mxu0 }
 0x118   :  { %v931_v35 = vpop.f32.mrb[5].mxu1  ;;  %v910_v36 = vadd.f32 %v909_v34, %v908_v32  ;;  %v911_v38 = vpop.f32.mrb[6].mxu0 }
 0x119   :  { %v932_v37 = vadd.f32 %v931_v35, %v930_v33  ;;  %v933_v39 = vpop.f32.mrb[6].mxu1  ;;  %v912_v40 = vpop.f32.mrb[7].mxu0 }
 0x11a   :  { %v934_v41 = vpop.f32.mrb[7].mxu1  ;;  %v696_v42 = vadd.f32 %v910_v36, %v656_v31 }
 0x11c   :  { %v736_v43 = vadd.f32 %v932_v37, %v696_v42 }
 0x11e   :  { %v743_v44 = vsel %vm742_vm0, %v736_v43, 0.0  ;;  %v741_v45 = vmax.f32 %v736_v43, 0.0 }
 0x11f   :  { %744 = vadd.xlane.f32.xlu0 %v743_v44 }
 0x135   :  { %760 = vperm.xlu0 %941, %v741_v45  }
 0x1ac   :  { %v745_v46 = vpop.xlane.xlu0 %744 }
 0x1ad   :  { %v746_v47 = vrot.slane %v745_v46, 4 }
 0x1af   :  { %v747_v48 = vadd.f32 %v746_v47, %v745_v46 }
 0x1b1   :  { %v748_v49 = vrot.slane %v747_v48, 2 }
 0x1b3   :  { %v749_v50 = vadd.f32 %v748_v49, %v747_v48 }
 0x1b4   :  { %v761_v56 = vpop.permute.xlu0 %760 }
 0x1b5   :  { %v750_v51 = vrot.slane %v749_v50, 1 }
 0x1b7   :  { %v751_v52 = vadd.f32 %v750_v51, %v749_v50 }
 0x1b9   :  { %936 = vpush %v751_v52 }
 0x1ea   :  { %s937_s1 = spop %936 }
 0x1eb   :  { %s755_s2 = smul.f32 0.125, %s937_s1 }
 0x1ed   :  { %v756_v53 = vstv %s755_s2 }
 0x1ee   :  { %v757_v54 = vsub.f32 %v736_v43, %v756_v53 }
 0x1f0   :  { %v764_v55 = vrot.slane %v757_v54, 6 }
 0x1f2   :  { %v766_v57 = vadd.f32 %v764_v55, %v761_v56 }
 0x1f4   :  { %768 = vst.msk [vmem:[#allocation2 - $0x2] sm:$0xc] %vm767_vm1, %v766_v57 }
 0x1f5   :  { %1019 = shalt.err (!%p1016_p4)
}
 0x1f6   :  { %s1020_s15 = scalar_lea.hbm %s1277_s3, 32 }
 0x1f7   :  { %p1021_p5 = scmp.ne.s32.totalorder %s1277_s3, %s1020_s15  ;;  %p1024_p6 = scmp.lt.u32.totalorder %s1020_s15, %s1277_s3 }
 0x1f9   :  { %p1026_p7 = pnand %p1024_p6, %p1021_p5 }
 0x1fb   :  { %1029 = shalt.err (!%p1026_p7)
}
 0x1fc   :  { %778 = dma.vmem_to_hbm [thread:$0]  %s776_s11, 32, %s1277_s3, [#allocation3]  }
 0x1fd   :  { %1030 = dma.done.wait [#allocation3], 32  }
 0x1fe   :  { %1031 = vsyncadd [#allocation3], 4294967264 }
 0x1ff   :  { %782 = vsyncpa [#allocation3], 1 }

// kernel: namco_boi_forward.8
= control target key start
LH: loop header
LB: loop body
LE: loop exit
PB: predicated region body
PF: predicated region fallthrough
CT: control target
= control target key end

     0   :  { %s15614_s0 = inlined_call_operand.vmem [shape: bf16[2,3136], index: 0, kind: input, shape index: {}]   ;;  %s15615_s1 = inlined_call_operand.vmem [shape: bf16[2,3136,1024], index: 1, kind: input, shape index: {}]   ;;  %s15616_s2 = inlined_call_operand.vmem [shape: f32[2,1,1024], index: 2, kind: input, shape index: {}]   ;;  %s15617_s3 = inlined_call_operand.vmem [shape: bf16[2,1024,1024], index: 3, kind: input, shape index: {}]   ;;  %s15618_s4 = inlined_call_operand.vmem [shape: f32[2,1,1024], index: 4, kind: input, shape index: {}]   ;;  %s15619_s5 = inlined_call_operand.vmem [shape: bf16[2,2,1024], index: 5, kind: output, shape index: {}]  }
   0x1   :  { %15622 = sst [smem:[#allocation6_spill]] %s15615_s1 }
   0x2   :  { %s12661_s18 = smov 0   ;;  %s12663_s19 = smov 0  }
   0x3   :  { %s12665_s20 = smov 0   ;;  %s12667_s21 = smov 0  }
   0x4   :  { %s12669_s22 = smov 0   ;;  %s12671_s23 = smov 0  }
   0x5   :  { %s12673_s24 = smov 0  }
   0x6 LB: > { %s24_s25 = sadd.s32 1, %s12617_s22  ;;  %s27_s26 = sadd.s32 1, %s12621_s23  ;;  %s12625_s24 = sphi %s12673_s24, %s15_s24   ;;  %s12621_s23 = sphi %s12671_s23, %s15633_s23   ;;  %s12617_s22 = sphi %s12669_s22, %s15632_s22   ;;  %s12613_s21 = sphi %s12667_s21, %s15631_s21   ;;  %s12609_s20 = sphi %s12665_s20, %s15630_s20   ;;  %s12605_s19 = sphi %s12663_s19, %s15629_s19   ;;  %s12601_s18 = sphi %s12661_s18, %s15628_s18  }
   0x7   : > { %p25_p0 = scmp.ge.s32.totalorder %s24_s25, 2  ;;  %p64_p1 = scmp.ne.s32.totalorder %s12605_s19, %s12601_s18 }
   0x8   : > { %p65_p2 = scmp.eq.s32.totalorder %s12625_s24, 0  ;;  %s57_s30 = sadd.s32 1, %s12605_s19 }
   0x9   : > { %s15635_s25 = smov (%p25_p0, %s24_s25), 0  ;;  %s15637_s26 = smov (!%p25_p0, %s27_s26), %s12621_s23 }
   0xa   : > { %15623 = sst [smem:[#allocation4_spill]] %s15635_s25  ;;  %p66_p3 = por %p65_p2, %p64_p1 }
   0xb   : > { %p29_p4 = scmp.ge.s32.totalorder %s15637_s26, 2  ;;  %s53_s27 = ssub.s32 %s12617_s22, %s15635_s25 }
   0xc   : > { %p10148_p6 = scmp.ge.s32.totalorder %s12625_s24, 4 }
   0xd   : > { %s15639_s26 = smov (%p29_p4, %s15637_s26), 0 }
   0xe   : > { %15624 = sst [smem:[#allocation5_spill]] %s15639_s26  ;;  %s52_s28 = ssub.s32 %s12621_s23, %s15639_s26 }
   0xf   : > { %s54_s29 = sor.u32 %s53_s27, %s52_s28  ;;  %201 = sbr.rel (%p10148_p6) target bundleno = 424 (0x1a8), region = 20 }
  0x10   : > { %p55_p5 = scmp.eq.s32.totalorder %s54_s29, 0 }
  0x12   : > { %s12712_s6 = scalar_select %p55_p5, %s12605_s19, %s57_s30  }
  0x16   : > { %204 = sbr.rel (!%p66_p3) target bundleno = 424 (0x1a8), region = 24  ;;  %s206_s7 = sand.u32 (%p66_p3), 1, %s12605_s19  }
  0x17   : > { %s11327_s8 = smul.u32 (%p66_p3), 6272, %s206_s7  ;;  %s10149_s9 = sshll.u32 (%p66_p3), %s12617_s22, 2 }
  0x18   : > { %s11328_s10 = smul.u32 (%p66_p3), 3136, %s12621_s23  ;;  %s15625_s1 = sld [smem:[#allocation6_spill]] (%p66_p3) }
  0x19   : > { %s12726_s16 = scalar_lea.vmem (%p66_p3), [#allocation3], %s11327_s8 }
  0x1a   : > { %s211_s11 = sadd.s32 (%p66_p3), %s11328_s10, %s10149_s9 }
  0x1b   : > { %s10150_s12 = sshll.u32 (%p66_p3), %s211_s11, 2 }
  0x1e   : > { %s12721_s15 = scalar_lea.vmem %s15625_s1, %s10150_s12 }
  0x1f   : > { %v226_v0 = vld [vmem:[%s12721_s15] sm:$0xff]  ;;  %v228_v1 = vld [vmem:[%s12721_s15 + $0x8] sm:$0xff] }
  0x20   : > { %v230_v2 = vld [vmem:[%s12721_s15 + $0x20] sm:$0xff]  ;;  %227 = vst [vmem:[%s12726_s16] sm:$0xff] %v226_v0  ;;  %229 = vst [vmem:[%s12726_s16 + $0x8] sm:$0xff] %v228_v1  ;;  %v232_v3 = vld [vmem:[%s12721_s15 + $0x28] sm:$0xff] }
  0x21   : > { %231 = vst [vmem:[%s12726_s16 + $0x10] sm:$0xff] %v230_v2  ;;  %v234_v4 = vld [vmem:[%s12721_s15 + $0x40] sm:$0xff]  ;;  %v236_v5 = vld [vmem:[%s12721_s15 + $0x48] sm:$0xff]  ;;  %233 = vst [vmem:[%s12726_s16 + $0x18] sm:$0xff] %v232_v3 }
  0x22   : > { %235 = vst [vmem:[%s12726_s16 + $0x20] sm:$0xff] %v234_v4  ;;  %237 = vst [vmem:[%s12726_s16 + $0x28] sm:$0xff] %v236_v5  ;;  %v238_v6 = vld [vmem:[%s12721_s15 + $0x60] sm:$0xff]  ;;  %v240_v7 = vld [vmem:[%s12721_s15 + $0x68] sm:$0xff] }
  0x23   : > { %v242_v8 = vld [vmem:[%s12721_s15 + $0x80] sm:$0xff]  ;;  %239 = vst [vmem:[%s12726_s16 + $0x30] sm:$0xff] %v238_v6  ;;  %241 = vst [vmem:[%s12726_s16 + $0x38] sm:$0xff] %v240_v7  ;;  %v244_v9 = vld [vmem:[%s12721_s15 + $0x88] sm:$0xff] }
  0x24   : > { %243 = vst [vmem:[%s12726_s16 + $0x40] sm:$0xff] %v242_v8  ;;  %v246_v10 = vld [vmem:[%s12721_s15 + $0xa0] sm:$0xff]  ;;  %v248_v11 = vld [vmem:[%s12721_s15 + $0xa8] sm:$0xff]  ;;  %245 = vst [vmem:[%s12726_s16 + $0x48] sm:$0xff] %v244_v9 }
  0x25   : > { %247 = vst [vmem:[%s12726_s16 + $0x50] sm:$0xff] %v246_v10  ;;  %249 = vst [vmem:[%s12726_s16 + $0x58] sm:$0xff] %v248_v11  ;;  %v250_v12 = vld [vmem:[%s12721_s15 + $0xc0] sm:$0xff]  ;;  %v252_v13 = vld [vmem:[%s12721_s15 + $0xc8] sm:$0xff] }
  0x26   : > { %v254_v14 = vld [vmem:[%s12721_s15 + $0xe0] sm:$0xff]  ;;  %251 = vst [vmem:[%s12726_s16 + $0x60] sm:$0xff] %v250_v12  ;;  %253 = vst [vmem:[%s12726_s16 + $0x68] sm:$0xff] %v252_v13  ;;  %v256_v15 = vld [vmem:[%s12721_s15 + $0xe8] sm:$0xff] }
  0x27   : > { %255 = vst [vmem:[%s12726_s16 + $0x70] sm:$0xff] %v254_v14  ;;  %v258_v16 = vld [vmem:[%s12721_s15 + $0x100] sm:$0xff]  ;;  %v260_v17 = vld [vmem:[%s12721_s15 + $0x108] sm:$0xff]  ;;  %257 = vst [vmem:[%s12726_s16 + $0x78] sm:$0xff] %v256_v15 }
  0x28   : > { %259 = vst [vmem:[%s12726_s16 + $0x80] sm:$0xff] %v258_v16  ;;  %261 = vst [vmem:[%s12726_s16 + $0x88] sm:$0xff] %v260_v17  ;;  %v262_v18 = vld [vmem:[%s12721_s15 + $0x120] sm:$0xff]  ;;  %v264_v19 = vld [vmem:[%s12721_s15 + $0x128] sm:$0xff] }
  0x29   : > { %v266_v20 = vld [vmem:[%s12721_s15 + $0x140] sm:$0xff]  ;;  %263 = vst [vmem:[%s12726_s16 + $0x90] sm:$0xff] %v262_v18  ;;  %265 = vst [vmem:[%s12726_s16 + $0x98] sm:$0xff] %v264_v19  ;;  %v268_v21 = vld [vmem:[%s12721_s15 + $0x148] sm:$0xff] }
  0x2a   : > { %267 = vst [vmem:[%s12726_s16 + $0xa0] sm:$0xff] %v266_v20  ;;  %v270_v22 = vld [vmem:[%s12721_s15 + $0x160] sm:$0xff]  ;;  %v272_v23 = vld [vmem:[%s12721_s15 + $0x168] sm:$0xff]  ;;  %269 = vst [vmem:[%s12726_s16 + $0xa8] sm:$0xff] %v268_v21 }
  0x2b   : > { %271 = vst [vmem:[%s12726_s16 + $0xb0] sm:$0xff] %v270_v22  ;;  %273 = vst [vmem:[%s12726_s16 + $0xb8] sm:$0xff] %v272_v23  ;;  %v274_v24 = vld [vmem:[%s12721_s15 + $0x180] sm:$0xff]  ;;  %v276_v25 = vld [vmem:[%s12721_s15 + $0x188] sm:$0xff] }
  0x2c   : > { %v278_v26 = vld [vmem:[%s12721_s15 + $0x1a0] sm:$0xff]  ;;  %275 = vst [vmem:[%s12726_s16 + $0xc0] sm:$0xff] %v274_v24  ;;  %277 = vst [vmem:[%s12726_s16 + $0xc8] sm:$0xff] %v276_v25  ;;  %v280_v27 = vld [vmem:[%s12721_s15 + $0x1a8] sm:$0xff] }
  0x2d   : > { %279 = vst [vmem:[%s12726_s16 + $0xd0] sm:$0xff] %v278_v26  ;;  %v282_v28 = vld [vmem:[%s12721_s15 + $0x1c0] sm:$0xff]  ;;  %v284_v29 = vld [vmem:[%s12721_s15 + $0x1c8] sm:$0xff]  ;;  %281 = vst [vmem:[%s12726_s16 + $0xd8] sm:$0xff] %v280_v27 }
  0x2e   : > { %283 = vst [vmem:[%s12726_s16 + $0xe0] sm:$0xff] %v282_v28  ;;  %285 = vst [vmem:[%s12726_s16 + $0xe8] sm:$0xff] %v284_v29  ;;  %v286_v30 = vld [vmem:[%s12721_s15 + $0x1e0] sm:$0xff]  ;;  %v288_v31 = vld [vmem:[%s12721_s15 + $0x1e8] sm:$0xff] }
  0x2f   : > { %v290_v32 = vld [vmem:[%s12721_s15 + $0x200] sm:$0xff]  ;;  %287 = vst [vmem:[%s12726_s16 + $0xf0] sm:$0xff] %v286_v30  ;;  %289 = vst [vmem:[%s12726_s16 + $0xf8] sm:$0xff] %v288_v31  ;;  %v292_v33 = vld [vmem:[%s12721_s15 + $0x208] sm:$0xff] }
  0x30   : > { %291 = vst [vmem:[%s12726_s16 + $0x100] sm:$0xff] %v290_v32  ;;  %v294_v34 = vld [vmem:[%s12721_s15 + $0x220] sm:$0xff]  ;;  %v296_v35 = vld [vmem:[%s12721_s15 + $0x228] sm:$0xff]  ;;  %293 = vst [vmem:[%s12726_s16 + $0x108] sm:$0xff] %v292_v33 }
  0x31   : > { %295 = vst [vmem:[%s12726_s16 + $0x110] sm:$0xff] %v294_v34  ;;  %297 = vst [vmem:[%s12726_s16 + $0x118] sm:$0xff] %v296_v35  ;;  %v298_v36 = vld [vmem:[%s12721_s15 + $0x240] sm:$0xff]  ;;  %v300_v37 = vld [vmem:[%s12721_s15 + $0x248] sm:$0xff] }
  0x32   : > { %v302_v38 = vld [vmem:[%s12721_s15 + $0x260] sm:$0xff]  ;;  %299 = vst [vmem:[%s12726_s16 + $0x120] sm:$0xff] %v298_v36  ;;  %301 = vst [vmem:[%s12726_s16 + $0x128] sm:$0xff] %v300_v37  ;;  %v304_v39 = vld [vmem:[%s12721_s15 + $0x268] sm:$0xff] }
  0x33   : > { %303 = vst [vmem:[%s12726_s16 + $0x130] sm:$0xff] %v302_v38  ;;  %v306_v40 = vld [vmem:[%s12721_s15 + $0x280] sm:$0xff]  ;;  %v308_v41 = vld [vmem:[%s12721_s15 + $0x288] sm:$0xff]  ;;  %305 = vst [vmem:[%s12726_s16 + $0x138] sm:$0xff] %v304_v39 }
  0x34   : > { %307 = vst [vmem:[%s12726_s16 + $0x140] sm:$0xff] %v306_v40  ;;  %309 = vst [vmem:[%s12726_s16 + $0x148] sm:$0xff] %v308_v41  ;;  %v310_v42 = vld [vmem:[%s12721_s15 + $0x2a0] sm:$0xff]  ;;  %v312_v43 = vld [vmem:[%s12721_s15 + $0x2a8] sm:$0xff] }
  0x35   : > { %v314_v44 = vld [vmem:[%s12721_s15 + $0x2c0] sm:$0xff]  ;;  %311 = vst [vmem:[%s12726_s16 + $0x150] sm:$0xff] %v310_v42  ;;  %313 = vst [vmem:[%s12726_s16 + $0x158] sm:$0xff] %v312_v43  ;;  %v316_v45 = vld [vmem:[%s12721_s15 + $0x2c8] sm:$0xff] }
  0x36   : > { %315 = vst [vmem:[%s12726_s16 + $0x160] sm:$0xff] %v314_v44  ;;  %v318_v46 = vld [vmem:[%s12721_s15 + $0x2e0] sm:$0xff]  ;;  %v320_v47 = vld [vmem:[%s12721_s15 + $0x2e8] sm:$0xff]  ;;  %317 = vst [vmem:[%s12726_s16 + $0x168] sm:$0xff] %v316_v45 }
  0x37   : > { %319 = vst [vmem:[%s12726_s16 + $0x170] sm:$0xff] %v318_v46  ;;  %321 = vst [vmem:[%s12726_s16 + $0x178] sm:$0xff] %v320_v47  ;;  %v322_v48 = vld [vmem:[%s12721_s15 + $0x300] sm:$0xff]  ;;  %v324_v49 = vld [vmem:[%s12721_s15 + $0x308] sm:$0xff] }
  0x38   : > { %v326_v50 = vld [vmem:[%s12721_s15 + $0x320] sm:$0xff]  ;;  %323 = vst [vmem:[%s12726_s16 + $0x180] sm:$0xff] %v322_v48  ;;  %325 = vst [vmem:[%s12726_s16 + $0x188] sm:$0xff] %v324_v49  ;;  %v328_v51 = vld [vmem:[%s12721_s15 + $0x328] sm:$0xff] }
  0x39   : > { %327 = vst [vmem:[%s12726_s16 + $0x190] sm:$0xff] %v326_v50  ;;  %v330_v52 = vld [vmem:[%s12721_s15 + $0x340] sm:$0xff]  ;;  %v332_v53 = vld [vmem:[%s12721_s15 + $0x348] sm:$0xff]  ;;  %329 = vst [vmem:[%s12726_s16 + $0x198] sm:$0xff] %v328_v51 }
  0x3a   : > { %331 = vst [vmem:[%s12726_s16 + $0x1a0] sm:$0xff] %v330_v52  ;;  %333 = vst [vmem:[%s12726_s16 + $0x1a8] sm:$0xff] %v332_v53  ;;  %v334_v54 = vld [vmem:[%s12721_s15 + $0x360] sm:$0xff]  ;;  %v336_v55 = vld [vmem:[%s12721_s15 + $0x368] sm:$0xff] }
  0x3b   : > { %v338_v56 = vld [vmem:[%s12721_s15 + $0x380] sm:$0xff]  ;;  %335 = vst [vmem:[%s12726_s16 + $0x1b0] sm:$0xff] %v334_v54  ;;  %337 = vst [vmem:[%s12726_s16 + $0x1b8] sm:$0xff] %v336_v55  ;;  %v340_v57 = vld [vmem:[%s12721_s15 + $0x388] sm:$0xff] }
  0x3c   : > { %339 = vst [vmem:[%s12726_s16 + $0x1c0] sm:$0xff] %v338_v56  ;;  %v342_v58 = vld [vmem:[%s12721_s15 + $0x3a0] sm:$0xff]  ;;  %v344_v59 = vld [vmem:[%s12721_s15 + $0x3a8] sm:$0xff]  ;;  %341 = vst [vmem:[%s12726_s16 + $0x1c8] sm:$0xff] %v340_v57 }
  0x3d   : > { %343 = vst [vmem:[%s12726_s16 + $0x1d0] sm:$0xff] %v342_v58  ;;  %345 = vst [vmem:[%s12726_s16 + $0x1d8] sm:$0xff] %v344_v59  ;;  %v346_v60 = vld [vmem:[%s12721_s15 + $0x3c0] sm:$0xff]  ;;  %v348_v61 = vld [vmem:[%s12721_s15 + $0x3c8] sm:$0xff] }
  0x3e   : > { %v350_v62 = vld [vmem:[%s12721_s15 + $0x3e0] sm:$0xff]  ;;  %347 = vst [vmem:[%s12726_s16 + $0x1e0] sm:$0xff] %v346_v60  ;;  %349 = vst [vmem:[%s12726_s16 + $0x1e8] sm:$0xff] %v348_v61  ;;  %v352_v63 = vld [vmem:[%s12721_s15 + $0x3e8] sm:$0xff] }
  0x3f   : > { %351 = vst [vmem:[%s12726_s16 + $0x1f0] sm:$0xff] %v350_v62  ;;  %v354_v0 = vld [vmem:[%s12721_s15 + $0x400] sm:$0xff]  ;;  %v356_v1 = vld [vmem:[%s12721_s15 + $0x408] sm:$0xff]  ;;  %353 = vst [vmem:[%s12726_s16 + $0x1f8] sm:$0xff] %v352_v63 }
  0x40   : > { %355 = vst [vmem:[%s12726_s16 + $0x200] sm:$0xff] %v354_v0  ;;  %357 = vst [vmem:[%s12726_s16 + $0x208] sm:$0xff] %v356_v1  ;;  %v358_v2 = vld [vmem:[%s12721_s15 + $0x420] sm:$0xff]  ;;  %v360_v3 = vld [vmem:[%s12721_s15 + $0x428] sm:$0xff] }
  0x41   : > { %v362_v4 = vld [vmem:[%s12721_s15 + $0x440] sm:$0xff]  ;;  %359 = vst [vmem:[%s12726_s16 + $0x210] sm:$0xff] %v358_v2  ;;  %361 = vst [vmem:[%s12726_s16 + $0x218] sm:$0xff] %v360_v3  ;;  %v364_v5 = vld [vmem:[%s12721_s15 + $0x448] sm:$0xff] }
  0x42   : > { %363 = vst [vmem:[%s12726_s16 + $0x220] sm:$0xff] %v362_v4  ;;  %v366_v6 = vld [vmem:[%s12721_s15 + $0x460] sm:$0xff]  ;;  %v368_v7 = vld [vmem:[%s12721_s15 + $0x468] sm:$0xff]  ;;  %365 = vst [vmem:[%s12726_s16 + $0x228] sm:$0xff] %v364_v5 }
  0x43   : > { %367 = vst [vmem:[%s12726_s16 + $0x230] sm:$0xff] %v366_v6  ;;  %369 = vst [vmem:[%s12726_s16 + $0x238] sm:$0xff] %v368_v7  ;;  %v370_v8 = vld [vmem:[%s12721_s15 + $0x480] sm:$0xff]  ;;  %v372_v9 = vld [vmem:[%s12721_s15 + $0x488] sm:$0xff] }
  0x44   : > { %v374_v10 = vld [vmem:[%s12721_s15 + $0x4a0] sm:$0xff]  ;;  %371 = vst [vmem:[%s12726_s16 + $0x240] sm:$0xff] %v370_v8  ;;  %373 = vst [vmem:[%s12726_s16 + $0x248] sm:$0xff] %v372_v9  ;;  %v376_v11 = vld [vmem:[%s12721_s15 + $0x4a8] sm:$0xff] }
  0x45   : > { %375 = vst [vmem:[%s12726_s16 + $0x250] sm:$0xff] %v374_v10  ;;  %v378_v12 = vld [vmem:[%s12721_s15 + $0x4c0] sm:$0xff]  ;;  %v380_v13 = vld [vmem:[%s12721_s15 + $0x4c8] sm:$0xff]  ;;  %377 = vst [vmem:[%s12726_s16 + $0x258] sm:$0xff] %v376_v11 }
  0x46   : > { %379 = vst [vmem:[%s12726_s16 + $0x260] sm:$0xff] %v378_v12  ;;  %381 = vst [vmem:[%s12726_s16 + $0x268] sm:$0xff] %v380_v13  ;;  %v382_v14 = vld [vmem:[%s12721_s15 + $0x4e0] sm:$0xff]  ;;  %v384_v15 = vld [vmem:[%s12721_s15 + $0x4e8] sm:$0xff] }
  0x47   : > { %v386_v16 = vld [vmem:[%s12721_s15 + $0x500] sm:$0xff]  ;;  %383 = vst [vmem:[%s12726_s16 + $0x270] sm:$0xff] %v382_v14  ;;  %385 = vst [vmem:[%s12726_s16 + $0x278] sm:$0xff] %v384_v15  ;;  %v388_v17 = vld [vmem:[%s12721_s15 + $0x508] sm:$0xff] }
  0x48   : > { %387 = vst [vmem:[%s12726_s16 + $0x280] sm:$0xff] %v386_v16  ;;  %v390_v18 = vld [vmem:[%s12721_s15 + $0x520] sm:$0xff]  ;;  %v392_v19 = vld [vmem:[%s12721_s15 + $0x528] sm:$0xff]  ;;  %389 = vst [vmem:[%s12726_s16 + $0x288] sm:$0xff] %v388_v17 }
  0x49   : > { %391 = vst [vmem:[%s12726_s16 + $0x290] sm:$0xff] %v390_v18  ;;  %393 = vst [vmem:[%s12726_s16 + $0x298] sm:$0xff] %v392_v19  ;;  %v394_v20 = vld [vmem:[%s12721_s15 + $0x540] sm:$0xff]  ;;  %v396_v21 = vld [vmem:[%s12721_s15 + $0x548] sm:$0xff] }
  0x4a   : > { %v398_v22 = vld [vmem:[%s12721_s15 + $0x560] sm:$0xff]  ;;  %395 = vst [vmem:[%s12726_s16 + $0x2a0] sm:$0xff] %v394_v20  ;;  %397 = vst [vmem:[%s12726_s16 + $0x2a8] sm:$0xff] %v396_v21  ;;  %v400_v23 = vld [vmem:[%s12721_s15 + $0x568] sm:$0xff] }
  0x4b   : > { %399 = vst [vmem:[%s12726_s16 + $0x2b0] sm:$0xff] %v398_v22  ;;  %v402_v24 = vld [vmem:[%s12721_s15 + $0x580] sm:$0xff]  ;;  %v404_v25 = vld [vmem:[%s12721_s15 + $0x588] sm:$0xff]  ;;  %401 = vst [vmem:[%s12726_s16 + $0x2b8] sm:$0xff] %v400_v23 }
  0x4c   : > { %403 = vst [vmem:[%s12726_s16 + $0x2c0] sm:$0xff] %v402_v24  ;;  %405 = vst [vmem:[%s12726_s16 + $0x2c8] sm:$0xff] %v404_v25  ;;  %v406_v26 = vld [vmem:[%s12721_s15 + $0x5a0] sm:$0xff]  ;;  %v408_v27 = vld [vmem:[%s12721_s15 + $0x5a8] sm:$0xff] }
  0x4d   : > { %v410_v28 = vld [vmem:[%s12721_s15 + $0x5c0] sm:$0xff]  ;;  %407 = vst [vmem:[%s12726_s16 + $0x2d0] sm:$0xff] %v406_v26  ;;  %409 = vst [vmem:[%s12726_s16 + $0x2d8] sm:$0xff] %v408_v27  ;;  %v412_v29 = vld [vmem:[%s12721_s15 + $0x5c8] sm:$0xff] }
  0x4e   : > { %411 = vst [vmem:[%s12726_s16 + $0x2e0] sm:$0xff] %v410_v28  ;;  %v414_v30 = vld [vmem:[%s12721_s15 + $0x5e0] sm:$0xff]  ;;  %v416_v31 = vld [vmem:[%s12721_s15 + $0x5e8] sm:$0xff]  ;;  %413 = vst [vmem:[%s12726_s16 + $0x2e8] sm:$0xff] %v412_v29 }
  0x4f   : > { %415 = vst [vmem:[%s12726_s16 + $0x2f0] sm:$0xff] %v414_v30  ;;  %417 = vst [vmem:[%s12726_s16 + $0x2f8] sm:$0xff] %v416_v31  ;;  %v418_v32 = vld [vmem:[%s12721_s15 + $0x600] sm:$0xff]  ;;  %v420_v33 = vld [vmem:[%s12721_s15 + $0x608] sm:$0xff] }
  0x50   : > { %v422_v34 = vld [vmem:[%s12721_s15 + $0x620] sm:$0xff]  ;;  %419 = vst [vmem:[%s12726_s16 + $0x300] sm:$0xff] %v418_v32  ;;  %421 = vst [vmem:[%s12726_s16 + $0x308] sm:$0xff] %v420_v33  ;;  %v424_v35 = vld [vmem:[%s12721_s15 + $0x628] sm:$0xff] }
  0x51   : > { %423 = vst [vmem:[%s12726_s16 + $0x310] sm:$0xff] %v422_v34  ;;  %v426_v36 = vld [vmem:[%s12721_s15 + $0x640] sm:$0xff]  ;;  %v428_v37 = vld [vmem:[%s12721_s15 + $0x648] sm:$0xff]  ;;  %425 = vst [vmem:[%s12726_s16 + $0x318] sm:$0xff] %v424_v35 }
  0x52   : > { %427 = vst [vmem:[%s12726_s16 + $0x320] sm:$0xff] %v426_v36  ;;  %429 = vst [vmem:[%s12726_s16 + $0x328] sm:$0xff] %v428_v37  ;;  %v430_v38 = vld [vmem:[%s12721_s15 + $0x660] sm:$0xff]  ;;  %v432_v39 = vld [vmem:[%s12721_s15 + $0x668] sm:$0xff] }
  0x53   : > { %v434_v40 = vld [vmem:[%s12721_s15 + $0x680] sm:$0xff]  ;;  %431 = vst [vmem:[%s12726_s16 + $0x330] sm:$0xff] %v430_v38  ;;  %433 = vst [vmem:[%s12726_s16 + $0x338] sm:$0xff] %v432_v39  ;;  %v436_v41 = vld [vmem:[%s12721_s15 + $0x688] sm:$0xff] }
  0x54   : > { %435 = vst [vmem:[%s12726_s16 + $0x340] sm:$0xff] %v434_v40  ;;  %v438_v42 = vld [vmem:[%s12721_s15 + $0x6a0] sm:$0xff]  ;;  %v440_v43 = vld [vmem:[%s12721_s15 + $0x6a8] sm:$0xff]  ;;  %437 = vst [vmem:[%s12726_s16 + $0x348] sm:$0xff] %v436_v41 }
  0x55   : > { %439 = vst [vmem:[%s12726_s16 + $0x350] sm:$0xff] %v438_v42  ;;  %441 = vst [vmem:[%s12726_s16 + $0x358] sm:$0xff] %v440_v43  ;;  %v442_v44 = vld [vmem:[%s12721_s15 + $0x6c0] sm:$0xff]  ;;  %v444_v45 = vld [vmem:[%s12721_s15 + $0x6c8] sm:$0xff] }
  0x56   : > { %v446_v46 = vld [vmem:[%s12721_s15 + $0x6e0] sm:$0xff]  ;;  %443 = vst [vmem:[%s12726_s16 + $0x360] sm:$0xff] %v442_v44  ;;  %445 = vst [vmem:[%s12726_s16 + $0x368] sm:$0xff] %v444_v45  ;;  %v448_v47 = vld [vmem:[%s12721_s15 + $0x6e8] sm:$0xff] }
  0x57   : > { %447 = vst [vmem:[%s12726_s16 + $0x370] sm:$0xff] %v446_v46  ;;  %v450_v48 = vld [vmem:[%s12721_s15 + $0x700] sm:$0xff]  ;;  %v452_v49 = vld [vmem:[%s12721_s15 + $0x708] sm:$0xff]  ;;  %449 = vst [vmem:[%s12726_s16 + $0x378] sm:$0xff] %v448_v47 }
  0x58   : > { %451 = vst [vmem:[%s12726_s16 + $0x380] sm:$0xff] %v450_v48  ;;  %453 = vst [vmem:[%s12726_s16 + $0x388] sm:$0xff] %v452_v49  ;;  %v454_v50 = vld [vmem:[%s12721_s15 + $0x720] sm:$0xff]  ;;  %v456_v51 = vld [vmem:[%s12721_s15 + $0x728] sm:$0xff] }
  0x59   : > { %v458_v52 = vld [vmem:[%s12721_s15 + $0x740] sm:$0xff]  ;;  %455 = vst [vmem:[%s12726_s16 + $0x390] sm:$0xff] %v454_v50  ;;  %457 = vst [vmem:[%s12726_s16 + $0x398] sm:$0xff] %v456_v51  ;;  %v460_v53 = vld [vmem:[%s12721_s15 + $0x748] sm:$0xff] }
  0x5a   : > { %459 = vst [vmem:[%s12726_s16 + $0x3a0] sm:$0xff] %v458_v52  ;;  %v462_v54 = vld [vmem:[%s12721_s15 + $0x760] sm:$0xff]  ;;  %v464_v55 = vld [vmem:[%s12721_s15 + $0x768] sm:$0xff]  ;;  %461 = vst [vmem:[%s12726_s16 + $0x3a8] sm:$0xff] %v460_v53 }
  0x5b   : > { %463 = vst [vmem:[%s12726_s16 + $0x3b0] sm:$0xff] %v462_v54  ;;  %465 = vst [vmem:[%s12726_s16 + $0x3b8] sm:$0xff] %v464_v55  ;;  %v466_v56 = vld [vmem:[%s12721_s15 + $0x780] sm:$0xff]  ;;  %v468_v57 = vld [vmem:[%s12721_s15 + $0x788] sm:$0xff] }
  0x5c   : > { %v470_v58 = vld [vmem:[%s12721_s15 + $0x7a0] sm:$0xff]  ;;  %467 = vst [vmem:[%s12726_s16 + $0x3c0] sm:$0xff] %v466_v56  ;;  %469 = vst [vmem:[%s12726_s16 + $0x3c8] sm:$0xff] %v468_v57  ;;  %v472_v59 = vld [vmem:[%s12721_s15 + $0x7a8] sm:$0xff] }
  0x5d   : > { %471 = vst [vmem:[%s12726_s16 + $0x3d0] sm:$0xff] %v470_v58  ;;  %v474_v60 = vld [vmem:[%s12721_s15 + $0x7c0] sm:$0xff]  ;;  %v476_v61 = vld [vmem:[%s12721_s15 + $0x7c8] sm:$0xff]  ;;  %473 = vst [vmem:[%s12726_s16 + $0x3d8] sm:$0xff] %v472_v59 }
  0x5e   : > { %475 = vst [vmem:[%s12726_s16 + $0x3e0] sm:$0xff] %v474_v60  ;;  %477 = vst [vmem:[%s12726_s16 + $0x3e8] sm:$0xff] %v476_v61  ;;  %v478_v62 = vld [vmem:[%s12721_s15 + $0x7e0] sm:$0xff]  ;;  %v480_v63 = vld [vmem:[%s12721_s15 + $0x7e8] sm:$0xff] }
  0x5f   : > { %v482_v0 = vld [vmem:[%s12721_s15 + $0x800] sm:$0xff]  ;;  %479 = vst [vmem:[%s12726_s16 + $0x3f0] sm:$0xff] %v478_v62  ;;  %481 = vst [vmem:[%s12726_s16 + $0x3f8] sm:$0xff] %v480_v63  ;;  %v484_v1 = vld [vmem:[%s12721_s15 + $0x808] sm:$0xff] }
  0x60   : > { %483 = vst [vmem:[%s12726_s16 + $0x400] sm:$0xff] %v482_v0  ;;  %v486_v2 = vld [vmem:[%s12721_s15 + $0x820] sm:$0xff]  ;;  %v488_v3 = vld [vmem:[%s12721_s15 + $0x828] sm:$0xff]  ;;  %485 = vst [vmem:[%s12726_s16 + $0x408] sm:$0xff] %v484_v1 }
  0x61   : > { %487 = vst [vmem:[%s12726_s16 + $0x410] sm:$0xff] %v486_v2  ;;  %489 = vst [vmem:[%s12726_s16 + $0x418] sm:$0xff] %v488_v3  ;;  %v490_v4 = vld [vmem:[%s12721_s15 + $0x840] sm:$0xff]  ;;  %v492_v5 = vld [vmem:[%s12721_s15 + $0x848] sm:$0xff] }
  0x62   : > { %v494_v6 = vld [vmem:[%s12721_s15 + $0x860] sm:$0xff]  ;;  %491 = vst [vmem:[%s12726_s16 + $0x420] sm:$0xff] %v490_v4  ;;  %493 = vst [vmem:[%s12726_s16 + $0x428] sm:$0xff] %v492_v5  ;;  %v496_v7 = vld [vmem:[%s12721_s15 + $0x868] sm:$0xff] }
  0x63   : > { %495 = vst [vmem:[%s12726_s16 + $0x430] sm:$0xff] %v494_v6  ;;  %v498_v8 = vld [vmem:[%s12721_s15 + $0x880] sm:$0xff]  ;;  %v500_v9 = vld [vmem:[%s12721_s15 + $0x888] sm:$0xff]  ;;  %497 = vst [vmem:[%s12726_s16 + $0x438] sm:$0xff] %v496_v7 }
  0x64   : > { %499 = vst [vmem:[%s12726_s16 + $0x440] sm:$0xff] %v498_v8  ;;  %501 = vst [vmem:[%s12726_s16 + $0x448] sm:$0xff] %v500_v9  ;;  %v502_v10 = vld [vmem:[%s12721_s15 + $0x8a0] sm:$0xff]  ;;  %v504_v11 = vld [vmem:[%s12721_s15 + $0x8a8] sm:$0xff] }
  0x65   : > { %v506_v12 = vld [vmem:[%s12721_s15 + $0x8c0] sm:$0xff]  ;;  %503 = vst [vmem:[%s12726_s16 + $0x450] sm:$0xff] %v502_v10  ;;  %505 = vst [vmem:[%s12726_s16 + $0x458] sm:$0xff] %v504_v11  ;;  %v508_v13 = vld [vmem:[%s12721_s15 + $0x8c8] sm:$0xff] }
  0x66   : > { %507 = vst [vmem:[%s12726_s16 + $0x460] sm:$0xff] %v506_v12  ;;  %v510_v14 = vld [vmem:[%s12721_s15 + $0x8e0] sm:$0xff]  ;;  %v512_v15 = vld [vmem:[%s12721_s15 + $0x8e8] sm:$0xff]  ;;  %509 = vst [vmem:[%s12726_s16 + $0x468] sm:$0xff] %v508_v13 }
  0x67   : > { %511 = vst [vmem:[%s12726_s16 + $0x470] sm:$0xff] %v510_v14  ;;  %513 = vst [vmem:[%s12726_s16 + $0x478] sm:$0xff] %v512_v15  ;;  %v514_v16 = vld [vmem:[%s12721_s15 + $0x900] sm:$0xff]  ;;  %v516_v17 = vld [vmem:[%s12721_s15 + $0x908] sm:$0xff] }
  0x68   : > { %v518_v18 = vld [vmem:[%s12721_s15 + $0x920] sm:$0xff]  ;;  %515 = vst [vmem:[%s12726_s16 + $0x480] sm:$0xff] %v514_v16  ;;  %517 = vst [vmem:[%s12726_s16 + $0x488] sm:$0xff] %v516_v17  ;;  %v520_v19 = vld [vmem:[%s12721_s15 + $0x928] sm:$0xff] }
  0x69   : > { %519 = vst [vmem:[%s12726_s16 + $0x490] sm:$0xff] %v518_v18  ;;  %v522_v20 = vld [vmem:[%s12721_s15 + $0x940] sm:$0xff]  ;;  %v524_v21 = vld [vmem:[%s12721_s15 + $0x948] sm:$0xff]  ;;  %521 = vst [vmem:[%s12726_s16 + $0x498] sm:$0xff] %v520_v19 }
  0x6a   : > { %523 = vst [vmem:[%s12726_s16 + $0x4a0] sm:$0xff] %v522_v20  ;;  %525 = vst [vmem:[%s12726_s16 + $0x4a8] sm:$0xff] %v524_v21  ;;  %v526_v22 = vld [vmem:[%s12721_s15 + $0x960] sm:$0xff]  ;;  %v528_v23 = vld [vmem:[%s12721_s15 + $0x968] sm:$0xff] }
  0x6b   : > { %v530_v24 = vld [vmem:[%s12721_s15 + $0x980] sm:$0xff]  ;;  %527 = vst [vmem:[%s12726_s16 + $0x4b0] sm:$0xff] %v526_v22  ;;  %529 = vst [vmem:[%s12726_s16 + $0x4b8] sm:$0xff] %v528_v23  ;;  %v532_v25 = vld [vmem:[%s12721_s15 + $0x988] sm:$0xff] }
  0x6c   : > { %531 = vst [vmem:[%s12726_s16 + $0x4c0] sm:$0xff] %v530_v24  ;;  %v534_v26 = vld [vmem:[%s12721_s15 + $0x9a0] sm:$0xff]  ;;  %v536_v27 = vld [vmem:[%s12721_s15 + $0x9a8] sm:$0xff]  ;;  %533 = vst [vmem:[%s12726_s16 + $0x4c8] sm:$0xff] %v532_v25 }
  0x6d   : > { %535 = vst [vmem:[%s12726_s16 + $0x4d0] sm:$0xff] %v534_v26  ;;  %537 = vst [vmem:[%s12726_s16 + $0x4d8] sm:$0xff] %v536_v27  ;;  %v538_v28 = vld [vmem:[%s12721_s15 + $0x9c0] sm:$0xff]  ;;  %v540_v29 = vld [vmem:[%s12721_s15 + $0x9c8] sm:$0xff] }
  0x6e   : > { %v542_v30 = vld [vmem:[%s12721_s15 + $0x9e0] sm:$0xff]  ;;  %539 = vst [vmem:[%s12726_s16 + $0x4e0] sm:$0xff] %v538_v28  ;;  %541 = vst [vmem:[%s12726_s16 + $0x4e8] sm:$0xff] %v540_v29  ;;  %v544_v31 = vld [vmem:[%s12721_s15 + $0x9e8] sm:$0xff] }
  0x6f   : > { %543 = vst [vmem:[%s12726_s16 + $0x4f0] sm:$0xff] %v542_v30  ;;  %v546_v32 = vld [vmem:[%s12721_s15 + $0xa00] sm:$0xff]  ;;  %v548_v33 = vld [vmem:[%s12721_s15 + $0xa08] sm:$0xff]  ;;  %545 = vst [vmem:[%s12726_s16 + $0x4f8] sm:$0xff] %v544_v31 }
  0x70   : > { %547 = vst [vmem:[%s12726_s16 + $0x500] sm:$0xff] %v546_v32  ;;  %549 = vst [vmem:[%s12726_s16 + $0x508] sm:$0xff] %v548_v33  ;;  %v550_v34 = vld [vmem:[%s12721_s15 + $0xa20] sm:$0xff]  ;;  %v552_v35 = vld [vmem:[%s12721_s15 + $0xa28] sm:$0xff] }
  0x71   : > { %v554_v36 = vld [vmem:[%s12721_s15 + $0xa40] sm:$0xff]  ;;  %551 = vst [vmem:[%s12726_s16 + $0x510] sm:$0xff] %v550_v34  ;;  %553 = vst [vmem:[%s12726_s16 + $0x518] sm:$0xff] %v552_v35  ;;  %v556_v37 = vld [vmem:[%s12721_s15 + $0xa48] sm:$0xff] }
  0x72   : > { %555 = vst [vmem:[%s12726_s16 + $0x520] sm:$0xff] %v554_v36  ;;  %v558_v38 = vld [vmem:[%s12721_s15 + $0xa60] sm:$0xff]  ;;  %v560_v39 = vld [vmem:[%s12721_s15 + $0xa68] sm:$0xff]  ;;  %557 = vst [vmem:[%s12726_s16 + $0x528] sm:$0xff] %v556_v37 }
  0x73   : > { %559 = vst [vmem:[%s12726_s16 + $0x530] sm:$0xff] %v558_v38  ;;  %561 = vst [vmem:[%s12726_s16 + $0x538] sm:$0xff] %v560_v39  ;;  %v562_v40 = vld [vmem:[%s12721_s15 + $0xa80] sm:$0xff]  ;;  %v564_v41 = vld [vmem:[%s12721_s15 + $0xa88] sm:$0xff] }
  0x74   : > { %v566_v42 = vld [vmem:[%s12721_s15 + $0xaa0] sm:$0xff]  ;;  %563 = vst [vmem:[%s12726_s16 + $0x540] sm:$0xff] %v562_v40  ;;  %565 = vst [vmem:[%s12726_s16 + $0x548] sm:$0xff] %v564_v41  ;;  %v568_v43 = vld [vmem:[%s12721_s15 + $0xaa8] sm:$0xff] }
  0x75   : > { %567 = vst [vmem:[%s12726_s16 + $0x550] sm:$0xff] %v566_v42  ;;  %v570_v44 = vld [vmem:[%s12721_s15 + $0xac0] sm:$0xff]  ;;  %v572_v45 = vld [vmem:[%s12721_s15 + $0xac8] sm:$0xff]  ;;  %569 = vst [vmem:[%s12726_s16 + $0x558] sm:$0xff] %v568_v43 }
  0x76   : > { %571 = vst [vmem:[%s12726_s16 + $0x560] sm:$0xff] %v570_v44  ;;  %573 = vst [vmem:[%s12726_s16 + $0x568] sm:$0xff] %v572_v45  ;;  %v574_v46 = vld [vmem:[%s12721_s15 + $0xae0] sm:$0xff]  ;;  %v576_v47 = vld [vmem:[%s12721_s15 + $0xae8] sm:$0xff] }
  0x77   : > { %v578_v48 = vld [vmem:[%s12721_s15 + $0xb00] sm:$0xff]  ;;  %575 = vst [vmem:[%s12726_s16 + $0x570] sm:$0xff] %v574_v46  ;;  %577 = vst [vmem:[%s12726_s16 + $0x578] sm:$0xff] %v576_v47  ;;  %v580_v49 = vld [vmem:[%s12721_s15 + $0xb08] sm:$0xff] }
  0x78   : > { %579 = vst [vmem:[%s12726_s16 + $0x580] sm:$0xff] %v578_v48  ;;  %v582_v50 = vld [vmem:[%s12721_s15 + $0xb20] sm:$0xff]  ;;  %v584_v51 = vld [vmem:[%s12721_s15 + $0xb28] sm:$0xff]  ;;  %581 = vst [vmem:[%s12726_s16 + $0x588] sm:$0xff] %v580_v49 }
  0x79   : > { %583 = vst [vmem:[%s12726_s16 + $0x590] sm:$0xff] %v582_v50  ;;  %585 = vst [vmem:[%s12726_s16 + $0x598] sm:$0xff] %v584_v51  ;;  %v586_v52 = vld [vmem:[%s12721_s15 + $0xb40] sm:$0xff]  ;;  %v588_v53 = vld [vmem:[%s12721_s15 + $0xb48] sm:$0xff] }
  0x7a   : > { %v590_v54 = vld [vmem:[%s12721_s15 + $0xb60] sm:$0xff]  ;;  %587 = vst [vmem:[%s12726_s16 + $0x5a0] sm:$0xff] %v586_v52  ;;  %589 = vst [vmem:[%s12726_s16 + $0x5a8] sm:$0xff] %v588_v53  ;;  %v592_v55 = vld [vmem:[%s12721_s15 + $0xb68] sm:$0xff] }
  0x7b   : > { %591 = vst [vmem:[%s12726_s16 + $0x5b0] sm:$0xff] %v590_v54  ;;  %v594_v56 = vld [vmem:[%s12721_s15 + $0xb80] sm:$0xff]  ;;  %v596_v57 = vld [vmem:[%s12721_s15 + $0xb88] sm:$0xff]  ;;  %593 = vst [vmem:[%s12726_s16 + $0x5b8] sm:$0xff] %v592_v55 }
  0x7c   : > { %595 = vst [vmem:[%s12726_s16 + $0x5c0] sm:$0xff] %v594_v56  ;;  %597 = vst [vmem:[%s12726_s16 + $0x5c8] sm:$0xff] %v596_v57  ;;  %v598_v58 = vld [vmem:[%s12721_s15 + $0xba0] sm:$0xff]  ;;  %v600_v59 = vld [vmem:[%s12721_s15 + $0xba8] sm:$0xff] }
  0x7d   : > { %v602_v60 = vld [vmem:[%s12721_s15 + $0xbc0] sm:$0xff]  ;;  %599 = vst [vmem:[%s12726_s16 + $0x5d0] sm:$0xff] %v598_v58  ;;  %601 = vst [vmem:[%s12726_s16 + $0x5d8] sm:$0xff] %v600_v59  ;;  %v604_v61 = vld [vmem:[%s12721_s15 + $0xbc8] sm:$0xff] }
  0x7e   : > { %603 = vst [vmem:[%s12726_s16 + $0x5e0] sm:$0xff] %v602_v60  ;;  %v606_v62 = vld [vmem:[%s12721_s15 + $0xbe0] sm:$0xff]  ;;  %v608_v63 = vld [vmem:[%s12721_s15 + $0xbe8] sm:$0xff]  ;;  %605 = vst [vmem:[%s12726_s16 + $0x5e8] sm:$0xff] %v604_v61 }
  0x7f   : > { %607 = vst [vmem:[%s12726_s16 + $0x5f0] sm:$0xff] %v606_v62  ;;  %609 = vst [vmem:[%s12726_s16 + $0x5f8] sm:$0xff] %v608_v63  ;;  %v610_v0 = vld [vmem:[%s12721_s15 + $0xc00] sm:$0xff]  ;;  %v612_v1 = vld [vmem:[%s12721_s15 + $0xc08] sm:$0xff] }
  0x80   : > { %v614_v2 = vld [vmem:[%s12721_s15 + $0xc20] sm:$0xff]  ;;  %611 = vst [vmem:[%s12726_s16 + $0x600] sm:$0xff] %v610_v0  ;;  %613 = vst [vmem:[%s12726_s16 + $0x608] sm:$0xff] %v612_v1  ;;  %v616_v3 = vld [vmem:[%s12721_s15 + $0xc28] sm:$0xff] }
  0x81   : > { %615 = vst [vmem:[%s12726_s16 + $0x610] sm:$0xff] %v614_v2  ;;  %v618_v4 = vld [vmem:[%s12721_s15 + $0xc40] sm:$0xff]  ;;  %v620_v5 = vld [vmem:[%s12721_s15 + $0xc48] sm:$0xff]  ;;  %617 = vst [vmem:[%s12726_s16 + $0x618] sm:$0xff] %v616_v3 }
  0x82   : > { %619 = vst [vmem:[%s12726_s16 + $0x620] sm:$0xff] %v618_v4  ;;  %621 = vst [vmem:[%s12726_s16 + $0x628] sm:$0xff] %v620_v5  ;;  %v622_v6 = vld [vmem:[%s12721_s15 + $0xc60] sm:$0xff]  ;;  %v624_v7 = vld [vmem:[%s12721_s15 + $0xc68] sm:$0xff] }
  0x83   : > { %v626_v8 = vld [vmem:[%s12721_s15 + $0xc80] sm:$0xff]  ;;  %623 = vst [vmem:[%s12726_s16 + $0x630] sm:$0xff] %v622_v6  ;;  %625 = vst [vmem:[%s12726_s16 + $0x638] sm:$0xff] %v624_v7  ;;  %v628_v9 = vld [vmem:[%s12721_s15 + $0xc88] sm:$0xff] }
  0x84   : > { %627 = vst [vmem:[%s12726_s16 + $0x640] sm:$0xff] %v626_v8  ;;  %v630_v10 = vld [vmem:[%s12721_s15 + $0xca0] sm:$0xff]  ;;  %v632_v11 = vld [vmem:[%s12721_s15 + $0xca8] sm:$0xff]  ;;  %629 = vst [vmem:[%s12726_s16 + $0x648] sm:$0xff] %v628_v9 }
  0x85   : > { %631 = vst [vmem:[%s12726_s16 + $0x650] sm:$0xff] %v630_v10  ;;  %633 = vst [vmem:[%s12726_s16 + $0x658] sm:$0xff] %v632_v11  ;;  %v634_v12 = vld [vmem:[%s12721_s15 + $0xcc0] sm:$0xff]  ;;  %v636_v13 = vld [vmem:[%s12721_s15 + $0xcc8] sm:$0xff] }
  0x86   : > { %v638_v14 = vld [vmem:[%s12721_s15 + $0xce0] sm:$0xff]  ;;  %635 = vst [vmem:[%s12726_s16 + $0x660] sm:$0xff] %v634_v12  ;;  %637 = vst [vmem:[%s12726_s16 + $0x668] sm:$0xff] %v636_v13  ;;  %v640_v15 = vld [vmem:[%s12721_s15 + $0xce8] sm:$0xff] }
  0x87   : > { %639 = vst [vmem:[%s12726_s16 + $0x670] sm:$0xff] %v638_v14  ;;  %v642_v16 = vld [vmem:[%s12721_s15 + $0xd00] sm:$0xff]  ;;  %v644_v17 = vld [vmem:[%s12721_s15 + $0xd08] sm:$0xff]  ;;  %641 = vst [vmem:[%s12726_s16 + $0x678] sm:$0xff] %v640_v15 }
  0x88   : > { %643 = vst [vmem:[%s12726_s16 + $0x680] sm:$0xff] %v642_v16  ;;  %645 = vst [vmem:[%s12726_s16 + $0x688] sm:$0xff] %v644_v17  ;;  %v646_v18 = vld [vmem:[%s12721_s15 + $0xd20] sm:$0xff]  ;;  %v648_v19 = vld [vmem:[%s12721_s15 + $0xd28] sm:$0xff] }
  0x89   : > { %v650_v20 = vld [vmem:[%s12721_s15 + $0xd40] sm:$0xff]  ;;  %647 = vst [vmem:[%s12726_s16 + $0x690] sm:$0xff] %v646_v18  ;;  %649 = vst [vmem:[%s12726_s16 + $0x698] sm:$0xff] %v648_v19  ;;  %v652_v21 = vld [vmem:[%s12721_s15 + $0xd48] sm:$0xff] }
  0x8a   : > { %651 = vst [vmem:[%s12726_s16 + $0x6a0] sm:$0xff] %v650_v20  ;;  %v654_v22 = vld [vmem:[%s12721_s15 + $0xd60] sm:$0xff]  ;;  %v656_v23 = vld [vmem:[%s12721_s15 + $0xd68] sm:$0xff]  ;;  %653 = vst [vmem:[%s12726_s16 + $0x6a8] sm:$0xff] %v652_v21 }
  0x8b   : > { %655 = vst [vmem:[%s12726_s16 + $0x6b0] sm:$0xff] %v654_v22  ;;  %657 = vst [vmem:[%s12726_s16 + $0x6b8] sm:$0xff] %v656_v23  ;;  %v658_v24 = vld [vmem:[%s12721_s15 + $0xd80] sm:$0xff]  ;;  %v660_v25 = vld [vmem:[%s12721_s15 + $0xd88] sm:$0xff] }
  0x8c   : > { %v662_v26 = vld [vmem:[%s12721_s15 + $0xda0] sm:$0xff]  ;;  %659 = vst [vmem:[%s12726_s16 + $0x6c0] sm:$0xff] %v658_v24  ;;  %661 = vst [vmem:[%s12726_s16 + $0x6c8] sm:$0xff] %v660_v25  ;;  %v664_v27 = vld [vmem:[%s12721_s15 + $0xda8] sm:$0xff] }
  0x8d   : > { %663 = vst [vmem:[%s12726_s16 + $0x6d0] sm:$0xff] %v662_v26  ;;  %v666_v28 = vld [vmem:[%s12721_s15 + $0xdc0] sm:$0xff]  ;;  %v668_v29 = vld [vmem:[%s12721_s15 + $0xdc8] sm:$0xff]  ;;  %665 = vst [vmem:[%s12726_s16 + $0x6d8] sm:$0xff] %v664_v27 }
  0x8e   : > { %667 = vst [vmem:[%s12726_s16 + $0x6e0] sm:$0xff] %v666_v28  ;;  %669 = vst [vmem:[%s12726_s16 + $0x6e8] sm:$0xff] %v668_v29  ;;  %v670_v30 = vld [vmem:[%s12721_s15 + $0xde0] sm:$0xff]  ;;  %v672_v31 = vld [vmem:[%s12721_s15 + $0xde8] sm:$0xff] }
  0x8f   : > { %v674_v32 = vld [vmem:[%s12721_s15 + $0xe00] sm:$0xff]  ;;  %671 = vst [vmem:[%s12726_s16 + $0x6f0] sm:$0xff] %v670_v30  ;;  %673 = vst [vmem:[%s12726_s16 + $0x6f8] sm:$0xff] %v672_v31  ;;  %v676_v33 = vld [vmem:[%s12721_s15 + $0xe08] sm:$0xff] }
  0x90   : > { %675 = vst [vmem:[%s12726_s16 + $0x700] sm:$0xff] %v674_v32  ;;  %v678_v34 = vld [vmem:[%s12721_s15 + $0xe20] sm:$0xff]  ;;  %v680_v35 = vld [vmem:[%s12721_s15 + $0xe28] sm:$0xff]  ;;  %677 = vst [vmem:[%s12726_s16 + $0x708] sm:$0xff] %v676_v33 }
  0x91   : > { %679 = vst [vmem:[%s12726_s16 + $0x710] sm:$0xff] %v678_v34  ;;  %681 = vst [vmem:[%s12726_s16 + $0x718] sm:$0xff] %v680_v35  ;;  %v682_v36 = vld [vmem:[%s12721_s15 + $0xe40] sm:$0xff]  ;;  %v684_v37 = vld [vmem:[%s12721_s15 + $0xe48] sm:$0xff] }
  0x92   : > { %v686_v38 = vld [vmem:[%s12721_s15 + $0xe60] sm:$0xff]  ;;  %683 = vst [vmem:[%s12726_s16 + $0x720] sm:$0xff] %v682_v36  ;;  %685 = vst [vmem:[%s12726_s16 + $0x728] sm:$0xff] %v684_v37  ;;  %v688_v39 = vld [vmem:[%s12721_s15 + $0xe68] sm:$0xff] }
  0x93   : > { %687 = vst [vmem:[%s12726_s16 + $0x730] sm:$0xff] %v686_v38  ;;  %v690_v40 = vld [vmem:[%s12721_s15 + $0xe80] sm:$0xff]  ;;  %v692_v41 = vld [vmem:[%s12721_s15 + $0xe88] sm:$0xff]  ;;  %689 = vst [vmem:[%s12726_s16 + $0x738] sm:$0xff] %v688_v39 }
  0x94   : > { %691 = vst [vmem:[%s12726_s16 + $0x740] sm:$0xff] %v690_v40  ;;  %693 = vst [vmem:[%s12726_s16 + $0x748] sm:$0xff] %v692_v41  ;;  %v694_v42 = vld [vmem:[%s12721_s15 + $0xea0] sm:$0xff]  ;;  %v696_v43 = vld [vmem:[%s12721_s15 + $0xea8] sm:$0xff] }
  0x95   : > { %v698_v44 = vld [vmem:[%s12721_s15 + $0xec0] sm:$0xff]  ;;  %695 = vst [vmem:[%s12726_s16 + $0x750] sm:$0xff] %v694_v42  ;;  %697 = vst [vmem:[%s12726_s16 + $0x758] sm:$0xff] %v696_v43  ;;  %v700_v45 = vld [vmem:[%s12721_s15 + $0xec8] sm:$0xff] }
  0x96   : > { %699 = vst [vmem:[%s12726_s16 + $0x760] sm:$0xff] %v698_v44  ;;  %v702_v46 = vld [vmem:[%s12721_s15 + $0xee0] sm:$0xff]  ;;  %v704_v47 = vld [vmem:[%s12721_s15 + $0xee8] sm:$0xff]  ;;  %701 = vst [vmem:[%s12726_s16 + $0x768] sm:$0xff] %v700_v45 }
  0x97   : > { %703 = vst [vmem:[%s12726_s16 + $0x770] sm:$0xff] %v702_v46  ;;  %705 = vst [vmem:[%s12726_s16 + $0x778] sm:$0xff] %v704_v47  ;;  %v706_v48 = vld [vmem:[%s12721_s15 + $0xf00] sm:$0xff]  ;;  %v708_v49 = vld [vmem:[%s12721_s15 + $0xf08] sm:$0xff] }
  0x98   : > { %v710_v50 = vld [vmem:[%s12721_s15 + $0xf20] sm:$0xff]  ;;  %707 = vst [vmem:[%s12726_s16 + $0x780] sm:$0xff] %v706_v48  ;;  %709 = vst [vmem:[%s12726_s16 + $0x788] sm:$0xff] %v708_v49  ;;  %v712_v51 = vld [vmem:[%s12721_s15 + $0xf28] sm:$0xff] }
  0x99   : > { %711 = vst [vmem:[%s12726_s16 + $0x790] sm:$0xff] %v710_v50  ;;  %v714_v52 = vld [vmem:[%s12721_s15 + $0xf40] sm:$0xff]  ;;  %v716_v53 = vld [vmem:[%s12721_s15 + $0xf48] sm:$0xff]  ;;  %713 = vst [vmem:[%s12726_s16 + $0x798] sm:$0xff] %v712_v51 }
  0x9a   : > { %715 = vst [vmem:[%s12726_s16 + $0x7a0] sm:$0xff] %v714_v52  ;;  %717 = vst [vmem:[%s12726_s16 + $0x7a8] sm:$0xff] %v716_v53  ;;  %v718_v54 = vld [vmem:[%s12721_s15 + $0xf60] sm:$0xff]  ;;  %v720_v55 = vld [vmem:[%s12721_s15 + $0xf68] sm:$0xff] }
  0x9b   : > { %v722_v56 = vld [vmem:[%s12721_s15 + $0xf80] sm:$0xff]  ;;  %719 = vst [vmem:[%s12726_s16 + $0x7b0] sm:$0xff] %v718_v54  ;;  %721 = vst [vmem:[%s12726_s16 + $0x7b8] sm:$0xff] %v720_v55  ;;  %v724_v57 = vld [vmem:[%s12721_s15 + $0xf88] sm:$0xff] }
  0x9c   : > { %723 = vst [vmem:[%s12726_s16 + $0x7c0] sm:$0xff] %v722_v56  ;;  %v726_v58 = vld [vmem:[%s12721_s15 + $0xfa0] sm:$0xff]  ;;  %v728_v59 = vld [vmem:[%s12721_s15 + $0xfa8] sm:$0xff]  ;;  %725 = vst [vmem:[%s12726_s16 + $0x7c8] sm:$0xff] %v724_v57 }
  0x9d   : > { %727 = vst [vmem:[%s12726_s16 + $0x7d0] sm:$0xff] %v726_v58  ;;  %729 = vst [vmem:[%s12726_s16 + $0x7d8] sm:$0xff] %v728_v59  ;;  %v730_v60 = vld [vmem:[%s12721_s15 + $0xfc0] sm:$0xff]  ;;  %v732_v61 = vld [vmem:[%s12721_s15 + $0xfc8] sm:$0xff] }
  0x9e   : > { %v734_v62 = vld [vmem:[%s12721_s15 + $0xfe0] sm:$0xff]  ;;  %731 = vst [vmem:[%s12726_s16 + $0x7e0] sm:$0xff] %v730_v60  ;;  %733 = vst [vmem:[%s12726_s16 + $0x7e8] sm:$0xff] %v732_v61  ;;  %v736_v63 = vld [vmem:[%s12721_s15 + $0xfe8] sm:$0xff] }
  0x9f   : > { %735 = vst [vmem:[%s12726_s16 + $0x7f0] sm:$0xff] %v734_v62  ;;  %v738_v0 = vld [vmem:[%s12721_s15 + $0x1000] sm:$0xff]  ;;  %v740_v1 = vld [vmem:[%s12721_s15 + $0x1008] sm:$0xff]  ;;  %737 = vst [vmem:[%s12726_s16 + $0x7f8] sm:$0xff] %v736_v63 }
  0xa0   : > { %739 = vst [vmem:[%s12726_s16 + $0x800] sm:$0xff] %v738_v0  ;;  %741 = vst [vmem:[%s12726_s16 + $0x808] sm:$0xff] %v740_v1  ;;  %v742_v2 = vld [vmem:[%s12721_s15 + $0x1020] sm:$0xff]  ;;  %v744_v3 = vld [vmem:[%s12721_s15 + $0x1028] sm:$0xff] }
  0xa1   : > { %v746_v4 = vld [vmem:[%s12721_s15 + $0x1040] sm:$0xff]  ;;  %743 = vst [vmem:[%s12726_s16 + $0x810] sm:$0xff] %v742_v2  ;;  %745 = vst [vmem:[%s12726_s16 + $0x818] sm:$0xff] %v744_v3  ;;  %v748_v5 = vld [vmem:[%s12721_s15 + $0x1048] sm:$0xff] }
  0xa2   : > { %747 = vst [vmem:[%s12726_s16 + $0x820] sm:$0xff] %v746_v4  ;;  %v750_v6 = vld [vmem:[%s12721_s15 + $0x1060] sm:$0xff]  ;;  %v752_v7 = vld [vmem:[%s12721_s15 + $0x1068] sm:$0xff]  ;;  %749 = vst [vmem:[%s12726_s16 + $0x828] sm:$0xff] %v748_v5 }
  0xa3   : > { %751 = vst [vmem:[%s12726_s16 + $0x830] sm:$0xff] %v750_v6  ;;  %753 = vst [vmem:[%s12726_s16 + $0x838] sm:$0xff] %v752_v7  ;;  %v754_v8 = vld [vmem:[%s12721_s15 + $0x1080] sm:$0xff]  ;;  %v756_v9 = vld [vmem:[%s12721_s15 + $0x1088] sm:$0xff] }
  0xa4   : > { %v758_v10 = vld [vmem:[%s12721_s15 + $0x10a0] sm:$0xff]  ;;  %755 = vst [vmem:[%s12726_s16 + $0x840] sm:$0xff] %v754_v8  ;;  %757 = vst [vmem:[%s12726_s16 + $0x848] sm:$0xff] %v756_v9  ;;  %v760_v11 = vld [vmem:[%s12721_s15 + $0x10a8] sm:$0xff] }
  0xa5   : > { %759 = vst [vmem:[%s12726_s16 + $0x850] sm:$0xff] %v758_v10  ;;  %v762_v12 = vld [vmem:[%s12721_s15 + $0x10c0] sm:$0xff]  ;;  %v764_v13 = vld [vmem:[%s12721_s15 + $0x10c8] sm:$0xff]  ;;  %761 = vst [vmem:[%s12726_s16 + $0x858] sm:$0xff] %v760_v11 }
  0xa6   : > { %763 = vst [vmem:[%s12726_s16 + $0x860] sm:$0xff] %v762_v12  ;;  %765 = vst [vmem:[%s12726_s16 + $0x868] sm:$0xff] %v764_v13  ;;  %v766_v14 = vld [vmem:[%s12721_s15 + $0x10e0] sm:$0xff]  ;;  %v768_v15 = vld [vmem:[%s12721_s15 + $0x10e8] sm:$0xff] }
  0xa7   : > { %v770_v16 = vld [vmem:[%s12721_s15 + $0x1100] sm:$0xff]  ;;  %767 = vst [vmem:[%s12726_s16 + $0x870] sm:$0xff] %v766_v14  ;;  %769 = vst [vmem:[%s12726_s16 + $0x878] sm:$0xff] %v768_v15  ;;  %v772_v17 = vld [vmem:[%s12721_s15 + $0x1108] sm:$0xff] }
  0xa8   : > { %771 = vst [vmem:[%s12726_s16 + $0x880] sm:$0xff] %v770_v16  ;;  %v774_v18 = vld [vmem:[%s12721_s15 + $0x1120] sm:$0xff]  ;;  %v776_v19 = vld [vmem:[%s12721_s15 + $0x1128] sm:$0xff]  ;;  %773 = vst [vmem:[%s12726_s16 + $0x888] sm:$0xff] %v772_v17 }
  0xa9   : > { %775 = vst [vmem:[%s12726_s16 + $0x890] sm:$0xff] %v774_v18  ;;  %777 = vst [vmem:[%s12726_s16 + $0x898] sm:$0xff] %v776_v19  ;;  %v778_v20 = vld [vmem:[%s12721_s15 + $0x1140] sm:$0xff]  ;;  %v780_v21 = vld [vmem:[%s12721_s15 + $0x1148] sm:$0xff] }
  0xaa   : > { %v782_v22 = vld [vmem:[%s12721_s15 + $0x1160] sm:$0xff]  ;;  %779 = vst [vmem:[%s12726_s16 + $0x8a0] sm:$0xff] %v778_v20  ;;  %781 = vst [vmem:[%s12726_s16 + $0x8a8] sm:$0xff] %v780_v21  ;;  %v784_v23 = vld [vmem:[%s12721_s15 + $0x1168] sm:$0xff] }
  0xab   : > { %783 = vst [vmem:[%s12726_s16 + $0x8b0] sm:$0xff] %v782_v22  ;;  %v786_v24 = vld [vmem:[%s12721_s15 + $0x1180] sm:$0xff]  ;;  %v788_v25 = vld [vmem:[%s12721_s15 + $0x1188] sm:$0xff]  ;;  %785 = vst [vmem:[%s12726_s16 + $0x8b8] sm:$0xff] %v784_v23 }
  0xac   : > { %787 = vst [vmem:[%s12726_s16 + $0x8c0] sm:$0xff] %v786_v24  ;;  %789 = vst [vmem:[%s12726_s16 + $0x8c8] sm:$0xff] %v788_v25  ;;  %v790_v26 = vld [vmem:[%s12721_s15 + $0x11a0] sm:$0xff]  ;;  %v792_v27 = vld [vmem:[%s12721_s15 + $0x11a8] sm:$0xff] }
  0xad   : > { %v794_v28 = vld [vmem:[%s12721_s15 + $0x11c0] sm:$0xff]  ;;  %791 = vst [vmem:[%s12726_s16 + $0x8d0] sm:$0xff] %v790_v26  ;;  %793 = vst [vmem:[%s12726_s16 + $0x8d8] sm:$0xff] %v792_v27  ;;  %v796_v29 = vld [vmem:[%s12721_s15 + $0x11c8] sm:$0xff] }
  0xae   : > { %795 = vst [vmem:[%s12726_s16 + $0x8e0] sm:$0xff] %v794_v28  ;;  %v798_v30 = vld [vmem:[%s12721_s15 + $0x11e0] sm:$0xff]  ;;  %v800_v31 = vld [vmem:[%s12721_s15 + $0x11e8] sm:$0xff]  ;;  %797 = vst [vmem:[%s12726_s16 + $0x8e8] sm:$0xff] %v796_v29 }
  0xaf   : > { %799 = vst [vmem:[%s12726_s16 + $0x8f0] sm:$0xff] %v798_v30  ;;  %801 = vst [vmem:[%s12726_s16 + $0x8f8] sm:$0xff] %v800_v31  ;;  %v802_v32 = vld [vmem:[%s12721_s15 + $0x1200] sm:$0xff]  ;;  %v804_v33 = vld [vmem:[%s12721_s15 + $0x1208] sm:$0xff] }
  0xb0   : > { %v806_v34 = vld [vmem:[%s12721_s15 + $0x1220] sm:$0xff]  ;;  %803 = vst [vmem:[%s12726_s16 + $0x900] sm:$0xff] %v802_v32  ;;  %805 = vst [vmem:[%s12726_s16 + $0x908] sm:$0xff] %v804_v33  ;;  %v808_v35 = vld [vmem:[%s12721_s15 + $0x1228] sm:$0xff] }
  0xb1   : > { %807 = vst [vmem:[%s12726_s16 + $0x910] sm:$0xff] %v806_v34  ;;  %v810_v36 = vld [vmem:[%s12721_s15 + $0x1240] sm:$0xff]  ;;  %v812_v37 = vld [vmem:[%s12721_s15 + $0x1248] sm:$0xff]  ;;  %809 = vst [vmem:[%s12726_s16 + $0x918] sm:$0xff] %v808_v35 }
  0xb2   : > { %811 = vst [vmem:[%s12726_s16 + $0x920] sm:$0xff] %v810_v36  ;;  %813 = vst [vmem:[%s12726_s16 + $0x928] sm:$0xff] %v812_v37  ;;  %v814_v38 = vld [vmem:[%s12721_s15 + $0x1260] sm:$0xff]  ;;  %v816_v39 = vld [vmem:[%s12721_s15 + $0x1268] sm:$0xff] }
  0xb3   : > { %v818_v40 = vld [vmem:[%s12721_s15 + $0x1280] sm:$0xff]  ;;  %815 = vst [vmem:[%s12726_s16 + $0x930] sm:$0xff] %v814_v38  ;;  %817 = vst [vmem:[%s12726_s16 + $0x938] sm:$0xff] %v816_v39  ;;  %v820_v41 = vld [vmem:[%s12721_s15 + $0x1288] sm:$0xff] }
  0xb4   : > { %819 = vst [vmem:[%s12726_s16 + $0x940] sm:$0xff] %v818_v40  ;;  %v822_v42 = vld [vmem:[%s12721_s15 + $0x12a0] sm:$0xff]  ;;  %v824_v43 = vld [vmem:[%s12721_s15 + $0x12a8] sm:$0xff]  ;;  %821 = vst [vmem:[%s12726_s16 + $0x948] sm:$0xff] %v820_v41 }
  0xb5   : > { %823 = vst [vmem:[%s12726_s16 + $0x950] sm:$0xff] %v822_v42  ;;  %825 = vst [vmem:[%s12726_s16 + $0x958] sm:$0xff] %v824_v43  ;;  %v826_v44 = vld [vmem:[%s12721_s15 + $0x12c0] sm:$0xff]  ;;  %v828_v45 = vld [vmem:[%s12721_s15 + $0x12c8] sm:$0xff] }
  0xb6   : > { %v830_v46 = vld [vmem:[%s12721_s15 + $0x12e0] sm:$0xff]  ;;  %827 = vst [vmem:[%s12726_s16 + $0x960] sm:$0xff] %v826_v44  ;;  %829 = vst [vmem:[%s12726_s16 + $0x968] sm:$0xff] %v828_v45  ;;  %v832_v47 = vld [vmem:[%s12721_s15 + $0x12e8] sm:$0xff] }
  0xb7   : > { %831 = vst [vmem:[%s12726_s16 + $0x970] sm:$0xff] %v830_v46  ;;  %v834_v48 = vld [vmem:[%s12721_s15 + $0x1300] sm:$0xff]  ;;  %v836_v49 = vld [vmem:[%s12721_s15 + $0x1308] sm:$0xff]  ;;  %833 = vst [vmem:[%s12726_s16 + $0x978] sm:$0xff] %v832_v47 }
  0xb8   : > { %835 = vst [vmem:[%s12726_s16 + $0x980] sm:$0xff] %v834_v48  ;;  %837 = vst [vmem:[%s12726_s16 + $0x988] sm:$0xff] %v836_v49  ;;  %v838_v50 = vld [vmem:[%s12721_s15 + $0x1320] sm:$0xff]  ;;  %v840_v51 = vld [vmem:[%s12721_s15 + $0x1328] sm:$0xff] }
  0xb9   : > { %v842_v52 = vld [vmem:[%s12721_s15 + $0x1340] sm:$0xff]  ;;  %839 = vst [vmem:[%s12726_s16 + $0x990] sm:$0xff] %v838_v50  ;;  %841 = vst [vmem:[%s12726_s16 + $0x998] sm:$0xff] %v840_v51  ;;  %v844_v53 = vld [vmem:[%s12721_s15 + $0x1348] sm:$0xff] }
  0xba   : > { %843 = vst [vmem:[%s12726_s16 + $0x9a0] sm:$0xff] %v842_v52  ;;  %v846_v54 = vld [vmem:[%s12721_s15 + $0x1360] sm:$0xff]  ;;  %v848_v55 = vld [vmem:[%s12721_s15 + $0x1368] sm:$0xff]  ;;  %845 = vst [vmem:[%s12726_s16 + $0x9a8] sm:$0xff] %v844_v53 }
  0xbb   : > { %847 = vst [vmem:[%s12726_s16 + $0x9b0] sm:$0xff] %v846_v54  ;;  %849 = vst [vmem:[%s12726_s16 + $0x9b8] sm:$0xff] %v848_v55  ;;  %v850_v56 = vld [vmem:[%s12721_s15 + $0x1380] sm:$0xff]  ;;  %v852_v57 = vld [vmem:[%s12721_s15 + $0x1388] sm:$0xff] }
  0xbc   : > { %v854_v58 = vld [vmem:[%s12721_s15 + $0x13a0] sm:$0xff]  ;;  %851 = vst [vmem:[%s12726_s16 + $0x9c0] sm:$0xff] %v850_v56  ;;  %853 = vst [vmem:[%s12726_s16 + $0x9c8] sm:$0xff] %v852_v57  ;;  %v856_v59 = vld [vmem:[%s12721_s15 + $0x13a8] sm:$0xff] }
  0xbd   : > { %855 = vst [vmem:[%s12726_s16 + $0x9d0] sm:$0xff] %v854_v58  ;;  %v858_v60 = vld [vmem:[%s12721_s15 + $0x13c0] sm:$0xff]  ;;  %v860_v61 = vld [vmem:[%s12721_s15 + $0x13c8] sm:$0xff]  ;;  %857 = vst [vmem:[%s12726_s16 + $0x9d8] sm:$0xff] %v856_v59 }
  0xbe   : > { %859 = vst [vmem:[%s12726_s16 + $0x9e0] sm:$0xff] %v858_v60  ;;  %861 = vst [vmem:[%s12726_s16 + $0x9e8] sm:$0xff] %v860_v61  ;;  %v862_v62 = vld [vmem:[%s12721_s15 + $0x13e0] sm:$0xff]  ;;  %v864_v63 = vld [vmem:[%s12721_s15 + $0x13e8] sm:$0xff] }
  0xbf   : > { %v866_v0 = vld [vmem:[%s12721_s15 + $0x1400] sm:$0xff]  ;;  %863 = vst [vmem:[%s12726_s16 + $0x9f0] sm:$0xff] %v862_v62  ;;  %865 = vst [vmem:[%s12726_s16 + $0x9f8] sm:$0xff] %v864_v63  ;;  %v868_v1 = vld [vmem:[%s12721_s15 + $0x1408] sm:$0xff] }
  0xc0   : > { %867 = vst [vmem:[%s12726_s16 + $0xa00] sm:$0xff] %v866_v0  ;;  %v870_v2 = vld [vmem:[%s12721_s15 + $0x1420] sm:$0xff]  ;;  %v872_v3 = vld [vmem:[%s12721_s15 + $0x1428] sm:$0xff]  ;;  %869 = vst [vmem:[%s12726_s16 + $0xa08] sm:$0xff] %v868_v1 }
  0xc1   : > { %871 = vst [vmem:[%s12726_s16 + $0xa10] sm:$0xff] %v870_v2  ;;  %873 = vst [vmem:[%s12726_s16 + $0xa18] sm:$0xff] %v872_v3  ;;  %v874_v4 = vld [vmem:[%s12721_s15 + $0x1440] sm:$0xff]  ;;  %v876_v5 = vld [vmem:[%s12721_s15 + $0x1448] sm:$0xff] }
  0xc2   : > { %v878_v6 = vld [vmem:[%s12721_s15 + $0x1460] sm:$0xff]  ;;  %875 = vst [vmem:[%s12726_s16 + $0xa20] sm:$0xff] %v874_v4  ;;  %877 = vst [vmem:[%s12726_s16 + $0xa28] sm:$0xff] %v876_v5  ;;  %v880_v7 = vld [vmem:[%s12721_s15 + $0x1468] sm:$0xff] }
  0xc3   : > { %879 = vst [vmem:[%s12726_s16 + $0xa30] sm:$0xff] %v878_v6  ;;  %v882_v8 = vld [vmem:[%s12721_s15 + $0x1480] sm:$0xff]  ;;  %v884_v9 = vld [vmem:[%s12721_s15 + $0x1488] sm:$0xff]  ;;  %881 = vst [vmem:[%s12726_s16 + $0xa38] sm:$0xff] %v880_v7 }
  0xc4   : > { %883 = vst [vmem:[%s12726_s16 + $0xa40] sm:$0xff] %v882_v8  ;;  %885 = vst [vmem:[%s12726_s16 + $0xa48] sm:$0xff] %v884_v9  ;;  %v886_v10 = vld [vmem:[%s12721_s15 + $0x14a0] sm:$0xff]  ;;  %v888_v11 = vld [vmem:[%s12721_s15 + $0x14a8] sm:$0xff] }
  0xc5   : > { %v890_v12 = vld [vmem:[%s12721_s15 + $0x14c0] sm:$0xff]  ;;  %887 = vst [vmem:[%s12726_s16 + $0xa50] sm:$0xff] %v886_v10  ;;  %889 = vst [vmem:[%s12726_s16 + $0xa58] sm:$0xff] %v888_v11  ;;  %v892_v13 = vld [vmem:[%s12721_s15 + $0x14c8] sm:$0xff] }
  0xc6   : > { %891 = vst [vmem:[%s12726_s16 + $0xa60] sm:$0xff] %v890_v12  ;;  %v894_v14 = vld [vmem:[%s12721_s15 + $0x14e0] sm:$0xff]  ;;  %v896_v15 = vld [vmem:[%s12721_s15 + $0x14e8] sm:$0xff]  ;;  %893 = vst [vmem:[%s12726_s16 + $0xa68] sm:$0xff] %v892_v13 }
  0xc7   : > { %895 = vst [vmem:[%s12726_s16 + $0xa70] sm:$0xff] %v894_v14  ;;  %897 = vst [vmem:[%s12726_s16 + $0xa78] sm:$0xff] %v896_v15  ;;  %v898_v16 = vld [vmem:[%s12721_s15 + $0x1500] sm:$0xff]  ;;  %v900_v17 = vld [vmem:[%s12721_s15 + $0x1508] sm:$0xff] }
  0xc8   : > { %v902_v18 = vld [vmem:[%s12721_s15 + $0x1520] sm:$0xff]  ;;  %899 = vst [vmem:[%s12726_s16 + $0xa80] sm:$0xff] %v898_v16  ;;  %901 = vst [vmem:[%s12726_s16 + $0xa88] sm:$0xff] %v900_v17  ;;  %v904_v19 = vld [vmem:[%s12721_s15 + $0x1528] sm:$0xff] }
  0xc9   : > { %903 = vst [vmem:[%s12726_s16 + $0xa90] sm:$0xff] %v902_v18  ;;  %v906_v20 = vld [vmem:[%s12721_s15 + $0x1540] sm:$0xff]  ;;  %v908_v21 = vld [vmem:[%s12721_s15 + $0x1548] sm:$0xff]  ;;  %905 = vst [vmem:[%s12726_s16 + $0xa98] sm:$0xff] %v904_v19 }
  0xca   : > { %907 = vst [vmem:[%s12726_s16 + $0xaa0] sm:$0xff] %v906_v20  ;;  %909 = vst [vmem:[%s12726_s16 + $0xaa8] sm:$0xff] %v908_v21  ;;  %v910_v22 = vld [vmem:[%s12721_s15 + $0x1560] sm:$0xff]  ;;  %v912_v23 = vld [vmem:[%s12721_s15 + $0x1568] sm:$0xff] }
  0xcb   : > { %v914_v24 = vld [vmem:[%s12721_s15 + $0x1580] sm:$0xff]  ;;  %911 = vst [vmem:[%s12726_s16 + $0xab0] sm:$0xff] %v910_v22  ;;  %913 = vst [vmem:[%s12726_s16 + $0xab8] sm:$0xff] %v912_v23  ;;  %v916_v25 = vld [vmem:[%s12721_s15 + $0x1588] sm:$0xff] }
  0xcc   : > { %915 = vst [vmem:[%s12726_s16 + $0xac0] sm:$0xff] %v914_v24  ;;  %v918_v26 = vld [vmem:[%s12721_s15 + $0x15a0] sm:$0xff]  ;;  %v920_v27 = vld [vmem:[%s12721_s15 + $0x15a8] sm:$0xff]  ;;  %917 = vst [vmem:[%s12726_s16 + $0xac8] sm:$0xff] %v916_v25 }
  0xcd   : > { %919 = vst [vmem:[%s12726_s16 + $0xad0] sm:$0xff] %v918_v26  ;;  %921 = vst [vmem:[%s12726_s16 + $0xad8] sm:$0xff] %v920_v27  ;;  %v922_v28 = vld [vmem:[%s12721_s15 + $0x15c0] sm:$0xff]  ;;  %v924_v29 = vld [vmem:[%s12721_s15 + $0x15c8] sm:$0xff] }
  0xce   : > { %v926_v30 = vld [vmem:[%s12721_s15 + $0x15e0] sm:$0xff]  ;;  %923 = vst [vmem:[%s12726_s16 + $0xae0] sm:$0xff] %v922_v28  ;;  %925 = vst [vmem:[%s12726_s16 + $0xae8] sm:$0xff] %v924_v29  ;;  %v928_v31 = vld [vmem:[%s12721_s15 + $0x15e8] sm:$0xff] }
  0xcf   : > { %927 = vst [vmem:[%s12726_s16 + $0xaf0] sm:$0xff] %v926_v30  ;;  %v930_v32 = vld [vmem:[%s12721_s15 + $0x1600] sm:$0xff]  ;;  %v932_v33 = vld [vmem:[%s12721_s15 + $0x1608] sm:$0xff]  ;;  %929 = vst [vmem:[%s12726_s16 + $0xaf8] sm:$0xff] %v928_v31 }
  0xd0   : > { %931 = vst [vmem:[%s12726_s16 + $0xb00] sm:$0xff] %v930_v32  ;;  %933 = vst [vmem:[%s12726_s16 + $0xb08] sm:$0xff] %v932_v33  ;;  %v934_v34 = vld [vmem:[%s12721_s15 + $0x1620] sm:$0xff]  ;;  %v936_v35 = vld [vmem:[%s12721_s15 + $0x1628] sm:$0xff] }
  0xd1   : > { %v938_v36 = vld [vmem:[%s12721_s15 + $0x1640] sm:$0xff]  ;;  %935 = vst [vmem:[%s12726_s16 + $0xb10] sm:$0xff] %v934_v34  ;;  %937 = vst [vmem:[%s12726_s16 + $0xb18] sm:$0xff] %v936_v35  ;;  %v940_v37 = vld [vmem:[%s12721_s15 + $0x1648] sm:$0xff] }
  0xd2   : > { %939 = vst [vmem:[%s12726_s16 + $0xb20] sm:$0xff] %v938_v36  ;;  %v942_v38 = vld [vmem:[%s12721_s15 + $0x1660] sm:$0xff]  ;;  %v944_v39 = vld [vmem:[%s12721_s15 + $0x1668] sm:$0xff]  ;;  %941 = vst [vmem:[%s12726_s16 + $0xb28] sm:$0xff] %v940_v37 }
  0xd3   : > { %943 = vst [vmem:[%s12726_s16 + $0xb30] sm:$0xff] %v942_v38  ;;  %945 = vst [vmem:[%s12726_s16 + $0xb38] sm:$0xff] %v944_v39  ;;  %v946_v40 = vld [vmem:[%s12721_s15 + $0x1680] sm:$0xff]  ;;  %v948_v41 = vld [vmem:[%s12721_s15 + $0x1688] sm:$0xff] }
  0xd4   : > { %v950_v42 = vld [vmem:[%s12721_s15 + $0x16a0] sm:$0xff]  ;;  %947 = vst [vmem:[%s12726_s16 + $0xb40] sm:$0xff] %v946_v40  ;;  %949 = vst [vmem:[%s12726_s16 + $0xb48] sm:$0xff] %v948_v41  ;;  %v952_v43 = vld [vmem:[%s12721_s15 + $0x16a8] sm:$0xff] }
  0xd5   : > { %951 = vst [vmem:[%s12726_s16 + $0xb50] sm:$0xff] %v950_v42  ;;  %v954_v44 = vld [vmem:[%s12721_s15 + $0x16c0] sm:$0xff]  ;;  %v956_v45 = vld [vmem:[%s12721_s15 + $0x16c8] sm:$0xff]  ;;  %953 = vst [vmem:[%s12726_s16 + $0xb58] sm:$0xff] %v952_v43 }
  0xd6   : > { %955 = vst [vmem:[%s12726_s16 + $0xb60] sm:$0xff] %v954_v44  ;;  %957 = vst [vmem:[%s12726_s16 + $0xb68] sm:$0xff] %v956_v45  ;;  %v958_v46 = vld [vmem:[%s12721_s15 + $0x16e0] sm:$0xff]  ;;  %v960_v47 = vld [vmem:[%s12721_s15 + $0x16e8] sm:$0xff] }
  0xd7   : > { %v962_v48 = vld [vmem:[%s12721_s15 + $0x1700] sm:$0xff]  ;;  %959 = vst [vmem:[%s12726_s16 + $0xb70] sm:$0xff] %v958_v46  ;;  %961 = vst [vmem:[%s12726_s16 + $0xb78] sm:$0xff] %v960_v47  ;;  %v964_v49 = vld [vmem:[%s12721_s15 + $0x1708] sm:$0xff] }
  0xd8   : > { %963 = vst [vmem:[%s12726_s16 + $0xb80] sm:$0xff] %v962_v48  ;;  %v966_v50 = vld [vmem:[%s12721_s15 + $0x1720] sm:$0xff]  ;;  %v968_v51 = vld [vmem:[%s12721_s15 + $0x1728] sm:$0xff]  ;;  %965 = vst [vmem:[%s12726_s16 + $0xb88] sm:$0xff] %v964_v49 }
  0xd9   : > { %967 = vst [vmem:[%s12726_s16 + $0xb90] sm:$0xff] %v966_v50  ;;  %969 = vst [vmem:[%s12726_s16 + $0xb98] sm:$0xff] %v968_v51  ;;  %v970_v52 = vld [vmem:[%s12721_s15 + $0x1740] sm:$0xff]  ;;  %v972_v53 = vld [vmem:[%s12721_s15 + $0x1748] sm:$0xff] }
  0xda   : > { %v974_v54 = vld [vmem:[%s12721_s15 + $0x1760] sm:$0xff]  ;;  %971 = vst [vmem:[%s12726_s16 + $0xba0] sm:$0xff] %v970_v52  ;;  %973 = vst [vmem:[%s12726_s16 + $0xba8] sm:$0xff] %v972_v53  ;;  %v976_v55 = vld [vmem:[%s12721_s15 + $0x1768] sm:$0xff] }
  0xdb   : > { %975 = vst [vmem:[%s12726_s16 + $0xbb0] sm:$0xff] %v974_v54  ;;  %v978_v56 = vld [vmem:[%s12721_s15 + $0x1780] sm:$0xff]  ;;  %v980_v57 = vld [vmem:[%s12721_s15 + $0x1788] sm:$0xff]  ;;  %977 = vst [vmem:[%s12726_s16 + $0xbb8] sm:$0xff] %v976_v55 }
  0xdc   : > { %979 = vst [vmem:[%s12726_s16 + $0xbc0] sm:$0xff] %v978_v56  ;;  %981 = vst [vmem:[%s12726_s16 + $0xbc8] sm:$0xff] %v980_v57  ;;  %v982_v58 = vld [vmem:[%s12721_s15 + $0x17a0] sm:$0xff]  ;;  %v984_v59 = vld [vmem:[%s12721_s15 + $0x17a8] sm:$0xff] }
  0xdd   : > { %v986_v60 = vld [vmem:[%s12721_s15 + $0x17c0] sm:$0xff]  ;;  %983 = vst [vmem:[%s12726_s16 + $0xbd0] sm:$0xff] %v982_v58  ;;  %985 = vst [vmem:[%s12726_s16 + $0xbd8] sm:$0xff] %v984_v59  ;;  %v988_v61 = vld [vmem:[%s12721_s15 + $0x17c8] sm:$0xff] }
  0xde   : > { %987 = vst [vmem:[%s12726_s16 + $0xbe0] sm:$0xff] %v986_v60  ;;  %v990_v62 = vld [vmem:[%s12721_s15 + $0x17e0] sm:$0xff]  ;;  %v992_v63 = vld [vmem:[%s12721_s15 + $0x17e8] sm:$0xff]  ;;  %989 = vst [vmem:[%s12726_s16 + $0xbe8] sm:$0xff] %v988_v61 }
  0xdf   : > { %991 = vst [vmem:[%s12726_s16 + $0xbf0] sm:$0xff] %v990_v62  ;;  %993 = vst [vmem:[%s12726_s16 + $0xbf8] sm:$0xff] %v992_v63  ;;  %v994_v0 = vld [vmem:[%s12721_s15 + $0x1800] sm:$0xff]  ;;  %v996_v1 = vld [vmem:[%s12721_s15 + $0x1808] sm:$0xff] }
  0xe0   : > { %v998_v2 = vld [vmem:[%s12721_s15 + $0x1820] sm:$0xff]  ;;  %995 = vst [vmem:[%s12726_s16 + $0xc00] sm:$0xff] %v994_v0  ;;  %997 = vst [vmem:[%s12726_s16 + $0xc08] sm:$0xff] %v996_v1  ;;  %v1000_v3 = vld [vmem:[%s12721_s15 + $0x1828] sm:$0xff] }
  0xe1   : > { %999 = vst [vmem:[%s12726_s16 + $0xc10] sm:$0xff] %v998_v2  ;;  %v1002_v4 = vld [vmem:[%s12721_s15 + $0x1840] sm:$0xff]  ;;  %v1004_v5 = vld [vmem:[%s12721_s15 + $0x1848] sm:$0xff]  ;;  %1001 = vst [vmem:[%s12726_s16 + $0xc18] sm:$0xff] %v1000_v3 }
  0xe2   : > { %1003 = vst [vmem:[%s12726_s16 + $0xc20] sm:$0xff] %v1002_v4  ;;  %1005 = vst [vmem:[%s12726_s16 + $0xc28] sm:$0xff] %v1004_v5  ;;  %v1006_v6 = vld [vmem:[%s12721_s15 + $0x1860] sm:$0xff]  ;;  %v1008_v7 = vld [vmem:[%s12721_s15 + $0x1868] sm:$0xff] }
  0xe3   : > { %v1010_v8 = vld [vmem:[%s12721_s15 + $0x1880] sm:$0xff]  ;;  %1007 = vst [vmem:[%s12726_s16 + $0xc30] sm:$0xff] %v1006_v6  ;;  %1009 = vst [vmem:[%s12726_s16 + $0xc38] sm:$0xff] %v1008_v7  ;;  %v1012_v9 = vld [vmem:[%s12721_s15 + $0x1888] sm:$0xff] }
  0xe4   : > { %1011 = vst [vmem:[%s12726_s16 + $0xc40] sm:$0xff] %v1010_v8  ;;  %v1014_v10 = vld [vmem:[%s12721_s15 + $0x18a0] sm:$0xff]  ;;  %v1016_v11 = vld [vmem:[%s12721_s15 + $0x18a8] sm:$0xff]  ;;  %1013 = vst [vmem:[%s12726_s16 + $0xc48] sm:$0xff] %v1012_v9 }
  0xe5   : > { %1015 = vst [vmem:[%s12726_s16 + $0xc50] sm:$0xff] %v1014_v10  ;;  %1017 = vst [vmem:[%s12726_s16 + $0xc58] sm:$0xff] %v1016_v11  ;;  %v1018_v12 = vld [vmem:[%s12721_s15 + $0x18c0] sm:$0xff]  ;;  %v1020_v13 = vld [vmem:[%s12721_s15 + $0x18c8] sm:$0xff] }
  0xe6   : > { %v1022_v14 = vld [vmem:[%s12721_s15 + $0x18e0] sm:$0xff]  ;;  %1019 = vst [vmem:[%s12726_s16 + $0xc60] sm:$0xff] %v1018_v12  ;;  %1021 = vst [vmem:[%s12726_s16 + $0xc68] sm:$0xff] %v1020_v13  ;;  %v1024_v15 = vld [vmem:[%s12721_s15 + $0x18e8] sm:$0xff] }
  0xe7   : > { %1023 = vst [vmem:[%s12726_s16 + $0xc70] sm:$0xff] %v1022_v14  ;;  %v1026_v16 = vld [vmem:[%s12721_s15 + $0x1900] sm:$0xff]  ;;  %v1028_v17 = vld [vmem:[%s12721_s15 + $0x1908] sm:$0xff]  ;;  %1025 = vst [vmem:[%s12726_s16 + $0xc78] sm:$0xff] %v1024_v15 }
  0xe8   : > { %1027 = vst [vmem:[%s12726_s16 + $0xc80] sm:$0xff] %v1026_v16  ;;  %1029 = vst [vmem:[%s12726_s16 + $0xc88] sm:$0xff] %v1028_v17  ;;  %v1030_v18 = vld [vmem:[%s12721_s15 + $0x1920] sm:$0xff]  ;;  %v1032_v19 = vld [vmem:[%s12721_s15 + $0x1928] sm:$0xff] }
  0xe9   : > { %v1034_v20 = vld [vmem:[%s12721_s15 + $0x1940] sm:$0xff]  ;;  %1031 = vst [vmem:[%s12726_s16 + $0xc90] sm:$0xff] %v1030_v18  ;;  %1033 = vst [vmem:[%s12726_s16 + $0xc98] sm:$0xff] %v1032_v19  ;;  %v1036_v21 = vld [vmem:[%s12721_s15 + $0x1948] sm:$0xff] }
  0xea   : > { %1035 = vst [vmem:[%s12726_s16 + $0xca0] sm:$0xff] %v1034_v20  ;;  %v1038_v22 = vld [vmem:[%s12721_s15 + $0x1960] sm:$0xff]  ;;  %v1040_v23 = vld [vmem:[%s12721_s15 + $0x1968] sm:$0xff]  ;;  %1037 = vst [vmem:[%s12726_s16 + $0xca8] sm:$0xff] %v1036_v21 }
  0xeb   : > { %1039 = vst [vmem:[%s12726_s16 + $0xcb0] sm:$0xff] %v1038_v22  ;;  %1041 = vst [vmem:[%s12726_s16 + $0xcb8] sm:$0xff] %v1040_v23  ;;  %v1042_v24 = vld [vmem:[%s12721_s15 + $0x1980] sm:$0xff]  ;;  %v1044_v25 = vld [vmem:[%s12721_s15 + $0x1988] sm:$0xff] }
  0xec   : > { %v1046_v26 = vld [vmem:[%s12721_s15 + $0x19a0] sm:$0xff]  ;;  %1043 = vst [vmem:[%s12726_s16 + $0xcc0] sm:$0xff] %v1042_v24  ;;  %1045 = vst [vmem:[%s12726_s16 + $0xcc8] sm:$0xff] %v1044_v25  ;;  %v1048_v27 = vld [vmem:[%s12721_s15 + $0x19a8] sm:$0xff] }
  0xed   : > { %1047 = vst [vmem:[%s12726_s16 + $0xcd0] sm:$0xff] %v1046_v26  ;;  %v1050_v28 = vld [vmem:[%s12721_s15 + $0x19c0] sm:$0xff]  ;;  %v1052_v29 = vld [vmem:[%s12721_s15 + $0x19c8] sm:$0xff]  ;;  %1049 = vst [vmem:[%s12726_s16 + $0xcd8] sm:$0xff] %v1048_v27 }
  0xee   : > { %1051 = vst [vmem:[%s12726_s16 + $0xce0] sm:$0xff] %v1050_v28  ;;  %1053 = vst [vmem:[%s12726_s16 + $0xce8] sm:$0xff] %v1052_v29  ;;  %v1054_v30 = vld [vmem:[%s12721_s15 + $0x19e0] sm:$0xff]  ;;  %v1056_v31 = vld [vmem:[%s12721_s15 + $0x19e8] sm:$0xff] }
  0xef   : > { %v1058_v32 = vld [vmem:[%s12721_s15 + $0x1a00] sm:$0xff]  ;;  %1055 = vst [vmem:[%s12726_s16 + $0xcf0] sm:$0xff] %v1054_v30  ;;  %1057 = vst [vmem:[%s12726_s16 + $0xcf8] sm:$0xff] %v1056_v31  ;;  %v1060_v33 = vld [vmem:[%s12721_s15 + $0x1a08] sm:$0xff] }
  0xf0   : > { %1059 = vst [vmem:[%s12726_s16 + $0xd00] sm:$0xff] %v1058_v32  ;;  %v1062_v34 = vld [vmem:[%s12721_s15 + $0x1a20] sm:$0xff]  ;;  %v1064_v35 = vld [vmem:[%s12721_s15 + $0x1a28] sm:$0xff]  ;;  %1061 = vst [vmem:[%s12726_s16 + $0xd08] sm:$0xff] %v1060_v33 }
  0xf1   : > { %1063 = vst [vmem:[%s12726_s16 + $0xd10] sm:$0xff] %v1062_v34  ;;  %1065 = vst [vmem:[%s12726_s16 + $0xd18] sm:$0xff] %v1064_v35  ;;  %v1066_v36 = vld [vmem:[%s12721_s15 + $0x1a40] sm:$0xff]  ;;  %v1068_v37 = vld [vmem:[%s12721_s15 + $0x1a48] sm:$0xff] }
  0xf2   : > { %v1070_v38 = vld [vmem:[%s12721_s15 + $0x1a60] sm:$0xff]  ;;  %1067 = vst [vmem:[%s12726_s16 + $0xd20] sm:$0xff] %v1066_v36  ;;  %1069 = vst [vmem:[%s12726_s16 + $0xd28] sm:$0xff] %v1068_v37  ;;  %v1072_v39 = vld [vmem:[%s12721_s15 + $0x1a68] sm:$0xff] }
  0xf3   : > { %1071 = vst [vmem:[%s12726_s16 + $0xd30] sm:$0xff] %v1070_v38  ;;  %v1074_v40 = vld [vmem:[%s12721_s15 + $0x1a80] sm:$0xff]  ;;  %v1076_v41 = vld [vmem:[%s12721_s15 + $0x1a88] sm:$0xff]  ;;  %1073 = vst [vmem:[%s12726_s16 + $0xd38] sm:$0xff] %v1072_v39 }
  0xf4   : > { %1075 = vst [vmem:[%s12726_s16 + $0xd40] sm:$0xff] %v1074_v40  ;;  %1077 = vst [vmem:[%s12726_s16 + $0xd48] sm:$0xff] %v1076_v41  ;;  %v1078_v42 = vld [vmem:[%s12721_s15 + $0x1aa0] sm:$0xff]  ;;  %v1080_v43 = vld [vmem:[%s12721_s15 + $0x1aa8] sm:$0xff] }
  0xf5   : > { %v1082_v44 = vld [vmem:[%s12721_s15 + $0x1ac0] sm:$0xff]  ;;  %1079 = vst [vmem:[%s12726_s16 + $0xd50] sm:$0xff] %v1078_v42  ;;  %1081 = vst [vmem:[%s12726_s16 + $0xd58] sm:$0xff] %v1080_v43  ;;  %v1084_v45 = vld [vmem:[%s12721_s15 + $0x1ac8] sm:$0xff] }
  0xf6   : > { %1083 = vst [vmem:[%s12726_s16 + $0xd60] sm:$0xff] %v1082_v44  ;;  %v1086_v46 = vld [vmem:[%s12721_s15 + $0x1ae0] sm:$0xff]  ;;  %v1088_v47 = vld [vmem:[%s12721_s15 + $0x1ae8] sm:$0xff]  ;;  %1085 = vst [vmem:[%s12726_s16 + $0xd68] sm:$0xff] %v1084_v45 }
  0xf7   : > { %1087 = vst [vmem:[%s12726_s16 + $0xd70] sm:$0xff] %v1086_v46  ;;  %1089 = vst [vmem:[%s12726_s16 + $0xd78] sm:$0xff] %v1088_v47  ;;  %v1090_v48 = vld [vmem:[%s12721_s15 + $0x1b00] sm:$0xff]  ;;  %v1092_v49 = vld [vmem:[%s12721_s15 + $0x1b08] sm:$0xff] }
  0xf8   : > { %v1094_v50 = vld [vmem:[%s12721_s15 + $0x1b20] sm:$0xff]  ;;  %1091 = vst [vmem:[%s12726_s16 + $0xd80] sm:$0xff] %v1090_v48  ;;  %1093 = vst [vmem:[%s12726_s16 + $0xd88] sm:$0xff] %v1092_v49  ;;  %v1096_v51 = vld [vmem:[%s12721_s15 + $0x1b28] sm:$0xff] }
  0xf9   : > { %1095 = vst [vmem:[%s12726_s16 + $0xd90] sm:$0xff] %v1094_v50  ;;  %v1098_v52 = vld [vmem:[%s12721_s15 + $0x1b40] sm:$0xff]  ;;  %v1100_v53 = vld [vmem:[%s12721_s15 + $0x1b48] sm:$0xff]  ;;  %1097 = vst [vmem:[%s12726_s16 + $0xd98] sm:$0xff] %v1096_v51 }
  0xfa   : > { %1099 = vst [vmem:[%s12726_s16 + $0xda0] sm:$0xff] %v1098_v52  ;;  %1101 = vst [vmem:[%s12726_s16 + $0xda8] sm:$0xff] %v1100_v53  ;;  %v1102_v54 = vld [vmem:[%s12721_s15 + $0x1b60] sm:$0xff]  ;;  %v1104_v55 = vld [vmem:[%s12721_s15 + $0x1b68] sm:$0xff] }
  0xfb   : > { %v1106_v56 = vld [vmem:[%s12721_s15 + $0x1b80] sm:$0xff]  ;;  %1103 = vst [vmem:[%s12726_s16 + $0xdb0] sm:$0xff] %v1102_v54  ;;  %1105 = vst [vmem:[%s12726_s16 + $0xdb8] sm:$0xff] %v1104_v55  ;;  %v1108_v57 = vld [vmem:[%s12721_s15 + $0x1b88] sm:$0xff] }
  0xfc   : > { %1107 = vst [vmem:[%s12726_s16 + $0xdc0] sm:$0xff] %v1106_v56  ;;  %v1110_v58 = vld [vmem:[%s12721_s15 + $0x1ba0] sm:$0xff]  ;;  %v1112_v59 = vld [vmem:[%s12721_s15 + $0x1ba8] sm:$0xff]  ;;  %1109 = vst [vmem:[%s12726_s16 + $0xdc8] sm:$0xff] %v1108_v57 }
  0xfd   : > { %1111 = vst [vmem:[%s12726_s16 + $0xdd0] sm:$0xff] %v1110_v58  ;;  %1113 = vst [vmem:[%s12726_s16 + $0xdd8] sm:$0xff] %v1112_v59  ;;  %v1114_v60 = vld [vmem:[%s12721_s15 + $0x1bc0] sm:$0xff]  ;;  %v1116_v61 = vld [vmem:[%s12721_s15 + $0x1bc8] sm:$0xff] }
  0xfe   : > { %v1118_v62 = vld [vmem:[%s12721_s15 + $0x1be0] sm:$0xff]  ;;  %1115 = vst [vmem:[%s12726_s16 + $0xde0] sm:$0xff] %v1114_v60  ;;  %1117 = vst [vmem:[%s12726_s16 + $0xde8] sm:$0xff] %v1116_v61  ;;  %v1120_v63 = vld [vmem:[%s12721_s15 + $0x1be8] sm:$0xff] }
  0xff   : > { %1119 = vst [vmem:[%s12726_s16 + $0xdf0] sm:$0xff] %v1118_v62  ;;  %v1122_v0 = vld [vmem:[%s12721_s15 + $0x1c00] sm:$0xff]  ;;  %v1124_v1 = vld [vmem:[%s12721_s15 + $0x1c08] sm:$0xff]  ;;  %1121 = vst [vmem:[%s12726_s16 + $0xdf8] sm:$0xff] %v1120_v63 }
 0x100   : > { %1123 = vst [vmem:[%s12726_s16 + $0xe00] sm:$0xff] %v1122_v0  ;;  %1125 = vst [vmem:[%s12726_s16 + $0xe08] sm:$0xff] %v1124_v1  ;;  %v1126_v2 = vld [vmem:[%s12721_s15 + $0x1c20] sm:$0xff]  ;;  %v1128_v3 = vld [vmem:[%s12721_s15 + $0x1c28] sm:$0xff] }
 0x101   : > { %v1130_v4 = vld [vmem:[%s12721_s15 + $0x1c40] sm:$0xff]  ;;  %1127 = vst [vmem:[%s12726_s16 + $0xe10] sm:$0xff] %v1126_v2  ;;  %1129 = vst [vmem:[%s12726_s16 + $0xe18] sm:$0xff] %v1128_v3  ;;  %v1132_v5 = vld [vmem:[%s12721_s15 + $0x1c48] sm:$0xff] }
 0x102   : > { %1131 = vst [vmem:[%s12726_s16 + $0xe20] sm:$0xff] %v1130_v4  ;;  %v1134_v6 = vld [vmem:[%s12721_s15 + $0x1c60] sm:$0xff]  ;;  %v1136_v7 = vld [vmem:[%s12721_s15 + $0x1c68] sm:$0xff]  ;;  %1133 = vst [vmem:[%s12726_s16 + $0xe28] sm:$0xff] %v1132_v5 }
 0x103   : > { %1135 = vst [vmem:[%s12726_s16 + $0xe30] sm:$0xff] %v1134_v6  ;;  %1137 = vst [vmem:[%s12726_s16 + $0xe38] sm:$0xff] %v1136_v7  ;;  %v1138_v8 = vld [vmem:[%s12721_s15 + $0x1c80] sm:$0xff]  ;;  %v1140_v9 = vld [vmem:[%s12721_s15 + $0x1c88] sm:$0xff] }
 0x104   : > { %v1142_v10 = vld [vmem:[%s12721_s15 + $0x1ca0] sm:$0xff]  ;;  %1139 = vst [vmem:[%s12726_s16 + $0xe40] sm:$0xff] %v1138_v8  ;;  %1141 = vst [vmem:[%s12726_s16 + $0xe48] sm:$0xff] %v1140_v9  ;;  %v1144_v11 = vld [vmem:[%s12721_s15 + $0x1ca8] sm:$0xff] }
 0x105   : > { %1143 = vst [vmem:[%s12726_s16 + $0xe50] sm:$0xff] %v1142_v10  ;;  %v1146_v12 = vld [vmem:[%s12721_s15 + $0x1cc0] sm:$0xff]  ;;  %v1148_v13 = vld [vmem:[%s12721_s15 + $0x1cc8] sm:$0xff]  ;;  %1145 = vst [vmem:[%s12726_s16 + $0xe58] sm:$0xff] %v1144_v11 }
 0x106   : > { %1147 = vst [vmem:[%s12726_s16 + $0xe60] sm:$0xff] %v1146_v12  ;;  %1149 = vst [vmem:[%s12726_s16 + $0xe68] sm:$0xff] %v1148_v13  ;;  %v1150_v14 = vld [vmem:[%s12721_s15 + $0x1ce0] sm:$0xff]  ;;  %v1152_v15 = vld [vmem:[%s12721_s15 + $0x1ce8] sm:$0xff] }
 0x107   : > { %v1154_v16 = vld [vmem:[%s12721_s15 + $0x1d00] sm:$0xff]  ;;  %1151 = vst [vmem:[%s12726_s16 + $0xe70] sm:$0xff] %v1150_v14  ;;  %1153 = vst [vmem:[%s12726_s16 + $0xe78] sm:$0xff] %v1152_v15  ;;  %v1156_v17 = vld [vmem:[%s12721_s15 + $0x1d08] sm:$0xff] }
 0x108   : > { %1155 = vst [vmem:[%s12726_s16 + $0xe80] sm:$0xff] %v1154_v16  ;;  %v1158_v18 = vld [vmem:[%s12721_s15 + $0x1d20] sm:$0xff]  ;;  %v1160_v19 = vld [vmem:[%s12721_s15 + $0x1d28] sm:$0xff]  ;;  %1157 = vst [vmem:[%s12726_s16 + $0xe88] sm:$0xff] %v1156_v17 }
 0x109   : > { %1159 = vst [vmem:[%s12726_s16 + $0xe90] sm:$0xff] %v1158_v18  ;;  %1161 = vst [vmem:[%s12726_s16 + $0xe98] sm:$0xff] %v1160_v19  ;;  %v1162_v20 = vld [vmem:[%s12721_s15 + $0x1d40] sm:$0xff]  ;;  %v1164_v21 = vld [vmem:[%s12721_s15 + $0x1d48] sm:$0xff] }
 0x10a   : > { %v1166_v22 = vld [vmem:[%s12721_s15 + $0x1d60] sm:$0xff]  ;;  %1163 = vst [vmem:[%s12726_s16 + $0xea0] sm:$0xff] %v1162_v20  ;;  %1165 = vst [vmem:[%s12726_s16 + $0xea8] sm:$0xff] %v1164_v21  ;;  %v1168_v23 = vld [vmem:[%s12721_s15 + $0x1d68] sm:$0xff] }
 0x10b   : > { %1167 = vst [vmem:[%s12726_s16 + $0xeb0] sm:$0xff] %v1166_v22  ;;  %v1170_v24 = vld [vmem:[%s12721_s15 + $0x1d80] sm:$0xff]  ;;  %v1172_v25 = vld [vmem:[%s12721_s15 + $0x1d88] sm:$0xff]  ;;  %1169 = vst [vmem:[%s12726_s16 + $0xeb8] sm:$0xff] %v1168_v23 }
 0x10c   : > { %1171 = vst [vmem:[%s12726_s16 + $0xec0] sm:$0xff] %v1170_v24  ;;  %1173 = vst [vmem:[%s12726_s16 + $0xec8] sm:$0xff] %v1172_v25  ;;  %v1174_v26 = vld [vmem:[%s12721_s15 + $0x1da0] sm:$0xff]  ;;  %v1176_v27 = vld [vmem:[%s12721_s15 + $0x1da8] sm:$0xff] }
 0x10d   : > { %v1178_v28 = vld [vmem:[%s12721_s15 + $0x1dc0] sm:$0xff]  ;;  %1175 = vst [vmem:[%s12726_s16 + $0xed0] sm:$0xff] %v1174_v26  ;;  %1177 = vst [vmem:[%s12726_s16 + $0xed8] sm:$0xff] %v1176_v27  ;;  %v1180_v29 = vld [vmem:[%s12721_s15 + $0x1dc8] sm:$0xff] }
 0x10e   : > { %1179 = vst [vmem:[%s12726_s16 + $0xee0] sm:$0xff] %v1178_v28  ;;  %v1182_v30 = vld [vmem:[%s12721_s15 + $0x1de0] sm:$0xff]  ;;  %v1184_v31 = vld [vmem:[%s12721_s15 + $0x1de8] sm:$0xff]  ;;  %1181 = vst [vmem:[%s12726_s16 + $0xee8] sm:$0xff] %v1180_v29 }
 0x10f   : > { %1183 = vst [vmem:[%s12726_s16 + $0xef0] sm:$0xff] %v1182_v30  ;;  %1185 = vst [vmem:[%s12726_s16 + $0xef8] sm:$0xff] %v1184_v31  ;;  %v1186_v32 = vld [vmem:[%s12721_s15 + $0x1e00] sm:$0xff]  ;;  %v1188_v33 = vld [vmem:[%s12721_s15 + $0x1e08] sm:$0xff] }
 0x110   : > { %v1190_v34 = vld [vmem:[%s12721_s15 + $0x1e20] sm:$0xff]  ;;  %1187 = vst [vmem:[%s12726_s16 + $0xf00] sm:$0xff] %v1186_v32  ;;  %1189 = vst [vmem:[%s12726_s16 + $0xf08] sm:$0xff] %v1188_v33  ;;  %v1192_v35 = vld [vmem:[%s12721_s15 + $0x1e28] sm:$0xff] }
 0x111   : > { %1191 = vst [vmem:[%s12726_s16 + $0xf10] sm:$0xff] %v1190_v34  ;;  %v1194_v36 = vld [vmem:[%s12721_s15 + $0x1e40] sm:$0xff]  ;;  %v1196_v37 = vld [vmem:[%s12721_s15 + $0x1e48] sm:$0xff]  ;;  %1193 = vst [vmem:[%s12726_s16 + $0xf18] sm:$0xff] %v1192_v35 }
 0x112   : > { %1195 = vst [vmem:[%s12726_s16 + $0xf20] sm:$0xff] %v1194_v36  ;;  %1197 = vst [vmem:[%s12726_s16 + $0xf28] sm:$0xff] %v1196_v37  ;;  %v1198_v38 = vld [vmem:[%s12721_s15 + $0x1e60] sm:$0xff]  ;;  %v1200_v39 = vld [vmem:[%s12721_s15 + $0x1e68] sm:$0xff] }
 0x113   : > { %v1202_v40 = vld [vmem:[%s12721_s15 + $0x1e80] sm:$0xff]  ;;  %1199 = vst [vmem:[%s12726_s16 + $0xf30] sm:$0xff] %v1198_v38  ;;  %1201 = vst [vmem:[%s12726_s16 + $0xf38] sm:$0xff] %v1200_v39  ;;  %v1204_v41 = vld [vmem:[%s12721_s15 + $0x1e88] sm:$0xff] }
 0x114   : > { %1203 = vst [vmem:[%s12726_s16 + $0xf40] sm:$0xff] %v1202_v40  ;;  %v1206_v42 = vld [vmem:[%s12721_s15 + $0x1ea0] sm:$0xff]  ;;  %v1208_v43 = vld [vmem:[%s12721_s15 + $0x1ea8] sm:$0xff]  ;;  %1205 = vst [vmem:[%s12726_s16 + $0xf48] sm:$0xff] %v1204_v41 }
 0x115   : > { %1207 = vst [vmem:[%s12726_s16 + $0xf50] sm:$0xff] %v1206_v42  ;;  %1209 = vst [vmem:[%s12726_s16 + $0xf58] sm:$0xff] %v1208_v43  ;;  %v1210_v44 = vld [vmem:[%s12721_s15 + $0x1ec0] sm:$0xff]  ;;  %v1212_v45 = vld [vmem:[%s12721_s15 + $0x1ec8] sm:$0xff] }
 0x116   : > { %v1214_v46 = vld [vmem:[%s12721_s15 + $0x1ee0] sm:$0xff]  ;;  %1211 = vst [vmem:[%s12726_s16 + $0xf60] sm:$0xff] %v1210_v44  ;;  %1213 = vst [vmem:[%s12726_s16 + $0xf68] sm:$0xff] %v1212_v45  ;;  %v1216_v47 = vld [vmem:[%s12721_s15 + $0x1ee8] sm:$0xff] }
 0x117   : > { %1215 = vst [vmem:[%s12726_s16 + $0xf70] sm:$0xff] %v1214_v46  ;;  %v1218_v48 = vld [vmem:[%s12721_s15 + $0x1f00] sm:$0xff]  ;;  %v1220_v49 = vld [vmem:[%s12721_s15 + $0x1f08] sm:$0xff]  ;;  %1217 = vst [vmem:[%s12726_s16 + $0xf78] sm:$0xff] %v1216_v47 }
 0x118   : > { %1219 = vst [vmem:[%s12726_s16 + $0xf80] sm:$0xff] %v1218_v48  ;;  %1221 = vst [vmem:[%s12726_s16 + $0xf88] sm:$0xff] %v1220_v49  ;;  %v1222_v50 = vld [vmem:[%s12721_s15 + $0x1f20] sm:$0xff]  ;;  %v1224_v51 = vld [vmem:[%s12721_s15 + $0x1f28] sm:$0xff] }
 0x119   : > { %v1226_v52 = vld [vmem:[%s12721_s15 + $0x1f40] sm:$0xff]  ;;  %1223 = vst [vmem:[%s12726_s16 + $0xf90] sm:$0xff] %v1222_v50  ;;  %1225 = vst [vmem:[%s12726_s16 + $0xf98] sm:$0xff] %v1224_v51  ;;  %v1228_v53 = vld [vmem:[%s12721_s15 + $0x1f48] sm:$0xff] }
 0x11a   : > { %1227 = vst [vmem:[%s12726_s16 + $0xfa0] sm:$0xff] %v1226_v52  ;;  %v1230_v54 = vld [vmem:[%s12721_s15 + $0x1f60] sm:$0xff]  ;;  %v1232_v55 = vld [vmem:[%s12721_s15 + $0x1f68] sm:$0xff]  ;;  %1229 = vst [vmem:[%s12726_s16 + $0xfa8] sm:$0xff] %v1228_v53 }
 0x11b   : > { %1231 = vst [vmem:[%s12726_s16 + $0xfb0] sm:$0xff] %v1230_v54  ;;  %1233 = vst [vmem:[%s12726_s16 + $0xfb8] sm:$0xff] %v1232_v55  ;;  %v1234_v56 = vld [vmem:[%s12721_s15 + $0x1f80] sm:$0xff]  ;;  %v1236_v57 = vld [vmem:[%s12721_s15 + $0x1f88] sm:$0xff] }
 0x11c   : > { %v1238_v58 = vld [vmem:[%s12721_s15 + $0x1fa0] sm:$0xff]  ;;  %1235 = vst [vmem:[%s12726_s16 + $0xfc0] sm:$0xff] %v1234_v56  ;;  %1237 = vst [vmem:[%s12726_s16 + $0xfc8] sm:$0xff] %v1236_v57  ;;  %v1240_v59 = vld [vmem:[%s12721_s15 + $0x1fa8] sm:$0xff] }
 0x11d   : > { %1239 = vst [vmem:[%s12726_s16 + $0xfd0] sm:$0xff] %v1238_v58  ;;  %v1242_v60 = vld [vmem:[%s12721_s15 + $0x1fc0] sm:$0xff]  ;;  %v1244_v61 = vld [vmem:[%s12721_s15 + $0x1fc8] sm:$0xff]  ;;  %1241 = vst [vmem:[%s12726_s16 + $0xfd8] sm:$0xff] %v1240_v59 }
 0x11e   : > { %1243 = vst [vmem:[%s12726_s16 + $0xfe0] sm:$0xff] %v1242_v60  ;;  %1245 = vst [vmem:[%s12726_s16 + $0xfe8] sm:$0xff] %v1244_v61  ;;  %v1246_v62 = vld [vmem:[%s12721_s15 + $0x1fe0] sm:$0xff]  ;;  %v1248_v63 = vld [vmem:[%s12721_s15 + $0x1fe8] sm:$0xff] }
 0x11f   : > { %v1250_v0 = vld [vmem:[%s12721_s15 + $0x2000] sm:$0xff]  ;;  %1247 = vst [vmem:[%s12726_s16 + $0xff0] sm:$0xff] %v1246_v62  ;;  %1249 = vst [vmem:[%s12726_s16 + $0xff8] sm:$0xff] %v1248_v63  ;;  %v1252_v1 = vld [vmem:[%s12721_s15 + $0x2008] sm:$0xff] }
 0x120   : > { %1251 = vst [vmem:[%s12726_s16 + $0x1000] sm:$0xff] %v1250_v0  ;;  %v1254_v2 = vld [vmem:[%s12721_s15 + $0x2020] sm:$0xff]  ;;  %v1256_v3 = vld [vmem:[%s12721_s15 + $0x2028] sm:$0xff]  ;;  %1253 = vst [vmem:[%s12726_s16 + $0x1008] sm:$0xff] %v1252_v1 }
 0x121   : > { %1255 = vst [vmem:[%s12726_s16 + $0x1010] sm:$0xff] %v1254_v2  ;;  %1257 = vst [vmem:[%s12726_s16 + $0x1018] sm:$0xff] %v1256_v3  ;;  %v1258_v4 = vld [vmem:[%s12721_s15 + $0x2040] sm:$0xff]  ;;  %v1260_v5 = vld [vmem:[%s12721_s15 + $0x2048] sm:$0xff] }
 0x122   : > { %v1262_v6 = vld [vmem:[%s12721_s15 + $0x2060] sm:$0xff]  ;;  %1259 = vst [vmem:[%s12726_s16 + $0x1020] sm:$0xff] %v1258_v4  ;;  %1261 = vst [vmem:[%s12726_s16 + $0x1028] sm:$0xff] %v1260_v5  ;;  %v1264_v7 = vld [vmem:[%s12721_s15 + $0x2068] sm:$0xff] }
 0x123   : > { %1263 = vst [vmem:[%s12726_s16 + $0x1030] sm:$0xff] %v1262_v6  ;;  %v1266_v8 = vld [vmem:[%s12721_s15 + $0x2080] sm:$0xff]  ;;  %v1268_v9 = vld [vmem:[%s12721_s15 + $0x2088] sm:$0xff]  ;;  %1265 = vst [vmem:[%s12726_s16 + $0x1038] sm:$0xff] %v1264_v7 }
 0x124   : > { %1267 = vst [vmem:[%s12726_s16 + $0x1040] sm:$0xff] %v1266_v8  ;;  %1269 = vst [vmem:[%s12726_s16 + $0x1048] sm:$0xff] %v1268_v9  ;;  %v1270_v10 = vld [vmem:[%s12721_s15 + $0x20a0] sm:$0xff]  ;;  %v1272_v11 = vld [vmem:[%s12721_s15 + $0x20a8] sm:$0xff] }
 0x125   : > { %v1274_v12 = vld [vmem:[%s12721_s15 + $0x20c0] sm:$0xff]  ;;  %1271 = vst [vmem:[%s12726_s16 + $0x1050] sm:$0xff] %v1270_v10  ;;  %1273 = vst [vmem:[%s12726_s16 + $0x1058] sm:$0xff] %v1272_v11  ;;  %v1276_v13 = vld [vmem:[%s12721_s15 + $0x20c8] sm:$0xff] }
 0x126   : > { %1275 = vst [vmem:[%s12726_s16 + $0x1060] sm:$0xff] %v1274_v12  ;;  %v1278_v14 = vld [vmem:[%s12721_s15 + $0x20e0] sm:$0xff]  ;;  %v1280_v15 = vld [vmem:[%s12721_s15 + $0x20e8] sm:$0xff]  ;;  %1277 = vst [vmem:[%s12726_s16 + $0x1068] sm:$0xff] %v1276_v13 }
 0x127   : > { %1279 = vst [vmem:[%s12726_s16 + $0x1070] sm:$0xff] %v1278_v14  ;;  %1281 = vst [vmem:[%s12726_s16 + $0x1078] sm:$0xff] %v1280_v15  ;;  %v1282_v16 = vld [vmem:[%s12721_s15 + $0x2100] sm:$0xff]  ;;  %v1284_v17 = vld [vmem:[%s12721_s15 + $0x2108] sm:$0xff] }
 0x128   : > { %v1286_v18 = vld [vmem:[%s12721_s15 + $0x2120] sm:$0xff]  ;;  %1283 = vst [vmem:[%s12726_s16 + $0x1080] sm:$0xff] %v1282_v16  ;;  %1285 = vst [vmem:[%s12726_s16 + $0x1088] sm:$0xff] %v1284_v17  ;;  %v1288_v19 = vld [vmem:[%s12721_s15 + $0x2128] sm:$0xff] }
 0x129   : > { %1287 = vst [vmem:[%s12726_s16 + $0x1090] sm:$0xff] %v1286_v18  ;;  %v1290_v20 = vld [vmem:[%s12721_s15 + $0x2140] sm:$0xff]  ;;  %v1292_v21 = vld [vmem:[%s12721_s15 + $0x2148] sm:$0xff]  ;;  %1289 = vst [vmem:[%s12726_s16 + $0x1098] sm:$0xff] %v1288_v19 }
 0x12a   : > { %1291 = vst [vmem:[%s12726_s16 + $0x10a0] sm:$0xff] %v1290_v20  ;;  %1293 = vst [vmem:[%s12726_s16 + $0x10a8] sm:$0xff] %v1292_v21  ;;  %v1294_v22 = vld [vmem:[%s12721_s15 + $0x2160] sm:$0xff]  ;;  %v1296_v23 = vld [vmem:[%s12721_s15 + $0x2168] sm:$0xff] }
 0x12b   : > { %v1298_v24 = vld [vmem:[%s12721_s15 + $0x2180] sm:$0xff]  ;;  %1295 = vst [vmem:[%s12726_s16 + $0x10b0] sm:$0xff] %v1294_v22  ;;  %1297 = vst [vmem:[%s12726_s16 + $0x10b8] sm:$0xff] %v1296_v23  ;;  %v1300_v25 = vld [vmem:[%s12721_s15 + $0x2188] sm:$0xff] }
 0x12c   : > { %1299 = vst [vmem:[%s12726_s16 + $0x10c0] sm:$0xff] %v1298_v24  ;;  %v1302_v26 = vld [vmem:[%s12721_s15 + $0x21a0] sm:$0xff]  ;;  %v1304_v27 = vld [vmem:[%s12721_s15 + $0x21a8] sm:$0xff]  ;;  %1301 = vst [vmem:[%s12726_s16 + $0x10c8] sm:$0xff] %v1300_v25 }
 0x12d   : > { %1303 = vst [vmem:[%s12726_s16 + $0x10d0] sm:$0xff] %v1302_v26  ;;  %1305 = vst [vmem:[%s12726_s16 + $0x10d8] sm:$0xff] %v1304_v27  ;;  %v1306_v28 = vld [vmem:[%s12721_s15 + $0x21c0] sm:$0xff]  ;;  %v1308_v29 = vld [vmem:[%s12721_s15 + $0x21c8] sm:$0xff] }
 0x12e   : > { %v1310_v30 = vld [vmem:[%s12721_s15 + $0x21e0] sm:$0xff]  ;;  %1307 = vst [vmem:[%s12726_s16 + $0x10e0] sm:$0xff] %v1306_v28  ;;  %1309 = vst [vmem:[%s12726_s16 + $0x10e8] sm:$0xff] %v1308_v29  ;;  %v1312_v31 = vld [vmem:[%s12721_s15 + $0x21e8] sm:$0xff] }
 0x12f   : > { %1311 = vst [vmem:[%s12726_s16 + $0x10f0] sm:$0xff] %v1310_v30  ;;  %v1314_v32 = vld [vmem:[%s12721_s15 + $0x2200] sm:$0xff]  ;;  %v1316_v33 = vld [vmem:[%s12721_s15 + $0x2208] sm:$0xff]  ;;  %1313 = vst [vmem:[%s12726_s16 + $0x10f8] sm:$0xff] %v1312_v31 }
 0x130   : > { %1315 = vst [vmem:[%s12726_s16 + $0x1100] sm:$0xff] %v1314_v32  ;;  %1317 = vst [vmem:[%s12726_s16 + $0x1108] sm:$0xff] %v1316_v33  ;;  %v1318_v34 = vld [vmem:[%s12721_s15 + $0x2220] sm:$0xff]  ;;  %v1320_v35 = vld [vmem:[%s12721_s15 + $0x2228] sm:$0xff] }
 0x131   : > { %v1322_v36 = vld [vmem:[%s12721_s15 + $0x2240] sm:$0xff]  ;;  %1319 = vst [vmem:[%s12726_s16 + $0x1110] sm:$0xff] %v1318_v34  ;;  %1321 = vst [vmem:[%s12726_s16 + $0x1118] sm:$0xff] %v1320_v35  ;;  %v1324_v37 = vld [vmem:[%s12721_s15 + $0x2248] sm:$0xff] }
 0x132   : > { %1323 = vst [vmem:[%s12726_s16 + $0x1120] sm:$0xff] %v1322_v36  ;;  %v1326_v38 = vld [vmem:[%s12721_s15 + $0x2260] sm:$0xff]  ;;  %v1328_v39 = vld [vmem:[%s12721_s15 + $0x2268] sm:$0xff]  ;;  %1325 = vst [vmem:[%s12726_s16 + $0x1128] sm:$0xff] %v1324_v37 }
 0x133   : > { %1327 = vst [vmem:[%s12726_s16 + $0x1130] sm:$0xff] %v1326_v38  ;;  %1329 = vst [vmem:[%s12726_s16 + $0x1138] sm:$0xff] %v1328_v39  ;;  %v1330_v40 = vld [vmem:[%s12721_s15 + $0x2280] sm:$0xff]  ;;  %v1332_v41 = vld [vmem:[%s12721_s15 + $0x2288] sm:$0xff] }
 0x134   : > { %v1334_v42 = vld [vmem:[%s12721_s15 + $0x22a0] sm:$0xff]  ;;  %1331 = vst [vmem:[%s12726_s16 + $0x1140] sm:$0xff] %v1330_v40  ;;  %1333 = vst [vmem:[%s12726_s16 + $0x1148] sm:$0xff] %v1332_v41  ;;  %v1336_v43 = vld [vmem:[%s12721_s15 + $0x22a8] sm:$0xff] }
 0x135   : > { %1335 = vst [vmem:[%s12726_s16 + $0x1150] sm:$0xff] %v1334_v42  ;;  %v1338_v44 = vld [vmem:[%s12721_s15 + $0x22c0] sm:$0xff]  ;;  %v1340_v45 = vld [vmem:[%s12721_s15 + $0x22c8] sm:$0xff]  ;;  %1337 = vst [vmem:[%s12726_s16 + $0x1158] sm:$0xff] %v1336_v43 }
 0x136   : > { %1339 = vst [vmem:[%s12726_s16 + $0x1160] sm:$0xff] %v1338_v44  ;;  %1341 = vst [vmem:[%s12726_s16 + $0x1168] sm:$0xff] %v1340_v45  ;;  %v1342_v46 = vld [vmem:[%s12721_s15 + $0x22e0] sm:$0xff]  ;;  %v1344_v47 = vld [vmem:[%s12721_s15 + $0x22e8] sm:$0xff] }
 0x137   : > { %v1346_v48 = vld [vmem:[%s12721_s15 + $0x2300] sm:$0xff]  ;;  %1343 = vst [vmem:[%s12726_s16 + $0x1170] sm:$0xff] %v1342_v46  ;;  %1345 = vst [vmem:[%s12726_s16 + $0x1178] sm:$0xff] %v1344_v47  ;;  %v1348_v49 = vld [vmem:[%s12721_s15 + $0x2308] sm:$0xff] }
 0x138   : > { %1347 = vst [vmem:[%s12726_s16 + $0x1180] sm:$0xff] %v1346_v48  ;;  %v1350_v50 = vld [vmem:[%s12721_s15 + $0x2320] sm:$0xff]  ;;  %v1352_v51 = vld [vmem:[%s12721_s15 + $0x2328] sm:$0xff]  ;;  %1349 = vst [vmem:[%s12726_s16 + $0x1188] sm:$0xff] %v1348_v49 }
 0x139   : > { %1351 = vst [vmem:[%s12726_s16 + $0x1190] sm:$0xff] %v1350_v50  ;;  %1353 = vst [vmem:[%s12726_s16 + $0x1198] sm:$0xff] %v1352_v51  ;;  %v1354_v52 = vld [vmem:[%s12721_s15 + $0x2340] sm:$0xff]  ;;  %v1356_v53 = vld [vmem:[%s12721_s15 + $0x2348] sm:$0xff] }
 0x13a   : > { %v1358_v54 = vld [vmem:[%s12721_s15 + $0x2360] sm:$0xff]  ;;  %1355 = vst [vmem:[%s12726_s16 + $0x11a0] sm:$0xff] %v1354_v52  ;;  %1357 = vst [vmem:[%s12726_s16 + $0x11a8] sm:$0xff] %v1356_v53  ;;  %v1360_v55 = vld [vmem:[%s12721_s15 + $0x2368] sm:$0xff] }
 0x13b   : > { %1359 = vst [vmem:[%s12726_s16 + $0x11b0] sm:$0xff] %v1358_v54  ;;  %v1362_v56 = vld [vmem:[%s12721_s15 + $0x2380] sm:$0xff]  ;;  %v1364_v57 = vld [vmem:[%s12721_s15 + $0x2388] sm:$0xff]  ;;  %1361 = vst [vmem:[%s12726_s16 + $0x11b8] sm:$0xff] %v1360_v55 }
 0x13c   : > { %1363 = vst [vmem:[%s12726_s16 + $0x11c0] sm:$0xff] %v1362_v56  ;;  %1365 = vst [vmem:[%s12726_s16 + $0x11c8] sm:$0xff] %v1364_v57  ;;  %v1366_v58 = vld [vmem:[%s12721_s15 + $0x23a0] sm:$0xff]  ;;  %v1368_v59 = vld [vmem:[%s12721_s15 + $0x23a8] sm:$0xff] }
 0x13d   : > { %v1370_v60 = vld [vmem:[%s12721_s15 + $0x23c0] sm:$0xff]  ;;  %1367 = vst [vmem:[%s12726_s16 + $0x11d0] sm:$0xff] %v1366_v58  ;;  %1369 = vst [vmem:[%s12726_s16 + $0x11d8] sm:$0xff] %v1368_v59  ;;  %v1372_v61 = vld [vmem:[%s12721_s15 + $0x23c8] sm:$0xff] }
 0x13e   : > { %1371 = vst [vmem:[%s12726_s16 + $0x11e0] sm:$0xff] %v1370_v60  ;;  %v1374_v62 = vld [vmem:[%s12721_s15 + $0x23e0] sm:$0xff]  ;;  %v1376_v63 = vld [vmem:[%s12721_s15 + $0x23e8] sm:$0xff]  ;;  %1373 = vst [vmem:[%s12726_s16 + $0x11e8] sm:$0xff] %v1372_v61 }
 0x13f   : > { %1375 = vst [vmem:[%s12726_s16 + $0x11f0] sm:$0xff] %v1374_v62  ;;  %1377 = vst [vmem:[%s12726_s16 + $0x11f8] sm:$0xff] %v1376_v63  ;;  %v1378_v0 = vld [vmem:[%s12721_s15 + $0x2400] sm:$0xff]  ;;  %v1380_v1 = vld [vmem:[%s12721_s15 + $0x2408] sm:$0xff] }
 0x140   : > { %v1382_v2 = vld [vmem:[%s12721_s15 + $0x2420] sm:$0xff]  ;;  %1379 = vst [vmem:[%s12726_s16 + $0x1200] sm:$0xff] %v1378_v0  ;;  %1381 = vst [vmem:[%s12726_s16 + $0x1208] sm:$0xff] %v1380_v1  ;;  %v1384_v3 = vld [vmem:[%s12721_s15 + $0x2428] sm:$0xff] }
 0x141   : > { %1383 = vst [vmem:[%s12726_s16 + $0x1210] sm:$0xff] %v1382_v2  ;;  %v1386_v4 = vld [vmem:[%s12721_s15 + $0x2440] sm:$0xff]  ;;  %v1388_v5 = vld [vmem:[%s12721_s15 + $0x2448] sm:$0xff]  ;;  %1385 = vst [vmem:[%s12726_s16 + $0x1218] sm:$0xff] %v1384_v3 }
 0x142   : > { %1387 = vst [vmem:[%s12726_s16 + $0x1220] sm:$0xff] %v1386_v4  ;;  %1389 = vst [vmem:[%s12726_s16 + $0x1228] sm:$0xff] %v1388_v5  ;;  %v1390_v6 = vld [vmem:[%s12721_s15 + $0x2460] sm:$0xff]  ;;  %v1392_v7 = vld [vmem:[%s12721_s15 + $0x2468] sm:$0xff] }
 0x143   : > { %v1394_v8 = vld [vmem:[%s12721_s15 + $0x2480] sm:$0xff]  ;;  %1391 = vst [vmem:[%s12726_s16 + $0x1230] sm:$0xff] %v1390_v6  ;;  %1393 = vst [vmem:[%s12726_s16 + $0x1238] sm:$0xff] %v1392_v7  ;;  %v1396_v9 = vld [vmem:[%s12721_s15 + $0x2488] sm:$0xff] }
 0x144   : > { %1395 = vst [vmem:[%s12726_s16 + $0x1240] sm:$0xff] %v1394_v8  ;;  %v1398_v10 = vld [vmem:[%s12721_s15 + $0x24a0] sm:$0xff]  ;;  %v1400_v11 = vld [vmem:[%s12721_s15 + $0x24a8] sm:$0xff]  ;;  %1397 = vst [vmem:[%s12726_s16 + $0x1248] sm:$0xff] %v1396_v9 }
 0x145   : > { %1399 = vst [vmem:[%s12726_s16 + $0x1250] sm:$0xff] %v1398_v10  ;;  %1401 = vst [vmem:[%s12726_s16 + $0x1258] sm:$0xff] %v1400_v11  ;;  %v1402_v12 = vld [vmem:[%s12721_s15 + $0x24c0] sm:$0xff]  ;;  %v1404_v13 = vld [vmem:[%s12721_s15 + $0x24c8] sm:$0xff] }
 0x146   : > { %v1406_v14 = vld [vmem:[%s12721_s15 + $0x24e0] sm:$0xff]  ;;  %1403 = vst [vmem:[%s12726_s16 + $0x1260] sm:$0xff] %v1402_v12  ;;  %1405 = vst [vmem:[%s12726_s16 + $0x1268] sm:$0xff] %v1404_v13  ;;  %v1408_v15 = vld [vmem:[%s12721_s15 + $0x24e8] sm:$0xff] }
 0x147   : > { %1407 = vst [vmem:[%s12726_s16 + $0x1270] sm:$0xff] %v1406_v14  ;;  %v1410_v16 = vld [vmem:[%s12721_s15 + $0x2500] sm:$0xff]  ;;  %v1412_v17 = vld [vmem:[%s12721_s15 + $0x2508] sm:$0xff]  ;;  %1409 = vst [vmem:[%s12726_s16 + $0x1278] sm:$0xff] %v1408_v15 }
 0x148   : > { %1411 = vst [vmem:[%s12726_s16 + $0x1280] sm:$0xff] %v1410_v16  ;;  %1413 = vst [vmem:[%s12726_s16 + $0x1288] sm:$0xff] %v1412_v17  ;;  %v1414_v18 = vld [vmem:[%s12721_s15 + $0x2520] sm:$0xff]  ;;  %v1416_v19 = vld [vmem:[%s12721_s15 + $0x2528] sm:$0xff] }
 0x149   : > { %v1418_v20 = vld [vmem:[%s12721_s15 + $0x2540] sm:$0xff]  ;;  %1415 = vst [vmem:[%s12726_s16 + $0x1290] sm:$0xff] %v1414_v18  ;;  %1417 = vst [vmem:[%s12726_s16 + $0x1298] sm:$0xff] %v1416_v19  ;;  %v1420_v21 = vld [vmem:[%s12721_s15 + $0x2548] sm:$0xff] }
 0x14a   : > { %1419 = vst [vmem:[%s12726_s16 + $0x12a0] sm:$0xff] %v1418_v20  ;;  %v1422_v22 = vld [vmem:[%s12721_s15 + $0x2560] sm:$0xff]  ;;  %v1424_v23 = vld [vmem:[%s12721_s15 + $0x2568] sm:$0xff]  ;;  %1421 = vst [vmem:[%s12726_s16 + $0x12a8] sm:$0xff] %v1420_v21 }
 0x14b   : > { %1423 = vst [vmem:[%s12726_s16 + $0x12b0] sm:$0xff] %v1422_v22  ;;  %1425 = vst [vmem:[%s12726_s16 + $0x12b8] sm:$0xff] %v1424_v23  ;;  %v1426_v24 = vld [vmem:[%s12721_s15 + $0x2580] sm:$0xff]  ;;  %v1428_v25 = vld [vmem:[%s12721_s15 + $0x2588] sm:$0xff] }
 0x14c   : > { %v1430_v26 = vld [vmem:[%s12721_s15 + $0x25a0] sm:$0xff]  ;;  %1427 = vst [vmem:[%s12726_s16 + $0x12c0] sm:$0xff] %v1426_v24  ;;  %1429 = vst [vmem:[%s12726_s16 + $0x12c8] sm:$0xff] %v1428_v25  ;;  %v1432_v27 = vld [vmem:[%s12721_s15 + $0x25a8] sm:$0xff] }
 0x14d   : > { %1431 = vst [vmem:[%s12726_s16 + $0x12d0] sm:$0xff] %v1430_v26  ;;  %v1434_v28 = vld [vmem:[%s12721_s15 + $0x25c0] sm:$0xff]  ;;  %v1436_v29 = vld [vmem:[%s12721_s15 + $0x25c8] sm:$0xff]  ;;  %1433 = vst [vmem:[%s12726_s16 + $0x12d8] sm:$0xff] %v1432_v27 }
 0x14e   : > { %1435 = vst [vmem:[%s12726_s16 + $0x12e0] sm:$0xff] %v1434_v28  ;;  %1437 = vst [vmem:[%s12726_s16 + $0x12e8] sm:$0xff] %v1436_v29  ;;  %v1438_v30 = vld [vmem:[%s12721_s15 + $0x25e0] sm:$0xff]  ;;  %v1440_v31 = vld [vmem:[%s12721_s15 + $0x25e8] sm:$0xff] }
 0x14f   : > { %v1442_v32 = vld [vmem:[%s12721_s15 + $0x2600] sm:$0xff]  ;;  %1439 = vst [vmem:[%s12726_s16 + $0x12f0] sm:$0xff] %v1438_v30  ;;  %1441 = vst [vmem:[%s12726_s16 + $0x12f8] sm:$0xff] %v1440_v31  ;;  %v1444_v33 = vld [vmem:[%s12721_s15 + $0x2608] sm:$0xff] }
 0x150   : > { %1443 = vst [vmem:[%s12726_s16 + $0x1300] sm:$0xff] %v1442_v32  ;;  %v1446_v34 = vld [vmem:[%s12721_s15 + $0x2620] sm:$0xff]  ;;  %v1448_v35 = vld [vmem:[%s12721_s15 + $0x2628] sm:$0xff]  ;;  %1445 = vst [vmem:[%s12726_s16 + $0x1308] sm:$0xff] %v1444_v33 }
 0x151   : > { %1447 = vst [vmem:[%s12726_s16 + $0x1310] sm:$0xff] %v1446_v34  ;;  %1449 = vst [vmem:[%s12726_s16 + $0x1318] sm:$0xff] %v1448_v35  ;;  %v1450_v36 = vld [vmem:[%s12721_s15 + $0x2640] sm:$0xff]  ;;  %v1452_v37 = vld [vmem:[%s12721_s15 + $0x2648] sm:$0xff] }
 0x152   : > { %v1454_v38 = vld [vmem:[%s12721_s15 + $0x2660] sm:$0xff]  ;;  %1451 = vst [vmem:[%s12726_s16 + $0x1320] sm:$0xff] %v1450_v36  ;;  %1453 = vst [vmem:[%s12726_s16 + $0x1328] sm:$0xff] %v1452_v37  ;;  %v1456_v39 = vld [vmem:[%s12721_s15 + $0x2668] sm:$0xff] }
 0x153   : > { %1455 = vst [vmem:[%s12726_s16 + $0x1330] sm:$0xff] %v1454_v38  ;;  %v1458_v40 = vld [vmem:[%s12721_s15 + $0x2680] sm:$0xff]  ;;  %v1460_v41 = vld [vmem:[%s12721_s15 + $0x2688] sm:$0xff]  ;;  %1457 = vst [vmem:[%s12726_s16 + $0x1338] sm:$0xff] %v1456_v39 }
 0x154   : > { %1459 = vst [vmem:[%s12726_s16 + $0x1340] sm:$0xff] %v1458_v40  ;;  %1461 = vst [vmem:[%s12726_s16 + $0x1348] sm:$0xff] %v1460_v41  ;;  %v1462_v42 = vld [vmem:[%s12721_s15 + $0x26a0] sm:$0xff]  ;;  %v1464_v43 = vld [vmem:[%s12721_s15 + $0x26a8] sm:$0xff] }
 0x155   : > { %v1466_v44 = vld [vmem:[%s12721_s15 + $0x26c0] sm:$0xff]  ;;  %1463 = vst [vmem:[%s12726_s16 + $0x1350] sm:$0xff] %v1462_v42  ;;  %1465 = vst [vmem:[%s12726_s16 + $0x1358] sm:$0xff] %v1464_v43  ;;  %v1468_v45 = vld [vmem:[%s12721_s15 + $0x26c8] sm:$0xff] }
 0x156   : > { %1467 = vst [vmem:[%s12726_s16 + $0x1360] sm:$0xff] %v1466_v44  ;;  %v1470_v46 = vld [vmem:[%s12721_s15 + $0x26e0] sm:$0xff]  ;;  %v1472_v47 = vld [vmem:[%s12721_s15 + $0x26e8] sm:$0xff]  ;;  %1469 = vst [vmem:[%s12726_s16 + $0x1368] sm:$0xff] %v1468_v45 }
 0x157   : > { %1471 = vst [vmem:[%s12726_s16 + $0x1370] sm:$0xff] %v1470_v46  ;;  %1473 = vst [vmem:[%s12726_s16 + $0x1378] sm:$0xff] %v1472_v47  ;;  %v1474_v48 = vld [vmem:[%s12721_s15 + $0x2700] sm:$0xff]  ;;  %v1476_v49 = vld [vmem:[%s12721_s15 + $0x2708] sm:$0xff] }
 0x158   : > { %v1478_v50 = vld [vmem:[%s12721_s15 + $0x2720] sm:$0xff]  ;;  %1475 = vst [vmem:[%s12726_s16 + $0x1380] sm:$0xff] %v1474_v48  ;;  %1477 = vst [vmem:[%s12726_s16 + $0x1388] sm:$0xff] %v1476_v49  ;;  %v1480_v51 = vld [vmem:[%s12721_s15 + $0x2728] sm:$0xff] }
 0x159   : > { %1479 = vst [vmem:[%s12726_s16 + $0x1390] sm:$0xff] %v1478_v50  ;;  %v1482_v52 = vld [vmem:[%s12721_s15 + $0x2740] sm:$0xff]  ;;  %v1484_v53 = vld [vmem:[%s12721_s15 + $0x2748] sm:$0xff]  ;;  %1481 = vst [vmem:[%s12726_s16 + $0x1398] sm:$0xff] %v1480_v51 }
 0x15a   : > { %1483 = vst [vmem:[%s12726_s16 + $0x13a0] sm:$0xff] %v1482_v52  ;;  %1485 = vst [vmem:[%s12726_s16 + $0x13a8] sm:$0xff] %v1484_v53  ;;  %v1486_v54 = vld [vmem:[%s12721_s15 + $0x2760] sm:$0xff]  ;;  %v1488_v55 = vld [vmem:[%s12721_s15 + $0x2768] sm:$0xff] }
 0x15b   : > { %v1490_v56 = vld [vmem:[%s12721_s15 + $0x2780] sm:$0xff]  ;;  %1487 = vst [vmem:[%s12726_s16 + $0x13b0] sm:$0xff] %v1486_v54  ;;  %1489 = vst [vmem:[%s12726_s16 + $0x13b8] sm:$0xff] %v1488_v55  ;;  %v1492_v57 = vld [vmem:[%s12721_s15 + $0x2788] sm:$0xff] }
 0x15c   : > { %1491 = vst [vmem:[%s12726_s16 + $0x13c0] sm:$0xff] %v1490_v56  ;;  %v1494_v58 = vld [vmem:[%s12721_s15 + $0x27a0] sm:$0xff]  ;;  %v1496_v59 = vld [vmem:[%s12721_s15 + $0x27a8] sm:$0xff]  ;;  %1493 = vst [vmem:[%s12726_s16 + $0x13c8] sm:$0xff] %v1492_v57 }
 0x15d   : > { %1495 = vst [vmem:[%s12726_s16 + $0x13d0] sm:$0xff] %v1494_v58  ;;  %1497 = vst [vmem:[%s12726_s16 + $0x13d8] sm:$0xff] %v1496_v59  ;;  %v1498_v60 = vld [vmem:[%s12721_s15 + $0x27c0] sm:$0xff]  ;;  %v1500_v61 = vld [vmem:[%s12721_s15 + $0x27c8] sm:$0xff] }
 0x15e   : > { %v1502_v62 = vld [vmem:[%s12721_s15 + $0x27e0] sm:$0xff]  ;;  %1499 = vst [vmem:[%s12726_s16 + $0x13e0] sm:$0xff] %v1498_v60  ;;  %1501 = vst [vmem:[%s12726_s16 + $0x13e8] sm:$0xff] %v1500_v61  ;;  %v1504_v63 = vld [vmem:[%s12721_s15 + $0x27e8] sm:$0xff] }
 0x15f   : > { %1503 = vst [vmem:[%s12726_s16 + $0x13f0] sm:$0xff] %v1502_v62  ;;  %v1506_v0 = vld [vmem:[%s12721_s15 + $0x2800] sm:$0xff]  ;;  %v1508_v1 = vld [vmem:[%s12721_s15 + $0x2808] sm:$0xff]  ;;  %1505 = vst [vmem:[%s12726_s16 + $0x13f8] sm:$0xff] %v1504_v63 }
 0x160   : > { %1507 = vst [vmem:[%s12726_s16 + $0x1400] sm:$0xff] %v1506_v0  ;;  %1509 = vst [vmem:[%s12726_s16 + $0x1408] sm:$0xff] %v1508_v1  ;;  %v1510_v2 = vld [vmem:[%s12721_s15 + $0x2820] sm:$0xff]  ;;  %v1512_v3 = vld [vmem:[%s12721_s15 + $0x2828] sm:$0xff] }
 0x161   : > { %v1514_v4 = vld [vmem:[%s12721_s15 + $0x2840] sm:$0xff]  ;;  %1511 = vst [vmem:[%s12726_s16 + $0x1410] sm:$0xff] %v1510_v2  ;;  %1513 = vst [vmem:[%s12726_s16 + $0x1418] sm:$0xff] %v1512_v3  ;;  %v1516_v5 = vld [vmem:[%s12721_s15 + $0x2848] sm:$0xff] }
 0x162   : > { %1515 = vst [vmem:[%s12726_s16 + $0x1420] sm:$0xff] %v1514_v4  ;;  %v1518_v6 = vld [vmem:[%s12721_s15 + $0x2860] sm:$0xff]  ;;  %v1520_v7 = vld [vmem:[%s12721_s15 + $0x2868] sm:$0xff]  ;;  %1517 = vst [vmem:[%s12726_s16 + $0x1428] sm:$0xff] %v1516_v5 }
 0x163   : > { %1519 = vst [vmem:[%s12726_s16 + $0x1430] sm:$0xff] %v1518_v6  ;;  %1521 = vst [vmem:[%s12726_s16 + $0x1438] sm:$0xff] %v1520_v7  ;;  %v1522_v8 = vld [vmem:[%s12721_s15 + $0x2880] sm:$0xff]  ;;  %v1524_v9 = vld [vmem:[%s12721_s15 + $0x2888] sm:$0xff] }
 0x164   : > { %v1526_v10 = vld [vmem:[%s12721_s15 + $0x28a0] sm:$0xff]  ;;  %1523 = vst [vmem:[%s12726_s16 + $0x1440] sm:$0xff] %v1522_v8  ;;  %1525 = vst [vmem:[%s12726_s16 + $0x1448] sm:$0xff] %v1524_v9  ;;  %v1528_v11 = vld [vmem:[%s12721_s15 + $0x28a8] sm:$0xff] }
 0x165   : > { %1527 = vst [vmem:[%s12726_s16 + $0x1450] sm:$0xff] %v1526_v10  ;;  %v1530_v12 = vld [vmem:[%s12721_s15 + $0x28c0] sm:$0xff]  ;;  %v1532_v13 = vld [vmem:[%s12721_s15 + $0x28c8] sm:$0xff]  ;;  %1529 = vst [vmem:[%s12726_s16 + $0x1458] sm:$0xff] %v1528_v11 }
 0x166   : > { %1531 = vst [vmem:[%s12726_s16 + $0x1460] sm:$0xff] %v1530_v12  ;;  %1533 = vst [vmem:[%s12726_s16 + $0x1468] sm:$0xff] %v1532_v13  ;;  %v1534_v14 = vld [vmem:[%s12721_s15 + $0x28e0] sm:$0xff]  ;;  %v1536_v15 = vld [vmem:[%s12721_s15 + $0x28e8] sm:$0xff] }
 0x167   : > { %v1538_v16 = vld [vmem:[%s12721_s15 + $0x2900] sm:$0xff]  ;;  %1535 = vst [vmem:[%s12726_s16 + $0x1470] sm:$0xff] %v1534_v14  ;;  %1537 = vst [vmem:[%s12726_s16 + $0x1478] sm:$0xff] %v1536_v15  ;;  %v1540_v17 = vld [vmem:[%s12721_s15 + $0x2908] sm:$0xff] }
 0x168   : > { %1539 = vst [vmem:[%s12726_s16 + $0x1480] sm:$0xff] %v1538_v16  ;;  %v1542_v18 = vld [vmem:[%s12721_s15 + $0x2920] sm:$0xff]  ;;  %v1544_v19 = vld [vmem:[%s12721_s15 + $0x2928] sm:$0xff]  ;;  %1541 = vst [vmem:[%s12726_s16 + $0x1488] sm:$0xff] %v1540_v17 }
 0x169   : > { %1543 = vst [vmem:[%s12726_s16 + $0x1490] sm:$0xff] %v1542_v18  ;;  %1545 = vst [vmem:[%s12726_s16 + $0x1498] sm:$0xff] %v1544_v19  ;;  %v1546_v20 = vld [vmem:[%s12721_s15 + $0x2940] sm:$0xff]  ;;  %v1548_v21 = vld [vmem:[%s12721_s15 + $0x2948] sm:$0xff] }
 0x16a   : > { %v1550_v22 = vld [vmem:[%s12721_s15 + $0x2960] sm:$0xff]  ;;  %1547 = vst [vmem:[%s12726_s16 + $0x14a0] sm:$0xff] %v1546_v20  ;;  %1549 = vst [vmem:[%s12726_s16 + $0x14a8] sm:$0xff] %v1548_v21  ;;  %v1552_v23 = vld [vmem:[%s12721_s15 + $0x2968] sm:$0xff] }
 0x16b   : > { %1551 = vst [vmem:[%s12726_s16 + $0x14b0] sm:$0xff] %v1550_v22  ;;  %v1554_v24 = vld [vmem:[%s12721_s15 + $0x2980] sm:$0xff]  ;;  %v1556_v25 = vld [vmem:[%s12721_s15 + $0x2988] sm:$0xff]  ;;  %1553 = vst [vmem:[%s12726_s16 + $0x14b8] sm:$0xff] %v1552_v23 }
 0x16c   : > { %1555 = vst [vmem:[%s12726_s16 + $0x14c0] sm:$0xff] %v1554_v24  ;;  %1557 = vst [vmem:[%s12726_s16 + $0x14c8] sm:$0xff] %v1556_v25  ;;  %v1558_v26 = vld [vmem:[%s12721_s15 + $0x29a0] sm:$0xff]  ;;  %v1560_v27 = vld [vmem:[%s12721_s15 + $0x29a8] sm:$0xff] }
 0x16d   : > { %v1562_v28 = vld [vmem:[%s12721_s15 + $0x29c0] sm:$0xff]  ;;  %1559 = vst [vmem:[%s12726_s16 + $0x14d0] sm:$0xff] %v1558_v26  ;;  %1561 = vst [vmem:[%s12726_s16 + $0x14d8] sm:$0xff] %v1560_v27  ;;  %v1564_v29 = vld [vmem:[%s12721_s15 + $0x29c8] sm:$0xff] }
 0x16e   : > { %1563 = vst [vmem:[%s12726_s16 + $0x14e0] sm:$0xff] %v1562_v28  ;;  %v1566_v30 = vld [vmem:[%s12721_s15 + $0x29e0] sm:$0xff]  ;;  %v1568_v31 = vld [vmem:[%s12721_s15 + $0x29e8] sm:$0xff]  ;;  %1565 = vst [vmem:[%s12726_s16 + $0x14e8] sm:$0xff] %v1564_v29 }
 0x16f   : > { %1567 = vst [vmem:[%s12726_s16 + $0x14f0] sm:$0xff] %v1566_v30  ;;  %1569 = vst [vmem:[%s12726_s16 + $0x14f8] sm:$0xff] %v1568_v31  ;;  %v1570_v32 = vld [vmem:[%s12721_s15 + $0x2a00] sm:$0xff]  ;;  %v1572_v33 = vld [vmem:[%s12721_s15 + $0x2a08] sm:$0xff] }
 0x170   : > { %v1574_v34 = vld [vmem:[%s12721_s15 + $0x2a20] sm:$0xff]  ;;  %1571 = vst [vmem:[%s12726_s16 + $0x1500] sm:$0xff] %v1570_v32  ;;  %1573 = vst [vmem:[%s12726_s16 + $0x1508] sm:$0xff] %v1572_v33  ;;  %v1576_v35 = vld [vmem:[%s12721_s15 + $0x2a28] sm:$0xff] }
 0x171   : > { %1575 = vst [vmem:[%s12726_s16 + $0x1510] sm:$0xff] %v1574_v34  ;;  %v1578_v36 = vld [vmem:[%s12721_s15 + $0x2a40] sm:$0xff]  ;;  %v1580_v37 = vld [vmem:[%s12721_s15 + $0x2a48] sm:$0xff]  ;;  %1577 = vst [vmem:[%s12726_s16 + $0x1518] sm:$0xff] %v1576_v35 }
 0x172   : > { %1579 = vst [vmem:[%s12726_s16 + $0x1520] sm:$0xff] %v1578_v36  ;;  %1581 = vst [vmem:[%s12726_s16 + $0x1528] sm:$0xff] %v1580_v37  ;;  %v1582_v38 = vld [vmem:[%s12721_s15 + $0x2a60] sm:$0xff]  ;;  %v1584_v39 = vld [vmem:[%s12721_s15 + $0x2a68] sm:$0xff] }
 0x173   : > { %v1586_v40 = vld [vmem:[%s12721_s15 + $0x2a80] sm:$0xff]  ;;  %1583 = vst [vmem:[%s12726_s16 + $0x1530] sm:$0xff] %v1582_v38  ;;  %1585 = vst [vmem:[%s12726_s16 + $0x1538] sm:$0xff] %v1584_v39  ;;  %v1588_v41 = vld [vmem:[%s12721_s15 + $0x2a88] sm:$0xff] }
 0x174   : > { %1587 = vst [vmem:[%s12726_s16 + $0x1540] sm:$0xff] %v1586_v40  ;;  %v1590_v42 = vld [vmem:[%s12721_s15 + $0x2aa0] sm:$0xff]  ;;  %v1592_v43 = vld [vmem:[%s12721_s15 + $0x2aa8] sm:$0xff]  ;;  %1589 = vst [vmem:[%s12726_s16 + $0x1548] sm:$0xff] %v1588_v41 }
 0x175   : > { %1591 = vst [vmem:[%s12726_s16 + $0x1550] sm:$0xff] %v1590_v42  ;;  %1593 = vst [vmem:[%s12726_s16 + $0x1558] sm:$0xff] %v1592_v43  ;;  %v1594_v44 = vld [vmem:[%s12721_s15 + $0x2ac0] sm:$0xff]  ;;  %v1596_v45 = vld [vmem:[%s12721_s15 + $0x2ac8] sm:$0xff] }
 0x176   : > { %v1598_v46 = vld [vmem:[%s12721_s15 + $0x2ae0] sm:$0xff]  ;;  %1595 = vst [vmem:[%s12726_s16 + $0x1560] sm:$0xff] %v1594_v44  ;;  %1597 = vst [vmem:[%s12726_s16 + $0x1568] sm:$0xff] %v1596_v45  ;;  %v1600_v47 = vld [vmem:[%s12721_s15 + $0x2ae8] sm:$0xff] }
 0x177   : > { %1599 = vst [vmem:[%s12726_s16 + $0x1570] sm:$0xff] %v1598_v46  ;;  %v1602_v48 = vld [vmem:[%s12721_s15 + $0x2b00] sm:$0xff]  ;;  %v1604_v49 = vld [vmem:[%s12721_s15 + $0x2b08] sm:$0xff]  ;;  %1601 = vst [vmem:[%s12726_s16 + $0x1578] sm:$0xff] %v1600_v47 }
 0x178   : > { %1603 = vst [vmem:[%s12726_s16 + $0x1580] sm:$0xff] %v1602_v48  ;;  %1605 = vst [vmem:[%s12726_s16 + $0x1588] sm:$0xff] %v1604_v49  ;;  %v1606_v50 = vld [vmem:[%s12721_s15 + $0x2b20] sm:$0xff]  ;;  %v1608_v51 = vld [vmem:[%s12721_s15 + $0x2b28] sm:$0xff] }
 0x179   : > { %v1610_v52 = vld [vmem:[%s12721_s15 + $0x2b40] sm:$0xff]  ;;  %1607 = vst [vmem:[%s12726_s16 + $0x1590] sm:$0xff] %v1606_v50  ;;  %1609 = vst [vmem:[%s12726_s16 + $0x1598] sm:$0xff] %v1608_v51  ;;  %v1612_v53 = vld [vmem:[%s12721_s15 + $0x2b48] sm:$0xff] }
 0x17a   : > { %1611 = vst [vmem:[%s12726_s16 + $0x15a0] sm:$0xff] %v1610_v52  ;;  %v1614_v54 = vld [vmem:[%s12721_s15 + $0x2b60] sm:$0xff]  ;;  %v1616_v55 = vld [vmem:[%s12721_s15 + $0x2b68] sm:$0xff]  ;;  %1613 = vst [vmem:[%s12726_s16 + $0x15a8] sm:$0xff] %v1612_v53 }
 0x17b   : > { %1615 = vst [vmem:[%s12726_s16 + $0x15b0] sm:$0xff] %v1614_v54  ;;  %1617 = vst [vmem:[%s12726_s16 + $0x15b8] sm:$0xff] %v1616_v55  ;;  %v1618_v56 = vld [vmem:[%s12721_s15 + $0x2b80] sm:$0xff]  ;;  %v1620_v57 = vld [vmem:[%s12721_s15 + $0x2b88] sm:$0xff] }
 0x17c   : > { %v1622_v58 = vld [vmem:[%s12721_s15 + $0x2ba0] sm:$0xff]  ;;  %1619 = vst [vmem:[%s12726_s16 + $0x15c0] sm:$0xff] %v1618_v56  ;;  %1621 = vst [vmem:[%s12726_s16 + $0x15c8] sm:$0xff] %v1620_v57  ;;  %v1624_v59 = vld [vmem:[%s12721_s15 + $0x2ba8] sm:$0xff] }
 0x17d   : > { %1623 = vst [vmem:[%s12726_s16 + $0x15d0] sm:$0xff] %v1622_v58  ;;  %v1626_v60 = vld [vmem:[%s12721_s15 + $0x2bc0] sm:$0xff]  ;;  %v1628_v61 = vld [vmem:[%s12721_s15 + $0x2bc8] sm:$0xff]  ;;  %1625 = vst [vmem:[%s12726_s16 + $0x15d8] sm:$0xff] %v1624_v59 }
 0x17e   : > { %1627 = vst [vmem:[%s12726_s16 + $0x15e0] sm:$0xff] %v1626_v60  ;;  %1629 = vst [vmem:[%s12726_s16 + $0x15e8] sm:$0xff] %v1628_v61  ;;  %v1630_v62 = vld [vmem:[%s12721_s15 + $0x2be0] sm:$0xff]  ;;  %v1632_v63 = vld [vmem:[%s12721_s15 + $0x2be8] sm:$0xff] }
 0x17f   : > { %v1634_v0 = vld [vmem:[%s12721_s15 + $0x2c00] sm:$0xff]  ;;  %1631 = vst [vmem:[%s12726_s16 + $0x15f0] sm:$0xff] %v1630_v62  ;;  %1633 = vst [vmem:[%s12726_s16 + $0x15f8] sm:$0xff] %v1632_v63  ;;  %v1636_v1 = vld [vmem:[%s12721_s15 + $0x2c08] sm:$0xff] }
 0x180   : > { %1635 = vst [vmem:[%s12726_s16 + $0x1600] sm:$0xff] %v1634_v0  ;;  %v1638_v2 = vld [vmem:[%s12721_s15 + $0x2c20] sm:$0xff]  ;;  %v1640_v3 = vld [vmem:[%s12721_s15 + $0x2c28] sm:$0xff]  ;;  %1637 = vst [vmem:[%s12726_s16 + $0x1608] sm:$0xff] %v1636_v1 }
 0x181   : > { %1639 = vst [vmem:[%s12726_s16 + $0x1610] sm:$0xff] %v1638_v2  ;;  %1641 = vst [vmem:[%s12726_s16 + $0x1618] sm:$0xff] %v1640_v3  ;;  %v1642_v4 = vld [vmem:[%s12721_s15 + $0x2c40] sm:$0xff]  ;;  %v1644_v5 = vld [vmem:[%s12721_s15 + $0x2c48] sm:$0xff] }
 0x182   : > { %v1646_v6 = vld [vmem:[%s12721_s15 + $0x2c60] sm:$0xff]  ;;  %1643 = vst [vmem:[%s12726_s16 + $0x1620] sm:$0xff] %v1642_v4  ;;  %1645 = vst [vmem:[%s12726_s16 + $0x1628] sm:$0xff] %v1644_v5  ;;  %v1648_v7 = vld [vmem:[%s12721_s15 + $0x2c68] sm:$0xff] }
 0x183   : > { %1647 = vst [vmem:[%s12726_s16 + $0x1630] sm:$0xff] %v1646_v6  ;;  %v1650_v8 = vld [vmem:[%s12721_s15 + $0x2c80] sm:$0xff]  ;;  %v1652_v9 = vld [vmem:[%s12721_s15 + $0x2c88] sm:$0xff]  ;;  %1649 = vst [vmem:[%s12726_s16 + $0x1638] sm:$0xff] %v1648_v7 }
 0x184   : > { %1651 = vst [vmem:[%s12726_s16 + $0x1640] sm:$0xff] %v1650_v8  ;;  %1653 = vst [vmem:[%s12726_s16 + $0x1648] sm:$0xff] %v1652_v9  ;;  %v1654_v10 = vld [vmem:[%s12721_s15 + $0x2ca0] sm:$0xff]  ;;  %v1656_v11 = vld [vmem:[%s12721_s15 + $0x2ca8] sm:$0xff] }
 0x185   : > { %v1658_v12 = vld [vmem:[%s12721_s15 + $0x2cc0] sm:$0xff]  ;;  %1655 = vst [vmem:[%s12726_s16 + $0x1650] sm:$0xff] %v1654_v10  ;;  %1657 = vst [vmem:[%s12726_s16 + $0x1658] sm:$0xff] %v1656_v11  ;;  %v1660_v13 = vld [vmem:[%s12721_s15 + $0x2cc8] sm:$0xff] }
 0x186   : > { %1659 = vst [vmem:[%s12726_s16 + $0x1660] sm:$0xff] %v1658_v12  ;;  %v1662_v14 = vld [vmem:[%s12721_s15 + $0x2ce0] sm:$0xff]  ;;  %v1664_v15 = vld [vmem:[%s12721_s15 + $0x2ce8] sm:$0xff]  ;;  %1661 = vst [vmem:[%s12726_s16 + $0x1668] sm:$0xff] %v1660_v13 }
 0x187   : > { %1663 = vst [vmem:[%s12726_s16 + $0x1670] sm:$0xff] %v1662_v14  ;;  %1665 = vst [vmem:[%s12726_s16 + $0x1678] sm:$0xff] %v1664_v15  ;;  %v1666_v16 = vld [vmem:[%s12721_s15 + $0x2d00] sm:$0xff]  ;;  %v1668_v17 = vld [vmem:[%s12721_s15 + $0x2d08] sm:$0xff] }
 0x188   : > { %v1670_v18 = vld [vmem:[%s12721_s15 + $0x2d20] sm:$0xff]  ;;  %1667 = vst [vmem:[%s12726_s16 + $0x1680] sm:$0xff] %v1666_v16  ;;  %1669 = vst [vmem:[%s12726_s16 + $0x1688] sm:$0xff] %v1668_v17  ;;  %v1672_v19 = vld [vmem:[%s12721_s15 + $0x2d28] sm:$0xff] }
 0x189   : > { %1671 = vst [vmem:[%s12726_s16 + $0x1690] sm:$0xff] %v1670_v18  ;;  %v1674_v20 = vld [vmem:[%s12721_s15 + $0x2d40] sm:$0xff]  ;;  %v1676_v21 = vld [vmem:[%s12721_s15 + $0x2d48] sm:$0xff]  ;;  %1673 = vst [vmem:[%s12726_s16 + $0x1698] sm:$0xff] %v1672_v19 }
 0x18a   : > { %1675 = vst [vmem:[%s12726_s16 + $0x16a0] sm:$0xff] %v1674_v20  ;;  %1677 = vst [vmem:[%s12726_s16 + $0x16a8] sm:$0xff] %v1676_v21  ;;  %v1678_v22 = vld [vmem:[%s12721_s15 + $0x2d60] sm:$0xff]  ;;  %v1680_v23 = vld [vmem:[%s12721_s15 + $0x2d68] sm:$0xff] }
 0x18b   : > { %v1682_v24 = vld [vmem:[%s12721_s15 + $0x2d80] sm:$0xff]  ;;  %1679 = vst [vmem:[%s12726_s16 + $0x16b0] sm:$0xff] %v1678_v22  ;;  %1681 = vst [vmem:[%s12726_s16 + $0x16b8] sm:$0xff] %v1680_v23  ;;  %v1684_v25 = vld [vmem:[%s12721_s15 + $0x2d88] sm:$0xff] }
 0x18c   : > { %1683 = vst [vmem:[%s12726_s16 + $0x16c0] sm:$0xff] %v1682_v24  ;;  %v1686_v26 = vld [vmem:[%s12721_s15 + $0x2da0] sm:$0xff]  ;;  %v1688_v27 = vld [vmem:[%s12721_s15 + $0x2da8] sm:$0xff]  ;;  %1685 = vst [vmem:[%s12726_s16 + $0x16c8] sm:$0xff] %v1684_v25 }
 0x18d   : > { %1687 = vst [vmem:[%s12726_s16 + $0x16d0] sm:$0xff] %v1686_v26  ;;  %1689 = vst [vmem:[%s12726_s16 + $0x16d8] sm:$0xff] %v1688_v27  ;;  %v1690_v28 = vld [vmem:[%s12721_s15 + $0x2dc0] sm:$0xff]  ;;  %v1692_v29 = vld [vmem:[%s12721_s15 + $0x2dc8] sm:$0xff] }
 0x18e   : > { %v1694_v30 = vld [vmem:[%s12721_s15 + $0x2de0] sm:$0xff]  ;;  %1691 = vst [vmem:[%s12726_s16 + $0x16e0] sm:$0xff] %v1690_v28  ;;  %1693 = vst [vmem:[%s12726_s16 + $0x16e8] sm:$0xff] %v1692_v29  ;;  %v1696_v31 = vld [vmem:[%s12721_s15 + $0x2de8] sm:$0xff] }
 0x18f   : > { %1695 = vst [vmem:[%s12726_s16 + $0x16f0] sm:$0xff] %v1694_v30  ;;  %v1698_v32 = vld [vmem:[%s12721_s15 + $0x2e00] sm:$0xff]  ;;  %v1700_v33 = vld [vmem:[%s12721_s15 + $0x2e08] sm:$0xff]  ;;  %1697 = vst [vmem:[%s12726_s16 + $0x16f8] sm:$0xff] %v1696_v31 }
 0x190   : > { %1699 = vst [vmem:[%s12726_s16 + $0x1700] sm:$0xff] %v1698_v32  ;;  %1701 = vst [vmem:[%s12726_s16 + $0x1708] sm:$0xff] %v1700_v33  ;;  %v1702_v34 = vld [vmem:[%s12721_s15 + $0x2e20] sm:$0xff]  ;;  %v1704_v35 = vld [vmem:[%s12721_s15 + $0x2e28] sm:$0xff] }
 0x191   : > { %v1706_v36 = vld [vmem:[%s12721_s15 + $0x2e40] sm:$0xff]  ;;  %1703 = vst [vmem:[%s12726_s16 + $0x1710] sm:$0xff] %v1702_v34  ;;  %1705 = vst [vmem:[%s12726_s16 + $0x1718] sm:$0xff] %v1704_v35  ;;  %v1708_v37 = vld [vmem:[%s12721_s15 + $0x2e48] sm:$0xff] }
 0x192   : > { %1707 = vst [vmem:[%s12726_s16 + $0x1720] sm:$0xff] %v1706_v36  ;;  %v1710_v38 = vld [vmem:[%s12721_s15 + $0x2e60] sm:$0xff]  ;;  %v1712_v39 = vld [vmem:[%s12721_s15 + $0x2e68] sm:$0xff]  ;;  %1709 = vst [vmem:[%s12726_s16 + $0x1728] sm:$0xff] %v1708_v37 }
 0x193   : > { %1711 = vst [vmem:[%s12726_s16 + $0x1730] sm:$0xff] %v1710_v38  ;;  %1713 = vst [vmem:[%s12726_s16 + $0x1738] sm:$0xff] %v1712_v39  ;;  %v1714_v40 = vld [vmem:[%s12721_s15 + $0x2e80] sm:$0xff]  ;;  %v1716_v41 = vld [vmem:[%s12721_s15 + $0x2e88] sm:$0xff] }
 0x194   : > { %v1718_v42 = vld [vmem:[%s12721_s15 + $0x2ea0] sm:$0xff]  ;;  %1715 = vst [vmem:[%s12726_s16 + $0x1740] sm:$0xff] %v1714_v40  ;;  %1717 = vst [vmem:[%s12726_s16 + $0x1748] sm:$0xff] %v1716_v41  ;;  %v1720_v43 = vld [vmem:[%s12721_s15 + $0x2ea8] sm:$0xff] }
 0x195   : > { %1719 = vst [vmem:[%s12726_s16 + $0x1750] sm:$0xff] %v1718_v42  ;;  %v1722_v44 = vld [vmem:[%s12721_s15 + $0x2ec0] sm:$0xff]  ;;  %v1724_v45 = vld [vmem:[%s12721_s15 + $0x2ec8] sm:$0xff]  ;;  %1721 = vst [vmem:[%s12726_s16 + $0x1758] sm:$0xff] %v1720_v43 }
 0x196   : > { %1723 = vst [vmem:[%s12726_s16 + $0x1760] sm:$0xff] %v1722_v44  ;;  %1725 = vst [vmem:[%s12726_s16 + $0x1768] sm:$0xff] %v1724_v45  ;;  %v1726_v46 = vld [vmem:[%s12721_s15 + $0x2ee0] sm:$0xff]  ;;  %v1728_v47 = vld [vmem:[%s12721_s15 + $0x2ee8] sm:$0xff] }
 0x197   : > { %v1730_v48 = vld [vmem:[%s12721_s15 + $0x2f00] sm:$0xff]  ;;  %1727 = vst [vmem:[%s12726_s16 + $0x1770] sm:$0xff] %v1726_v46  ;;  %1729 = vst [vmem:[%s12726_s16 + $0x1778] sm:$0xff] %v1728_v47  ;;  %v1732_v49 = vld [vmem:[%s12721_s15 + $0x2f08] sm:$0xff] }
 0x198   : > { %1731 = vst [vmem:[%s12726_s16 + $0x1780] sm:$0xff] %v1730_v48  ;;  %v1734_v50 = vld [vmem:[%s12721_s15 + $0x2f20] sm:$0xff]  ;;  %v1736_v51 = vld [vmem:[%s12721_s15 + $0x2f28] sm:$0xff]  ;;  %1733 = vst [vmem:[%s12726_s16 + $0x1788] sm:$0xff] %v1732_v49 }
 0x199   : > { %1735 = vst [vmem:[%s12726_s16 + $0x1790] sm:$0xff] %v1734_v50  ;;  %1737 = vst [vmem:[%s12726_s16 + $0x1798] sm:$0xff] %v1736_v51  ;;  %v1738_v52 = vld [vmem:[%s12721_s15 + $0x2f40] sm:$0xff]  ;;  %v1740_v53 = vld [vmem:[%s12721_s15 + $0x2f48] sm:$0xff] }
 0x19a   : > { %v1742_v54 = vld [vmem:[%s12721_s15 + $0x2f60] sm:$0xff]  ;;  %1739 = vst [vmem:[%s12726_s16 + $0x17a0] sm:$0xff] %v1738_v52  ;;  %1741 = vst [vmem:[%s12726_s16 + $0x17a8] sm:$0xff] %v1740_v53  ;;  %v1744_v55 = vld [vmem:[%s12721_s15 + $0x2f68] sm:$0xff] }
 0x19b   : > { %1743 = vst [vmem:[%s12726_s16 + $0x17b0] sm:$0xff] %v1742_v54  ;;  %v1746_v56 = vld [vmem:[%s12721_s15 + $0x2f80] sm:$0xff]  ;;  %v1748_v57 = vld [vmem:[%s12721_s15 + $0x2f88] sm:$0xff]  ;;  %1745 = vst [vmem:[%s12726_s16 + $0x17b8] sm:$0xff] %v1744_v55 }
 0x19c   : > { %1747 = vst [vmem:[%s12726_s16 + $0x17c0] sm:$0xff] %v1746_v56  ;;  %1749 = vst [vmem:[%s12726_s16 + $0x17c8] sm:$0xff] %v1748_v57  ;;  %v1750_v58 = vld [vmem:[%s12721_s15 + $0x2fa0] sm:$0xff]  ;;  %v1752_v59 = vld [vmem:[%s12721_s15 + $0x2fa8] sm:$0xff] }
 0x19d   : > { %v1754_v60 = vld [vmem:[%s12721_s15 + $0x2fc0] sm:$0xff]  ;;  %1751 = vst [vmem:[%s12726_s16 + $0x17d0] sm:$0xff] %v1750_v58  ;;  %1753 = vst [vmem:[%s12726_s16 + $0x17d8] sm:$0xff] %v1752_v59  ;;  %v1756_v61 = vld [vmem:[%s12721_s15 + $0x2fc8] sm:$0xff] }
 0x19e   : > { %1755 = vst [vmem:[%s12726_s16 + $0x17e0] sm:$0xff] %v1754_v60  ;;  %v1758_v62 = vld [vmem:[%s12721_s15 + $0x2fe0] sm:$0xff]  ;;  %v1760_v63 = vld [vmem:[%s12721_s15 + $0x2fe8] sm:$0xff]  ;;  %1757 = vst [vmem:[%s12726_s16 + $0x17e8] sm:$0xff] %v1756_v61 }
 0x19f   : > { %1759 = vst [vmem:[%s12726_s16 + $0x17f0] sm:$0xff] %v1758_v62  ;;  %1761 = vst [vmem:[%s12726_s16 + $0x17f8] sm:$0xff] %v1760_v63  ;;  %v1762_v0 = vld [vmem:[%s12721_s15 + $0x3000] sm:$0xff]  ;;  %v1764_v1 = vld [vmem:[%s12721_s15 + $0x3008] sm:$0xff] }
 0x1a0   : > { %v1766_v2 = vld [vmem:[%s12721_s15 + $0x3020] sm:$0xff]  ;;  %1763 = vst [vmem:[%s12726_s16 + $0x1800] sm:$0xff] %v1762_v0  ;;  %1765 = vst [vmem:[%s12726_s16 + $0x1808] sm:$0xff] %v1764_v1  ;;  %v1768_v3 = vld [vmem:[%s12721_s15 + $0x3028] sm:$0xff] }
 0x1a1   : > { %1767 = vst [vmem:[%s12726_s16 + $0x1810] sm:$0xff] %v1766_v2  ;;  %v1770_v4 = vld [vmem:[%s12721_s15 + $0x3040] sm:$0xff]  ;;  %v1772_v5 = vld [vmem:[%s12721_s15 + $0x3048] sm:$0xff]  ;;  %1769 = vst [vmem:[%s12726_s16 + $0x1818] sm:$0xff] %v1768_v3 }
 0x1a2   : > { %1771 = vst [vmem:[%s12726_s16 + $0x1820] sm:$0xff] %v1770_v4  ;;  %1773 = vst [vmem:[%s12726_s16 + $0x1828] sm:$0xff] %v1772_v5  ;;  %v1774_v6 = vld [vmem:[%s12721_s15 + $0x3060] sm:$0xff]  ;;  %v1776_v7 = vld [vmem:[%s12721_s15 + $0x3068] sm:$0xff] }
 0x1a3   : > { %v1778_v8 = vld [vmem:[%s12721_s15 + $0x3080] sm:$0xff]  ;;  %1775 = vst [vmem:[%s12726_s16 + $0x1830] sm:$0xff] %v1774_v6  ;;  %1777 = vst [vmem:[%s12726_s16 + $0x1838] sm:$0xff] %v1776_v7  ;;  %v1780_v9 = vld [vmem:[%s12721_s15 + $0x3088] sm:$0xff] }
 0x1a4   : > { %1779 = vst [vmem:[%s12726_s16 + $0x1840] sm:$0xff] %v1778_v8  ;;  %v1782_v10 = vld [vmem:[%s12721_s15 + $0x30a0] sm:$0xff]  ;;  %v1784_v11 = vld [vmem:[%s12721_s15 + $0x30a8] sm:$0xff]  ;;  %1781 = vst [vmem:[%s12726_s16 + $0x1848] sm:$0xff] %v1780_v9 }
 0x1a5   : > { %1783 = vst [vmem:[%s12726_s16 + $0x1850] sm:$0xff] %v1782_v10  ;;  %1785 = vst [vmem:[%s12726_s16 + $0x1858] sm:$0xff] %v1784_v11  ;;  %v1786_v12 = vld [vmem:[%s12721_s15 + $0x30c0] sm:$0xff]  ;;  %v1788_v13 = vld [vmem:[%s12721_s15 + $0x30c8] sm:$0xff] }
 0x1a6   : > { %v1790_v14 = vld [vmem:[%s12721_s15 + $0x30e0] sm:$0xff]  ;;  %1787 = vst [vmem:[%s12726_s16 + $0x1860] sm:$0xff] %v1786_v12  ;;  %1789 = vst [vmem:[%s12726_s16 + $0x1868] sm:$0xff] %v1788_v13  ;;  %v1792_v15 = vld [vmem:[%s12721_s15 + $0x30e8] sm:$0xff] }
 0x1a7   : > { %1791 = vst [vmem:[%s12726_s16 + $0x1870] sm:$0xff] %v1790_v14  ;;  %1793 = vst [vmem:[%s12726_s16 + $0x1878] sm:$0xff] %v1792_v15 }
 0x1a8 PF: > { %p10151_p7 = scmp.ge.s32.totalorder %s12625_s24, 1  ;;  %p1831_p8 = scmp.lt.s32.totalorder %s12625_s24, 5 }
 0x1aa   : > { %p1832_p9 = pnand %p10151_p7, %p1831_p8 }
 0x1ab   : > { %s1838_s17 = sand.u32 (!%p1832_p9), 1, %s12601_s18   ;;  %s10152_s27 = sshll.u32 (!%p1832_p9), %s12609_s20, 2 }
 0x1ac   : > { %1835 = sbr.rel (%p1832_p9) target bundleno = 1894 (0x766), region = 59  ;;  %p1888_p10 = scmp.lt.s32.totalorder (!%p1832_p9), %s12613_s21, 1 }
 0x1ad   : > { %s11329_s28 = smul.u32 (!%p1832_p9), 6272, %s1838_s17  ;;  %p1890_p11 = scmp.lt.s32.totalorder (!%p1832_p9), %s10152_s27, 7 }
 0x1ae   : > { %s10154_s29 = sshll.u32 (!%p1832_p9), %s12609_s20, 6  ;;  %p10160_p13 = scmp.ne.s32.totalorder (!%p1832_p9), %s12609_s20, 0 }
 0x1af   : > { %p1899_p12 = scmp.lt.s32.totalorder (!%p1832_p9), %s10154_s29, 127  ;;  %s14321_s9 = scalar_lea.vmem (!%p1832_p9), [#allocation3], %s11329_s28 }
 0x1b3   : > { %s15641_s21 = smov (!%p1888_p10, %s12613_s21), 1  ;;  %s15643_s27 = smov (!%p1890_p11, %s10152_s27), 7 }
 0x1b4   : > { %s14300_s30 = sshll.u32 %s15641_s21, 3  ;;  %s10156_s7 = sshll.u32 %s15641_s21, 10  ;;  %v12627_v16 = vmov (!%p10160_p13), 0.0  }
 0x1b5   : > { %s1893_s8 = sadd.s32 %s14300_s30, %s15643_s27  ;;  %s1910_s11 = scalar_lea.vmem %s15618_s4, %s14300_s30  ;;  %1920 = vst [vmem:[#allocation2] sm:$0xff] (!%p10160_p13), %v12627_v16  ;;  %1921 = vst [vmem:[#allocation2 + $0x8] sm:$0xff] (!%p10160_p13), %v12627_v16 }
 0x1b6   : > { %s14310_s13 = scalar_lea.vmem %s15616_s2, %s1893_s8  ;;  %s1914_s16 = scalar_lea.vmem %s15619_s5, %s14300_s30 }
 0x1b7   : > { %s15645_s29 = smov (!%p1899_p12, %s10154_s29), 127  ;;  %1919 = sbr.rel (%p10160_p13) target bundleno = 446 (0x1be), region = 67 }
 0x1b8   : > { %s10155_s17 = sshll.u32 %s15645_s29, 3 }
 0x1b9   : > { %s1903_s1 = sadd.s32 %s10156_s7, %s10155_s17 }
 0x1ba   : > { %s10157_s26 = sshll.u32 %s1903_s1, 2 }
 0x1bb   : > { %s14319_s27 = scalar_lea.vmem %s15617_s3, %s10157_s26 }
 0x1be PF: > { %v11390_v17 = vld [vmem:[%s14321_s9 + $0x4] ss:$16 sps:$4 sm:$0xff]   ;;  %v11392_v18 = vld [vmem:[%s14321_s9 + $0xc] ss:$16 sps:$4 sm:$0xff]   ;;  %v11394_v19 = vld [vmem:[%s14321_s9] ss:$16 sps:$4 sm:$0xff]   ;;  %v2712_v53 = vlaneseq }
 0x1bf   : > { %6845 = vmatprep.subr.bf16.mxu0 %v11390_v17  ;;  %v11395_v20 = vld [vmem:[%s14321_s9 + $0x8] ss:$16 sps:$4 sm:$0xff]   ;;  %7378 = vmatprep.subr.bf16.mxu1 %v11392_v18  ;;  %v11396_v21 = vld [vmem:[%s14321_s9 + $0x24] ss:$16 sps:$4 sm:$0xff]   ;;  %v11398_v22 = vld [vmem:[%s14321_s9 + $0x2c] ss:$16 sps:$4 sm:$0xff]  }
 0x1c0   : > { %6846 = vmatpush1.bf16.msra.mxu0 %v11394_v19  ;;  %7379 = vmatpush1.bf16.msra.mxu1 %v11395_v20  ;;  %v11400_v23 = vld [vmem:[%s14321_s9 + $0x20] ss:$16 sps:$4 sm:$0xff]   ;;  %v11401_v24 = vld [vmem:[%s14321_s9 + $0x28] ss:$16 sps:$4 sm:$0xff]   ;;  %v11402_v25 = vld [vmem:[%s14321_s9 + $0x44] ss:$16 sps:$4 sm:$0xff]  }
 0x1c1   : > { %6847 = vmatprep.subr.bf16.mxu0 %v11396_v21  ;;  %7380 = vmatprep.subr.bf16.mxu1 %v11398_v22  ;;  %v11404_v26 = vld [vmem:[%s14321_s9 + $0x4c] ss:$16 sps:$4 sm:$0xff]   ;;  %v11406_v27 = vld [vmem:[%s14321_s9 + $0x40] ss:$16 sps:$4 sm:$0xff]   ;;  %v11407_v28 = vld [vmem:[%s14321_s9 + $0x48] ss:$16 sps:$4 sm:$0xff]  }
 0x1c2   : > { %v11408_v29 = vld [vmem:[%s14321_s9 + $0x64] ss:$16 sps:$4 sm:$0xff]   ;;  %v11410_v30 = vld [vmem:[%s14321_s9 + $0x6c] ss:$16 sps:$4 sm:$0xff]   ;;  %v11412_v31 = vld [vmem:[%s14321_s9 + $0x60] ss:$16 sps:$4 sm:$0xff]  }
 0x1c3   : > { %v11413_v32 = vld [vmem:[%s14321_s9 + $0x68] ss:$16 sps:$4 sm:$0xff]   ;;  %v11414_v33 = vld [vmem:[%s14321_s9 + $0x84] ss:$16 sps:$4 sm:$0xff]   ;;  %v11416_v34 = vld [vmem:[%s14321_s9 + $0x8c] ss:$16 sps:$4 sm:$0xff]  }
 0x1c4   : > { %6848 = vmatpush1.bf16.msra.mxu0 %v11400_v23  ;;  %7381 = vmatpush1.bf16.msra.mxu1 %v11401_v24  ;;  %v11418_v35 = vld [vmem:[%s14321_s9 + $0x80] ss:$16 sps:$4 sm:$0xff]   ;;  %v11419_v36 = vld [vmem:[%s14321_s9 + $0x88] ss:$16 sps:$4 sm:$0xff]   ;;  %v11420_v37 = vld [vmem:[%s14321_s9 + $0xa4] ss:$16 sps:$4 sm:$0xff]  }
 0x1c5   : > { %6849 = vmatprep.subr.bf16.mxu0 %v11402_v25  ;;  %7382 = vmatprep.subr.bf16.mxu1 %v11404_v26  ;;  %v11422_v38 = vld [vmem:[%s14321_s9 + $0xac] ss:$16 sps:$4 sm:$0xff]   ;;  %v11424_v39 = vld [vmem:[%s14321_s9 + $0xa0] ss:$16 sps:$4 sm:$0xff]   ;;  %v11425_v40 = vld [vmem:[%s14321_s9 + $0xa8] ss:$16 sps:$4 sm:$0xff]  }
 0x1c6   : > { %v11426_v41 = vld [vmem:[%s14321_s9 + $0xc4] ss:$16 sps:$4 sm:$0xff]   ;;  %v11428_v42 = vld [vmem:[%s14321_s9 + $0xcc] ss:$16 sps:$4 sm:$0xff]   ;;  %v11430_v43 = vld [vmem:[%s14321_s9 + $0xc0] ss:$16 sps:$4 sm:$0xff]  }
 0x1c7   : > { %v11431_v44 = vld [vmem:[%s14321_s9 + $0xc8] ss:$16 sps:$4 sm:$0xff]   ;;  %v11432_v45 = vld [vmem:[%s14321_s9 + $0xe4] ss:$16 sps:$4 sm:$0xff]   ;;  %v11434_v46 = vld [vmem:[%s14321_s9 + $0xec] ss:$16 sps:$4 sm:$0xff]  }
 0x1c8   : > { %6850 = vmatpush1.bf16.msra.mxu0 %v11406_v27  ;;  %7383 = vmatpush1.bf16.msra.mxu1 %v11407_v28  ;;  %v11436_v47 = vld [vmem:[%s14321_s9 + $0xe0] ss:$16 sps:$4 sm:$0xff]   ;;  %v11437_v48 = vld [vmem:[%s14321_s9 + $0xe8] ss:$16 sps:$4 sm:$0xff]   ;;  %v11438_v49 = vld [vmem:[%s14321_s9 + $0x104] ss:$16 sps:$4 sm:$0xff]  }
 0x1c9   : > { %6851 = vmatprep.subr.bf16.mxu0 %v11408_v29  ;;  %7384 = vmatprep.subr.bf16.mxu1 %v11410_v30  ;;  %v11440_v50 = vld [vmem:[%s14321_s9 + $0x10c] ss:$16 sps:$4 sm:$0xff]   ;;  %v11442_v51 = vld [vmem:[%s14321_s9 + $0x100] ss:$16 sps:$4 sm:$0xff]   ;;  %v11443_v52 = vld [vmem:[%s14321_s9 + $0x108] ss:$16 sps:$4 sm:$0xff]  }
 0x1ca   : > { %v12628_v54 = vmov 1966171168   ;;  %v11444_v56 = vld [vmem:[%s14321_s9 + $0x124] ss:$16 sps:$4 sm:$0xff]   ;;  %v11446_v57 = vld [vmem:[%s14321_s9 + $0x12c] ss:$16 sps:$4 sm:$0xff]  }
 0x1cb   : > { %v2738_v55 = vunpack.c.l.s4 %v12628_v54  ;;  %v11448_v58 = vld [vmem:[%s14321_s9 + $0x120] ss:$16 sps:$4 sm:$0xff]   ;;  %v14363_v59 = vshrl.u32 %v2712_v53, 7  ;;  %v11449_v61 = vld [vmem:[%s14321_s9 + $0x128] ss:$16 sps:$4 sm:$0xff]   ;;  %vm6841_vm0 = vcmask 523264  }
 0x1cc   : > { %6852 = vmatpush1.bf16.msra.mxu0 %v11412_v31  ;;  %7385 = vmatpush1.bf16.msra.mxu1 %v11413_v32  ;;  %v11450_v62 = vld [vmem:[%s14321_s9 + $0x144] ss:$16 sps:$4 sm:$0xff]   ;;  %v11452_v63 = vld [vmem:[%s14321_s9 + $0x14c] ss:$16 sps:$4 sm:$0xff]   ;;  %v11454_v0 = vld [vmem:[%s14321_s9 + $0x140] ss:$16 sps:$4 sm:$0xff]  }
 0x1cd   : > { %6853 = vmatprep.subr.bf16.mxu0 %v11414_v33  ;;  %7386 = vmatprep.subr.bf16.mxu1 %v11416_v34  ;;  %v2739_v60 = vunpack.c.0.s8 %v2738_v55  ;;  %v11455_v1 = vld [vmem:[%s14321_s9 + $0x148] ss:$16 sps:$4 sm:$0xff]   ;;  %v11456_v3 = vld [vmem:[%s14321_s9 + $0x164] ss:$16 sps:$4 sm:$0xff]   ;;  %v11458_v4 = vld [vmem:[%s14321_s9 + $0x16c] ss:$16 sps:$4 sm:$0xff]  }
 0x1ce   : > { %v14378_v5 = vld [vmem:[%s15614_s0] sm:$0xff]  ;;  %v11460_v6 = vld [vmem:[%s14321_s9 + $0x160] ss:$16 sps:$4 sm:$0xff]   ;;  %v11462_v9 = vld [vmem:[%s14321_s9 + $0x184] ss:$16 sps:$4 sm:$0xff]   ;;  %p11204_p0 = scmp.ne.s32.totalorder %s12609_s20, 1 }
 0x1cf   : > { %v14371_v2 = vsub.s32 %v2739_v60, %v14363_v59  ;;  %v11461_v8 = vld [vmem:[%s14321_s9 + $0x168] ss:$16 sps:$4 sm:$0xff]   ;;  %v11464_v10 = vld [vmem:[%s14321_s9 + $0x18c] ss:$16 sps:$4 sm:$0xff]   ;;  %v11466_v12 = vld [vmem:[%s14321_s9 + $0x180] ss:$16 sps:$4 sm:$0xff]  }
 0x1d0   : > { %6854 = vmatpush1.bf16.msra.mxu0 %v11418_v35  ;;  %7387 = vmatpush1.bf16.msra.mxu1 %v11419_v36  ;;  %v11467_v14 = vld [vmem:[%s14321_s9 + $0x188] ss:$16 sps:$4 sm:$0xff]   ;;  %v11468_v15 = vld [vmem:[%s14321_s9 + $0x1a4] ss:$16 sps:$4 sm:$0xff]   ;;  %v11470_v16 = vld [vmem:[%s14321_s9 + $0x1ac] ss:$16 sps:$4 sm:$0xff]  }
 0x1d1   : > { %6855 = vmatprep.subr.bf16.mxu0 %v11420_v37  ;;  %7388 = vmatprep.subr.bf16.mxu1 %v11422_v38  ;;  %v2743_v7 = vrot.slane %v14378_v5, %v14371_v2  ;;  %v11472_v17 = vld [vmem:[%s14321_s9 + $0x1a0] ss:$16 sps:$4 sm:$0xff]   ;;  %v11473_v18 = vld [vmem:[%s14321_s9 + $0x1a8] ss:$16 sps:$4 sm:$0xff]   ;;  %v11474_v19 = vld [vmem:[%s14321_s9 + $0x1c4] ss:$16 sps:$4 sm:$0xff]  }
 0x1d2   : > { %v11476_v20 = vld [vmem:[%s14321_s9 + $0x1cc] ss:$16 sps:$4 sm:$0xff]   ;;  %v11478_v21 = vld [vmem:[%s14321_s9 + $0x1c0] ss:$16 sps:$4 sm:$0xff]   ;;  %v11479_v22 = vld [vmem:[%s14321_s9 + $0x1c8] ss:$16 sps:$4 sm:$0xff]  }
 0x1d3   : > { %v2751_v11 = vcombine.high %v2743_v7, %v2743_v7  ;;  %v11480_v23 = vld [vmem:[%s14321_s9 + $0x1e4] ss:$16 sps:$4 sm:$0xff]   ;;  %v11482_v24 = vld [vmem:[%s14321_s9 + $0x1ec] ss:$16 sps:$4 sm:$0xff]   ;;  %v11484_v25 = vld [vmem:[%s14321_s9 + $0x1e0] ss:$16 sps:$4 sm:$0xff]   ;;  %v14405_v30 = vrot.slane %v2743_v7, %v14371_v2 }
 0x1d4   : > { %6856 = vmatpush1.bf16.msra.mxu0 %v11424_v39  ;;  %7389 = vmatpush1.bf16.msra.mxu1 %v11425_v40  ;;  %v11485_v26 = vld [vmem:[%s14321_s9 + $0x1e8] ss:$16 sps:$4 sm:$0xff]   ;;  %v11488_v27 = vld [vmem:[%s14321_s9 + $0x204] ss:$16 sps:$4 sm:$0xff]   ;;  %v11491_v28 = vld [vmem:[%s14321_s9 + $0x20c] ss:$16 sps:$4 sm:$0xff]  }
 0x1d5   : > { %6857 = vmatprep.subr.bf16.mxu0 %v11426_v41  ;;  %7390 = vmatprep.subr.bf16.mxu1 %v11428_v42  ;;  %v2773_v13 = vrot.slane %v2751_v11, %v14371_v2  ;;  %v11486_v29 = vld [vmem:[%s14321_s9 + $0x200] ss:$16 sps:$4 sm:$0xff]   ;;  %v11489_v31 = vld [vmem:[%s14321_s9 + $0x208] ss:$16 sps:$4 sm:$0xff]   ;;  %v11494_v32 = vld [vmem:[%s14321_s9 + $0x224] ss:$16 sps:$4 sm:$0xff]  }
 0x1d6   : > { %v11497_v33 = vld [vmem:[%s14321_s9 + $0x22c] ss:$16 sps:$4 sm:$0xff]   ;;  %v11492_v35 = vld [vmem:[%s14321_s9 + $0x220] ss:$16 sps:$4 sm:$0xff]   ;;  %v11495_v36 = vld [vmem:[%s14321_s9 + $0x228] ss:$16 sps:$4 sm:$0xff]  }
 0x1d7   : > { %6877 = vmatprep.mubr.bf16.mxu0 %v2773_v13  ;;  %7410 = vmatprep.mubr.bf16.mxu1 %v2773_v13  ;;  %v2783_v34 = vcombine.high %v2773_v13, %v2773_v13  ;;  %v11500_v37 = vld [vmem:[%s14321_s9 + $0x244] ss:$16 sps:$4 sm:$0xff]   ;;  %v11503_v38 = vld [vmem:[%s14321_s9 + $0x24c] ss:$16 sps:$4 sm:$0xff]   ;;  %v11498_v39 = vld [vmem:[%s14321_s9 + $0x240] ss:$16 sps:$4 sm:$0xff]  }
 0x1d8   : > { %6858 = vmatpush1.bf16.msra.mxu0 %v11430_v43  ;;  %7391 = vmatpush1.bf16.msra.mxu1 %v11431_v44  ;;  %v11501_v40 = vld [vmem:[%s14321_s9 + $0x248] ss:$16 sps:$4 sm:$0xff]   ;;  %v11506_v41 = vld [vmem:[%s14321_s9 + $0x264] ss:$16 sps:$4 sm:$0xff]   ;;  %v11509_v42 = vld [vmem:[%s14321_s9 + $0x26c] ss:$16 sps:$4 sm:$0xff]  }
 0x1d9   : > { %6859 = vmatprep.subr.bf16.mxu0 %v11432_v45  ;;  %7392 = vmatprep.subr.bf16.mxu1 %v11434_v46  ;;  %v11504_v43 = vld [vmem:[%s14321_s9 + $0x260] ss:$16 sps:$4 sm:$0xff]   ;;  %v11507_v44 = vld [vmem:[%s14321_s9 + $0x268] ss:$16 sps:$4 sm:$0xff]   ;;  %v11512_v45 = vld [vmem:[%s14321_s9 + $0x284] ss:$16 sps:$4 sm:$0xff]  }
 0x1da   : > { %v11515_v46 = vld [vmem:[%s14321_s9 + $0x28c] ss:$16 sps:$4 sm:$0xff]   ;;  %v11524_v53 = vld [vmem:[%s14321_s9 + $0x2c4] ss:$16 sps:$4 sm:$0xff]   ;;  %v11522_v55 = vld [vmem:[%s14321_s9 + $0x2c0] ss:$16 sps:$4 sm:$0xff]  }
 0x1db   : > { %v11527_v54 = vld [vmem:[%s14321_s9 + $0x2cc] ss:$16 sps:$4 sm:$0xff]   ;;  %v11528_v60 = vld [vmem:[%s14321_s9 + $0x2e0] ss:$16 sps:$4 sm:$0xff]   ;;  %v11543_v7 = vld [vmem:[%s14321_s9 + $0x328] ss:$16 sps:$4 sm:$0xff]  }
 0x1dc   : > { %6860 = vmatpush1.bf16.msra.mxu0 %v11436_v47  ;;  %7393 = vmatpush1.bf16.msra.mxu1 %v11437_v48  ;;  %v11510_v47 = vld [vmem:[%s14321_s9 + $0x280] ss:$16 sps:$4 sm:$0xff]   ;;  %v11513_v48 = vld [vmem:[%s14321_s9 + $0x288] ss:$16 sps:$4 sm:$0xff]   ;;  %v11557_v13 = vld [vmem:[%s14321_s9 + $0x36c] ss:$16 sps:$4 sm:$0xff]  }
 0x1dd   : > { %6861 = vmatprep.subr.bf16.mxu0 %v11438_v49  ;;  %7394 = vmatprep.subr.bf16.mxu1 %v11440_v50  ;;  %v11518_v49 = vld [vmem:[%s14321_s9 + $0x2a4] ss:$16 sps:$4 sm:$0xff]   ;;  %v11521_v50 = vld [vmem:[%s14321_s9 + $0x2ac] ss:$16 sps:$4 sm:$0xff]   ;;  %v11549_v11 = vld [vmem:[%s14321_s9 + $0x348] ss:$16 sps:$4 sm:$0xff]  }
 0x1e0   : > { %6862 = vmatpush1.bf16.msra.mxu0 %v11442_v51  ;;  %7395 = vmatpush1.bf16.msra.mxu1 %v11443_v52  ;;  %v11516_v51 = vld [vmem:[%s14321_s9 + $0x2a0] ss:$16 sps:$4 sm:$0xff]   ;;  %v11519_v52 = vld [vmem:[%s14321_s9 + $0x2a8] ss:$16 sps:$4 sm:$0xff]  }
 0x1e1   : > { %6863 = vmatprep.subr.bf16.mxu0 %v11444_v56  ;;  %7396 = vmatprep.subr.bf16.mxu1 %v11446_v57  ;;  %v11525_v56 = vld [vmem:[%s14321_s9 + $0x2c8] ss:$16 sps:$4 sm:$0xff]   ;;  %v11530_v57 = vld [vmem:[%s14321_s9 + $0x2e4] ss:$16 sps:$4 sm:$0xff]  }
 0x1e4   : > { %6864 = vmatpush1.bf16.msra.mxu0 %v11448_v58  ;;  %7397 = vmatpush1.bf16.msra.mxu1 %v11449_v61  ;;  %v11533_v58 = vld [vmem:[%s14321_s9 + $0x2ec] ss:$16 sps:$4 sm:$0xff]   ;;  %v11531_v61 = vld [vmem:[%s14321_s9 + $0x2e8] ss:$16 sps:$4 sm:$0xff]  }
 0x1e5   : > { %6865 = vmatprep.subr.bf16.mxu0 %v11450_v62  ;;  %7398 = vmatprep.subr.bf16.mxu1 %v11452_v63  ;;  %v11536_v62 = vld [vmem:[%s14321_s9 + $0x304] ss:$16 sps:$4 sm:$0xff]   ;;  %v11539_v63 = vld [vmem:[%s14321_s9 + $0x30c] ss:$16 sps:$4 sm:$0xff]  }
 0x1e8   : > { %6866 = vmatpush1.bf16.msra.mxu0 %v11454_v0  ;;  %7399 = vmatpush1.bf16.msra.mxu1 %v11455_v1  ;;  %v11534_v0 = vld [vmem:[%s14321_s9 + $0x300] ss:$16 sps:$4 sm:$0xff]   ;;  %v11537_v1 = vld [vmem:[%s14321_s9 + $0x308] ss:$16 sps:$4 sm:$0xff]  }
 0x1e9   : > { %6867 = vmatprep.subr.bf16.mxu0 %v11456_v3  ;;  %7400 = vmatprep.subr.bf16.mxu1 %v11458_v4  ;;  %v11542_v3 = vld [vmem:[%s14321_s9 + $0x324] ss:$16 sps:$4 sm:$0xff]   ;;  %v11545_v4 = vld [vmem:[%s14321_s9 + $0x32c] ss:$16 sps:$4 sm:$0xff]  }
 0x1ec   : > { %6868 = vmatpush1.bf16.msra.mxu0 %v11460_v6  ;;  %7401 = vmatpush1.bf16.msra.mxu1 %v11461_v8  ;;  %v11540_v6 = vld [vmem:[%s14321_s9 + $0x320] ss:$16 sps:$4 sm:$0xff]   ;;  %v11548_v8 = vld [vmem:[%s14321_s9 + $0x344] ss:$16 sps:$4 sm:$0xff]  }
 0x1ed   : > { %6869 = vmatprep.subr.bf16.mxu0 %v11462_v9  ;;  %7402 = vmatprep.subr.bf16.mxu1 %v11464_v10  ;;  %v11551_v9 = vld [vmem:[%s14321_s9 + $0x34c] ss:$16 sps:$4 sm:$0xff]   ;;  %v11546_v10 = vld [vmem:[%s14321_s9 + $0x340] ss:$16 sps:$4 sm:$0xff]  }
 0x1f0   : > { %6870 = vmatpush1.bf16.msra.mxu0 %v11466_v12  ;;  %7403 = vmatpush1.bf16.msra.mxu1 %v11467_v14  ;;  %v11554_v12 = vld [vmem:[%s14321_s9 + $0x364] ss:$16 sps:$4 sm:$0xff]   ;;  %v11552_v14 = vld [vmem:[%s14321_s9 + $0x360] ss:$16 sps:$4 sm:$0xff]  }
 0x1f1   : > { %6871 = vmatprep.subr.bf16.mxu0 %v11468_v15  ;;  %7404 = vmatprep.subr.bf16.mxu1 %v11470_v16  ;;  %v11555_v15 = vld [vmem:[%s14321_s9 + $0x368] ss:$16 sps:$4 sm:$0xff]   ;;  %v11560_v16 = vld [vmem:[%s14321_s9 + $0x384] ss:$16 sps:$4 sm:$0xff]  }
 0x1f4   : > { %6872 = vmatpush1.bf16.msra.mxu0 %v11472_v17  ;;  %7405 = vmatpush1.bf16.msra.mxu1 %v11473_v18  ;;  %v11563_v17 = vld [vmem:[%s14321_s9 + $0x38c] ss:$16 sps:$4 sm:$0xff]   ;;  %v11558_v18 = vld [vmem:[%s14321_s9 + $0x380] ss:$16 sps:$4 sm:$0xff]  }
 0x1f5   : > { %6873 = vmatprep.subr.bf16.mxu0 %v11474_v19  ;;  %7406 = vmatprep.subr.bf16.mxu1 %v11476_v20  ;;  %v11561_v19 = vld [vmem:[%s14321_s9 + $0x388] ss:$16 sps:$4 sm:$0xff]   ;;  %v11566_v20 = vld [vmem:[%s14321_s9 + $0x3a4] ss:$16 sps:$4 sm:$0xff]  }
 0x1f8   : > { %6874 = vmatpush1.bf16.msra.mxu0 %v11478_v21  ;;  %7407 = vmatpush1.bf16.msra.mxu1 %v11479_v22  ;;  %v11569_v21 = vld [vmem:[%s14321_s9 + $0x3ac] ss:$16 sps:$4 sm:$0xff]   ;;  %v11564_v22 = vld [vmem:[%s14321_s9 + $0x3a0] ss:$16 sps:$4 sm:$0xff]  }
 0x1f9   : > { %6875 = vmatprep.subr.bf16.mxu0 %v11480_v23  ;;  %7408 = vmatprep.subr.bf16.mxu1 %v11482_v24  ;;  %v11567_v23 = vld [vmem:[%s14321_s9 + $0x3a8] ss:$16 sps:$4 sm:$0xff]   ;;  %v11572_v24 = vld [vmem:[%s14321_s9 + $0x3c4] ss:$16 sps:$4 sm:$0xff]  }
 0x1fc   : > { %6876 = vmatpush1.bf16.msra.mxu0 %v11484_v25  ;;  %7409 = vmatpush1.bf16.msra.mxu1 %v11485_v26  ;;  %v11575_v25 = vld [vmem:[%s14321_s9 + $0x3cc] ss:$16 sps:$4 sm:$0xff]   ;;  %v2736_v26 = vcombine.high %v14378_v5, %v14378_v5  ;;  %v11579_v5 = vld [vmem:[%s14321_s9 + $0x3e8] ss:$16 sps:$4 sm:$0xff]  }
 0x1fd   : > { %6886 = vmatprep.subr.bf16.mxu0 %v11488_v27  ;;  %7419 = vmatprep.subr.bf16.mxu1 %v11491_v28  ;;  %v11570_v27 = vld [vmem:[%s14321_s9 + $0x3c0] ss:$16 sps:$4 sm:$0xff]   ;;  %v11573_v28 = vld [vmem:[%s14321_s9 + $0x3c8] ss:$16 sps:$4 sm:$0xff]  }
 0x1ff   : > { %6878 = vmatmul.mubr.bf16.vlgmr.msra.gmra.mrb[0].mxu0 %v14405_v30  ;;  %7411 = vmatmul.mubr.bf16.vlgmr.msra.gmra.mrb[0].mxu1 %v14405_v30 }
 0x200   : > { %6887 = vmatpush1.bf16.msra.mxu0 %v11486_v29  ;;  %7420 = vmatpush1.bf16.msra.mxu1 %v11489_v31  ;;  %v11578_v29 = vld [vmem:[%s14321_s9 + $0x3e4] ss:$16 sps:$4 sm:$0xff]   ;;  %v11581_v31 = vld [vmem:[%s14321_s9 + $0x3ec] ss:$16 sps:$4 sm:$0xff]  }
 0x201   : > { %6888 = vmatprep.subr.bf16.mxu0 %v11494_v32  ;;  %7421 = vmatprep.subr.bf16.mxu1 %v11497_v33  ;;  %v14471_v32 = vrot.slane %v2736_v26, %v14371_v2  ;;  %v11576_v33 = vld [vmem:[%s14321_s9 + $0x3e0] ss:$16 sps:$4 sm:$0xff]   ;;  %v11657_v26 = vld [vmem:[%s14321_s9 + $0x588] ss:$16 sps:$4 sm:$0xff]  }
 0x202   : > { %6918 = vmatprep.mubr.bf16.mxu0 %v2783_v34  ;;  %7451 = vmatprep.mubr.bf16.mxu1 %v2783_v34  ;;  %v11584_v34 = vld [vmem:[%s14321_s9 + $0x404] ss:$16 sps:$4 sm:$0xff]  }
 0x204   : > { %6889 = vmatpush1.bf16.msra.mxu0 %v11492_v35  ;;  %7422 = vmatpush1.bf16.msra.mxu1 %v11495_v36  ;;  %v11587_v35 = vld [vmem:[%s14321_s9 + $0x40c] ss:$16 sps:$4 sm:$0xff]   ;;  %v2752_v36 = vcombine.high %v14471_v32, %v14471_v32 }
 0x205   : > { %6890 = vmatprep.subr.bf16.mxu0 %v11500_v37  ;;  %7423 = vmatprep.subr.bf16.mxu1 %v11503_v38  ;;  %v11582_v37 = vld [vmem:[%s14321_s9 + $0x400] ss:$16 sps:$4 sm:$0xff]   ;;  %v2781_v38 = vcombine.high %v14405_v30, %v14405_v30  ;;  %v11591_v30 = vld [vmem:[%s14321_s9 + $0x428] ss:$16 sps:$4 sm:$0xff]  }
 0x208   : > { %6891 = vmatpush1.bf16.msra.mxu0 %v11498_v39  ;;  %7424 = vmatpush1.bf16.msra.mxu1 %v11501_v40  ;;  %v11585_v39 = vld [vmem:[%s14321_s9 + $0x408] ss:$16 sps:$4 sm:$0xff]   ;;  %v11590_v40 = vld [vmem:[%s14321_s9 + $0x424] ss:$16 sps:$4 sm:$0xff]  }
 0x209   : > { %6892 = vmatprep.subr.bf16.mxu0 %v11506_v41  ;;  %7425 = vmatprep.subr.bf16.mxu1 %v11509_v42  ;;  %v11593_v41 = vld [vmem:[%s14321_s9 + $0x42c] ss:$16 sps:$4 sm:$0xff]   ;;  %v14486_v42 = vrot.slane %v2752_v36, %v14371_v2  ;;  %v11674_v36 = vld [vmem:[%s14321_s9 + $0x5e4] ss:$16 sps:$4 sm:$0xff]  }
 0x20c   : > { %6893 = vmatpush1.bf16.msra.mxu0 %v11504_v43  ;;  %7426 = vmatpush1.bf16.msra.mxu1 %v11507_v44  ;;  %v11588_v43 = vld [vmem:[%s14321_s9 + $0x420] ss:$16 sps:$4 sm:$0xff]   ;;  %v11596_v44 = vld [vmem:[%s14321_s9 + $0x444] ss:$16 sps:$4 sm:$0xff]  }
 0x20d   : > { %6894 = vmatprep.subr.bf16.mxu0 %v11512_v45  ;;  %7427 = vmatprep.subr.bf16.mxu1 %v11515_v46  ;;  %v11599_v45 = vld [vmem:[%s14321_s9 + $0x44c] ss:$16 sps:$4 sm:$0xff]   ;;  %v11594_v46 = vld [vmem:[%s14321_s9 + $0x440] ss:$16 sps:$4 sm:$0xff]  }
 0x210   : > { %6895 = vmatpush1.bf16.msra.mxu0 %v11510_v47  ;;  %7428 = vmatpush1.bf16.msra.mxu1 %v11513_v48  ;;  %v11597_v47 = vld [vmem:[%s14321_s9 + $0x448] ss:$16 sps:$4 sm:$0xff]   ;;  %v11602_v48 = vld [vmem:[%s14321_s9 + $0x464] ss:$16 sps:$4 sm:$0xff]  }
 0x211   : > { %6896 = vmatprep.subr.bf16.mxu0 %v11518_v49  ;;  %7429 = vmatprep.subr.bf16.mxu1 %v11521_v50  ;;  %v11605_v49 = vld [vmem:[%s14321_s9 + $0x46c] ss:$16 sps:$4 sm:$0xff]   ;;  %v11600_v50 = vld [vmem:[%s14321_s9 + $0x460] ss:$16 sps:$4 sm:$0xff]  }
 0x214   : > { %6897 = vmatpush1.bf16.msra.mxu0 %v11516_v51  ;;  %7430 = vmatpush1.bf16.msra.mxu1 %v11519_v52  ;;  %v11603_v51 = vld [vmem:[%s14321_s9 + $0x468] ss:$16 sps:$4 sm:$0xff]   ;;  %v11608_v52 = vld [vmem:[%s14321_s9 + $0x484] ss:$16 sps:$4 sm:$0xff]  }
 0x215   : > { %6898 = vmatprep.subr.bf16.mxu0 %v11524_v53  ;;  %7431 = vmatprep.subr.bf16.mxu1 %v11527_v54  ;;  %v11611_v53 = vld [vmem:[%s14321_s9 + $0x48c] ss:$16 sps:$4 sm:$0xff]   ;;  %v11606_v54 = vld [vmem:[%s14321_s9 + $0x480] ss:$16 sps:$4 sm:$0xff]  }
 0x218   : > { %6899 = vmatpush1.bf16.msra.mxu0 %v11522_v55  ;;  %7432 = vmatpush1.bf16.msra.mxu1 %v11525_v56  ;;  %v11609_v55 = vld [vmem:[%s14321_s9 + $0x488] ss:$16 sps:$4 sm:$0xff]   ;;  %v11614_v56 = vld [vmem:[%s14321_s9 + $0x4a4] ss:$16 sps:$4 sm:$0xff]  }
 0x219   : > { %6900 = vmatprep.subr.bf16.mxu0 %v11530_v57  ;;  %7433 = vmatprep.subr.bf16.mxu1 %v11533_v58  ;;  %v11617_v57 = vld [vmem:[%s14321_s9 + $0x4ac] ss:$16 sps:$4 sm:$0xff]   ;;  %v11612_v58 = vld [vmem:[%s14321_s9 + $0x4a0] ss:$16 sps:$4 sm:$0xff]  }
 0x21c   : > { %6901 = vmatpush1.bf16.msra.mxu0 %v11528_v60  ;;  %7434 = vmatpush1.bf16.msra.mxu1 %v11531_v61  ;;  %v11615_v60 = vld [vmem:[%s14321_s9 + $0x4a8] ss:$16 sps:$4 sm:$0xff]   ;;  %v11620_v61 = vld [vmem:[%s14321_s9 + $0x4c4] ss:$16 sps:$4 sm:$0xff]  }
 0x21d   : > { %6902 = vmatprep.subr.bf16.mxu0 %v11536_v62  ;;  %7435 = vmatprep.subr.bf16.mxu1 %v11539_v63  ;;  %v11623_v62 = vld [vmem:[%s14321_s9 + $0x4cc] ss:$16 sps:$4 sm:$0xff]   ;;  %v11618_v63 = vld [vmem:[%s14321_s9 + $0x4c0] ss:$16 sps:$4 sm:$0xff]  }
 0x220   : > { %6903 = vmatpush1.bf16.msra.mxu0 %v11534_v0  ;;  %7436 = vmatpush1.bf16.msra.mxu1 %v11537_v1  ;;  %v11621_v0 = vld [vmem:[%s14321_s9 + $0x4c8] ss:$16 sps:$4 sm:$0xff]   ;;  %v11626_v1 = vld [vmem:[%s14321_s9 + $0x4e4] ss:$16 sps:$4 sm:$0xff]  }
 0x221   : > { %6904 = vmatprep.subr.bf16.mxu0 %v11542_v3  ;;  %7437 = vmatprep.subr.bf16.mxu1 %v11545_v4  ;;  %v11629_v3 = vld [vmem:[%s14321_s9 + $0x4ec] ss:$16 sps:$4 sm:$0xff]   ;;  %v11624_v4 = vld [vmem:[%s14321_s9 + $0x4e0] ss:$16 sps:$4 sm:$0xff]  }
 0x224   : > { %6905 = vmatpush1.bf16.msra.mxu0 %v11540_v6  ;;  %7438 = vmatpush1.bf16.msra.mxu1 %v11543_v7  ;;  %v11627_v6 = vld [vmem:[%s14321_s9 + $0x4e8] ss:$16 sps:$4 sm:$0xff]   ;;  %v11632_v7 = vld [vmem:[%s14321_s9 + $0x504] ss:$16 sps:$4 sm:$0xff]  }
 0x225   : > { %6906 = vmatprep.subr.bf16.mxu0 %v11548_v8  ;;  %7439 = vmatprep.subr.bf16.mxu1 %v11551_v9  ;;  %v11635_v8 = vld [vmem:[%s14321_s9 + $0x50c] ss:$16 sps:$4 sm:$0xff]   ;;  %v11630_v9 = vld [vmem:[%s14321_s9 + $0x500] ss:$16 sps:$4 sm:$0xff]  }
 0x228   : > { %6907 = vmatpush1.bf16.msra.mxu0 %v11546_v10  ;;  %7440 = vmatpush1.bf16.msra.mxu1 %v11549_v11  ;;  %v11633_v10 = vld [vmem:[%s14321_s9 + $0x508] ss:$16 sps:$4 sm:$0xff]   ;;  %v11638_v11 = vld [vmem:[%s14321_s9 + $0x524] ss:$16 sps:$4 sm:$0xff]  }
 0x229   : > { %6908 = vmatprep.subr.bf16.mxu0 %v11554_v12  ;;  %7441 = vmatprep.subr.bf16.mxu1 %v11557_v13  ;;  %v11641_v12 = vld [vmem:[%s14321_s9 + $0x52c] ss:$16 sps:$4 sm:$0xff]   ;;  %v11636_v13 = vld [vmem:[%s14321_s9 + $0x520] ss:$16 sps:$4 sm:$0xff]  }
 0x22c   : > { %6909 = vmatpush1.bf16.msra.mxu0 %v11552_v14  ;;  %7442 = vmatpush1.bf16.msra.mxu1 %v11555_v15  ;;  %v11639_v14 = vld [vmem:[%s14321_s9 + $0x528] ss:$16 sps:$4 sm:$0xff]   ;;  %v11644_v15 = vld [vmem:[%s14321_s9 + $0x544] ss:$16 sps:$4 sm:$0xff]  }
 0x22d   : > { %6910 = vmatprep.subr.bf16.mxu0 %v11560_v16  ;;  %7443 = vmatprep.subr.bf16.mxu1 %v11563_v17  ;;  %v11647_v16 = vld [vmem:[%s14321_s9 + $0x54c] ss:$16 sps:$4 sm:$0xff]   ;;  %v11642_v17 = vld [vmem:[%s14321_s9 + $0x540] ss:$16 sps:$4 sm:$0xff]  }
 0x230   : > { %6911 = vmatpush1.bf16.msra.mxu0 %v11558_v18  ;;  %7444 = vmatpush1.bf16.msra.mxu1 %v11561_v19  ;;  %v11645_v18 = vld [vmem:[%s14321_s9 + $0x548] ss:$16 sps:$4 sm:$0xff]   ;;  %v11650_v19 = vld [vmem:[%s14321_s9 + $0x564] ss:$16 sps:$4 sm:$0xff]  }
 0x231   : > { %6912 = vmatprep.subr.bf16.mxu0 %v11566_v20  ;;  %7445 = vmatprep.subr.bf16.mxu1 %v11569_v21  ;;  %v11653_v20 = vld [vmem:[%s14321_s9 + $0x56c] ss:$16 sps:$4 sm:$0xff]   ;;  %v11648_v21 = vld [vmem:[%s14321_s9 + $0x560] ss:$16 sps:$4 sm:$0xff]  }
 0x234   : > { %6913 = vmatpush1.bf16.msra.mxu0 %v11564_v22  ;;  %7446 = vmatpush1.bf16.msra.mxu1 %v11567_v23  ;;  %v11651_v22 = vld [vmem:[%s14321_s9 + $0x568] ss:$16 sps:$4 sm:$0xff]   ;;  %v11656_v23 = vld [vmem:[%s14321_s9 + $0x584] ss:$16 sps:$4 sm:$0xff]  }
 0x235   : > { %6914 = vmatprep.subr.bf16.mxu0 %v11572_v24  ;;  %7447 = vmatprep.subr.bf16.mxu1 %v11575_v25  ;;  %v11659_v24 = vld [vmem:[%s14321_s9 + $0x58c] ss:$16 sps:$4 sm:$0xff]   ;;  %v11654_v25 = vld [vmem:[%s14321_s9 + $0x580] ss:$16 sps:$4 sm:$0xff]  }
 0x238   : > { %6915 = vmatpush1.bf16.msra.mxu0 %v11570_v27  ;;  %7448 = vmatpush1.bf16.msra.mxu1 %v11573_v28  ;;  %v11662_v27 = vld [vmem:[%s14321_s9 + $0x5a4] ss:$16 sps:$4 sm:$0xff]   ;;  %v11665_v28 = vld [vmem:[%s14321_s9 + $0x5ac] ss:$16 sps:$4 sm:$0xff]  }
 0x239   : > { %6916 = vmatprep.subr.bf16.mxu0 %v11578_v29  ;;  %7449 = vmatprep.subr.bf16.mxu1 %v11581_v31  ;;  %v11660_v29 = vld [vmem:[%s14321_s9 + $0x5a0] ss:$16 sps:$4 sm:$0xff]   ;;  %v11663_v31 = vld [vmem:[%s14321_s9 + $0x5a8] ss:$16 sps:$4 sm:$0xff]  }
 0x23c   : > { %6917 = vmatpush1.bf16.msra.mxu0 %v11576_v33  ;;  %7450 = vmatpush1.bf16.msra.mxu1 %v11579_v5  ;;  %v11668_v33 = vld [vmem:[%s14321_s9 + $0x5c4] ss:$16 sps:$4 sm:$0xff]   ;;  %v11671_v5 = vld [vmem:[%s14321_s9 + $0x5cc] ss:$16 sps:$4 sm:$0xff]  }
 0x23d   : > { %6927 = vmatprep.subr.bf16.mxu0 %v11584_v34  ;;  %7460 = vmatprep.subr.bf16.mxu1 %v11587_v35  ;;  %v11666_v34 = vld [vmem:[%s14321_s9 + $0x5c0] ss:$16 sps:$4 sm:$0xff]   ;;  %v11669_v35 = vld [vmem:[%s14321_s9 + $0x5c8] ss:$16 sps:$4 sm:$0xff]  }
 0x23f   : > { %6919 = vmatmul.mubr.bf16.vlgmr.msra.gmra.mrb[0].mxu0 %v2781_v38  ;;  %7452 = vmatmul.mubr.bf16.vlgmr.msra.gmra.mrb[0].mxu1 %v2781_v38  ;;  %v11672_v38 = vld [vmem:[%s14321_s9 + $0x5e0] ss:$16 sps:$4 sm:$0xff]  }
 0x240   : > { %6928 = vmatpush1.bf16.msra.mxu0 %v11582_v37  ;;  %7461 = vmatpush1.bf16.msra.mxu1 %v11585_v39  ;;  %v11677_v37 = vld [vmem:[%s14321_s9 + $0x5ec] ss:$16 sps:$4 sm:$0xff]   ;;  %v11675_v39 = vld [vmem:[%s14321_s9 + $0x5e8] ss:$16 sps:$4 sm:$0xff]  }
 0x241   : > { %6929 = vmatprep.subr.bf16.mxu0 %v11590_v40  ;;  %7462 = vmatprep.subr.bf16.mxu1 %v11593_v41  ;;  %v11681_v40 = vld [vmem:[%s14321_s9 + $0x604] ss:$16 sps:$4 sm:$0xff]   ;;  %v11684_v41 = vld [vmem:[%s14321_s9 + $0x60c] ss:$16 sps:$4 sm:$0xff]  }
 0x242   : > { %6959 = vmatprep.mubr.bf16.mxu0 %v14486_v42  ;;  %7492 = vmatprep.mubr.bf16.mxu1 %v14486_v42 }
 0x244   : > { %6930 = vmatpush1.bf16.msra.mxu0 %v11588_v43  ;;  %7463 = vmatpush1.bf16.msra.mxu1 %v11591_v30  ;;  %v11679_v43 = vld [vmem:[%s14321_s9 + $0x600] ss:$16 sps:$4 sm:$0xff]   ;;  %v14553_v30 = vrot.slane %v14471_v32, %v14371_v2 }
 0x245   : > { %6931 = vmatprep.subr.bf16.mxu0 %v11596_v44  ;;  %7464 = vmatprep.subr.bf16.mxu1 %v11599_v45  ;;  %v11682_v44 = vld [vmem:[%s14321_s9 + $0x608] ss:$16 sps:$4 sm:$0xff]   ;;  %v11687_v45 = vld [vmem:[%s14321_s9 + $0x624] ss:$16 sps:$4 sm:$0xff]   ;;  %v11685_v32 = vld [vmem:[%s14321_s9 + $0x620] ss:$16 sps:$4 sm:$0xff]  }
 0x248   : > { %6932 = vmatpush1.bf16.msra.mxu0 %v11594_v46  ;;  %7465 = vmatpush1.bf16.msra.mxu1 %v11597_v47  ;;  %v11690_v46 = vld [vmem:[%s14321_s9 + $0x62c] ss:$16 sps:$4 sm:$0xff]   ;;  %v2784_v47 = vcombine.high %v14486_v42, %v14486_v42  ;;  %v11691_v42 = vld [vmem:[%s14321_s9 + $0x640] ss:$16 sps:$4 sm:$0xff]  }
 0x249   : > { %6933 = vmatprep.subr.bf16.mxu0 %v11602_v48  ;;  %7466 = vmatprep.subr.bf16.mxu1 %v11605_v49  ;;  %v11688_v48 = vld [vmem:[%s14321_s9 + $0x628] ss:$16 sps:$4 sm:$0xff]   ;;  %v11693_v49 = vld [vmem:[%s14321_s9 + $0x644] ss:$16 sps:$4 sm:$0xff]  }
 0x24c   : > { %6934 = vmatpush1.bf16.msra.mxu0 %v11600_v50  ;;  %7467 = vmatpush1.bf16.msra.mxu1 %v11603_v51  ;;  %v11696_v50 = vld [vmem:[%s14321_s9 + $0x64c] ss:$16 sps:$4 sm:$0xff]   ;;  %v11694_v51 = vld [vmem:[%s14321_s9 + $0x648] ss:$16 sps:$4 sm:$0xff]  }
 0x24d   : > { %6935 = vmatprep.subr.bf16.mxu0 %v11608_v52  ;;  %7468 = vmatprep.subr.bf16.mxu1 %v11611_v53  ;;  %v11699_v52 = vld [vmem:[%s14321_s9 + $0x664] ss:$16 sps:$4 sm:$0xff]   ;;  %v11702_v53 = vld [vmem:[%s14321_s9 + $0x66c] ss:$16 sps:$4 sm:$0xff]  }
 0x250   : > { %6936 = vmatpush1.bf16.msra.mxu0 %v11606_v54  ;;  %7469 = vmatpush1.bf16.msra.mxu1 %v11609_v55  ;;  %v11697_v54 = vld [vmem:[%s14321_s9 + $0x660] ss:$16 sps:$4 sm:$0xff]   ;;  %v11700_v55 = vld [vmem:[%s14321_s9 + $0x668] ss:$16 sps:$4 sm:$0xff]  }
 0x251   : > { %6937 = vmatprep.subr.bf16.mxu0 %v11614_v56  ;;  %7470 = vmatprep.subr.bf16.mxu1 %v11617_v57  ;;  %v11705_v56 = vld [vmem:[%s14321_s9 + $0x684] ss:$16 sps:$4 sm:$0xff]   ;;  %v11708_v57 = vld [vmem:[%s14321_s9 + $0x68c] ss:$16 sps:$4 sm:$0xff]  }
 0x254   : > { %6938 = vmatpush1.bf16.msra.mxu0 %v11612_v58  ;;  %7471 = vmatpush1.bf16.msra.mxu1 %v11615_v60  ;;  %v11703_v58 = vld [vmem:[%s14321_s9 + $0x680] ss:$16 sps:$4 sm:$0xff]   ;;  %v11706_v60 = vld [vmem:[%s14321_s9 + $0x688] ss:$16 sps:$4 sm:$0xff]  }
 0x255   : > { %6939 = vmatprep.subr.bf16.mxu0 %v11620_v61  ;;  %7472 = vmatprep.subr.bf16.mxu1 %v11623_v62  ;;  %v11711_v61 = vld [vmem:[%s14321_s9 + $0x6a4] ss:$16 sps:$4 sm:$0xff]   ;;  %v11714_v62 = vld [vmem:[%s14321_s9 + $0x6ac] ss:$16 sps:$4 sm:$0xff]  }
 0x258   : > { %6940 = vmatpush1.bf16.msra.mxu0 %v11618_v63  ;;  %7473 = vmatpush1.bf16.msra.mxu1 %v11621_v0  ;;  %v11709_v63 = vld [vmem:[%s14321_s9 + $0x6a0] ss:$16 sps:$4 sm:$0xff]   ;;  %v11712_v0 = vld [vmem:[%s14321_s9 + $0x6a8] ss:$16 sps:$4 sm:$0xff]  }
 0x259   : > { %6941 = vmatprep.subr.bf16.mxu0 %v11626_v1  ;;  %7474 = vmatprep.subr.bf16.mxu1 %v11629_v3  ;;  %v11717_v1 = vld [vmem:[%s14321_s9 + $0x6c4] ss:$16 sps:$4 sm:$0xff]   ;;  %v11720_v3 = vld [vmem:[%s14321_s9 + $0x6cc] ss:$16 sps:$4 sm:$0xff]  }
 0x25c   : > { %6942 = vmatpush1.bf16.msra.mxu0 %v11624_v4  ;;  %7475 = vmatpush1.bf16.msra.mxu1 %v11627_v6  ;;  %v11715_v4 = vld [vmem:[%s14321_s9 + $0x6c0] ss:$16 sps:$4 sm:$0xff]   ;;  %v11718_v6 = vld [vmem:[%s14321_s9 + $0x6c8] ss:$16 sps:$4 sm:$0xff]  }
 0x25d   : > { %6943 = vmatprep.subr.bf16.mxu0 %v11632_v7  ;;  %7476 = vmatprep.subr.bf16.mxu1 %v11635_v8  ;;  %v11723_v7 = vld [vmem:[%s14321_s9 + $0x6e4] ss:$16 sps:$4 sm:$0xff]   ;;  %v11726_v8 = vld [vmem:[%s14321_s9 + $0x6ec] ss:$16 sps:$4 sm:$0xff]  }
 0x260   : > { %6944 = vmatpush1.bf16.msra.mxu0 %v11630_v9  ;;  %7477 = vmatpush1.bf16.msra.mxu1 %v11633_v10  ;;  %v11721_v9 = vld [vmem:[%s14321_s9 + $0x6e0] ss:$16 sps:$4 sm:$0xff]   ;;  %v11724_v10 = vld [vmem:[%s14321_s9 + $0x6e8] ss:$16 sps:$4 sm:$0xff]  }
 0x261   : > { %6945 = vmatprep.subr.bf16.mxu0 %v11638_v11  ;;  %7478 = vmatprep.subr.bf16.mxu1 %v11641_v12  ;;  %v11729_v11 = vld [vmem:[%s14321_s9 + $0x704] ss:$16 sps:$4 sm:$0xff]   ;;  %v11732_v12 = vld [vmem:[%s14321_s9 + $0x70c] ss:$16 sps:$4 sm:$0xff]  }
 0x264   : > { %6946 = vmatpush1.bf16.msra.mxu0 %v11636_v13  ;;  %7479 = vmatpush1.bf16.msra.mxu1 %v11639_v14  ;;  %v11727_v13 = vld [vmem:[%s14321_s9 + $0x700] ss:$16 sps:$4 sm:$0xff]   ;;  %v11730_v14 = vld [vmem:[%s14321_s9 + $0x708] ss:$16 sps:$4 sm:$0xff]  }
 0x265   : > { %6947 = vmatprep.subr.bf16.mxu0 %v11644_v15  ;;  %7480 = vmatprep.subr.bf16.mxu1 %v11647_v16  ;;  %v11735_v15 = vld [vmem:[%s14321_s9 + $0x724] ss:$16 sps:$4 sm:$0xff]   ;;  %v11738_v16 = vld [vmem:[%s14321_s9 + $0x72c] ss:$16 sps:$4 sm:$0xff]  }
 0x268   : > { %6948 = vmatpush1.bf16.msra.mxu0 %v11642_v17  ;;  %7481 = vmatpush1.bf16.msra.mxu1 %v11645_v18  ;;  %v11733_v17 = vld [vmem:[%s14321_s9 + $0x720] ss:$16 sps:$4 sm:$0xff]   ;;  %v11736_v18 = vld [vmem:[%s14321_s9 + $0x728] ss:$16 sps:$4 sm:$0xff]  }
 0x269   : > { %6949 = vmatprep.subr.bf16.mxu0 %v11650_v19  ;;  %7482 = vmatprep.subr.bf16.mxu1 %v11653_v20  ;;  %v11741_v19 = vld [vmem:[%s14321_s9 + $0x744] ss:$16 sps:$4 sm:$0xff]   ;;  %v11744_v20 = vld [vmem:[%s14321_s9 + $0x74c] ss:$16 sps:$4 sm:$0xff]  }
 0x26c   : > { %6950 = vmatpush1.bf16.msra.mxu0 %v11648_v21  ;;  %7483 = vmatpush1.bf16.msra.mxu1 %v11651_v22  ;;  %v11739_v21 = vld [vmem:[%s14321_s9 + $0x740] ss:$16 sps:$4 sm:$0xff]   ;;  %v11742_v22 = vld [vmem:[%s14321_s9 + $0x748] ss:$16 sps:$4 sm:$0xff]  }
 0x26d   : > { %6951 = vmatprep.subr.bf16.mxu0 %v11656_v23  ;;  %7484 = vmatprep.subr.bf16.mxu1 %v11659_v24  ;;  %v11747_v23 = vld [vmem:[%s14321_s9 + $0x764] ss:$16 sps:$4 sm:$0xff]   ;;  %v11750_v24 = vld [vmem:[%s14321_s9 + $0x76c] ss:$16 sps:$4 sm:$0xff]  }
 0x270   : > { %6952 = vmatpush1.bf16.msra.mxu0 %v11654_v25  ;;  %7485 = vmatpush1.bf16.msra.mxu1 %v11657_v26  ;;  %v11745_v25 = vld [vmem:[%s14321_s9 + $0x760] ss:$16 sps:$4 sm:$0xff]   ;;  %v11748_v26 = vld [vmem:[%s14321_s9 + $0x768] ss:$16 sps:$4 sm:$0xff]  }
 0x271   : > { %6953 = vmatprep.subr.bf16.mxu0 %v11662_v27  ;;  %7486 = vmatprep.subr.bf16.mxu1 %v11665_v28  ;;  %v11753_v27 = vld [vmem:[%s14321_s9 + $0x784] ss:$16 sps:$4 sm:$0xff]   ;;  %v11756_v28 = vld [vmem:[%s14321_s9 + $0x78c] ss:$16 sps:$4 sm:$0xff]  }
 0x274   : > { %6954 = vmatpush1.bf16.msra.mxu0 %v11660_v29  ;;  %7487 = vmatpush1.bf16.msra.mxu1 %v11663_v31  ;;  %v11751_v29 = vld [vmem:[%s14321_s9 + $0x780] ss:$16 sps:$4 sm:$0xff]   ;;  %v11754_v31 = vld [vmem:[%s14321_s9 + $0x788] ss:$16 sps:$4 sm:$0xff]  }
 0x275   : > { %6955 = vmatprep.subr.bf16.mxu0 %v11668_v33  ;;  %7488 = vmatprep.subr.bf16.mxu1 %v11671_v5  ;;  %v11759_v33 = vld [vmem:[%s14321_s9 + $0x7a4] ss:$16 sps:$4 sm:$0xff]   ;;  %v11762_v5 = vld [vmem:[%s14321_s9 + $0x7ac] ss:$16 sps:$4 sm:$0xff]  }
 0x278   : > { %6956 = vmatpush1.bf16.msra.mxu0 %v11666_v34  ;;  %7489 = vmatpush1.bf16.msra.mxu1 %v11669_v35  ;;  %v11757_v34 = vld [vmem:[%s14321_s9 + $0x7a0] ss:$16 sps:$4 sm:$0xff]   ;;  %v11760_v35 = vld [vmem:[%s14321_s9 + $0x7a8] ss:$16 sps:$4 sm:$0xff]  }
 0x279   : > { %6957 = vmatprep.subr.bf16.mxu0 %v11674_v36  ;;  %7490 = vmatprep.subr.bf16.mxu1 %v11677_v37  ;;  %v11765_v36 = vld [vmem:[%s14321_s9 + $0x7c4] ss:$16 sps:$4 sm:$0xff]   ;;  %v11768_v37 = vld [vmem:[%s14321_s9 + $0x7cc] ss:$16 sps:$4 sm:$0xff]  }
 0x27c   : > { %6958 = vmatpush1.bf16.msra.mxu0 %v11672_v38  ;;  %7491 = vmatpush1.bf16.msra.mxu1 %v11675_v39  ;;  %v14617_v38 = vld.sshfl [vmem:[%s15614_s0 + $0x8] sm:$0xff pattern:$0x75316420] }
 0x27d   : > { %6968 = vmatprep.subr.bf16.mxu0 %v11681_v40  ;;  %7501 = vmatprep.subr.bf16.mxu1 %v11684_v41  ;;  %v11763_v39 = vld [vmem:[%s14321_s9 + $0x7c0] ss:$16 sps:$4 sm:$0xff]   ;;  %v11766_v40 = vld [vmem:[%s14321_s9 + $0x7c8] ss:$16 sps:$4 sm:$0xff]   ;;  %v11771_v41 = vld [vmem:[%s14321_s9 + $0x7e4] ss:$16 sps:$4 sm:$0xff]  }
 0x27f   : > { %6960 = vmatmul.mubr.bf16.vlgmr.msra.gmra.mrb[0].mxu0 %v14553_v30  ;;  %7493 = vmatmul.mubr.bf16.vlgmr.msra.gmra.mrb[0].mxu1 %v14553_v30 }
 0x280   : > { %6969 = vmatpush1.bf16.msra.mxu0 %v11679_v43  ;;  %7502 = vmatpush1.bf16.msra.mxu1 %v11682_v44  ;;  %v11774_v43 = vld [vmem:[%s14321_s9 + $0x7ec] ss:$16 sps:$4 sm:$0xff]   ;;  %v11769_v44 = vld [vmem:[%s14321_s9 + $0x7e0] ss:$16 sps:$4 sm:$0xff]  }
 0x281   : > { %6970 = vmatprep.subr.bf16.mxu0 %v11687_v45  ;;  %7503 = vmatprep.subr.bf16.mxu1 %v11690_v46  ;;  %v11772_v45 = vld [vmem:[%s14321_s9 + $0x7e8] ss:$16 sps:$4 sm:$0xff]   ;;  %v11777_v46 = vld [vmem:[%s14321_s9 + $0x804] ss:$16 sps:$4 sm:$0xff]  }
 0x282   : > { %7000 = vmatprep.mubr.bf16.mxu0 %v2784_v47  ;;  %7533 = vmatprep.mubr.bf16.mxu1 %v2784_v47  ;;  %v11780_v47 = vld [vmem:[%s14321_s9 + $0x80c] ss:$16 sps:$4 sm:$0xff]  }
 0x284   : > { %6971 = vmatpush1.bf16.msra.mxu0 %v11685_v32  ;;  %7504 = vmatpush1.bf16.msra.mxu1 %v11688_v48  ;;  %v2800_v32 = vcombine.high %v14617_v38, %v14617_v38  ;;  %v2782_v48 = vcombine.high %v14553_v30, %v14553_v30  ;;  %v11781_v30 = vld [vmem:[%s14321_s9 + $0x820] ss:$16 sps:$4 sm:$0xff]  }
 0x285   : > { %6972 = vmatprep.subr.bf16.mxu0 %v11693_v49  ;;  %7505 = vmatprep.subr.bf16.mxu1 %v11696_v50  ;;  %v11775_v49 = vld [vmem:[%s14321_s9 + $0x800] ss:$16 sps:$4 sm:$0xff]   ;;  %v11778_v50 = vld [vmem:[%s14321_s9 + $0x808] ss:$16 sps:$4 sm:$0xff]  }
 0x288   : > { %6973 = vmatpush1.bf16.msra.mxu0 %v11691_v42  ;;  %7506 = vmatpush1.bf16.msra.mxu1 %v11694_v51  ;;  %v11783_v42 = vld [vmem:[%s14321_s9 + $0x824] ss:$16 sps:$4 sm:$0xff]   ;;  %v11786_v51 = vld [vmem:[%s14321_s9 + $0x82c] ss:$16 sps:$4 sm:$0xff]  }
 0x289   : > { %6974 = vmatprep.subr.bf16.mxu0 %v11699_v52  ;;  %7507 = vmatprep.subr.bf16.mxu1 %v11702_v53  ;;  %v14636_v52 = vrot.slane %v2800_v32, %v14371_v2  ;;  %v11784_v53 = vld [vmem:[%s14321_s9 + $0x828] ss:$16 sps:$4 sm:$0xff]   ;;  %v11867_v32 = vld [vmem:[%s14321_s9 + $0x9e4] ss:$16 sps:$4 sm:$0xff]  }
 0x28c   : > { %6975 = vmatpush1.bf16.msra.mxu0 %v11697_v54  ;;  %7508 = vmatpush1.bf16.msra.mxu1 %v11700_v55  ;;  %v11789_v54 = vld [vmem:[%s14321_s9 + $0x844] ss:$16 sps:$4 sm:$0xff]   ;;  %v11792_v55 = vld [vmem:[%s14321_s9 + $0x84c] ss:$16 sps:$4 sm:$0xff]  }
 0x28d   : > { %6976 = vmatprep.subr.bf16.mxu0 %v11705_v56  ;;  %7509 = vmatprep.subr.bf16.mxu1 %v11708_v57  ;;  %v11787_v56 = vld [vmem:[%s14321_s9 + $0x840] ss:$16 sps:$4 sm:$0xff]   ;;  %v11790_v57 = vld [vmem:[%s14321_s9 + $0x848] ss:$16 sps:$4 sm:$0xff]  }
 0x290   : > { %6977 = vmatpush1.bf16.msra.mxu0 %v11703_v58  ;;  %7510 = vmatpush1.bf16.msra.mxu1 %v11706_v60  ;;  %v11795_v58 = vld [vmem:[%s14321_s9 + $0x864] ss:$16 sps:$4 sm:$0xff]   ;;  %v11798_v60 = vld [vmem:[%s14321_s9 + $0x86c] ss:$16 sps:$4 sm:$0xff]  }
 0x291   : > { %6978 = vmatprep.subr.bf16.mxu0 %v11711_v61  ;;  %7511 = vmatprep.subr.bf16.mxu1 %v11714_v62  ;;  %v11793_v61 = vld [vmem:[%s14321_s9 + $0x860] ss:$16 sps:$4 sm:$0xff]   ;;  %v11796_v62 = vld [vmem:[%s14321_s9 + $0x868] ss:$16 sps:$4 sm:$0xff]  }
 0x294   : > { %6979 = vmatpush1.bf16.msra.mxu0 %v11709_v63  ;;  %7512 = vmatpush1.bf16.msra.mxu1 %v11712_v0  ;;  %v11801_v63 = vld [vmem:[%s14321_s9 + $0x884] ss:$16 sps:$4 sm:$0xff]   ;;  %v11804_v0 = vld [vmem:[%s14321_s9 + $0x88c] ss:$16 sps:$4 sm:$0xff]  }
 0x295   : > { %6980 = vmatprep.subr.bf16.mxu0 %v11717_v1  ;;  %7513 = vmatprep.subr.bf16.mxu1 %v11720_v3  ;;  %v11799_v1 = vld [vmem:[%s14321_s9 + $0x880] ss:$16 sps:$4 sm:$0xff]   ;;  %v11802_v3 = vld [vmem:[%s14321_s9 + $0x888] ss:$16 sps:$4 sm:$0xff]  }
 0x298   : > { %6981 = vmatpush1.bf16.msra.mxu0 %v11715_v4  ;;  %7514 = vmatpush1.bf16.msra.mxu1 %v11718_v6  ;;  %v11807_v4 = vld [vmem:[%s14321_s9 + $0x8a4] ss:$16 sps:$4 sm:$0xff]   ;;  %v11810_v6 = vld [vmem:[%s14321_s9 + $0x8ac] ss:$16 sps:$4 sm:$0xff]  }
 0x299   : > { %6982 = vmatprep.subr.bf16.mxu0 %v11723_v7  ;;  %7515 = vmatprep.subr.bf16.mxu1 %v11726_v8  ;;  %v11805_v7 = vld [vmem:[%s14321_s9 + $0x8a0] ss:$16 sps:$4 sm:$0xff]   ;;  %v11808_v8 = vld [vmem:[%s14321_s9 + $0x8a8] ss:$16 sps:$4 sm:$0xff]  }
 0x29c   : > { %6983 = vmatpush1.bf16.msra.mxu0 %v11721_v9  ;;  %7516 = vmatpush1.bf16.msra.mxu1 %v11724_v10  ;;  %v11813_v9 = vld [vmem:[%s14321_s9 + $0x8c4] ss:$16 sps:$4 sm:$0xff]   ;;  %v11816_v10 = vld [vmem:[%s14321_s9 + $0x8cc] ss:$16 sps:$4 sm:$0xff]  }
 0x29d   : > { %6984 = vmatprep.subr.bf16.mxu0 %v11729_v11  ;;  %7517 = vmatprep.subr.bf16.mxu1 %v11732_v12  ;;  %v11811_v11 = vld [vmem:[%s14321_s9 + $0x8c0] ss:$16 sps:$4 sm:$0xff]   ;;  %v11814_v12 = vld [vmem:[%s14321_s9 + $0x8c8] ss:$16 sps:$4 sm:$0xff]  }
 0x2a0   : > { %6985 = vmatpush1.bf16.msra.mxu0 %v11727_v13  ;;  %7518 = vmatpush1.bf16.msra.mxu1 %v11730_v14  ;;  %v11819_v13 = vld [vmem:[%s14321_s9 + $0x8e4] ss:$16 sps:$4 sm:$0xff]   ;;  %v11822_v14 = vld [vmem:[%s14321_s9 + $0x8ec] ss:$16 sps:$4 sm:$0xff]  }
 0x2a1   : > { %6986 = vmatprep.subr.bf16.mxu0 %v11735_v15  ;;  %7519 = vmatprep.subr.bf16.mxu1 %v11738_v16  ;;  %v11817_v15 = vld [vmem:[%s14321_s9 + $0x8e0] ss:$16 sps:$4 sm:$0xff]   ;;  %v11820_v16 = vld [vmem:[%s14321_s9 + $0x8e8] ss:$16 sps:$4 sm:$0xff]  }
 0x2a4   : > { %6987 = vmatpush1.bf16.msra.mxu0 %v11733_v17  ;;  %7520 = vmatpush1.bf16.msra.mxu1 %v11736_v18  ;;  %v11825_v17 = vld [vmem:[%s14321_s9 + $0x904] ss:$16 sps:$4 sm:$0xff]   ;;  %v11828_v18 = vld [vmem:[%s14321_s9 + $0x90c] ss:$16 sps:$4 sm:$0xff]  }
 0x2a5   : > { %6988 = vmatprep.subr.bf16.mxu0 %v11741_v19  ;;  %7521 = vmatprep.subr.bf16.mxu1 %v11744_v20  ;;  %v11823_v19 = vld [vmem:[%s14321_s9 + $0x900] ss:$16 sps:$4 sm:$0xff]   ;;  %v11826_v20 = vld [vmem:[%s14321_s9 + $0x908] ss:$16 sps:$4 sm:$0xff]  }
 0x2a8   : > { %6989 = vmatpush1.bf16.msra.mxu0 %v11739_v21  ;;  %7522 = vmatpush1.bf16.msra.mxu1 %v11742_v22  ;;  %v11831_v21 = vld [vmem:[%s14321_s9 + $0x924] ss:$16 sps:$4 sm:$0xff]   ;;  %v11834_v22 = vld [vmem:[%s14321_s9 + $0x92c] ss:$16 sps:$4 sm:$0xff]  }
 0x2a9   : > { %6990 = vmatprep.subr.bf16.mxu0 %v11747_v23  ;;  %7523 = vmatprep.subr.bf16.mxu1 %v11750_v24  ;;  %v11829_v23 = vld [vmem:[%s14321_s9 + $0x920] ss:$16 sps:$4 sm:$0xff]   ;;  %v11832_v24 = vld [vmem:[%s14321_s9 + $0x928] ss:$16 sps:$4 sm:$0xff]  }
 0x2ac   : > { %6991 = vmatpush1.bf16.msra.mxu0 %v11745_v25  ;;  %7524 = vmatpush1.bf16.msra.mxu1 %v11748_v26  ;;  %v11837_v25 = vld [vmem:[%s14321_s9 + $0x944] ss:$16 sps:$4 sm:$0xff]   ;;  %v11840_v26 = vld [vmem:[%s14321_s9 + $0x94c] ss:$16 sps:$4 sm:$0xff]  }
 0x2ad   : > { %6992 = vmatprep.subr.bf16.mxu0 %v11753_v27  ;;  %7525 = vmatprep.subr.bf16.mxu1 %v11756_v28  ;;  %v11835_v27 = vld [vmem:[%s14321_s9 + $0x940] ss:$16 sps:$4 sm:$0xff]   ;;  %v11838_v28 = vld [vmem:[%s14321_s9 + $0x948] ss:$16 sps:$4 sm:$0xff]  }
 0x2b0   : > { %6993 = vmatpush1.bf16.msra.mxu0 %v11751_v29  ;;  %7526 = vmatpush1.bf16.msra.mxu1 %v11754_v31  ;;  %v11843_v29 = vld [vmem:[%s14321_s9 + $0x964] ss:$16 sps:$4 sm:$0xff]   ;;  %v11846_v31 = vld [vmem:[%s14321_s9 + $0x96c] ss:$16 sps:$4 sm:$0xff]  }
 0x2b1   : > { %6994 = vmatprep.subr.bf16.mxu0 %v11759_v33  ;;  %7527 = vmatprep.subr.bf16.mxu1 %v11762_v5  ;;  %v11841_v33 = vld [vmem:[%s14321_s9 + $0x960] ss:$16 sps:$4 sm:$0xff]   ;;  %v11844_v5 = vld [vmem:[%s14321_s9 + $0x968] ss:$16 sps:$4 sm:$0xff]  }
 0x2b4   : > { %6995 = vmatpush1.bf16.msra.mxu0 %v11757_v34  ;;  %7528 = vmatpush1.bf16.msra.mxu1 %v11760_v35  ;;  %v11849_v34 = vld [vmem:[%s14321_s9 + $0x984] ss:$16 sps:$4 sm:$0xff]   ;;  %v11852_v35 = vld [vmem:[%s14321_s9 + $0x98c] ss:$16 sps:$4 sm:$0xff]  }
 0x2b5   : > { %6996 = vmatprep.subr.bf16.mxu0 %v11765_v36  ;;  %7529 = vmatprep.subr.bf16.mxu1 %v11768_v37  ;;  %v11847_v36 = vld [vmem:[%s14321_s9 + $0x980] ss:$16 sps:$4 sm:$0xff]   ;;  %v11850_v37 = vld [vmem:[%s14321_s9 + $0x988] ss:$16 sps:$4 sm:$0xff]  }
 0x2b8   : > { %6997 = vmatpush1.bf16.msra.mxu0 %v11763_v39  ;;  %7530 = vmatpush1.bf16.msra.mxu1 %v11766_v40  ;;  %v11855_v39 = vld [vmem:[%s14321_s9 + $0x9a4] ss:$16 sps:$4 sm:$0xff]   ;;  %v11858_v40 = vld [vmem:[%s14321_s9 + $0x9ac] ss:$16 sps:$4 sm:$0xff]  }
 0x2b9   : > { %6998 = vmatprep.subr.bf16.mxu0 %v11771_v41  ;;  %7531 = vmatprep.subr.bf16.mxu1 %v11774_v43  ;;  %v11853_v41 = vld [vmem:[%s14321_s9 + $0x9a0] ss:$16 sps:$4 sm:$0xff]   ;;  %v11856_v43 = vld [vmem:[%s14321_s9 + $0x9a8] ss:$16 sps:$4 sm:$0xff]  }
 0x2bc   : > { %6999 = vmatpush1.bf16.msra.mxu0 %v11769_v44  ;;  %7532 = vmatpush1.bf16.msra.mxu1 %v11772_v45  ;;  %v11861_v44 = vld [vmem:[%s14321_s9 + $0x9c4] ss:$16 sps:$4 sm:$0xff]   ;;  %v11864_v45 = vld [vmem:[%s14321_s9 + $0x9cc] ss:$16 sps:$4 sm:$0xff]  }
 0x2bd   : > { %7009 = vmatprep.subr.bf16.mxu0 %v11777_v46  ;;  %7542 = vmatprep.subr.bf16.mxu1 %v11780_v47  ;;  %v11859_v46 = vld [vmem:[%s14321_s9 + $0x9c0] ss:$16 sps:$4 sm:$0xff]   ;;  %v11862_v47 = vld [vmem:[%s14321_s9 + $0x9c8] ss:$16 sps:$4 sm:$0xff]  }
 0x2bf   : > { %7001 = vmatmul.mubr.bf16.vlgmr.msra.gmra.mrb[0].mxu0 %v2782_v48  ;;  %7534 = vmatmul.mubr.bf16.vlgmr.msra.gmra.mrb[0].mxu1 %v2782_v48  ;;  %v11870_v48 = vld [vmem:[%s14321_s9 + $0x9ec] ss:$16 sps:$4 sm:$0xff]  }
 0x2c0   : > { %7010 = vmatpush1.bf16.msra.mxu0 %v11775_v49  ;;  %7543 = vmatpush1.bf16.msra.mxu1 %v11778_v50  ;;  %v11865_v49 = vld [vmem:[%s14321_s9 + $0x9e0] ss:$16 sps:$4 sm:$0xff]   ;;  %v11868_v50 = vld [vmem:[%s14321_s9 + $0x9e8] ss:$16 sps:$4 sm:$0xff]  }
 0x2c1   : > { %7011 = vmatprep.subr.bf16.mxu0 %v11783_v42  ;;  %7544 = vmatprep.subr.bf16.mxu1 %v11786_v51  ;;  %v11873_v42 = vld [vmem:[%s14321_s9 + $0xa04] ss:$16 sps:$4 sm:$0xff]   ;;  %v11876_v51 = vld [vmem:[%s14321_s9 + $0xa0c] ss:$16 sps:$4 sm:$0xff]  }
 0x2c2   : > { %7041 = vmatprep.mubr.bf16.mxu0 %v14636_v52  ;;  %7574 = vmatprep.mubr.bf16.mxu1 %v14636_v52 }
 0x2c4   : > { %7012 = vmatpush1.bf16.msra.mxu0 %v11781_v30  ;;  %7545 = vmatpush1.bf16.msra.mxu1 %v11784_v53  ;;  %v14702_v30 = vrot.slane %v14617_v38, %v14371_v2  ;;  %v11871_v53 = vld [vmem:[%s14321_s9 + $0xa00] ss:$16 sps:$4 sm:$0xff]  }
 0x2c5   : > { %7013 = vmatprep.subr.bf16.mxu0 %v11789_v54  ;;  %7546 = vmatprep.subr.bf16.mxu1 %v11792_v55  ;;  %v11874_v54 = vld [vmem:[%s14321_s9 + $0xa08] ss:$16 sps:$4 sm:$0xff]   ;;  %v11879_v55 = vld [vmem:[%s14321_s9 + $0xa24] ss:$16 sps:$4 sm:$0xff]   ;;  %v11877_v38 = vld [vmem:[%s14321_s9 + $0xa20] ss:$16 sps:$4 sm:$0xff]  }
 0x2c8   : > { %7014 = vmatpush1.bf16.msra.mxu0 %v11787_v56  ;;  %7547 = vmatpush1.bf16.msra.mxu1 %v11790_v57  ;;  %v11882_v56 = vld [vmem:[%s14321_s9 + $0xa2c] ss:$16 sps:$4 sm:$0xff]   ;;  %v2832_v57 = vcombine.high %v14636_v52, %v14636_v52  ;;  %v11883_v52 = vld [vmem:[%s14321_s9 + $0xa40] ss:$16 sps:$4 sm:$0xff]  }
 0x2c9   : > { %7015 = vmatprep.subr.bf16.mxu0 %v11795_v58  ;;  %7548 = vmatprep.subr.bf16.mxu1 %v11798_v60  ;;  %v11880_v58 = vld [vmem:[%s14321_s9 + $0xa28] ss:$16 sps:$4 sm:$0xff]   ;;  %v11885_v60 = vld [vmem:[%s14321_s9 + $0xa44] ss:$16 sps:$4 sm:$0xff]  }
 0x2cc   : > { %7016 = vmatpush1.bf16.msra.mxu0 %v11793_v61  ;;  %7549 = vmatpush1.bf16.msra.mxu1 %v11796_v62  ;;  %v11888_v61 = vld [vmem:[%s14321_s9 + $0xa4c] ss:$16 sps:$4 sm:$0xff]   ;;  %v11886_v62 = vld [vmem:[%s14321_s9 + $0xa48] ss:$16 sps:$4 sm:$0xff]  }
 0x2cd   : > { %7017 = vmatprep.subr.bf16.mxu0 %v11801_v63  ;;  %7550 = vmatprep.subr.bf16.mxu1 %v11804_v0  ;;  %v11891_v63 = vld [vmem:[%s14321_s9 + $0xa64] ss:$16 sps:$4 sm:$0xff]   ;;  %v11894_v0 = vld [vmem:[%s14321_s9 + $0xa6c] ss:$16 sps:$4 sm:$0xff]  }
 0x2d0   : > { %7018 = vmatpush1.bf16.msra.mxu0 %v11799_v1  ;;  %7551 = vmatpush1.bf16.msra.mxu1 %v11802_v3  ;;  %v11889_v1 = vld [vmem:[%s14321_s9 + $0xa60] ss:$16 sps:$4 sm:$0xff]   ;;  %v11892_v3 = vld [vmem:[%s14321_s9 + $0xa68] ss:$16 sps:$4 sm:$0xff]  }
 0x2d1   : > { %7019 = vmatprep.subr.bf16.mxu0 %v11807_v4  ;;  %7552 = vmatprep.subr.bf16.mxu1 %v11810_v6  ;;  %v11897_v4 = vld [vmem:[%s14321_s9 + $0xa84] ss:$16 sps:$4 sm:$0xff]   ;;  %v11900_v6 = vld [vmem:[%s14321_s9 + $0xa8c] ss:$16 sps:$4 sm:$0xff]  }
 0x2d4   : > { %7020 = vmatpush1.bf16.msra.mxu0 %v11805_v7  ;;  %7553 = vmatpush1.bf16.msra.mxu1 %v11808_v8  ;;  %v11895_v7 = vld [vmem:[%s14321_s9 + $0xa80] ss:$16 sps:$4 sm:$0xff]   ;;  %v11898_v8 = vld [vmem:[%s14321_s9 + $0xa88] ss:$16 sps:$4 sm:$0xff]  }
 0x2d5   : > { %7021 = vmatprep.subr.bf16.mxu0 %v11813_v9  ;;  %7554 = vmatprep.subr.bf16.mxu1 %v11816_v10  ;;  %v11903_v9 = vld [vmem:[%s14321_s9 + $0xaa4] ss:$16 sps:$4 sm:$0xff]   ;;  %v11906_v10 = vld [vmem:[%s14321_s9 + $0xaac] ss:$16 sps:$4 sm:$0xff]  }
 0x2d8   : > { %7022 = vmatpush1.bf16.msra.mxu0 %v11811_v11  ;;  %7555 = vmatpush1.bf16.msra.mxu1 %v11814_v12  ;;  %v11901_v11 = vld [vmem:[%s14321_s9 + $0xaa0] ss:$16 sps:$4 sm:$0xff]   ;;  %v11904_v12 = vld [vmem:[%s14321_s9 + $0xaa8] ss:$16 sps:$4 sm:$0xff]  }
 0x2d9   : > { %7023 = vmatprep.subr.bf16.mxu0 %v11819_v13  ;;  %7556 = vmatprep.subr.bf16.mxu1 %v11822_v14  ;;  %v11909_v13 = vld [vmem:[%s14321_s9 + $0xac4] ss:$16 sps:$4 sm:$0xff]   ;;  %v11912_v14 = vld [vmem:[%s14321_s9 + $0xacc] ss:$16 sps:$4 sm:$0xff]  }
 0x2dc   : > { %7024 = vmatpush1.bf16.msra.mxu0 %v11817_v15  ;;  %7557 = vmatpush1.bf16.msra.mxu1 %v11820_v16  ;;  %v11907_v15 = vld [vmem:[%s14321_s9 + $0xac0] ss:$16 sps:$4 sm:$0xff]   ;;  %v11910_v16 = vld [vmem:[%s14321_s9 + $0xac8] ss:$16 sps:$4 sm:$0xff]  }
 0x2dd   : > { %7025 = vmatprep.subr.bf16.mxu0 %v11825_v17  ;;  %7558 = vmatprep.subr.bf16.mxu1 %v11828_v18  ;;  %v11915_v17 = vld [vmem:[%s14321_s9 + $0xae4] ss:$16 sps:$4 sm:$0xff]   ;;  %v11918_v18 = vld [vmem:[%s14321_s9 + $0xaec] ss:$16 sps:$4 sm:$0xff]  }
 0x2e0   : > { %7026 = vmatpush1.bf16.msra.mxu0 %v11823_v19  ;;  %7559 = vmatpush1.bf16.msra.mxu1 %v11826_v20  ;;  %v11913_v19 = vld [vmem:[%s14321_s9 + $0xae0] ss:$16 sps:$4 sm:$0xff]   ;;  %v11916_v20 = vld [vmem:[%s14321_s9 + $0xae8] ss:$16 sps:$4 sm:$0xff]  }
 0x2e1   : > { %7027 = vmatprep.subr.bf16.mxu0 %v11831_v21  ;;  %7560 = vmatprep.subr.bf16.mxu1 %v11834_v22  ;;  %v11921_v21 = vld [vmem:[%s14321_s9 + $0xb04] ss:$16 sps:$4 sm:$0xff]   ;;  %v11924_v22 = vld [vmem:[%s14321_s9 + $0xb0c] ss:$16 sps:$4 sm:$0xff]  }
 0x2e4   : > { %7028 = vmatpush1.bf16.msra.mxu0 %v11829_v23  ;;  %7561 = vmatpush1.bf16.msra.mxu1 %v11832_v24  ;;  %v11919_v23 = vld [vmem:[%s14321_s9 + $0xb00] ss:$16 sps:$4 sm:$0xff]   ;;  %v11922_v24 = vld [vmem:[%s14321_s9 + $0xb08] ss:$16 sps:$4 sm:$0xff]  }
 0x2e5   : > { %7029 = vmatprep.subr.bf16.mxu0 %v11837_v25  ;;  %7562 = vmatprep.subr.bf16.mxu1 %v11840_v26  ;;  %v11927_v25 = vld [vmem:[%s14321_s9 + $0xb24] ss:$16 sps:$4 sm:$0xff]   ;;  %v11930_v26 = vld [vmem:[%s14321_s9 + $0xb2c] ss:$16 sps:$4 sm:$0xff]  }
 0x2e8   : > { %7030 = vmatpush1.bf16.msra.mxu0 %v11835_v27  ;;  %7563 = vmatpush1.bf16.msra.mxu1 %v11838_v28  ;;  %v11925_v27 = vld [vmem:[%s14321_s9 + $0xb20] ss:$16 sps:$4 sm:$0xff]   ;;  %v11928_v28 = vld [vmem:[%s14321_s9 + $0xb28] ss:$16 sps:$4 sm:$0xff]  }
 0x2e9   : > { %7031 = vmatprep.subr.bf16.mxu0 %v11843_v29  ;;  %7564 = vmatprep.subr.bf16.mxu1 %v11846_v31  ;;  %v11933_v29 = vld [vmem:[%s14321_s9 + $0xb44] ss:$16 sps:$4 sm:$0xff]   ;;  %v11936_v31 = vld [vmem:[%s14321_s9 + $0xb4c] ss:$16 sps:$4 sm:$0xff]  }
 0x2ec   : > { %7032 = vmatpush1.bf16.msra.mxu0 %v11841_v33  ;;  %7565 = vmatpush1.bf16.msra.mxu1 %v11844_v5  ;;  %v11931_v33 = vld [vmem:[%s14321_s9 + $0xb40] ss:$16 sps:$4 sm:$0xff]   ;;  %v11934_v5 = vld [vmem:[%s14321_s9 + $0xb48] ss:$16 sps:$4 sm:$0xff]  }
 0x2ed   : > { %7033 = vmatprep.subr.bf16.mxu0 %v11849_v34  ;;  %7566 = vmatprep.subr.bf16.mxu1 %v11852_v35  ;;  %v11939_v34 = vld [vmem:[%s14321_s9 + $0xb64] ss:$16 sps:$4 sm:$0xff]   ;;  %v11942_v35 = vld [vmem:[%s14321_s9 + $0xb6c] ss:$16 sps:$4 sm:$0xff]  }
 0x2f0   : > { %7034 = vmatpush1.bf16.msra.mxu0 %v11847_v36  ;;  %7567 = vmatpush1.bf16.msra.mxu1 %v11850_v37  ;;  %v11937_v36 = vld [vmem:[%s14321_s9 + $0xb60] ss:$16 sps:$4 sm:$0xff]   ;;  %v11940_v37 = vld [vmem:[%s14321_s9 + $0xb68] ss:$16 sps:$4 sm:$0xff]  }
 0x2f1   : > { %7035 = vmatprep.subr.bf16.mxu0 %v11855_v39  ;;  %7568 = vmatprep.subr.bf16.mxu1 %v11858_v40  ;;  %v11945_v39 = vld [vmem:[%s14321_s9 + $0xb84] ss:$16 sps:$4 sm:$0xff]   ;;  %v11948_v40 = vld [vmem:[%s14321_s9 + $0xb8c] ss:$16 sps:$4 sm:$0xff]  }
 0x2f4   : > { %7036 = vmatpush1.bf16.msra.mxu0 %v11853_v41  ;;  %7569 = vmatpush1.bf16.msra.mxu1 %v11856_v43  ;;  %v11943_v41 = vld [vmem:[%s14321_s9 + $0xb80] ss:$16 sps:$4 sm:$0xff]   ;;  %v11946_v43 = vld [vmem:[%s14321_s9 + $0xb88] ss:$16 sps:$4 sm:$0xff]  }
 0x2f5   : > { %7037 = vmatprep.subr.bf16.mxu0 %v11861_v44  ;;  %7570 = vmatprep.subr.bf16.mxu1 %v11864_v45  ;;  %v11951_v44 = vld [vmem:[%s14321_s9 + $0xba4] ss:$16 sps:$4 sm:$0xff]   ;;  %v11954_v45 = vld [vmem:[%s14321_s9 + $0xbac] ss:$16 sps:$4 sm:$0xff]  }
 0x2f8   : > { %7038 = vmatpush1.bf16.msra.mxu0 %v11859_v46  ;;  %7571 = vmatpush1.bf16.msra.mxu1 %v11862_v47  ;;  %v11949_v46 = vld [vmem:[%s14321_s9 + $0xba0] ss:$16 sps:$4 sm:$0xff]   ;;  %v11952_v47 = vld [vmem:[%s14321_s9 + $0xba8] ss:$16 sps:$4 sm:$0xff]  }
 0x2f9   : > { %7039 = vmatprep.subr.bf16.mxu0 %v11867_v32  ;;  %7572 = vmatprep.subr.bf16.mxu1 %v11870_v48  ;;  %v11957_v32 = vld [vmem:[%s14321_s9 + $0xbc4] ss:$16 sps:$4 sm:$0xff]   ;;  %v11960_v48 = vld [vmem:[%s14321_s9 + $0xbcc] ss:$16 sps:$4 sm:$0xff]  }
 0x2fc   : > { %7040 = vmatpush1.bf16.msra.mxu0 %v11865_v49  ;;  %7573 = vmatpush1.bf16.msra.mxu1 %v11868_v50  ;;  %v12569_v49 = vld [vmem:[%s15614_s0 + $0x8] sm:$0xff] }
 0x2fd   : > { %7050 = vmatprep.subr.bf16.mxu0 %v11873_v42  ;;  %7583 = vmatprep.subr.bf16.mxu1 %v11876_v51  ;;  %v2785_v50 = vcombine.high %v12569_v49, %v12569_v49  ;;  %v11955_v42 = vld [vmem:[%s14321_s9 + $0xbc0] ss:$16 sps:$4 sm:$0xff]   ;;  %v11958_v51 = vld [vmem:[%s14321_s9 + $0xbc8] ss:$16 sps:$4 sm:$0xff]  }
 0x2fe   : > { %v12039_v49 = vld [vmem:[%s14321_s9 + $0xd80] ss:$16 sps:$4 sm:$0xff]  }
 0x2ff   : > { %7042 = vmatmul.mubr.bf16.vlgmr.msra.gmra.mrb[0].mxu0 %v14702_v30  ;;  %7575 = vmatmul.mubr.bf16.vlgmr.msra.gmra.mrb[0].mxu1 %v14702_v30 }
 0x300   : > { %7051 = vmatpush1.bf16.msra.mxu0 %v11871_v53  ;;  %7584 = vmatpush1.bf16.msra.mxu1 %v11874_v54  ;;  %v11963_v53 = vld [vmem:[%s14321_s9 + $0xbe4] ss:$16 sps:$4 sm:$0xff]   ;;  %v11966_v54 = vld [vmem:[%s14321_s9 + $0xbec] ss:$16 sps:$4 sm:$0xff]  }
 0x301   : > { %7052 = vmatprep.subr.bf16.mxu0 %v11879_v55  ;;  %7585 = vmatprep.subr.bf16.mxu1 %v11882_v56  ;;  %v14772_v55 = vrot.slane %v2785_v50, %v14371_v2  ;;  %v11961_v56 = vld [vmem:[%s14321_s9 + $0xbe0] ss:$16 sps:$4 sm:$0xff]   ;;  %v12042_v50 = vld [vmem:[%s14321_s9 + $0xd88] ss:$16 sps:$4 sm:$0xff]  }
 0x302   : > { %7082 = vmatprep.mubr.bf16.mxu0 %v2832_v57  ;;  %7615 = vmatprep.mubr.bf16.mxu1 %v2832_v57  ;;  %v11964_v57 = vld [vmem:[%s14321_s9 + $0xbe8] ss:$16 sps:$4 sm:$0xff]  }
 0x304   : > { %7053 = vmatpush1.bf16.msra.mxu0 %v11877_v38  ;;  %7586 = vmatpush1.bf16.msra.mxu1 %v11880_v58  ;;  %v11969_v38 = vld [vmem:[%s14321_s9 + $0xc04] ss:$16 sps:$4 sm:$0xff]   ;;  %v11972_v58 = vld [vmem:[%s14321_s9 + $0xc0c] ss:$16 sps:$4 sm:$0xff]  }
 0x305   : > { %7054 = vmatprep.subr.bf16.mxu0 %v11885_v60  ;;  %7587 = vmatprep.subr.bf16.mxu1 %v11888_v61  ;;  %v2801_v60 = vcombine.high %v14772_v55, %v14772_v55  ;;  %v2830_v61 = vcombine.high %v14702_v30, %v14702_v30  ;;  %v11973_v30 = vld [vmem:[%s14321_s9 + $0xc20] ss:$16 sps:$4 sm:$0xff]  }
 0x308   : > { %7055 = vmatpush1.bf16.msra.mxu0 %v11883_v52  ;;  %7588 = vmatpush1.bf16.msra.mxu1 %v11886_v62  ;;  %v11967_v52 = vld [vmem:[%s14321_s9 + $0xc00] ss:$16 sps:$4 sm:$0xff]   ;;  %v11970_v62 = vld [vmem:[%s14321_s9 + $0xc08] ss:$16 sps:$4 sm:$0xff]  }
 0x309   : > { %7056 = vmatprep.subr.bf16.mxu0 %v11891_v63  ;;  %7589 = vmatprep.subr.bf16.mxu1 %v11894_v0  ;;  %v11975_v63 = vld [vmem:[%s14321_s9 + $0xc24] ss:$16 sps:$4 sm:$0xff]   ;;  %v11978_v0 = vld [vmem:[%s14321_s9 + $0xc2c] ss:$16 sps:$4 sm:$0xff]  }
 0x30c   : > { %7057 = vmatpush1.bf16.msra.mxu0 %v11889_v1  ;;  %7590 = vmatpush1.bf16.msra.mxu1 %v11892_v3  ;;  %v14787_v1 = vrot.slane %v2801_v60, %v14371_v2  ;;  %v11976_v3 = vld [vmem:[%s14321_s9 + $0xc28] ss:$16 sps:$4 sm:$0xff]   ;;  %v12059_v60 = vld [vmem:[%s14321_s9 + $0xde4] ss:$16 sps:$4 sm:$0xff]  }
 0x30d   : > { %7058 = vmatprep.subr.bf16.mxu0 %v11897_v4  ;;  %7591 = vmatprep.subr.bf16.mxu1 %v11900_v6  ;;  %v11981_v4 = vld [vmem:[%s14321_s9 + $0xc44] ss:$16 sps:$4 sm:$0xff]   ;;  %v11984_v6 = vld [vmem:[%s14321_s9 + $0xc4c] ss:$16 sps:$4 sm:$0xff]  }
 0x310   : > { %7059 = vmatpush1.bf16.msra.mxu0 %v11895_v7  ;;  %7592 = vmatpush1.bf16.msra.mxu1 %v11898_v8  ;;  %v11979_v7 = vld [vmem:[%s14321_s9 + $0xc40] ss:$16 sps:$4 sm:$0xff]   ;;  %v11982_v8 = vld [vmem:[%s14321_s9 + $0xc48] ss:$16 sps:$4 sm:$0xff]  }
 0x311   : > { %7060 = vmatprep.subr.bf16.mxu0 %v11903_v9  ;;  %7593 = vmatprep.subr.bf16.mxu1 %v11906_v10  ;;  %v11987_v9 = vld [vmem:[%s14321_s9 + $0xc64] ss:$16 sps:$4 sm:$0xff]   ;;  %v11990_v10 = vld [vmem:[%s14321_s9 + $0xc6c] ss:$16 sps:$4 sm:$0xff]  }
 0x314   : > { %7061 = vmatpush1.bf16.msra.mxu0 %v11901_v11  ;;  %7594 = vmatpush1.bf16.msra.mxu1 %v11904_v12  ;;  %v11985_v11 = vld [vmem:[%s14321_s9 + $0xc60] ss:$16 sps:$4 sm:$0xff]   ;;  %v11988_v12 = vld [vmem:[%s14321_s9 + $0xc68] ss:$16 sps:$4 sm:$0xff]  }
 0x315   : > { %7062 = vmatprep.subr.bf16.mxu0 %v11909_v13  ;;  %7595 = vmatprep.subr.bf16.mxu1 %v11912_v14  ;;  %v11993_v13 = vld [vmem:[%s14321_s9 + $0xc84] ss:$16 sps:$4 sm:$0xff]   ;;  %v11996_v14 = vld [vmem:[%s14321_s9 + $0xc8c] ss:$16 sps:$4 sm:$0xff]  }
 0x318   : > { %7063 = vmatpush1.bf16.msra.mxu0 %v11907_v15  ;;  %7596 = vmatpush1.bf16.msra.mxu1 %v11910_v16  ;;  %v11991_v15 = vld [vmem:[%s14321_s9 + $0xc80] ss:$16 sps:$4 sm:$0xff]   ;;  %v11994_v16 = vld [vmem:[%s14321_s9 + $0xc88] ss:$16 sps:$4 sm:$0xff]  }
 0x319   : > { %7064 = vmatprep.subr.bf16.mxu0 %v11915_v17  ;;  %7597 = vmatprep.subr.bf16.mxu1 %v11918_v18  ;;  %v11999_v17 = vld [vmem:[%s14321_s9 + $0xca4] ss:$16 sps:$4 sm:$0xff]   ;;  %v12002_v18 = vld [vmem:[%s14321_s9 + $0xcac] ss:$16 sps:$4 sm:$0xff]  }
 0x31c   : > { %7065 = vmatpush1.bf16.msra.mxu0 %v11913_v19  ;;  %7598 = vmatpush1.bf16.msra.mxu1 %v11916_v20  ;;  %v11997_v19 = vld [vmem:[%s14321_s9 + $0xca0] ss:$16 sps:$4 sm:$0xff]   ;;  %v12000_v20 = vld [vmem:[%s14321_s9 + $0xca8] ss:$16 sps:$4 sm:$0xff]  }
 0x31d   : > { %7066 = vmatprep.subr.bf16.mxu0 %v11921_v21  ;;  %7599 = vmatprep.subr.bf16.mxu1 %v11924_v22  ;;  %v12005_v21 = vld [vmem:[%s14321_s9 + $0xcc4] ss:$16 sps:$4 sm:$0xff]   ;;  %v12008_v22 = vld [vmem:[%s14321_s9 + $0xccc] ss:$16 sps:$4 sm:$0xff]  }
 0x320   : > { %7067 = vmatpush1.bf16.msra.mxu0 %v11919_v23  ;;  %7600 = vmatpush1.bf16.msra.mxu1 %v11922_v24  ;;  %v12003_v23 = vld [vmem:[%s14321_s9 + $0xcc0] ss:$16 sps:$4 sm:$0xff]   ;;  %v12006_v24 = vld [vmem:[%s14321_s9 + $0xcc8] ss:$16 sps:$4 sm:$0xff]  }
 0x321   : > { %7068 = vmatprep.subr.bf16.mxu0 %v11927_v25  ;;  %7601 = vmatprep.subr.bf16.mxu1 %v11930_v26  ;;  %v12011_v25 = vld [vmem:[%s14321_s9 + $0xce4] ss:$16 sps:$4 sm:$0xff]   ;;  %v12014_v26 = vld [vmem:[%s14321_s9 + $0xcec] ss:$16 sps:$4 sm:$0xff]  }
 0x324   : > { %7069 = vmatpush1.bf16.msra.mxu0 %v11925_v27  ;;  %7602 = vmatpush1.bf16.msra.mxu1 %v11928_v28  ;;  %v12009_v27 = vld [vmem:[%s14321_s9 + $0xce0] ss:$16 sps:$4 sm:$0xff]   ;;  %v12012_v28 = vld [vmem:[%s14321_s9 + $0xce8] ss:$16 sps:$4 sm:$0xff]  }
 0x325   : > { %7070 = vmatprep.subr.bf16.mxu0 %v11933_v29  ;;  %7603 = vmatprep.subr.bf16.mxu1 %v11936_v31  ;;  %v12017_v29 = vld [vmem:[%s14321_s9 + $0xd04] ss:$16 sps:$4 sm:$0xff]   ;;  %v12020_v31 = vld [vmem:[%s14321_s9 + $0xd0c] ss:$16 sps:$4 sm:$0xff]  }
 0x328   : > { %7071 = vmatpush1.bf16.msra.mxu0 %v11931_v33  ;;  %7604 = vmatpush1.bf16.msra.mxu1 %v11934_v5  ;;  %v12015_v33 = vld [vmem:[%s14321_s9 + $0xd00] ss:$16 sps:$4 sm:$0xff]   ;;  %v12018_v5 = vld [vmem:[%s14321_s9 + $0xd08] ss:$16 sps:$4 sm:$0xff]  }
 0x329   : > { %7072 = vmatprep.subr.bf16.mxu0 %v11939_v34  ;;  %7605 = vmatprep.subr.bf16.mxu1 %v11942_v35  ;;  %v12023_v34 = vld [vmem:[%s14321_s9 + $0xd24] ss:$16 sps:$4 sm:$0xff]   ;;  %v12026_v35 = vld [vmem:[%s14321_s9 + $0xd2c] ss:$16 sps:$4 sm:$0xff]  }
 0x32c   : > { %7073 = vmatpush1.bf16.msra.mxu0 %v11937_v36  ;;  %7606 = vmatpush1.bf16.msra.mxu1 %v11940_v37  ;;  %v12021_v36 = vld [vmem:[%s14321_s9 + $0xd20] ss:$16 sps:$4 sm:$0xff]   ;;  %v12024_v37 = vld [vmem:[%s14321_s9 + $0xd28] ss:$16 sps:$4 sm:$0xff]  }
 0x32d   : > { %7074 = vmatprep.subr.bf16.mxu0 %v11945_v39  ;;  %7607 = vmatprep.subr.bf16.mxu1 %v11948_v40  ;;  %v12029_v39 = vld [vmem:[%s14321_s9 + $0xd44] ss:$16 sps:$4 sm:$0xff]   ;;  %v12032_v40 = vld [vmem:[%s14321_s9 + $0xd4c] ss:$16 sps:$4 sm:$0xff]  }
 0x330   : > { %7075 = vmatpush1.bf16.msra.mxu0 %v11943_v41  ;;  %7608 = vmatpush1.bf16.msra.mxu1 %v11946_v43  ;;  %v12027_v41 = vld [vmem:[%s14321_s9 + $0xd40] ss:$16 sps:$4 sm:$0xff]   ;;  %v12030_v43 = vld [vmem:[%s14321_s9 + $0xd48] ss:$16 sps:$4 sm:$0xff]  }
 0x331   : > { %7076 = vmatprep.subr.bf16.mxu0 %v11951_v44  ;;  %7609 = vmatprep.subr.bf16.mxu1 %v11954_v45  ;;  %v12035_v44 = vld [vmem:[%s14321_s9 + $0xd64] ss:$16 sps:$4 sm:$0xff]   ;;  %v12038_v45 = vld [vmem:[%s14321_s9 + $0xd6c] ss:$16 sps:$4 sm:$0xff]  }
 0x334   : > { %7077 = vmatpush1.bf16.msra.mxu0 %v11949_v46  ;;  %7610 = vmatpush1.bf16.msra.mxu1 %v11952_v47  ;;  %v12033_v46 = vld [vmem:[%s14321_s9 + $0xd60] ss:$16 sps:$4 sm:$0xff]   ;;  %v12036_v47 = vld [vmem:[%s14321_s9 + $0xd68] ss:$16 sps:$4 sm:$0xff]  }
 0x335   : > { %7078 = vmatprep.subr.bf16.mxu0 %v11957_v32  ;;  %7611 = vmatprep.subr.bf16.mxu1 %v11960_v48  ;;  %v12041_v32 = vld [vmem:[%s14321_s9 + $0xd84] ss:$16 sps:$4 sm:$0xff]   ;;  %v12044_v48 = vld [vmem:[%s14321_s9 + $0xd8c] ss:$16 sps:$4 sm:$0xff]  }
 0x338   : > { %7079 = vmatpush1.bf16.msra.mxu0 %v11955_v42  ;;  %7612 = vmatpush1.bf16.msra.mxu1 %v11958_v51  ;;  %v12047_v42 = vld [vmem:[%s14321_s9 + $0xda4] ss:$16 sps:$4 sm:$0xff]   ;;  %v12050_v51 = vld [vmem:[%s14321_s9 + $0xdac] ss:$16 sps:$4 sm:$0xff]  }
 0x339   : > { %7080 = vmatprep.subr.bf16.mxu0 %v11963_v53  ;;  %7613 = vmatprep.subr.bf16.mxu1 %v11966_v54  ;;  %v12045_v53 = vld [vmem:[%s14321_s9 + $0xda0] ss:$16 sps:$4 sm:$0xff]   ;;  %v12048_v54 = vld [vmem:[%s14321_s9 + $0xda8] ss:$16 sps:$4 sm:$0xff]  }
 0x33c   : > { %7081 = vmatpush1.bf16.msra.mxu0 %v11961_v56  ;;  %7614 = vmatpush1.bf16.msra.mxu1 %v11964_v57  ;;  %v12053_v56 = vld [vmem:[%s14321_s9 + $0xdc4] ss:$16 sps:$4 sm:$0xff]   ;;  %v12056_v57 = vld [vmem:[%s14321_s9 + $0xdcc] ss:$16 sps:$4 sm:$0xff]  }
 0x33d   : > { %7091 = vmatprep.subr.bf16.mxu0 %v11969_v38  ;;  %7624 = vmatprep.subr.bf16.mxu1 %v11972_v58  ;;  %v12051_v38 = vld [vmem:[%s14321_s9 + $0xdc0] ss:$16 sps:$4 sm:$0xff]   ;;  %v12054_v58 = vld [vmem:[%s14321_s9 + $0xdc8] ss:$16 sps:$4 sm:$0xff]  }
 0x33f   : > { %7083 = vmatmul.mubr.bf16.vlgmr.msra.gmra.mrb[0].mxu0 %v2830_v61  ;;  %7616 = vmatmul.mubr.bf16.vlgmr.msra.gmra.mrb[0].mxu1 %v2830_v61  ;;  %v12062_v61 = vld [vmem:[%s14321_s9 + $0xdec] ss:$16 sps:$4 sm:$0xff]  }
 0x340   : > { %7092 = vmatpush1.bf16.msra.mxu0 %v11967_v52  ;;  %7625 = vmatpush1.bf16.msra.mxu1 %v11970_v62  ;;  %v12057_v52 = vld [vmem:[%s14321_s9 + $0xde0] ss:$16 sps:$4 sm:$0xff]   ;;  %v12060_v62 = vld [vmem:[%s14321_s9 + $0xde8] ss:$16 sps:$4 sm:$0xff]  }
 0x341   : > { %7093 = vmatprep.subr.bf16.mxu0 %v11975_v63  ;;  %7626 = vmatprep.subr.bf16.mxu1 %v11978_v0  ;;  %v12066_v63 = vld [vmem:[%s14321_s9 + $0xe04] ss:$16 sps:$4 sm:$0xff]   ;;  %v12069_v0 = vld [vmem:[%s14321_s9 + $0xe0c] ss:$16 sps:$4 sm:$0xff]  }
 0x342   : > { %7123 = vmatprep.mubr.bf16.mxu0 %v14787_v1  ;;  %7656 = vmatprep.mubr.bf16.mxu1 %v14787_v1 }
 0x344   : > { %7094 = vmatpush1.bf16.msra.mxu0 %v11973_v30  ;;  %7627 = vmatpush1.bf16.msra.mxu1 %v11976_v3  ;;  %v14853_v30 = vrot.slane %v14772_v55, %v14371_v2  ;;  %v12064_v3 = vld [vmem:[%s14321_s9 + $0xe00] ss:$16 sps:$4 sm:$0xff]  }
 0x345   : > { %7095 = vmatprep.subr.bf16.mxu0 %v11981_v4  ;;  %7628 = vmatprep.subr.bf16.mxu1 %v11984_v6  ;;  %v12067_v4 = vld [vmem:[%s14321_s9 + $0xe08] ss:$16 sps:$4 sm:$0xff]   ;;  %v12072_v6 = vld [vmem:[%s14321_s9 + $0xe24] ss:$16 sps:$4 sm:$0xff]   ;;  %v12070_v55 = vld [vmem:[%s14321_s9 + $0xe20] ss:$16 sps:$4 sm:$0xff]  }
 0x348   : > { %7096 = vmatpush1.bf16.msra.mxu0 %v11979_v7  ;;  %7629 = vmatpush1.bf16.msra.mxu1 %v11982_v8  ;;  %v12075_v7 = vld [vmem:[%s14321_s9 + $0xe2c] ss:$16 sps:$4 sm:$0xff]   ;;  %v2833_v8 = vcombine.high %v14787_v1, %v14787_v1  ;;  %v12076_v1 = vld [vmem:[%s14321_s9 + $0xe40] ss:$16 sps:$4 sm:$0xff]  }
 0x349   : > { %7097 = vmatprep.subr.bf16.mxu0 %v11987_v9  ;;  %7630 = vmatprep.subr.bf16.mxu1 %v11990_v10  ;;  %v12073_v9 = vld [vmem:[%s14321_s9 + $0xe28] ss:$16 sps:$4 sm:$0xff]   ;;  %v12078_v10 = vld [vmem:[%s14321_s9 + $0xe44] ss:$16 sps:$4 sm:$0xff]  }
 0x34c   : > { %7098 = vmatpush1.bf16.msra.mxu0 %v11985_v11  ;;  %7631 = vmatpush1.bf16.msra.mxu1 %v11988_v12  ;;  %v12081_v11 = vld [vmem:[%s14321_s9 + $0xe4c] ss:$16 sps:$4 sm:$0xff]   ;;  %v12079_v12 = vld [vmem:[%s14321_s9 + $0xe48] ss:$16 sps:$4 sm:$0xff]  }
 0x34d   : > { %7099 = vmatprep.subr.bf16.mxu0 %v11993_v13  ;;  %7632 = vmatprep.subr.bf16.mxu1 %v11996_v14  ;;  %v12084_v13 = vld [vmem:[%s14321_s9 + $0xe64] ss:$16 sps:$4 sm:$0xff]   ;;  %v12087_v14 = vld [vmem:[%s14321_s9 + $0xe6c] ss:$16 sps:$4 sm:$0xff]  }
 0x350   : > { %7100 = vmatpush1.bf16.msra.mxu0 %v11991_v15  ;;  %7633 = vmatpush1.bf16.msra.mxu1 %v11994_v16  ;;  %v12082_v15 = vld [vmem:[%s14321_s9 + $0xe60] ss:$16 sps:$4 sm:$0xff]   ;;  %v12085_v16 = vld [vmem:[%s14321_s9 + $0xe68] ss:$16 sps:$4 sm:$0xff]  }
 0x351   : > { %7101 = vmatprep.subr.bf16.mxu0 %v11999_v17  ;;  %7634 = vmatprep.subr.bf16.mxu1 %v12002_v18  ;;  %v12090_v17 = vld [vmem:[%s14321_s9 + $0xe84] ss:$16 sps:$4 sm:$0xff]   ;;  %v12093_v18 = vld [vmem:[%s14321_s9 + $0xe8c] ss:$16 sps:$4 sm:$0xff]  }
 0x354   : > { %7102 = vmatpush1.bf16.msra.mxu0 %v11997_v19  ;;  %7635 = vmatpush1.bf16.msra.mxu1 %v12000_v20  ;;  %v12088_v19 = vld [vmem:[%s14321_s9 + $0xe80] ss:$16 sps:$4 sm:$0xff]   ;;  %v12091_v20 = vld [vmem:[%s14321_s9 + $0xe88] ss:$16 sps:$4 sm:$0xff]  }
 0x355   : > { %7103 = vmatprep.subr.bf16.mxu0 %v12005_v21  ;;  %7636 = vmatprep.subr.bf16.mxu1 %v12008_v22  ;;  %v12096_v21 = vld [vmem:[%s14321_s9 + $0xea4] ss:$16 sps:$4 sm:$0xff]   ;;  %v12099_v22 = vld [vmem:[%s14321_s9 + $0xeac] ss:$16 sps:$4 sm:$0xff]  }
 0x358   : > { %7104 = vmatpush1.bf16.msra.mxu0 %v12003_v23  ;;  %7637 = vmatpush1.bf16.msra.mxu1 %v12006_v24  ;;  %v12094_v23 = vld [vmem:[%s14321_s9 + $0xea0] ss:$16 sps:$4 sm:$0xff]   ;;  %v12097_v24 = vld [vmem:[%s14321_s9 + $0xea8] ss:$16 sps:$4 sm:$0xff]  }
 0x359   : > { %7105 = vmatprep.subr.bf16.mxu0 %v12011_v25  ;;  %7638 = vmatprep.subr.bf16.mxu1 %v12014_v26  ;;  %v12102_v25 = vld [vmem:[%s14321_s9 + $0xec4] ss:$16 sps:$4 sm:$0xff]   ;;  %v12105_v26 = vld [vmem:[%s14321_s9 + $0xecc] ss:$16 sps:$4 sm:$0xff]  }
 0x35c   : > { %7106 = vmatpush1.bf16.msra.mxu0 %v12009_v27  ;;  %7639 = vmatpush1.bf16.msra.mxu1 %v12012_v28  ;;  %v12100_v27 = vld [vmem:[%s14321_s9 + $0xec0] ss:$16 sps:$4 sm:$0xff]   ;;  %v12103_v28 = vld [vmem:[%s14321_s9 + $0xec8] ss:$16 sps:$4 sm:$0xff]  }
 0x35d   : > { %7107 = vmatprep.subr.bf16.mxu0 %v12017_v29  ;;  %7640 = vmatprep.subr.bf16.mxu1 %v12020_v31  ;;  %v12108_v29 = vld [vmem:[%s14321_s9 + $0xee4] ss:$16 sps:$4 sm:$0xff]   ;;  %v12111_v31 = vld [vmem:[%s14321_s9 + $0xeec] ss:$16 sps:$4 sm:$0xff]  }
 0x360   : > { %7108 = vmatpush1.bf16.msra.mxu0 %v12015_v33  ;;  %7641 = vmatpush1.bf16.msra.mxu1 %v12018_v5  ;;  %v12106_v33 = vld [vmem:[%s14321_s9 + $0xee0] ss:$16 sps:$4 sm:$0xff]   ;;  %v12109_v5 = vld [vmem:[%s14321_s9 + $0xee8] ss:$16 sps:$4 sm:$0xff]  }
 0x361   : > { %7109 = vmatprep.subr.bf16.mxu0 %v12023_v34  ;;  %7642 = vmatprep.subr.bf16.mxu1 %v12026_v35  ;;  %v12114_v34 = vld [vmem:[%s14321_s9 + $0xf04] ss:$16 sps:$4 sm:$0xff]   ;;  %v12117_v35 = vld [vmem:[%s14321_s9 + $0xf0c] ss:$16 sps:$4 sm:$0xff]  }
 0x364   : > { %7110 = vmatpush1.bf16.msra.mxu0 %v12021_v36  ;;  %7643 = vmatpush1.bf16.msra.mxu1 %v12024_v37  ;;  %v12112_v36 = vld [vmem:[%s14321_s9 + $0xf00] ss:$16 sps:$4 sm:$0xff]   ;;  %v12115_v37 = vld [vmem:[%s14321_s9 + $0xf08] ss:$16 sps:$4 sm:$0xff]  }
 0x365   : > { %7111 = vmatprep.subr.bf16.mxu0 %v12029_v39  ;;  %7644 = vmatprep.subr.bf16.mxu1 %v12032_v40  ;;  %v12120_v39 = vld [vmem:[%s14321_s9 + $0xf24] ss:$16 sps:$4 sm:$0xff]   ;;  %v12123_v40 = vld [vmem:[%s14321_s9 + $0xf2c] ss:$16 sps:$4 sm:$0xff]  }
 0x368   : > { %7112 = vmatpush1.bf16.msra.mxu0 %v12027_v41  ;;  %7645 = vmatpush1.bf16.msra.mxu1 %v12030_v43  ;;  %v12118_v41 = vld [vmem:[%s14321_s9 + $0xf20] ss:$16 sps:$4 sm:$0xff]   ;;  %v12121_v43 = vld [vmem:[%s14321_s9 + $0xf28] ss:$16 sps:$4 sm:$0xff]  }
 0x369   : > { %7113 = vmatprep.subr.bf16.mxu0 %v12035_v44  ;;  %7646 = vmatprep.subr.bf16.mxu1 %v12038_v45  ;;  %v12126_v44 = vld [vmem:[%s14321_s9 + $0xf44] ss:$16 sps:$4 sm:$0xff]   ;;  %v12129_v45 = vld [vmem:[%s14321_s9 + $0xf4c] ss:$16 sps:$4 sm:$0xff]  }
 0x36c   : > { %7114 = vmatpush1.bf16.msra.mxu0 %v12033_v46  ;;  %7647 = vmatpush1.bf16.msra.mxu1 %v12036_v47  ;;  %v12124_v46 = vld [vmem:[%s14321_s9 + $0xf40] ss:$16 sps:$4 sm:$0xff]   ;;  %v12127_v47 = vld [vmem:[%s14321_s9 + $0xf48] ss:$16 sps:$4 sm:$0xff]  }
 0x36d   : > { %7115 = vmatprep.subr.bf16.mxu0 %v12041_v32  ;;  %7648 = vmatprep.subr.bf16.mxu1 %v12044_v48  ;;  %v12132_v32 = vld [vmem:[%s14321_s9 + $0xf64] ss:$16 sps:$4 sm:$0xff]   ;;  %v12135_v48 = vld [vmem:[%s14321_s9 + $0xf6c] ss:$16 sps:$4 sm:$0xff]  }
 0x370   : > { %7116 = vmatpush1.bf16.msra.mxu0 %v12039_v49  ;;  %7649 = vmatpush1.bf16.msra.mxu1 %v12042_v50  ;;  %v12130_v49 = vld [vmem:[%s14321_s9 + $0xf60] ss:$16 sps:$4 sm:$0xff]   ;;  %v12133_v50 = vld [vmem:[%s14321_s9 + $0xf68] ss:$16 sps:$4 sm:$0xff]  }
 0x371   : > { %7117 = vmatprep.subr.bf16.mxu0 %v12047_v42  ;;  %7650 = vmatprep.subr.bf16.mxu1 %v12050_v51  ;;  %v12138_v42 = vld [vmem:[%s14321_s9 + $0xf84] ss:$16 sps:$4 sm:$0xff]   ;;  %v12141_v51 = vld [vmem:[%s14321_s9 + $0xf8c] ss:$16 sps:$4 sm:$0xff]  }
 0x374   : > { %7118 = vmatpush1.bf16.msra.mxu0 %v12045_v53  ;;  %7651 = vmatpush1.bf16.msra.mxu1 %v12048_v54  ;;  %v12136_v53 = vld [vmem:[%s14321_s9 + $0xf80] ss:$16 sps:$4 sm:$0xff]   ;;  %v12139_v54 = vld [vmem:[%s14321_s9 + $0xf88] ss:$16 sps:$4 sm:$0xff]  }
 0x375   : > { %7119 = vmatprep.subr.bf16.mxu0 %v12053_v56  ;;  %7652 = vmatprep.subr.bf16.mxu1 %v12056_v57  ;;  %v12144_v56 = vld [vmem:[%s14321_s9 + $0xfa4] ss:$16 sps:$4 sm:$0xff]   ;;  %v12147_v57 = vld [vmem:[%s14321_s9 + $0xfac] ss:$16 sps:$4 sm:$0xff]  }
 0x378   : > { %7120 = vmatpush1.bf16.msra.mxu0 %v12051_v38  ;;  %7653 = vmatpush1.bf16.msra.mxu1 %v12054_v58  ;;  %v12142_v38 = vld [vmem:[%s14321_s9 + $0xfa0] ss:$16 sps:$4 sm:$0xff]   ;;  %v12145_v58 = vld [vmem:[%s14321_s9 + $0xfa8] ss:$16 sps:$4 sm:$0xff]  }
 0x379   : > { %7121 = vmatprep.subr.bf16.mxu0 %v12059_v60  ;;  %7654 = vmatprep.subr.bf16.mxu1 %v12062_v61  ;;  %v12150_v60 = vld [vmem:[%s14321_s9 + $0xfc4] ss:$16 sps:$4 sm:$0xff]   ;;  %v12153_v61 = vld [vmem:[%s14321_s9 + $0xfcc] ss:$16 sps:$4 sm:$0xff]  }
 0x37c   : > { %7122 = vmatpush1.bf16.msra.mxu0 %v12057_v52  ;;  %7655 = vmatpush1.bf16.msra.mxu1 %v12060_v62  ;;  %v14918_v52 = vld [vmem:[%s15614_s0 + $0x10] sm:$0xff]  ;;  %v12148_v62 = vld [vmem:[%s14321_s9 + $0xfc0] ss:$16 sps:$4 sm:$0xff]  }
 0x37d   : > { %7132 = vmatprep.subr.bf16.mxu0 %v12066_v63  ;;  %7665 = vmatprep.subr.bf16.mxu1 %v12069_v0  ;;  %v12151_v63 = vld [vmem:[%s14321_s9 + $0xfc8] ss:$16 sps:$4 sm:$0xff]   ;;  %v12156_v0 = vld [vmem:[%s14321_s9 + $0xfe4] ss:$16 sps:$4 sm:$0xff]  }
 0x37f   : > { %7124 = vmatmul.mubr.bf16.vlgmr.msra.gmra.mrb[0].mxu0 %v14853_v30  ;;  %7657 = vmatmul.mubr.bf16.vlgmr.msra.gmra.mrb[0].mxu1 %v14853_v30 }
 0x380   : > { %7133 = vmatpush1.bf16.msra.mxu0 %v12064_v3  ;;  %7666 = vmatpush1.bf16.msra.mxu1 %v12067_v4  ;;  %v12159_v3 = vld [vmem:[%s14321_s9 + $0xfec] ss:$16 sps:$4 sm:$0xff]   ;;  %v14926_v4 = vrot.slane %v14918_v52, %v14371_v2 }
 0x381   : > { %7134 = vmatprep.subr.bf16.mxu0 %v12072_v6  ;;  %7667 = vmatprep.subr.bf16.mxu1 %v12075_v7  ;;  %v12154_v6 = vld [vmem:[%s14321_s9 + $0xfe0] ss:$16 sps:$4 sm:$0xff]   ;;  %v12157_v7 = vld [vmem:[%s14321_s9 + $0xfe8] ss:$16 sps:$4 sm:$0xff]  }
 0x382   : > { %7164 = vmatprep.mubr.bf16.mxu0 %v2833_v8  ;;  %7697 = vmatprep.mubr.bf16.mxu1 %v2833_v8  ;;  %v12162_v8 = vld [vmem:[%s14321_s9 + $0x1004] ss:$16 sps:$4 sm:$0xff]  }
 0x384   : > { %7135 = vmatpush1.bf16.msra.mxu0 %v12070_v55  ;;  %7668 = vmatpush1.bf16.msra.mxu1 %v12073_v9  ;;  %v12165_v55 = vld [vmem:[%s14321_s9 + $0x100c] ss:$16 sps:$4 sm:$0xff]   ;;  %v2849_v9 = vcombine.high %v14926_v4, %v14926_v4 }
 0x385   : > { %7136 = vmatprep.subr.bf16.mxu0 %v12078_v10  ;;  %7669 = vmatprep.subr.bf16.mxu1 %v12081_v11  ;;  %v2831_v10 = vcombine.high %v14853_v30, %v14853_v30  ;;  %v12160_v11 = vld [vmem:[%s14321_s9 + $0x1000] ss:$16 sps:$4 sm:$0xff]  }
 0x386   : > { %v12166_v30 = vld [vmem:[%s14321_s9 + $0x1020] ss:$16 sps:$4 sm:$0xff]  }
 0x388   : > { %7137 = vmatpush1.bf16.msra.mxu0 %v12076_v1  ;;  %7670 = vmatpush1.bf16.msra.mxu1 %v12079_v12  ;;  %v12163_v1 = vld [vmem:[%s14321_s9 + $0x1008] ss:$16 sps:$4 sm:$0xff]   ;;  %v12168_v12 = vld [vmem:[%s14321_s9 + $0x1024] ss:$16 sps:$4 sm:$0xff]  }
 0x389   : > { %7138 = vmatprep.subr.bf16.mxu0 %v12084_v13  ;;  %7671 = vmatprep.subr.bf16.mxu1 %v12087_v14  ;;  %v12171_v13 = vld [vmem:[%s14321_s9 + $0x102c] ss:$16 sps:$4 sm:$0xff]   ;;  %v14941_v14 = vrot.slane %v2849_v9, %v14371_v2  ;;  %v12247_v9 = vld [vmem:[%s14321_s9 + $0x11c8] ss:$16 sps:$4 sm:$0xff]  }
 0x38c   : > { %7139 = vmatpush1.bf16.msra.mxu0 %v12082_v15  ;;  %7672 = vmatpush1.bf16.msra.mxu1 %v12085_v16  ;;  %v12169_v15 = vld [vmem:[%s14321_s9 + $0x1028] ss:$16 sps:$4 sm:$0xff]   ;;  %v12174_v16 = vld [vmem:[%s14321_s9 + $0x1044] ss:$16 sps:$4 sm:$0xff]  }
 0x38d   : > { %7140 = vmatprep.subr.bf16.mxu0 %v12090_v17  ;;  %7673 = vmatprep.subr.bf16.mxu1 %v12093_v18  ;;  %v12177_v17 = vld [vmem:[%s14321_s9 + $0x104c] ss:$16 sps:$4 sm:$0xff]   ;;  %v12172_v18 = vld [vmem:[%s14321_s9 + $0x1040] ss:$16 sps:$4 sm:$0xff]  }
 0x390   : > { %7141 = vmatpush1.bf16.msra.mxu0 %v12088_v19  ;;  %7674 = vmatpush1.bf16.msra.mxu1 %v12091_v20  ;;  %v12175_v19 = vld [vmem:[%s14321_s9 + $0x1048] ss:$16 sps:$4 sm:$0xff]   ;;  %v12180_v20 = vld [vmem:[%s14321_s9 + $0x1064] ss:$16 sps:$4 sm:$0xff]  }
 0x391   : > { %7142 = vmatprep.subr.bf16.mxu0 %v12096_v21  ;;  %7675 = vmatprep.subr.bf16.mxu1 %v12099_v22  ;;  %v12183_v21 = vld [vmem:[%s14321_s9 + $0x106c] ss:$16 sps:$4 sm:$0xff]   ;;  %v12178_v22 = vld [vmem:[%s14321_s9 + $0x1060] ss:$16 sps:$4 sm:$0xff]  }
 0x394   : > { %7143 = vmatpush1.bf16.msra.mxu0 %v12094_v23  ;;  %7676 = vmatpush1.bf16.msra.mxu1 %v12097_v24  ;;  %v12181_v23 = vld [vmem:[%s14321_s9 + $0x1068] ss:$16 sps:$4 sm:$0xff]   ;;  %v12186_v24 = vld [vmem:[%s14321_s9 + $0x1084] ss:$16 sps:$4 sm:$0xff]  }
 0x395   : > { %7144 = vmatprep.subr.bf16.mxu0 %v12102_v25  ;;  %7677 = vmatprep.subr.bf16.mxu1 %v12105_v26  ;;  %v12189_v25 = vld [vmem:[%s14321_s9 + $0x108c] ss:$16 sps:$4 sm:$0xff]   ;;  %v12184_v26 = vld [vmem:[%s14321_s9 + $0x1080] ss:$16 sps:$4 sm:$0xff]  }
 0x398   : > { %7145 = vmatpush1.bf16.msra.mxu0 %v12100_v27  ;;  %7678 = vmatpush1.bf16.msra.mxu1 %v12103_v28  ;;  %v12187_v27 = vld [vmem:[%s14321_s9 + $0x1088] ss:$16 sps:$4 sm:$0xff]   ;;  %v12192_v28 = vld [vmem:[%s14321_s9 + $0x10a4] ss:$16 sps:$4 sm:$0xff]  }
 0x399   : > { %7146 = vmatprep.subr.bf16.mxu0 %v12108_v29  ;;  %7679 = vmatprep.subr.bf16.mxu1 %v12111_v31  ;;  %v12195_v29 = vld [vmem:[%s14321_s9 + $0x10ac] ss:$16 sps:$4 sm:$0xff]   ;;  %v12190_v31 = vld [vmem:[%s14321_s9 + $0x10a0] ss:$16 sps:$4 sm:$0xff]  }
 0x39c   : > { %7147 = vmatpush1.bf16.msra.mxu0 %v12106_v33  ;;  %7680 = vmatpush1.bf16.msra.mxu1 %v12109_v5  ;;  %v12193_v33 = vld [vmem:[%s14321_s9 + $0x10a8] ss:$16 sps:$4 sm:$0xff]   ;;  %v12198_v5 = vld [vmem:[%s14321_s9 + $0x10c4] ss:$16 sps:$4 sm:$0xff]  }
 0x39d   : > { %7148 = vmatprep.subr.bf16.mxu0 %v12114_v34  ;;  %7681 = vmatprep.subr.bf16.mxu1 %v12117_v35  ;;  %v12201_v34 = vld [vmem:[%s14321_s9 + $0x10cc] ss:$16 sps:$4 sm:$0xff]   ;;  %v12196_v35 = vld [vmem:[%s14321_s9 + $0x10c0] ss:$16 sps:$4 sm:$0xff]  }
 0x3a0   : > { %7149 = vmatpush1.bf16.msra.mxu0 %v12112_v36  ;;  %7682 = vmatpush1.bf16.msra.mxu1 %v12115_v37  ;;  %v12199_v36 = vld [vmem:[%s14321_s9 + $0x10c8] ss:$16 sps:$4 sm:$0xff]   ;;  %v12204_v37 = vld [vmem:[%s14321_s9 + $0x10e4] ss:$16 sps:$4 sm:$0xff]  }
 0x3a1   : > { %7150 = vmatprep.subr.bf16.mxu0 %v12120_v39  ;;  %7683 = vmatprep.subr.bf16.mxu1 %v12123_v40  ;;  %v12207_v39 = vld [vmem:[%s14321_s9 + $0x10ec] ss:$16 sps:$4 sm:$0xff]   ;;  %v12202_v40 = vld [vmem:[%s14321_s9 + $0x10e0] ss:$16 sps:$4 sm:$0xff]  }
 0x3a4   : > { %7151 = vmatpush1.bf16.msra.mxu0 %v12118_v41  ;;  %7684 = vmatpush1.bf16.msra.mxu1 %v12121_v43  ;;  %v12205_v41 = vld [vmem:[%s14321_s9 + $0x10e8] ss:$16 sps:$4 sm:$0xff]   ;;  %v12210_v43 = vld [vmem:[%s14321_s9 + $0x1104] ss:$16 sps:$4 sm:$0xff]  }
 0x3a5   : > { %7152 = vmatprep.subr.bf16.mxu0 %v12126_v44  ;;  %7685 = vmatprep.subr.bf16.mxu1 %v12129_v45  ;;  %v12213_v44 = vld [vmem:[%s14321_s9 + $0x110c] ss:$16 sps:$4 sm:$0xff]   ;;  %v12208_v45 = vld [vmem:[%s14321_s9 + $0x1100] ss:$16 sps:$4 sm:$0xff]  }
 0x3a8   : > { %7153 = vmatpush1.bf16.msra.mxu0 %v12124_v46  ;;  %7686 = vmatpush1.bf16.msra.mxu1 %v12127_v47  ;;  %v12211_v46 = vld [vmem:[%s14321_s9 + $0x1108] ss:$16 sps:$4 sm:$0xff]   ;;  %v12216_v47 = vld [vmem:[%s14321_s9 + $0x1124] ss:$16 sps:$4 sm:$0xff]  }
 0x3a9   : > { %7154 = vmatprep.subr.bf16.mxu0 %v12132_v32  ;;  %7687 = vmatprep.subr.bf16.mxu1 %v12135_v48  ;;  %v12219_v32 = vld [vmem:[%s14321_s9 + $0x112c] ss:$16 sps:$4 sm:$0xff]   ;;  %v12214_v48 = vld [vmem:[%s14321_s9 + $0x1120] ss:$16 sps:$4 sm:$0xff]  }
 0x3ac   : > { %7155 = vmatpush1.bf16.msra.mxu0 %v12130_v49  ;;  %7688 = vmatpush1.bf16.msra.mxu1 %v12133_v50  ;;  %v12217_v49 = vld [vmem:[%s14321_s9 + $0x1128] ss:$16 sps:$4 sm:$0xff]   ;;  %v12222_v50 = vld [vmem:[%s14321_s9 + $0x1144] ss:$16 sps:$4 sm:$0xff]  }
 0x3ad   : > { %7156 = vmatprep.subr.bf16.mxu0 %v12138_v42  ;;  %7689 = vmatprep.subr.bf16.mxu1 %v12141_v51  ;;  %v12225_v42 = vld [vmem:[%s14321_s9 + $0x114c] ss:$16 sps:$4 sm:$0xff]   ;;  %v12220_v51 = vld [vmem:[%s14321_s9 + $0x1140] ss:$16 sps:$4 sm:$0xff]  }
 0x3b0   : > { %7157 = vmatpush1.bf16.msra.mxu0 %v12136_v53  ;;  %7690 = vmatpush1.bf16.msra.mxu1 %v12139_v54  ;;  %v12223_v53 = vld [vmem:[%s14321_s9 + $0x1148] ss:$16 sps:$4 sm:$0xff]   ;;  %v12228_v54 = vld [vmem:[%s14321_s9 + $0x1164] ss:$16 sps:$4 sm:$0xff]  }
 0x3b1   : > { %7158 = vmatprep.subr.bf16.mxu0 %v12144_v56  ;;  %7691 = vmatprep.subr.bf16.mxu1 %v12147_v57  ;;  %v12231_v56 = vld [vmem:[%s14321_s9 + $0x116c] ss:$16 sps:$4 sm:$0xff]   ;;  %v12226_v57 = vld [vmem:[%s14321_s9 + $0x1160] ss:$16 sps:$4 sm:$0xff]  }
 0x3b4   : > { %7159 = vmatpush1.bf16.msra.mxu0 %v12142_v38  ;;  %7692 = vmatpush1.bf16.msra.mxu1 %v12145_v58  ;;  %v12229_v38 = vld [vmem:[%s14321_s9 + $0x1168] ss:$16 sps:$4 sm:$0xff]   ;;  %v12234_v58 = vld [vmem:[%s14321_s9 + $0x1184] ss:$16 sps:$4 sm:$0xff]  }
 0x3b5   : > { %7160 = vmatprep.subr.bf16.mxu0 %v12150_v60  ;;  %7693 = vmatprep.subr.bf16.mxu1 %v12153_v61  ;;  %v12237_v60 = vld [vmem:[%s14321_s9 + $0x118c] ss:$16 sps:$4 sm:$0xff]   ;;  %v12232_v61 = vld [vmem:[%s14321_s9 + $0x1180] ss:$16 sps:$4 sm:$0xff]  }
 0x3b8   : > { %7161 = vmatpush1.bf16.msra.mxu0 %v12148_v62  ;;  %7694 = vmatpush1.bf16.msra.mxu1 %v12151_v63  ;;  %v12235_v62 = vld [vmem:[%s14321_s9 + $0x1188] ss:$16 sps:$4 sm:$0xff]   ;;  %v12240_v63 = vld [vmem:[%s14321_s9 + $0x11a4] ss:$16 sps:$4 sm:$0xff]  }
 0x3b9   : > { %7162 = vmatprep.subr.bf16.mxu0 %v12156_v0  ;;  %7695 = vmatprep.subr.bf16.mxu1 %v12159_v3  ;;  %v12243_v0 = vld [vmem:[%s14321_s9 + $0x11ac] ss:$16 sps:$4 sm:$0xff]   ;;  %v12238_v3 = vld [vmem:[%s14321_s9 + $0x11a0] ss:$16 sps:$4 sm:$0xff]  }
 0x3bc   : > { %7163 = vmatpush1.bf16.msra.mxu0 %v12154_v6  ;;  %7696 = vmatpush1.bf16.msra.mxu1 %v12157_v7  ;;  %v12241_v6 = vld [vmem:[%s14321_s9 + $0x11a8] ss:$16 sps:$4 sm:$0xff]   ;;  %v12246_v7 = vld [vmem:[%s14321_s9 + $0x11c4] ss:$16 sps:$4 sm:$0xff]  }
 0x3bd   : > { %7173 = vmatprep.subr.bf16.mxu0 %v12162_v8  ;;  %7706 = vmatprep.subr.bf16.mxu1 %v12165_v55  ;;  %v12249_v8 = vld [vmem:[%s14321_s9 + $0x11cc] ss:$16 sps:$4 sm:$0xff]   ;;  %v12244_v55 = vld [vmem:[%s14321_s9 + $0x11c0] ss:$16 sps:$4 sm:$0xff]  }
 0x3bf   : > { %7165 = vmatmul.mubr.bf16.vlgmr.msra.gmra.mrb[0].mxu0 %v2831_v10  ;;  %7698 = vmatmul.mubr.bf16.vlgmr.msra.gmra.mrb[0].mxu1 %v2831_v10  ;;  %v12252_v10 = vld [vmem:[%s14321_s9 + $0x11e4] ss:$16 sps:$4 sm:$0xff]  }
 0x3c0   : > { %7174 = vmatpush1.bf16.msra.mxu0 %v12160_v11  ;;  %7707 = vmatpush1.bf16.msra.mxu1 %v12163_v1  ;;  %v12255_v11 = vld [vmem:[%s14321_s9 + $0x11ec] ss:$16 sps:$4 sm:$0xff]   ;;  %v12250_v1 = vld [vmem:[%s14321_s9 + $0x11e0] ss:$16 sps:$4 sm:$0xff]  }
 0x3c1   : > { %7175 = vmatprep.subr.bf16.mxu0 %v12168_v12  ;;  %7708 = vmatprep.subr.bf16.mxu1 %v12171_v13  ;;  %v12253_v12 = vld [vmem:[%s14321_s9 + $0x11e8] ss:$16 sps:$4 sm:$0xff]   ;;  %v12258_v13 = vld [vmem:[%s14321_s9 + $0x1204] ss:$16 sps:$4 sm:$0xff]  }
 0x3c2   : > { %7205 = vmatprep.mubr.bf16.mxu0 %v14941_v14  ;;  %7738 = vmatprep.mubr.bf16.mxu1 %v14941_v14 }
 0x3c4   : > { %7176 = vmatpush1.bf16.msra.mxu0 %v12166_v30  ;;  %7709 = vmatpush1.bf16.msra.mxu1 %v12169_v15  ;;  %v12261_v30 = vld [vmem:[%s14321_s9 + $0x120c] ss:$16 sps:$4 sm:$0xff]   ;;  %v15007_v15 = vrot.slane %v14926_v4, %v14371_v2  ;;  %v12262_v4 = vld [vmem:[%s14321_s9 + $0x1220] ss:$16 sps:$4 sm:$0xff]  }
 0x3c5   : > { %7177 = vmatprep.subr.bf16.mxu0 %v12174_v16  ;;  %7710 = vmatprep.subr.bf16.mxu1 %v12177_v17  ;;  %v12256_v16 = vld [vmem:[%s14321_s9 + $0x1200] ss:$16 sps:$4 sm:$0xff]   ;;  %v12259_v17 = vld [vmem:[%s14321_s9 + $0x1208] ss:$16 sps:$4 sm:$0xff]  }
 0x3c8   : > { %7178 = vmatpush1.bf16.msra.mxu0 %v12172_v18  ;;  %7711 = vmatpush1.bf16.msra.mxu1 %v12175_v19  ;;  %v12264_v18 = vld [vmem:[%s14321_s9 + $0x1224] ss:$16 sps:$4 sm:$0xff]   ;;  %v12267_v19 = vld [vmem:[%s14321_s9 + $0x122c] ss:$16 sps:$4 sm:$0xff]  }
 0x3c9   : > { %7179 = vmatprep.subr.bf16.mxu0 %v12180_v20  ;;  %7712 = vmatprep.subr.bf16.mxu1 %v12183_v21  ;;  %v2881_v20 = vcombine.high %v14941_v14, %v14941_v14  ;;  %v12265_v21 = vld [vmem:[%s14321_s9 + $0x1228] ss:$16 sps:$4 sm:$0xff]   ;;  %v12268_v14 = vld [vmem:[%s14321_s9 + $0x1240] ss:$16 sps:$4 sm:$0xff]  }
 0x3cc   : > { %7180 = vmatpush1.bf16.msra.mxu0 %v12178_v22  ;;  %7713 = vmatpush1.bf16.msra.mxu1 %v12181_v23  ;;  %v12270_v22 = vld [vmem:[%s14321_s9 + $0x1244] ss:$16 sps:$4 sm:$0xff]   ;;  %v12273_v23 = vld [vmem:[%s14321_s9 + $0x124c] ss:$16 sps:$4 sm:$0xff]  }
 0x3cd   : > { %7181 = vmatprep.subr.bf16.mxu0 %v12186_v24  ;;  %7714 = vmatprep.subr.bf16.mxu1 %v12189_v25  ;;  %v12271_v24 = vld [vmem:[%s14321_s9 + $0x1248] ss:$16 sps:$4 sm:$0xff]   ;;  %v12276_v25 = vld [vmem:[%s14321_s9 + $0x1264] ss:$16 sps:$4 sm:$0xff]  }
 0x3d0   : > { %7182 = vmatpush1.bf16.msra.mxu0 %v12184_v26  ;;  %7715 = vmatpush1.bf16.msra.mxu1 %v12187_v27  ;;  %v12279_v26 = vld [vmem:[%s14321_s9 + $0x126c] ss:$16 sps:$4 sm:$0xff]   ;;  %v12274_v27 = vld [vmem:[%s14321_s9 + $0x1260] ss:$16 sps:$4 sm:$0xff]  }
 0x3d1   : > { %7183 = vmatprep.subr.bf16.mxu0 %v12192_v28  ;;  %7716 = vmatprep.subr.bf16.mxu1 %v12195_v29  ;;  %v12277_v28 = vld [vmem:[%s14321_s9 + $0x1268] ss:$16 sps:$4 sm:$0xff]   ;;  %v12282_v29 = vld [vmem:[%s14321_s9 + $0x1284] ss:$16 sps:$4 sm:$0xff]  }
 0x3d4   : > { %7184 = vmatpush1.bf16.msra.mxu0 %v12190_v31  ;;  %7717 = vmatpush1.bf16.msra.mxu1 %v12193_v33  ;;  %v12285_v31 = vld [vmem:[%s14321_s9 + $0x128c] ss:$16 sps:$4 sm:$0xff]   ;;  %v12280_v33 = vld [vmem:[%s14321_s9 + $0x1280] ss:$16 sps:$4 sm:$0xff]  }
 0x3d5   : > { %7185 = vmatprep.subr.bf16.mxu0 %v12198_v5  ;;  %7718 = vmatprep.subr.bf16.mxu1 %v12201_v34  ;;  %v12283_v5 = vld [vmem:[%s14321_s9 + $0x1288] ss:$16 sps:$4 sm:$0xff]   ;;  %v12288_v34 = vld [vmem:[%s14321_s9 + $0x12a4] ss:$16 sps:$4 sm:$0xff]  }
 0x3d8   : > { %7186 = vmatpush1.bf16.msra.mxu0 %v12196_v35  ;;  %7719 = vmatpush1.bf16.msra.mxu1 %v12199_v36  ;;  %v12291_v35 = vld [vmem:[%s14321_s9 + $0x12ac] ss:$16 sps:$4 sm:$0xff]   ;;  %v12286_v36 = vld [vmem:[%s14321_s9 + $0x12a0] ss:$16 sps:$4 sm:$0xff]  }
 0x3d9   : > { %7187 = vmatprep.subr.bf16.mxu0 %v12204_v37  ;;  %7720 = vmatprep.subr.bf16.mxu1 %v12207_v39  ;;  %v12289_v37 = vld [vmem:[%s14321_s9 + $0x12a8] ss:$16 sps:$4 sm:$0xff]   ;;  %v12294_v39 = vld [vmem:[%s14321_s9 + $0x12c4] ss:$16 sps:$4 sm:$0xff]  }
 0x3dc   : > { %7188 = vmatpush1.bf16.msra.mxu0 %v12202_v40  ;;  %7721 = vmatpush1.bf16.msra.mxu1 %v12205_v41  ;;  %v12297_v40 = vld [vmem:[%s14321_s9 + $0x12cc] ss:$16 sps:$4 sm:$0xff]   ;;  %v12292_v41 = vld [vmem:[%s14321_s9 + $0x12c0] ss:$16 sps:$4 sm:$0xff]  }
 0x3dd   : > { %7189 = vmatprep.subr.bf16.mxu0 %v12210_v43  ;;  %7722 = vmatprep.subr.bf16.mxu1 %v12213_v44  ;;  %v12295_v43 = vld [vmem:[%s14321_s9 + $0x12c8] ss:$16 sps:$4 sm:$0xff]   ;;  %v12300_v44 = vld [vmem:[%s14321_s9 + $0x12e4] ss:$16 sps:$4 sm:$0xff]  }
 0x3e0   : > { %7190 = vmatpush1.bf16.msra.mxu0 %v12208_v45  ;;  %7723 = vmatpush1.bf16.msra.mxu1 %v12211_v46  ;;  %v12303_v45 = vld [vmem:[%s14321_s9 + $0x12ec] ss:$16 sps:$4 sm:$0xff]   ;;  %v12298_v46 = vld [vmem:[%s14321_s9 + $0x12e0] ss:$16 sps:$4 sm:$0xff]  }
 0x3e1   : > { %7191 = vmatprep.subr.bf16.mxu0 %v12216_v47  ;;  %7724 = vmatprep.subr.bf16.mxu1 %v12219_v32  ;;  %v12301_v47 = vld [vmem:[%s14321_s9 + $0x12e8] ss:$16 sps:$4 sm:$0xff]   ;;  %v12306_v32 = vld [vmem:[%s14321_s9 + $0x1304] ss:$16 sps:$4 sm:$0xff]  }
 0x3e4   : > { %7192 = vmatpush1.bf16.msra.mxu0 %v12214_v48  ;;  %7725 = vmatpush1.bf16.msra.mxu1 %v12217_v49  ;;  %v12309_v48 = vld [vmem:[%s14321_s9 + $0x130c] ss:$16 sps:$4 sm:$0xff]   ;;  %v12304_v49 = vld [vmem:[%s14321_s9 + $0x1300] ss:$16 sps:$4 sm:$0xff]  }
 0x3e5   : > { %7193 = vmatprep.subr.bf16.mxu0 %v12222_v50  ;;  %7726 = vmatprep.subr.bf16.mxu1 %v12225_v42  ;;  %v12307_v50 = vld [vmem:[%s14321_s9 + $0x1308] ss:$16 sps:$4 sm:$0xff]   ;;  %v12312_v42 = vld [vmem:[%s14321_s9 + $0x1324] ss:$16 sps:$4 sm:$0xff]  }
 0x3e8   : > { %7194 = vmatpush1.bf16.msra.mxu0 %v12220_v51  ;;  %7727 = vmatpush1.bf16.msra.mxu1 %v12223_v53  ;;  %v12315_v51 = vld [vmem:[%s14321_s9 + $0x132c] ss:$16 sps:$4 sm:$0xff]   ;;  %v12310_v53 = vld [vmem:[%s14321_s9 + $0x1320] ss:$16 sps:$4 sm:$0xff]  }
 0x3e9   : > { %7195 = vmatprep.subr.bf16.mxu0 %v12228_v54  ;;  %7728 = vmatprep.subr.bf16.mxu1 %v12231_v56  ;;  %v12313_v54 = vld [vmem:[%s14321_s9 + $0x1328] ss:$16 sps:$4 sm:$0xff]   ;;  %v12318_v56 = vld [vmem:[%s14321_s9 + $0x1344] ss:$16 sps:$4 sm:$0xff]  }
 0x3ec   : > { %7196 = vmatpush1.bf16.msra.mxu0 %v12226_v57  ;;  %7729 = vmatpush1.bf16.msra.mxu1 %v12229_v38  ;;  %v12321_v57 = vld [vmem:[%s14321_s9 + $0x134c] ss:$16 sps:$4 sm:$0xff]   ;;  %v12316_v38 = vld [vmem:[%s14321_s9 + $0x1340] ss:$16 sps:$4 sm:$0xff]  }
 0x3ed   : > { %7197 = vmatprep.subr.bf16.mxu0 %v12234_v58  ;;  %7730 = vmatprep.subr.bf16.mxu1 %v12237_v60  ;;  %v12319_v58 = vld [vmem:[%s14321_s9 + $0x1348] ss:$16 sps:$4 sm:$0xff]   ;;  %v12324_v60 = vld [vmem:[%s14321_s9 + $0x1364] ss:$16 sps:$4 sm:$0xff]  }
 0x3f0   : > { %7198 = vmatpush1.bf16.msra.mxu0 %v12232_v61  ;;  %7731 = vmatpush1.bf16.msra.mxu1 %v12235_v62  ;;  %v12327_v61 = vld [vmem:[%s14321_s9 + $0x136c] ss:$16 sps:$4 sm:$0xff]   ;;  %v12322_v62 = vld [vmem:[%s14321_s9 + $0x1360] ss:$16 sps:$4 sm:$0xff]  }
 0x3f1   : > { %7199 = vmatprep.subr.bf16.mxu0 %v12240_v63  ;;  %7732 = vmatprep.subr.bf16.mxu1 %v12243_v0  ;;  %v12325_v63 = vld [vmem:[%s14321_s9 + $0x1368] ss:$16 sps:$4 sm:$0xff]   ;;  %v12330_v0 = vld [vmem:[%s14321_s9 + $0x1384] ss:$16 sps:$4 sm:$0xff]  }
 0x3f4   : > { %7200 = vmatpush1.bf16.msra.mxu0 %v12238_v3  ;;  %7733 = vmatpush1.bf16.msra.mxu1 %v12241_v6  ;;  %v12333_v3 = vld [vmem:[%s14321_s9 + $0x138c] ss:$16 sps:$4 sm:$0xff]   ;;  %v12328_v6 = vld [vmem:[%s14321_s9 + $0x1380] ss:$16 sps:$4 sm:$0xff]  }
 0x3f5   : > { %7201 = vmatprep.subr.bf16.mxu0 %v12246_v7  ;;  %7734 = vmatprep.subr.bf16.mxu1 %v12249_v8  ;;  %v12331_v7 = vld [vmem:[%s14321_s9 + $0x1388] ss:$16 sps:$4 sm:$0xff]   ;;  %v12336_v8 = vld [vmem:[%s14321_s9 + $0x13a4] ss:$16 sps:$4 sm:$0xff]  }
 0x3f8   : > { %7202 = vmatpush1.bf16.msra.mxu0 %v12244_v55  ;;  %7735 = vmatpush1.bf16.msra.mxu1 %v12247_v9  ;;  %v12339_v55 = vld [vmem:[%s14321_s9 + $0x13ac] ss:$16 sps:$4 sm:$0xff]   ;;  %v12334_v9 = vld [vmem:[%s14321_s9 + $0x13a0] ss:$16 sps:$4 sm:$0xff]  }
 0x3f9   : > { %7203 = vmatprep.subr.bf16.mxu0 %v12252_v10  ;;  %7736 = vmatprep.subr.bf16.mxu1 %v12255_v11  ;;  %v12337_v10 = vld [vmem:[%s14321_s9 + $0x13a8] ss:$16 sps:$4 sm:$0xff]   ;;  %v12342_v11 = vld [vmem:[%s14321_s9 + $0x13c4] ss:$16 sps:$4 sm:$0xff]  }
 0x3fc   : > { %7204 = vmatpush1.bf16.msra.mxu0 %v12250_v1  ;;  %7737 = vmatpush1.bf16.msra.mxu1 %v12253_v12  ;;  %v12345_v1 = vld [vmem:[%s14321_s9 + $0x13cc] ss:$16 sps:$4 sm:$0xff]   ;;  %v2834_v12 = vcombine.high %v14918_v52, %v14918_v52  ;;  %v12346_v52 = vld [vmem:[%s14321_s9 + $0x13e0] ss:$16 sps:$4 sm:$0xff]  }
 0x3fd   : > { %7214 = vmatprep.subr.bf16.mxu0 %v12258_v13  ;;  %7747 = vmatprep.subr.bf16.mxu1 %v12261_v30  ;;  %v12340_v13 = vld [vmem:[%s14321_s9 + $0x13c0] ss:$16 sps:$4 sm:$0xff]   ;;  %v12343_v30 = vld [vmem:[%s14321_s9 + $0x13c8] ss:$16 sps:$4 sm:$0xff]  }
 0x3ff   : > { %7206 = vmatmul.mubr.bf16.vlgmr.msra.gmra.mrb[0].mxu0 %v15007_v15  ;;  %7739 = vmatmul.mubr.bf16.vlgmr.msra.gmra.mrb[0].mxu1 %v15007_v15 }
 0x400   : > { %7215 = vmatpush1.bf16.msra.mxu0 %v12256_v16  ;;  %7748 = vmatpush1.bf16.msra.mxu1 %v12259_v17  ;;  %v12348_v16 = vld [vmem:[%s14321_s9 + $0x13e4] ss:$16 sps:$4 sm:$0xff]   ;;  %v12351_v17 = vld [vmem:[%s14321_s9 + $0x13ec] ss:$16 sps:$4 sm:$0xff]  }
 0x401   : > { %7216 = vmatprep.subr.bf16.mxu0 %v12264_v18  ;;  %7749 = vmatprep.subr.bf16.mxu1 %v12267_v19  ;;  %v15076_v18 = vrot.slane %v2834_v12, %v14371_v2  ;;  %v12349_v19 = vld [vmem:[%s14321_s9 + $0x13e8] ss:$16 sps:$4 sm:$0xff]  }
 0x402   : > { %7246 = vmatprep.mubr.bf16.mxu0 %v2881_v20  ;;  %7779 = vmatprep.mubr.bf16.mxu1 %v2881_v20  ;;  %v12354_v20 = vld [vmem:[%s14321_s9 + $0x1404] ss:$16 sps:$4 sm:$0xff]   ;;  %v12427_v12 = vld [vmem:[%s14321_s9 + $0x1588] ss:$16 sps:$4 sm:$0xff]  }
 0x404   : > { %7217 = vmatpush1.bf16.msra.mxu0 %v12262_v4  ;;  %7750 = vmatpush1.bf16.msra.mxu1 %v12265_v21  ;;  %v12357_v4 = vld [vmem:[%s14321_s9 + $0x140c] ss:$16 sps:$4 sm:$0xff]   ;;  %v2850_v21 = vcombine.high %v15076_v18, %v15076_v18 }
 0x405   : > { %7218 = vmatprep.subr.bf16.mxu0 %v12270_v22  ;;  %7751 = vmatprep.subr.bf16.mxu1 %v12273_v23  ;;  %v2879_v22 = vcombine.high %v15007_v15, %v15007_v15  ;;  %v12352_v23 = vld [vmem:[%s14321_s9 + $0x1400] ss:$16 sps:$4 sm:$0xff]  }
 0x406   : > { %v12358_v15 = vld [vmem:[%s14321_s9 + $0x1420] ss:$16 sps:$4 sm:$0xff]  }
 0x408   : > { %7219 = vmatpush1.bf16.msra.mxu0 %v12268_v14  ;;  %7752 = vmatpush1.bf16.msra.mxu1 %v12271_v24  ;;  %v12355_v14 = vld [vmem:[%s14321_s9 + $0x1408] ss:$16 sps:$4 sm:$0xff]   ;;  %v12360_v24 = vld [vmem:[%s14321_s9 + $0x1424] ss:$16 sps:$4 sm:$0xff]  }
 0x409   : > { %7220 = vmatprep.subr.bf16.mxu0 %v12276_v25  ;;  %7753 = vmatprep.subr.bf16.mxu1 %v12279_v26  ;;  %v12363_v25 = vld [vmem:[%s14321_s9 + $0x142c] ss:$16 sps:$4 sm:$0xff]   ;;  %v15091_v26 = vrot.slane %v2850_v21, %v14371_v2  ;;  %v12444_v21 = vld [vmem:[%s14321_s9 + $0x15e4] ss:$16 sps:$4 sm:$0xff]  }
 0x40c   : > { %7221 = vmatpush1.bf16.msra.mxu0 %v12274_v27  ;;  %7754 = vmatpush1.bf16.msra.mxu1 %v12277_v28  ;;  %v12361_v27 = vld [vmem:[%s14321_s9 + $0x1428] ss:$16 sps:$4 sm:$0xff]   ;;  %v12366_v28 = vld [vmem:[%s14321_s9 + $0x1444] ss:$16 sps:$4 sm:$0xff]  }
 0x40d   : > { %7222 = vmatprep.subr.bf16.mxu0 %v12282_v29  ;;  %7755 = vmatprep.subr.bf16.mxu1 %v12285_v31  ;;  %v12369_v29 = vld [vmem:[%s14321_s9 + $0x144c] ss:$16 sps:$4 sm:$0xff]   ;;  %v12364_v31 = vld [vmem:[%s14321_s9 + $0x1440] ss:$16 sps:$4 sm:$0xff]  }
 0x410   : > { %7223 = vmatpush1.bf16.msra.mxu0 %v12280_v33  ;;  %7756 = vmatpush1.bf16.msra.mxu1 %v12283_v5  ;;  %v12367_v33 = vld [vmem:[%s14321_s9 + $0x1448] ss:$16 sps:$4 sm:$0xff]   ;;  %v12372_v5 = vld [vmem:[%s14321_s9 + $0x1464] ss:$16 sps:$4 sm:$0xff]  }
 0x411   : > { %7224 = vmatprep.subr.bf16.mxu0 %v12288_v34  ;;  %7757 = vmatprep.subr.bf16.mxu1 %v12291_v35  ;;  %v12375_v34 = vld [vmem:[%s14321_s9 + $0x146c] ss:$16 sps:$4 sm:$0xff]   ;;  %v12370_v35 = vld [vmem:[%s14321_s9 + $0x1460] ss:$16 sps:$4 sm:$0xff]  }
 0x414   : > { %7225 = vmatpush1.bf16.msra.mxu0 %v12286_v36  ;;  %7758 = vmatpush1.bf16.msra.mxu1 %v12289_v37  ;;  %v12373_v36 = vld [vmem:[%s14321_s9 + $0x1468] ss:$16 sps:$4 sm:$0xff]   ;;  %v12378_v37 = vld [vmem:[%s14321_s9 + $0x1484] ss:$16 sps:$4 sm:$0xff]  }
 0x415   : > { %7226 = vmatprep.subr.bf16.mxu0 %v12294_v39  ;;  %7759 = vmatprep.subr.bf16.mxu1 %v12297_v40  ;;  %v12381_v39 = vld [vmem:[%s14321_s9 + $0x148c] ss:$16 sps:$4 sm:$0xff]   ;;  %v12376_v40 = vld [vmem:[%s14321_s9 + $0x1480] ss:$16 sps:$4 sm:$0xff]  }
 0x418   : > { %7227 = vmatpush1.bf16.msra.mxu0 %v12292_v41  ;;  %7760 = vmatpush1.bf16.msra.mxu1 %v12295_v43  ;;  %v12379_v41 = vld [vmem:[%s14321_s9 + $0x1488] ss:$16 sps:$4 sm:$0xff]   ;;  %v12384_v43 = vld [vmem:[%s14321_s9 + $0x14a4] ss:$16 sps:$4 sm:$0xff]  }
 0x419   : > { %7228 = vmatprep.subr.bf16.mxu0 %v12300_v44  ;;  %7761 = vmatprep.subr.bf16.mxu1 %v12303_v45  ;;  %v12387_v44 = vld [vmem:[%s14321_s9 + $0x14ac] ss:$16 sps:$4 sm:$0xff]   ;;  %v12382_v45 = vld [vmem:[%s14321_s9 + $0x14a0] ss:$16 sps:$4 sm:$0xff]  }
 0x41c   : > { %7229 = vmatpush1.bf16.msra.mxu0 %v12298_v46  ;;  %7762 = vmatpush1.bf16.msra.mxu1 %v12301_v47  ;;  %v12385_v46 = vld [vmem:[%s14321_s9 + $0x14a8] ss:$16 sps:$4 sm:$0xff]   ;;  %v12390_v47 = vld [vmem:[%s14321_s9 + $0x14c4] ss:$16 sps:$4 sm:$0xff]  }
 0x41d   : > { %7230 = vmatprep.subr.bf16.mxu0 %v12306_v32  ;;  %7763 = vmatprep.subr.bf16.mxu1 %v12309_v48  ;;  %v12393_v32 = vld [vmem:[%s14321_s9 + $0x14cc] ss:$16 sps:$4 sm:$0xff]   ;;  %v12388_v48 = vld [vmem:[%s14321_s9 + $0x14c0] ss:$16 sps:$4 sm:$0xff]  }
 0x420   : > { %7231 = vmatpush1.bf16.msra.mxu0 %v12304_v49  ;;  %7764 = vmatpush1.bf16.msra.mxu1 %v12307_v50  ;;  %v12391_v49 = vld [vmem:[%s14321_s9 + $0x14c8] ss:$16 sps:$4 sm:$0xff]   ;;  %v12396_v50 = vld [vmem:[%s14321_s9 + $0x14e4] ss:$16 sps:$4 sm:$0xff]  }
 0x421   : > { %7232 = vmatprep.subr.bf16.mxu0 %v12312_v42  ;;  %7765 = vmatprep.subr.bf16.mxu1 %v12315_v51  ;;  %v12399_v42 = vld [vmem:[%s14321_s9 + $0x14ec] ss:$16 sps:$4 sm:$0xff]   ;;  %v12394_v51 = vld [vmem:[%s14321_s9 + $0x14e0] ss:$16 sps:$4 sm:$0xff]  }
 0x424   : > { %7233 = vmatpush1.bf16.msra.mxu0 %v12310_v53  ;;  %7766 = vmatpush1.bf16.msra.mxu1 %v12313_v54  ;;  %v12397_v53 = vld [vmem:[%s14321_s9 + $0x14e8] ss:$16 sps:$4 sm:$0xff]   ;;  %v12402_v54 = vld [vmem:[%s14321_s9 + $0x1504] ss:$16 sps:$4 sm:$0xff]  }
 0x425   : > { %7234 = vmatprep.subr.bf16.mxu0 %v12318_v56  ;;  %7767 = vmatprep.subr.bf16.mxu1 %v12321_v57  ;;  %v12405_v56 = vld [vmem:[%s14321_s9 + $0x150c] ss:$16 sps:$4 sm:$0xff]   ;;  %v12400_v57 = vld [vmem:[%s14321_s9 + $0x1500] ss:$16 sps:$4 sm:$0xff]  }
 0x428   : > { %7235 = vmatpush1.bf16.msra.mxu0 %v12316_v38  ;;  %7768 = vmatpush1.bf16.msra.mxu1 %v12319_v58  ;;  %v12403_v38 = vld [vmem:[%s14321_s9 + $0x1508] ss:$16 sps:$4 sm:$0xff]   ;;  %v12408_v58 = vld [vmem:[%s14321_s9 + $0x1524] ss:$16 sps:$4 sm:$0xff]  }
 0x429   : > { %7236 = vmatprep.subr.bf16.mxu0 %v12324_v60  ;;  %7769 = vmatprep.subr.bf16.mxu1 %v12327_v61  ;;  %v12411_v60 = vld [vmem:[%s14321_s9 + $0x152c] ss:$16 sps:$4 sm:$0xff]   ;;  %v12406_v61 = vld [vmem:[%s14321_s9 + $0x1520] ss:$16 sps:$4 sm:$0xff]  }
 0x42c   : > { %7237 = vmatpush1.bf16.msra.mxu0 %v12322_v62  ;;  %7770 = vmatpush1.bf16.msra.mxu1 %v12325_v63  ;;  %v12409_v62 = vld [vmem:[%s14321_s9 + $0x1528] ss:$16 sps:$4 sm:$0xff]   ;;  %v12414_v63 = vld [vmem:[%s14321_s9 + $0x1544] ss:$16 sps:$4 sm:$0xff]  }
 0x42d   : > { %7238 = vmatprep.subr.bf16.mxu0 %v12330_v0  ;;  %7771 = vmatprep.subr.bf16.mxu1 %v12333_v3  ;;  %v12417_v0 = vld [vmem:[%s14321_s9 + $0x154c] ss:$16 sps:$4 sm:$0xff]   ;;  %v12412_v3 = vld [vmem:[%s14321_s9 + $0x1540] ss:$16 sps:$4 sm:$0xff]  }
 0x430   : > { %7239 = vmatpush1.bf16.msra.mxu0 %v12328_v6  ;;  %7772 = vmatpush1.bf16.msra.mxu1 %v12331_v7  ;;  %v12415_v6 = vld [vmem:[%s14321_s9 + $0x1548] ss:$16 sps:$4 sm:$0xff]   ;;  %v12420_v7 = vld [vmem:[%s14321_s9 + $0x1564] ss:$16 sps:$4 sm:$0xff]  }
 0x431   : > { %7240 = vmatprep.subr.bf16.mxu0 %v12336_v8  ;;  %7773 = vmatprep.subr.bf16.mxu1 %v12339_v55  ;;  %v12423_v8 = vld [vmem:[%s14321_s9 + $0x156c] ss:$16 sps:$4 sm:$0xff]   ;;  %v12418_v55 = vld [vmem:[%s14321_s9 + $0x1560] ss:$16 sps:$4 sm:$0xff]  }
 0x434   : > { %7241 = vmatpush1.bf16.msra.mxu0 %v12334_v9  ;;  %7774 = vmatpush1.bf16.msra.mxu1 %v12337_v10  ;;  %v12421_v9 = vld [vmem:[%s14321_s9 + $0x1568] ss:$16 sps:$4 sm:$0xff]   ;;  %v12426_v10 = vld [vmem:[%s14321_s9 + $0x1584] ss:$16 sps:$4 sm:$0xff]  }
 0x435   : > { %7242 = vmatprep.subr.bf16.mxu0 %v12342_v11  ;;  %7775 = vmatprep.subr.bf16.mxu1 %v12345_v1  ;;  %v12429_v11 = vld [vmem:[%s14321_s9 + $0x158c] ss:$16 sps:$4 sm:$0xff]   ;;  %v12424_v1 = vld [vmem:[%s14321_s9 + $0x1580] ss:$16 sps:$4 sm:$0xff]  }
 0x438   : > { %7243 = vmatpush1.bf16.msra.mxu0 %v12340_v13  ;;  %7776 = vmatpush1.bf16.msra.mxu1 %v12343_v30  ;;  %v12432_v13 = vld [vmem:[%s14321_s9 + $0x15a4] ss:$16 sps:$4 sm:$0xff]   ;;  %v12435_v30 = vld [vmem:[%s14321_s9 + $0x15ac] ss:$16 sps:$4 sm:$0xff]  }
 0x439   : > { %7244 = vmatprep.subr.bf16.mxu0 %v12348_v16  ;;  %7777 = vmatprep.subr.bf16.mxu1 %v12351_v17  ;;  %v12430_v16 = vld [vmem:[%s14321_s9 + $0x15a0] ss:$16 sps:$4 sm:$0xff]   ;;  %v12433_v17 = vld [vmem:[%s14321_s9 + $0x15a8] ss:$16 sps:$4 sm:$0xff]  }
 0x43c   : > { %7245 = vmatpush1.bf16.msra.mxu0 %v12346_v52  ;;  %7778 = vmatpush1.bf16.msra.mxu1 %v12349_v19  ;;  %v12438_v52 = vld [vmem:[%s14321_s9 + $0x15c4] ss:$16 sps:$4 sm:$0xff]   ;;  %v12441_v19 = vld [vmem:[%s14321_s9 + $0x15cc] ss:$16 sps:$4 sm:$0xff]  }
 0x43d   : > { %7255 = vmatprep.subr.bf16.mxu0 %v12354_v20  ;;  %7788 = vmatprep.subr.bf16.mxu1 %v12357_v4  ;;  %v12436_v20 = vld [vmem:[%s14321_s9 + $0x15c0] ss:$16 sps:$4 sm:$0xff]   ;;  %v12439_v4 = vld [vmem:[%s14321_s9 + $0x15c8] ss:$16 sps:$4 sm:$0xff]  }
 0x43f   : > { %7247 = vmatmul.mubr.bf16.vlgmr.msra.gmra.mrb[0].mxu0 %v2879_v22  ;;  %7780 = vmatmul.mubr.bf16.vlgmr.msra.gmra.mrb[0].mxu1 %v2879_v22  ;;  %v12447_v22 = vld [vmem:[%s14321_s9 + $0x15ec] ss:$16 sps:$4 sm:$0xff]  }
 0x440   : > { %7256 = vmatpush1.bf16.msra.mxu0 %v12352_v23  ;;  %7789 = vmatpush1.bf16.msra.mxu1 %v12355_v14  ;;  %v12442_v23 = vld [vmem:[%s14321_s9 + $0x15e0] ss:$16 sps:$4 sm:$0xff]   ;;  %v12445_v14 = vld [vmem:[%s14321_s9 + $0x15e8] ss:$16 sps:$4 sm:$0xff]  }
 0x441   : > { %7257 = vmatprep.subr.bf16.mxu0 %v12360_v24  ;;  %7790 = vmatprep.subr.bf16.mxu1 %v12363_v25  ;;  %v12451_v24 = vld [vmem:[%s14321_s9 + $0x1604] ss:$16 sps:$4 sm:$0xff]   ;;  %v12454_v25 = vld [vmem:[%s14321_s9 + $0x160c] ss:$16 sps:$4 sm:$0xff]  }
 0x442   : > { %7287 = vmatprep.mubr.bf16.mxu0 %v15091_v26  ;;  %7820 = vmatprep.mubr.bf16.mxu1 %v15091_v26 }
 0x444   : > { %7258 = vmatpush1.bf16.msra.mxu0 %v12358_v15  ;;  %7791 = vmatpush1.bf16.msra.mxu1 %v12361_v27  ;;  %v15157_v15 = vrot.slane %v15076_v18, %v14371_v2  ;;  %v12449_v27 = vld [vmem:[%s14321_s9 + $0x1600] ss:$16 sps:$4 sm:$0xff]  }
 0x445   : > { %7259 = vmatprep.subr.bf16.mxu0 %v12366_v28  ;;  %7792 = vmatprep.subr.bf16.mxu1 %v12369_v29  ;;  %v12452_v28 = vld [vmem:[%s14321_s9 + $0x1608] ss:$16 sps:$4 sm:$0xff]   ;;  %v12457_v29 = vld [vmem:[%s14321_s9 + $0x1624] ss:$16 sps:$4 sm:$0xff]   ;;  %v12455_v18 = vld [vmem:[%s14321_s9 + $0x1620] ss:$16 sps:$4 sm:$0xff]  }
 0x448   : > { %7260 = vmatpush1.bf16.msra.mxu0 %v12364_v31  ;;  %7793 = vmatpush1.bf16.msra.mxu1 %v12367_v33  ;;  %v12460_v31 = vld [vmem:[%s14321_s9 + $0x162c] ss:$16 sps:$4 sm:$0xff]   ;;  %v2882_v33 = vcombine.high %v15091_v26, %v15091_v26  ;;  %v12461_v26 = vld [vmem:[%s14321_s9 + $0x1640] ss:$16 sps:$4 sm:$0xff]  }
 0x449   : > { %7261 = vmatprep.subr.bf16.mxu0 %v12372_v5  ;;  %7794 = vmatprep.subr.bf16.mxu1 %v12375_v34  ;;  %v12458_v5 = vld [vmem:[%s14321_s9 + $0x1628] ss:$16 sps:$4 sm:$0xff]   ;;  %v12463_v34 = vld [vmem:[%s14321_s9 + $0x1644] ss:$16 sps:$4 sm:$0xff]  }
 0x44c   : > { %7262 = vmatpush1.bf16.msra.mxu0 %v12370_v35  ;;  %7795 = vmatpush1.bf16.msra.mxu1 %v12373_v36  ;;  %v12466_v35 = vld [vmem:[%s14321_s9 + $0x164c] ss:$16 sps:$4 sm:$0xff]   ;;  %v12464_v36 = vld [vmem:[%s14321_s9 + $0x1648] ss:$16 sps:$4 sm:$0xff]  }
 0x44d   : > { %7263 = vmatprep.subr.bf16.mxu0 %v12378_v37  ;;  %7796 = vmatprep.subr.bf16.mxu1 %v12381_v39  ;;  %v12469_v37 = vld [vmem:[%s14321_s9 + $0x1664] ss:$16 sps:$4 sm:$0xff]   ;;  %v12472_v39 = vld [vmem:[%s14321_s9 + $0x166c] ss:$16 sps:$4 sm:$0xff]  }
 0x450   : > { %7264 = vmatpush1.bf16.msra.mxu0 %v12376_v40  ;;  %7797 = vmatpush1.bf16.msra.mxu1 %v12379_v41  ;;  %v12467_v40 = vld [vmem:[%s14321_s9 + $0x1660] ss:$16 sps:$4 sm:$0xff]   ;;  %v12470_v41 = vld [vmem:[%s14321_s9 + $0x1668] ss:$16 sps:$4 sm:$0xff]  }
 0x451   : > { %7265 = vmatprep.subr.bf16.mxu0 %v12384_v43  ;;  %7798 = vmatprep.subr.bf16.mxu1 %v12387_v44  ;;  %v12475_v43 = vld [vmem:[%s14321_s9 + $0x1684] ss:$16 sps:$4 sm:$0xff]   ;;  %v12478_v44 = vld [vmem:[%s14321_s9 + $0x168c] ss:$16 sps:$4 sm:$0xff]  }
 0x454   : > { %7266 = vmatpush1.bf16.msra.mxu0 %v12382_v45  ;;  %7799 = vmatpush1.bf16.msra.mxu1 %v12385_v46  ;;  %v12473_v45 = vld [vmem:[%s14321_s9 + $0x1680] ss:$16 sps:$4 sm:$0xff]   ;;  %v12476_v46 = vld [vmem:[%s14321_s9 + $0x1688] ss:$16 sps:$4 sm:$0xff]  }
 0x455   : > { %7267 = vmatprep.subr.bf16.mxu0 %v12390_v47  ;;  %7800 = vmatprep.subr.bf16.mxu1 %v12393_v32  ;;  %v12481_v47 = vld [vmem:[%s14321_s9 + $0x16a4] ss:$16 sps:$4 sm:$0xff]   ;;  %v12484_v32 = vld [vmem:[%s14321_s9 + $0x16ac] ss:$16 sps:$4 sm:$0xff]  }
 0x458   : > { %7268 = vmatpush1.bf16.msra.mxu0 %v12388_v48  ;;  %7801 = vmatpush1.bf16.msra.mxu1 %v12391_v49  ;;  %v12479_v48 = vld [vmem:[%s14321_s9 + $0x16a0] ss:$16 sps:$4 sm:$0xff]   ;;  %v12482_v49 = vld [vmem:[%s14321_s9 + $0x16a8] ss:$16 sps:$4 sm:$0xff]  }
 0x459   : > { %7269 = vmatprep.subr.bf16.mxu0 %v12396_v50  ;;  %7802 = vmatprep.subr.bf16.mxu1 %v12399_v42  ;;  %v12487_v50 = vld [vmem:[%s14321_s9 + $0x16c4] ss:$16 sps:$4 sm:$0xff]   ;;  %v12490_v42 = vld [vmem:[%s14321_s9 + $0x16cc] ss:$16 sps:$4 sm:$0xff]  }
 0x45c   : > { %7270 = vmatpush1.bf16.msra.mxu0 %v12394_v51  ;;  %7803 = vmatpush1.bf16.msra.mxu1 %v12397_v53  ;;  %v12485_v51 = vld [vmem:[%s14321_s9 + $0x16c0] ss:$16 sps:$4 sm:$0xff]   ;;  %v12488_v53 = vld [vmem:[%s14321_s9 + $0x16c8] ss:$16 sps:$4 sm:$0xff]  }
 0x45d   : > { %7271 = vmatprep.subr.bf16.mxu0 %v12402_v54  ;;  %7804 = vmatprep.subr.bf16.mxu1 %v12405_v56  ;;  %v12493_v54 = vld [vmem:[%s14321_s9 + $0x16e4] ss:$16 sps:$4 sm:$0xff]   ;;  %v12496_v56 = vld [vmem:[%s14321_s9 + $0x16ec] ss:$16 sps:$4 sm:$0xff]  }
 0x460   : > { %7272 = vmatpush1.bf16.msra.mxu0 %v12400_v57  ;;  %7805 = vmatpush1.bf16.msra.mxu1 %v12403_v38  ;;  %v12491_v57 = vld [vmem:[%s14321_s9 + $0x16e0] ss:$16 sps:$4 sm:$0xff]   ;;  %v12494_v38 = vld [vmem:[%s14321_s9 + $0x16e8] ss:$16 sps:$4 sm:$0xff]  }
 0x461   : > { %7273 = vmatprep.subr.bf16.mxu0 %v12408_v58  ;;  %7806 = vmatprep.subr.bf16.mxu1 %v12411_v60  ;;  %v12499_v58 = vld [vmem:[%s14321_s9 + $0x1704] ss:$16 sps:$4 sm:$0xff]   ;;  %v12502_v60 = vld [vmem:[%s14321_s9 + $0x170c] ss:$16 sps:$4 sm:$0xff]  }
 0x464   : > { %7274 = vmatpush1.bf16.msra.mxu0 %v12406_v61  ;;  %7807 = vmatpush1.bf16.msra.mxu1 %v12409_v62  ;;  %v12497_v61 = vld [vmem:[%s14321_s9 + $0x1700] ss:$16 sps:$4 sm:$0xff]   ;;  %v12500_v62 = vld [vmem:[%s14321_s9 + $0x1708] ss:$16 sps:$4 sm:$0xff]  }
 0x465   : > { %7275 = vmatprep.subr.bf16.mxu0 %v12414_v63  ;;  %7808 = vmatprep.subr.bf16.mxu1 %v12417_v0  ;;  %v12505_v63 = vld [vmem:[%s14321_s9 + $0x1724] ss:$16 sps:$4 sm:$0xff]   ;;  %v12508_v0 = vld [vmem:[%s14321_s9 + $0x172c] ss:$16 sps:$4 sm:$0xff]  }
 0x468   : > { %7276 = vmatpush1.bf16.msra.mxu0 %v12412_v3  ;;  %7809 = vmatpush1.bf16.msra.mxu1 %v12415_v6  ;;  %v12503_v3 = vld [vmem:[%s14321_s9 + $0x1720] ss:$16 sps:$4 sm:$0xff]   ;;  %v12506_v6 = vld [vmem:[%s14321_s9 + $0x1728] ss:$16 sps:$4 sm:$0xff]  }
 0x469   : > { %7277 = vmatprep.subr.bf16.mxu0 %v12420_v7  ;;  %7810 = vmatprep.subr.bf16.mxu1 %v12423_v8  ;;  %v12511_v7 = vld [vmem:[%s14321_s9 + $0x1744] ss:$16 sps:$4 sm:$0xff]   ;;  %v12514_v8 = vld [vmem:[%s14321_s9 + $0x174c] ss:$16 sps:$4 sm:$0xff]  }
 0x46c   : > { %7278 = vmatpush1.bf16.msra.mxu0 %v12418_v55  ;;  %7811 = vmatpush1.bf16.msra.mxu1 %v12421_v9  ;;  %v12509_v55 = vld [vmem:[%s14321_s9 + $0x1740] ss:$16 sps:$4 sm:$0xff]   ;;  %v12512_v9 = vld [vmem:[%s14321_s9 + $0x1748] ss:$16 sps:$4 sm:$0xff]  }
 0x46d   : > { %7279 = vmatprep.subr.bf16.mxu0 %v12426_v10  ;;  %7812 = vmatprep.subr.bf16.mxu1 %v12429_v11  ;;  %v12517_v10 = vld [vmem:[%s14321_s9 + $0x1764] ss:$16 sps:$4 sm:$0xff]   ;;  %v12520_v11 = vld [vmem:[%s14321_s9 + $0x176c] ss:$16 sps:$4 sm:$0xff]  }
 0x470   : > { %7280 = vmatpush1.bf16.msra.mxu0 %v12424_v1  ;;  %7813 = vmatpush1.bf16.msra.mxu1 %v12427_v12  ;;  %v12515_v1 = vld [vmem:[%s14321_s9 + $0x1760] ss:$16 sps:$4 sm:$0xff]   ;;  %v12518_v12 = vld [vmem:[%s14321_s9 + $0x1768] ss:$16 sps:$4 sm:$0xff]  }
 0x471   : > { %7281 = vmatprep.subr.bf16.mxu0 %v12432_v13  ;;  %7814 = vmatprep.subr.bf16.mxu1 %v12435_v30  ;;  %v12523_v13 = vld [vmem:[%s14321_s9 + $0x1784] ss:$16 sps:$4 sm:$0xff]   ;;  %v12526_v30 = vld [vmem:[%s14321_s9 + $0x178c] ss:$16 sps:$4 sm:$0xff]  }
 0x474   : > { %7282 = vmatpush1.bf16.msra.mxu0 %v12430_v16  ;;  %7815 = vmatpush1.bf16.msra.mxu1 %v12433_v17  ;;  %v12521_v16 = vld [vmem:[%s14321_s9 + $0x1780] ss:$16 sps:$4 sm:$0xff]   ;;  %v12524_v17 = vld [vmem:[%s14321_s9 + $0x1788] ss:$16 sps:$4 sm:$0xff]  }
 0x475   : > { %7283 = vmatprep.subr.bf16.mxu0 %v12438_v52  ;;  %7816 = vmatprep.subr.bf16.mxu1 %v12441_v19  ;;  %v12529_v52 = vld [vmem:[%s14321_s9 + $0x17a4] ss:$16 sps:$4 sm:$0xff]   ;;  %v12532_v19 = vld [vmem:[%s14321_s9 + $0x17ac] ss:$16 sps:$4 sm:$0xff]  }
 0x478   : > { %7284 = vmatpush1.bf16.msra.mxu0 %v12436_v20  ;;  %7817 = vmatpush1.bf16.msra.mxu1 %v12439_v4  ;;  %v12527_v20 = vld [vmem:[%s14321_s9 + $0x17a0] ss:$16 sps:$4 sm:$0xff]   ;;  %v12530_v4 = vld [vmem:[%s14321_s9 + $0x17a8] ss:$16 sps:$4 sm:$0xff]  }
 0x479   : > { %7285 = vmatprep.subr.bf16.mxu0 %v12444_v21  ;;  %7818 = vmatprep.subr.bf16.mxu1 %v12447_v22  ;;  %v12535_v21 = vld [vmem:[%s14321_s9 + $0x17c4] ss:$16 sps:$4 sm:$0xff]   ;;  %v12538_v22 = vld [vmem:[%s14321_s9 + $0x17cc] ss:$16 sps:$4 sm:$0xff]  }
 0x47c   : > { %7286 = vmatpush1.bf16.msra.mxu0 %v12442_v23  ;;  %7819 = vmatpush1.bf16.msra.mxu1 %v12445_v14  ;;  %v12533_v23 = vld [vmem:[%s14321_s9 + $0x17c0] ss:$16 sps:$4 sm:$0xff]   ;;  %v12536_v14 = vld [vmem:[%s14321_s9 + $0x17c8] ss:$16 sps:$4 sm:$0xff]  }
 0x47d   : > { %7296 = vmatprep.subr.bf16.mxu0 %v12451_v24  ;;  %7829 = vmatprep.subr.bf16.mxu1 %v12454_v25  ;;  %v12541_v24 = vld [vmem:[%s14321_s9 + $0x17e4] ss:$16 sps:$4 sm:$0xff]   ;;  %v12544_v25 = vld [vmem:[%s14321_s9 + $0x17ec] ss:$16 sps:$4 sm:$0xff]  }
 0x47f   : > { %7288 = vmatmul.mubr.bf16.vlgmr.msra.gmra.mrb[0].mxu0 %v15157_v15  ;;  %7821 = vmatmul.mubr.bf16.vlgmr.msra.gmra.mrb[0].mxu1 %v15157_v15 }
 0x480   : > { %7297 = vmatpush1.bf16.msra.mxu0 %v12449_v27  ;;  %7830 = vmatpush1.bf16.msra.mxu1 %v12452_v28  ;;  %v12539_v27 = vld [vmem:[%s14321_s9 + $0x17e0] ss:$16 sps:$4 sm:$0xff]   ;;  %v12542_v28 = vld [vmem:[%s14321_s9 + $0x17e8] ss:$16 sps:$4 sm:$0xff]  }
 0x481   : > { %7298 = vmatprep.subr.bf16.mxu0 %v12457_v29  ;;  %7831 = vmatprep.subr.bf16.mxu1 %v12460_v31  ;;  %v12547_v29 = vld [vmem:[%s14321_s9 + $0x1804] ss:$16 sps:$4 sm:$0xff]   ;;  %v12550_v31 = vld [vmem:[%s14321_s9 + $0x180c] ss:$16 sps:$4 sm:$0xff]  }
 0x482   : > { %7328 = vmatprep.mubr.bf16.mxu0 %v2882_v33  ;;  %7861 = vmatprep.mubr.bf16.mxu1 %v2882_v33  ;;  %v2880_v33 = vcombine.high %v15157_v15, %v15157_v15  ;;  %v12554_v15 = vld [vmem:[%s14321_s9 + $0x1828] ss:$16 sps:$4 sm:$0xff]  }
 0x484   : > { %7299 = vmatpush1.bf16.msra.mxu0 %v12455_v18  ;;  %7832 = vmatpush1.bf16.msra.mxu1 %v12458_v5  ;;  %v12545_v18 = vld [vmem:[%s14321_s9 + $0x1800] ss:$16 sps:$4 sm:$0xff]   ;;  %v12548_v5 = vld [vmem:[%s14321_s9 + $0x1808] ss:$16 sps:$4 sm:$0xff]  }
 0x485   : > { %7300 = vmatprep.subr.bf16.mxu0 %v12463_v34  ;;  %7833 = vmatprep.subr.bf16.mxu1 %v12466_v35  ;;  %v12553_v34 = vld [vmem:[%s14321_s9 + $0x1824] ss:$16 sps:$4 sm:$0xff]   ;;  %v12556_v35 = vld [vmem:[%s14321_s9 + $0x182c] ss:$16 sps:$4 sm:$0xff]  }
 0x488   : > { %7301 = vmatpush1.bf16.msra.mxu0 %v12461_v26  ;;  %7834 = vmatpush1.bf16.msra.mxu1 %v12464_v36  ;;  %v12551_v26 = vld [vmem:[%s14321_s9 + $0x1820] ss:$16 sps:$4 sm:$0xff]   ;;  %v12559_v36 = vld [vmem:[%s14321_s9 + $0x1844] ss:$16 sps:$4 sm:$0xff]  }
 0x489   : > { %7302 = vmatprep.subr.bf16.mxu0 %v12469_v37  ;;  %7835 = vmatprep.subr.bf16.mxu1 %v12472_v39  ;;  %v12562_v37 = vld [vmem:[%s14321_s9 + $0x184c] ss:$16 sps:$4 sm:$0xff]   ;;  %v12629_v39 = vmov 0  }
 0x48c   : > { %7303 = vmatpush1.bf16.msra.mxu0 %v12467_v40  ;;  %7836 = vmatpush1.bf16.msra.mxu1 %v12470_v41  ;;  %v12557_v40 = vld [vmem:[%s14321_s9 + $0x1840] ss:$16 sps:$4 sm:$0xff]   ;;  %v12560_v41 = vld [vmem:[%s14321_s9 + $0x1848] ss:$16 sps:$4 sm:$0xff]  }
 0x48d   : > { %7304 = vmatprep.subr.bf16.mxu0 %v12475_v43  ;;  %7837 = vmatprep.subr.bf16.mxu1 %v12478_v44  ;;  %v12565_v43 = vld [vmem:[%s14321_s9 + $0x1864] ss:$16 sps:$4 sm:$0xff]   ;;  %v12568_v44 = vld [vmem:[%s14321_s9 + $0x186c] ss:$16 sps:$4 sm:$0xff]  }
 0x490   : > { %7305 = vmatpush1.bf16.msra.mxu0 %v12473_v45  ;;  %7838 = vmatpush1.bf16.msra.mxu1 %v12476_v46  ;;  %v7921_v45 = vld [vmem:[%s14319_s27] sm:$0xff] }
 0x491   : > { %7306 = vmatprep.subr.bf16.mxu0 %v12481_v47  ;;  %7839 = vmatprep.subr.bf16.mxu1 %v12484_v32  ;;  %v7925_v46 = vld [vmem:[%s14319_s27 + $0x20] sm:$0xff]  ;;  %v7922_v47 = vld [vmem:[%s14319_s27 + $0x8] sm:$0xff] }
 0x492   : > { %v7926_v32 = vld [vmem:[%s14319_s27 + $0x28] sm:$0xff] }
 0x494   : > { %7307 = vmatpush1.bf16.msra.mxu0 %v12479_v48  ;;  %7840 = vmatpush1.bf16.msra.mxu1 %v12482_v49  ;;  %v12563_v48 = vld [vmem:[%s14321_s9 + $0x1860] ss:$16 sps:$4 sm:$0xff]   ;;  %v12566_v49 = vld [vmem:[%s14321_s9 + $0x1868] ss:$16 sps:$4 sm:$0xff]  }
 0x495   : > { %7308 = vmatprep.subr.bf16.mxu0 %v12487_v50  ;;  %7841 = vmatprep.subr.bf16.mxu1 %v12490_v42  ;;  %v10161_v50 = vld.sshfl [vmem:[%s15614_s0 + $0x18] sm:$0x1 pattern:$0x75316420]  ;;  %v10949_v42 = vcombine.high %v7921_v45, %v7925_v46 }
 0x498   : > { %7309 = vmatpush1.bf16.msra.mxu0 %v12485_v51  ;;  %7842 = vmatpush1.bf16.msra.mxu1 %v12488_v53  ;;  %v10951_v51 = vcombine.high %v7922_v47, %v7926_v32  ;;  %v7929_v53 = vld [vmem:[%s14319_s27 + $0x40] sm:$0xff] }
 0x499   : > { %7310 = vmatprep.subr.bf16.mxu0 %v12493_v54  ;;  %7843 = vmatprep.subr.bf16.mxu1 %v12496_v56  ;;  %v7933_v54 = vld [vmem:[%s14319_s27 + $0x60] sm:$0xff]  ;;  %v7930_v56 = vld [vmem:[%s14319_s27 + $0x48] sm:$0xff] }
 0x49c   : > { %7311 = vmatpush1.bf16.msra.mxu0 %v12491_v57  ;;  %7844 = vmatpush1.bf16.msra.mxu1 %v12494_v38  ;;  %v7934_v57 = vld [vmem:[%s14319_s27 + $0x68] sm:$0xff]  ;;  %v2896_v38 = vrot.slane %v10161_v50, %v14371_v2 }
 0x49d   : > { %7312 = vmatprep.subr.bf16.mxu0 %v12499_v58  ;;  %7845 = vmatprep.subr.bf16.mxu1 %v12502_v60  ;;  %v10948_v58 = vcombine.low %v7921_v45, %v7925_v46  ;;  %v10950_v60 = vcombine.low %v7922_v47, %v7926_v32  ;;  %v7986_v50 = vld [vmem:[%s14319_s27 + $0x208] sm:$0xff] }
 0x4a0   : > { %7313 = vmatpush1.bf16.msra.mxu0 %v12497_v61  ;;  %7846 = vmatpush1.bf16.msra.mxu1 %v12500_v62  ;;  %v10957_v61 = vcombine.high %v7929_v53, %v7933_v54  ;;  %v10959_v62 = vcombine.high %v7930_v56, %v7934_v57 }
 0x4a1   : > { %7314 = vmatprep.subr.bf16.mxu0 %v12505_v63  ;;  %7847 = vmatprep.subr.bf16.mxu1 %v12508_v0  ;;  %v7937_v63 = vld [vmem:[%s14319_s27 + $0x80] sm:$0xff] }
 0x4a2   : > { %v7941_v0 = vld [vmem:[%s14319_s27 + $0xa0] sm:$0xff] }
 0x4a4   : > { %7315 = vmatpush1.bf16.msra.mxu0 %v12503_v3  ;;  %7848 = vmatpush1.bf16.msra.mxu1 %v12506_v6  ;;  %v7938_v3 = vld [vmem:[%s14319_s27 + $0x88] sm:$0xff] }
 0x4a5   : > { %7316 = vmatprep.subr.bf16.mxu0 %v12511_v7  ;;  %7849 = vmatprep.subr.bf16.mxu1 %v12514_v8  ;;  %v7942_v6 = vld [vmem:[%s14319_s27 + $0xa8] sm:$0xff]  ;;  %v10956_v7 = vcombine.low %v7929_v53, %v7933_v54  ;;  %v10958_v8 = vcombine.low %v7930_v56, %v7934_v57  ;;  %v7993_v57 = vld [vmem:[%s14319_s27 + $0x240] sm:$0xff] }
 0x4a8   : > { %7317 = vmatpush1.bf16.msra.mxu0 %v12509_v55  ;;  %7850 = vmatpush1.bf16.msra.mxu1 %v12512_v9  ;;  %v10965_v55 = vcombine.high %v7937_v63, %v7941_v0  ;;  %v10967_v9 = vcombine.high %v7938_v3, %v7942_v6 }
 0x4a9   : > { %7318 = vmatprep.subr.bf16.mxu0 %v12517_v10  ;;  %7851 = vmatprep.subr.bf16.mxu1 %v12520_v11  ;;  %v7945_v10 = vld [vmem:[%s14319_s27 + $0xc0] sm:$0xff] }
 0x4aa   : > { %v7949_v11 = vld [vmem:[%s14319_s27 + $0xe0] sm:$0xff] }
 0x4ac   : > { %7319 = vmatpush1.bf16.msra.mxu0 %v12515_v1  ;;  %7852 = vmatpush1.bf16.msra.mxu1 %v12518_v12  ;;  %v7946_v1 = vld [vmem:[%s14319_s27 + $0xc8] sm:$0xff] }
 0x4ad   : > { %7320 = vmatprep.subr.bf16.mxu0 %v12523_v13  ;;  %7853 = vmatprep.subr.bf16.mxu1 %v12526_v30  ;;  %v7950_v12 = vld [vmem:[%s14319_s27 + $0xe8] sm:$0xff]  ;;  %v10964_v13 = vcombine.low %v7937_v63, %v7941_v0  ;;  %v10966_v30 = vcombine.low %v7938_v3, %v7942_v6  ;;  %v8001_v3 = vld [vmem:[%s14319_s27 + $0x280] sm:$0xff] }
 0x4ae   : > { %v8005_v6 = vld [vmem:[%s14319_s27 + $0x2a0] sm:$0xff] }
 0x4b0   : > { %7321 = vmatpush1.bf16.msra.mxu0 %v12521_v16  ;;  %7854 = vmatpush1.bf16.msra.mxu1 %v12524_v17  ;;  %v10973_v16 = vcombine.high %v7945_v10, %v7949_v11  ;;  %v10975_v17 = vcombine.high %v7946_v1, %v7950_v12 }
 0x4b1   : > { %7322 = vmatprep.subr.bf16.mxu0 %v12529_v52  ;;  %7855 = vmatprep.subr.bf16.mxu1 %v12532_v19  ;;  %v7953_v52 = vld [vmem:[%s14319_s27 + $0x100] sm:$0xff] }
 0x4b2   : > { %v7957_v19 = vld [vmem:[%s14319_s27 + $0x120] sm:$0xff] }
 0x4b4   : > { %7323 = vmatpush1.bf16.msra.mxu0 %v12527_v20  ;;  %7856 = vmatpush1.bf16.msra.mxu1 %v12530_v4  ;;  %v7954_v20 = vld [vmem:[%s14319_s27 + $0x108] sm:$0xff] }
 0x4b5   : > { %7324 = vmatprep.subr.bf16.mxu0 %v12535_v21  ;;  %7857 = vmatprep.subr.bf16.mxu1 %v12538_v22  ;;  %v7958_v4 = vld [vmem:[%s14319_s27 + $0x128] sm:$0xff]  ;;  %v10972_v21 = vcombine.low %v7945_v10, %v7949_v11  ;;  %v10974_v22 = vcombine.low %v7946_v1, %v7950_v12  ;;  %v11029_v10 = vcombine.high %v8001_v3, %v8005_v6  ;;  %v8009_v1 = vld [vmem:[%s14319_s27 + $0x2c0] sm:$0xff] }
 0x4b6   : > { %v8013_v12 = vld [vmem:[%s14319_s27 + $0x2e0] sm:$0xff] }
 0x4b8   : > { %7325 = vmatpush1.bf16.msra.mxu0 %v12533_v23  ;;  %7858 = vmatpush1.bf16.msra.mxu1 %v12536_v14  ;;  %v10981_v23 = vcombine.high %v7953_v52, %v7957_v19  ;;  %v10983_v14 = vcombine.high %v7954_v20, %v7958_v4 }
 0x4b9   : > { %7326 = vmatprep.subr.bf16.mxu0 %v12541_v24  ;;  %7859 = vmatprep.subr.bf16.mxu1 %v12544_v25  ;;  %v7961_v24 = vld [vmem:[%s14319_s27 + $0x140] sm:$0xff] }
 0x4ba   : > { %v7965_v25 = vld [vmem:[%s14319_s27 + $0x160] sm:$0xff] }
 0x4bc   : > { %7327 = vmatpush1.bf16.msra.mxu0 %v12539_v27  ;;  %7860 = vmatpush1.bf16.msra.mxu1 %v12542_v28  ;;  %v7962_v27 = vld [vmem:[%s14319_s27 + $0x148] sm:$0xff] }
 0x4bd   : > { %7337 = vmatprep.subr.bf16.mxu0 %v12547_v29  ;;  %7870 = vmatprep.subr.bf16.mxu1 %v12550_v31  ;;  %v7966_v28 = vld [vmem:[%s14319_s27 + $0x168] sm:$0xff]  ;;  %v10980_v29 = vcombine.low %v7953_v52, %v7957_v19  ;;  %v10982_v31 = vcombine.low %v7954_v20, %v7958_v4  ;;  %v11037_v52 = vcombine.high %v8009_v1, %v8013_v12  ;;  %v8017_v20 = vld [vmem:[%s14319_s27 + $0x300] sm:$0xff] }
 0x4be   : > { %v8021_v4 = vld [vmem:[%s14319_s27 + $0x320] sm:$0xff] }
 0x4bf   : > { %7329 = vmatmul.mubr.bf16.vlgmr.msra.gmra.mrb[0].mxu0 %v2880_v33  ;;  %7862 = vmatmul.mubr.bf16.vlgmr.msra.gmra.mrb[0].mxu1 %v2880_v33  ;;  %v10989_v33 = vcombine.high %v7961_v24, %v7965_v25 }
 0x4c0   : > { %7338 = vmatpush1.bf16.msra.mxu0 %v12545_v18  ;;  %7871 = vmatpush1.bf16.msra.mxu1 %v12548_v5  ;;  %v10991_v18 = vcombine.high %v7962_v27, %v7966_v28  ;;  %v7969_v5 = vld [vmem:[%s14319_s27 + $0x180] sm:$0xff] }
 0x4c1   : > { %7339 = vmatprep.subr.bf16.mxu0 %v12553_v34  ;;  %7872 = vmatprep.subr.bf16.mxu1 %v12556_v35  ;;  %v7973_v34 = vld [vmem:[%s14319_s27 + $0x1a0] sm:$0xff]  ;;  %v7970_v35 = vld [vmem:[%s14319_s27 + $0x188] sm:$0xff] }
 0x4c2   : > { %7369 = vmatprep.mubr.bf16.mxu0 %v12629_v39  ;;  %7902 = vmatprep.mubr.bf16.mxu1 %v12629_v39  ;;  %v10996_v45 = vcombine.low %v7969_v5, %v7973_v34 }
 0x4c4   : > { %7340 = vmatpush1.bf16.msra.mxu0 %v12551_v26  ;;  %7873 = vmatpush1.bf16.msra.mxu1 %v12554_v15  ;;  %v7974_v26 = vld [vmem:[%s14319_s27 + $0x1a8] sm:$0xff]  ;;  %v10988_v15 = vcombine.low %v7961_v24, %v7965_v25  ;;  %v11045_v24 = vcombine.high %v8017_v20, %v8021_v4 }
 0x4c5   : > { %7341 = vmatprep.subr.bf16.mxu0 %v12559_v36  ;;  %7874 = vmatprep.subr.bf16.mxu1 %v12562_v37  ;;  %v10990_v36 = vcombine.low %v7962_v27, %v7966_v28  ;;  %v10997_v37 = vcombine.high %v7969_v5, %v7973_v34  ;;  %v10999_v39 = vcombine.high %v7970_v35, %v7974_v26  ;;  %v8025_v27 = vld [vmem:[%s14319_s27 + $0x340] sm:$0xff] }
 0x4c6   : > { %v10998_v46 = vcombine.low %v7970_v35, %v7974_v26  ;;  %v8029_v28 = vld [vmem:[%s14319_s27 + $0x360] sm:$0xff] }
 0x4c7   : > { %v11053_v5 = vcombine.high %v8025_v27, %v8029_v28  ;;  %v11052_v35 = vcombine.low %v8025_v27, %v8029_v28 }
 0x4c8   : > { %7342 = vmatpush1.bf16.msra.mxu0 %v12557_v40  ;;  %7875 = vmatpush1.bf16.msra.mxu1 %v12560_v41  ;;  %v7977_v40 = vld [vmem:[%s14319_s27 + $0x1c0] sm:$0xff] }
 0x4c9   : > { %7343 = vmatprep.subr.bf16.mxu0 %v12565_v43  ;;  %7876 = vmatprep.subr.bf16.mxu1 %v12568_v44  ;;  %v7981_v41 = vld [vmem:[%s14319_s27 + $0x1e0] sm:$0xff]  ;;  %v7978_v43 = vld [vmem:[%s14319_s27 + $0x1c8] sm:$0xff] }
 0x4ca   : > { %v7982_v44 = vld [vmem:[%s14319_s27 + $0x1e8] sm:$0xff]  ;;  %v11005_v47 = vcombine.high %v7977_v40, %v7981_v41 }
 0x4cb   : > { %v11007_v32 = vcombine.high %v7978_v43, %v7982_v44  ;;  %v11006_v53 = vcombine.low %v7978_v43, %v7982_v44 }
 0x4cc   : > { %7344 = vmatpush1.bf16.msra.mxu0 %v12563_v48  ;;  %7877 = vmatpush1.bf16.msra.mxu1 %v12566_v49  ;;  %v7985_v48 = vld [vmem:[%s14319_s27 + $0x200] sm:$0xff] }
 0x4cd   : > { %9457 = vmatprep.subr.bf16.mxu0 %v10949_v42  ;;  %9539 = vmatprep.subr.bf16.mxu1 %v10951_v51  ;;  %v7989_v49 = vld [vmem:[%s14319_s27 + $0x220] sm:$0xff]  ;;  %v7990_v42 = vld [vmem:[%s14319_s27 + $0x228] sm:$0xff]  ;;  %v11004_v51 = vcombine.low %v7977_v40, %v7981_v41 }
 0x4ce   : > { %v11013_v54 = vcombine.high %v7985_v48, %v7989_v49  ;;  %v11015_v56 = vcombine.high %v7986_v50, %v7990_v42  ;;  %v8038_v40 = vld [vmem:[%s14319_s27 + $0x3a8] sm:$0xff] }
 0x4cf   : > { %10946 = vmatmul.mubr.msk.bf16.vlgmr.msra.gmra.mrb[0].mxu0 %vm6841_vm0, %v2896_v38  ;;  %10947 = vmatmul.mubr.msk.bf16.vlgmr.msra.gmra.mrb[0].mxu1 %vm6841_vm0, %v2896_v38  ;;  %v7997_v38 = vld [vmem:[%s14319_s27 + $0x260] sm:$0xff] }
 0x4d0   : > { %9458 = vmatpush1.bf16.msra.mxu0 %v10948_v58  ;;  %9540 = vmatpush1.bf16.msra.mxu1 %v10950_v60  ;;  %v7994_v58 = vld [vmem:[%s14319_s27 + $0x248] sm:$0xff]  ;;  %v11021_v63 = vcombine.high %v7993_v57, %v7997_v38 }
 0x4d1   : > { %9459 = vmatprep.subr.bf16.mxu0 %v10957_v61  ;;  %9541 = vmatprep.subr.bf16.mxu1 %v10959_v62  ;;  %v7998_v60 = vld [vmem:[%s14319_s27 + $0x268] sm:$0xff]  ;;  %v11012_v61 = vcombine.low %v7985_v48, %v7989_v49  ;;  %v11014_v62 = vcombine.low %v7986_v50, %v7990_v42 }
 0x4d2   : > { %v11023_v0 = vcombine.high %v7994_v58, %v7998_v60  ;;  %v8046_v48 = vld [vmem:[%s14319_s27 + $0x3e8] sm:$0xff] }
 0x4d4   : > { %9460 = vmatpush1.bf16.msra.mxu0 %v10956_v7  ;;  %9542 = vmatpush1.bf16.msra.mxu1 %v10958_v8  ;;  %v8002_v7 = vld [vmem:[%s14319_s27 + $0x288] sm:$0xff] }
 0x4d5   : > { %9461 = vmatprep.subr.bf16.mxu0 %v10965_v55  ;;  %9543 = vmatprep.subr.bf16.mxu1 %v10967_v9  ;;  %v8006_v8 = vld [vmem:[%s14319_s27 + $0x2a8] sm:$0xff]  ;;  %v11020_v55 = vcombine.low %v7993_v57, %v7997_v38  ;;  %v11022_v9 = vcombine.low %v7994_v58, %v7998_v60 }
 0x4d6   : > { %v11031_v11 = vcombine.high %v8002_v7, %v8006_v8  ;;  %v8054_v57 = vld [vmem:[%s14319_s27 + $0x428] sm:$0xff] }
 0x4d8   : > { %9462 = vmatpush1.bf16.msra.mxu0 %v10964_v13  ;;  %9544 = vmatpush1.bf16.msra.mxu1 %v10966_v30  ;;  %v8010_v13 = vld [vmem:[%s14319_s27 + $0x2c8] sm:$0xff] }
 0x4d9   : > { %9463 = vmatprep.subr.bf16.mxu0 %v10973_v16  ;;  %9545 = vmatprep.subr.bf16.mxu1 %v10975_v17  ;;  %v8014_v30 = vld [vmem:[%s14319_s27 + $0x2e8] sm:$0xff]  ;;  %v11028_v16 = vcombine.low %v8001_v3, %v8005_v6  ;;  %v11030_v17 = vcombine.low %v8002_v7, %v8006_v8 }
 0x4da   : > { %v11039_v19 = vcombine.high %v8010_v13, %v8014_v30 }
 0x4dc   : > { %9464 = vmatpush1.bf16.msra.mxu0 %v10972_v21  ;;  %9546 = vmatpush1.bf16.msra.mxu1 %v10974_v22  ;;  %v8018_v21 = vld [vmem:[%s14319_s27 + $0x308] sm:$0xff] }
 0x4dd   : > { %9465 = vmatprep.subr.bf16.mxu0 %v10981_v23  ;;  %9547 = vmatprep.subr.bf16.mxu1 %v10983_v14  ;;  %v8022_v22 = vld [vmem:[%s14319_s27 + $0x328] sm:$0xff]  ;;  %v11036_v23 = vcombine.low %v8009_v1, %v8013_v12  ;;  %v11038_v14 = vcombine.low %v8010_v13, %v8014_v30 }
 0x4de   : > { %v11047_v25 = vcombine.high %v8018_v21, %v8022_v22 }
 0x4e0   : > { %9466 = vmatpush1.bf16.msra.mxu0 %v10980_v29  ;;  %9548 = vmatpush1.bf16.msra.mxu1 %v10982_v31  ;;  %v8026_v29 = vld [vmem:[%s14319_s27 + $0x348] sm:$0xff] }
 0x4e1   : > { %9467 = vmatprep.subr.bf16.mxu0 %v10989_v33  ;;  %9549 = vmatprep.subr.bf16.mxu1 %v10991_v18  ;;  %v8030_v31 = vld [vmem:[%s14319_s27 + $0x368] sm:$0xff]  ;;  %v11044_v33 = vcombine.low %v8017_v20, %v8021_v4  ;;  %v11046_v18 = vcombine.low %v8018_v21, %v8022_v22  ;;  %v8057_v20 = vld [vmem:[%s14319_s27 + $0x440] sm:$0xff] }
 0x4e2   : > { %v11055_v34 = vcombine.high %v8026_v29, %v8030_v31  ;;  %v11054_v26 = vcombine.low %v8026_v29, %v8030_v31  ;;  %v8061_v21 = vld [vmem:[%s14319_s27 + $0x460] sm:$0xff]  ;;  %v8058_v22 = vld [vmem:[%s14319_s27 + $0x448] sm:$0xff] }
 0x4e3   : > { %v11085_v27 = vcombine.high %v8057_v20, %v8061_v21  ;;  %v8069_v29 = vld [vmem:[%s14319_s27 + $0x4a0] sm:$0xff]  ;;  %v8066_v31 = vld [vmem:[%s14319_s27 + $0x488] sm:$0xff] }
 0x4e4   : > { %9468 = vmatpush1.bf16.msra.mxu0 %v10988_v15  ;;  %9550 = vmatpush1.bf16.msra.mxu1 %v10990_v36  ;;  %v8033_v15 = vld [vmem:[%s14319_s27 + $0x380] sm:$0xff] }
 0x4e5   : > { %9469 = vmatprep.subr.bf16.mxu0 %v10997_v37  ;;  %9551 = vmatprep.subr.bf16.mxu1 %v10999_v39  ;;  %v8037_v36 = vld [vmem:[%s14319_s27 + $0x3a0] sm:$0xff]  ;;  %v8034_v37 = vld [vmem:[%s14319_s27 + $0x388] sm:$0xff] }
 0x4e6   : > { %v11061_v39 = vcombine.high %v8033_v15, %v8037_v36  ;;  %v11060_v41 = vcombine.low %v8033_v15, %v8037_v36  ;;  %v11062_v43 = vcombine.low %v8034_v37, %v8038_v40  ;;  %v11063_v44 = vcombine.high %v8034_v37, %v8038_v40  ;;  %v8073_v15 = vld [vmem:[%s14319_s27 + $0x4c0] sm:$0xff]  ;;  %v8074_v37 = vld [vmem:[%s14319_s27 + $0x4c8] sm:$0xff] }
 0x4e7   : > { %v8077_v36 = vld [vmem:[%s14319_s27 + $0x4e0] sm:$0xff] }
 0x4e8   : > { %9470 = vmatpush1.bf16.msra.mxu0 %v10996_v45  ;;  %9552 = vmatpush1.bf16.msra.mxu1 %v10998_v46  ;;  %v8041_v45 = vld [vmem:[%s14319_s27 + $0x3c0] sm:$0xff] }
 0x4e9   : > { %9471 = vmatprep.subr.bf16.mxu0 %v11005_v47  ;;  %9553 = vmatprep.subr.bf16.mxu1 %v11007_v32  ;;  %v8045_v46 = vld [vmem:[%s14319_s27 + $0x3e0] sm:$0xff]  ;;  %v8042_v47 = vld [vmem:[%s14319_s27 + $0x3c8] sm:$0xff] }
 0x4ea   : > { %v11069_v32 = vcombine.high %v8041_v45, %v8045_v46  ;;  %v11068_v49 = vcombine.low %v8041_v45, %v8045_v46  ;;  %v11070_v50 = vcombine.low %v8042_v47, %v8046_v48  ;;  %v11071_v42 = vcombine.high %v8042_v47, %v8046_v48  ;;  %v8081_v45 = vld [vmem:[%s14319_s27 + $0x500] sm:$0xff]  ;;  %v8082_v47 = vld [vmem:[%s14319_s27 + $0x508] sm:$0xff] }
 0x4eb   : > { %v8085_v46 = vld [vmem:[%s14319_s27 + $0x520] sm:$0xff]  ;;  %v11100_v48 = vcombine.low %v8073_v15, %v8077_v36 }
 0x4ec   : > { %9472 = vmatpush1.bf16.msra.mxu0 %v11004_v51  ;;  %9554 = vmatpush1.bf16.msra.mxu1 %v11006_v53  ;;  %v8049_v51 = vld [vmem:[%s14319_s27 + $0x400] sm:$0xff] }
 0x4ed   : > { %9473 = vmatprep.subr.bf16.mxu0 %v11013_v54  ;;  %9555 = vmatprep.subr.bf16.mxu1 %v11015_v56  ;;  %v8053_v53 = vld [vmem:[%s14319_s27 + $0x420] sm:$0xff]  ;;  %v8050_v54 = vld [vmem:[%s14319_s27 + $0x408] sm:$0xff] }
 0x4ee   : > { %v11077_v56 = vcombine.high %v8049_v51, %v8053_v53  ;;  %v11076_v38 = vcombine.low %v8049_v51, %v8053_v53  ;;  %v11078_v58 = vcombine.low %v8050_v54, %v8054_v57  ;;  %v11079_v60 = vcombine.high %v8050_v54, %v8054_v57  ;;  %v8089_v51 = vld [vmem:[%s14319_s27 + $0x540] sm:$0xff]  ;;  %v8090_v54 = vld [vmem:[%s14319_s27 + $0x548] sm:$0xff] }
 0x4ef   : > { %v8093_v53 = vld [vmem:[%s14319_s27 + $0x560] sm:$0xff]  ;;  %v11108_v57 = vcombine.low %v8081_v45, %v8085_v46 }
 0x4f0   : > { %9474 = vmatpush1.bf16.msra.mxu0 %v11012_v61  ;;  %9556 = vmatpush1.bf16.msra.mxu1 %v11014_v62  ;;  %v2714_v61 = vsub.s32 0, %v14363_v59  ;;  %v15317_v62 = vld [vmem:[%s14310_s13] sm:$0xf] }
 0x4f1   : > { %9475 = vmatprep.subr.bf16.mxu0 %v11021_v63  ;;  %9557 = vmatprep.subr.bf16.mxu1 %v11023_v0  ;;  %v2718_v63 = vsub.s32 1, %v14363_v59  ;;  %v2726_v0 = vsub.s32 3, %v14363_v59 }
 0x4f2   : > { %v2715_v3 = vrot.slane %v15317_v62, %v2714_v61 }
 0x4f3   : > { %v2719_v6 = vrot.slane %v15317_v62, %v2718_v63  ;;  %v2727_v7 = vrot.slane %v15317_v62, %v2726_v0 }
 0x4f4   : > { %9476 = vmatpush1.bf16.msra.mxu0 %v11020_v55  ;;  %9558 = vmatpush1.bf16.msra.mxu1 %v11022_v9 }
 0x4f5   : > { %9477 = vmatprep.subr.bf16.mxu0 %v11029_v10  ;;  %9559 = vmatprep.subr.bf16.mxu1 %v11031_v11 }
 0x4f8   : > { %9478 = vmatpush1.bf16.msra.mxu0 %v11028_v16  ;;  %9560 = vmatpush1.bf16.msra.mxu1 %v11030_v17 }
 0x4f9   : > { %9479 = vmatprep.subr.bf16.mxu0 %v11037_v52  ;;  %9561 = vmatprep.subr.bf16.mxu1 %v11039_v19 }
 0x4fc   : > { %9480 = vmatpush1.bf16.msra.mxu0 %v11036_v23  ;;  %9562 = vmatpush1.bf16.msra.mxu1 %v11038_v14  ;;  %v8062_v23 = vld [vmem:[%s14319_s27 + $0x468] sm:$0xff] }
 0x4fd   : > { %9481 = vmatprep.subr.bf16.mxu0 %v11045_v24  ;;  %9563 = vmatprep.subr.bf16.mxu1 %v11047_v25  ;;  %v8065_v25 = vld [vmem:[%s14319_s27 + $0x480] sm:$0xff]  ;;  %v11087_v28 = vcombine.high %v8058_v22, %v8062_v23 }
 0x4fe   : > { %v11092_v40 = vcombine.low %v8065_v25, %v8069_v29 }
 0x500   : > { %9482 = vmatpush1.bf16.msra.mxu0 %v11044_v33  ;;  %9564 = vmatpush1.bf16.msra.mxu1 %v11046_v18  ;;  %v8070_v33 = vld [vmem:[%s14319_s27 + $0x4a8] sm:$0xff] }
 0x501   : > { %9483 = vmatprep.subr.bf16.mxu0 %v11053_v5  ;;  %9565 = vmatprep.subr.bf16.mxu1 %v11055_v34  ;;  %v11084_v5 = vcombine.low %v8057_v20, %v8061_v21  ;;  %v11086_v34 = vcombine.low %v8058_v22, %v8062_v23  ;;  %v8117_v21 = vld [vmem:[%s14319_s27 + $0x620] sm:$0xff]  ;;  %v8114_v22 = vld [vmem:[%s14319_s27 + $0x608] sm:$0xff] }
 0x502   : > { %v8118_v23 = vld [vmem:[%s14319_s27 + $0x628] sm:$0xff] }
 0x504   : > { %9484 = vmatpush1.bf16.msra.mxu0 %v11052_v35  ;;  %9566 = vmatpush1.bf16.msra.mxu1 %v11054_v26  ;;  %v11093_v35 = vcombine.high %v8065_v25, %v8069_v29  ;;  %v11095_v26 = vcombine.high %v8066_v31, %v8070_v33  ;;  %v11143_v29 = vcombine.high %v8114_v22, %v8118_v23 }
 0x505   : > { %9485 = vmatprep.subr.bf16.mxu0 %v11061_v39  ;;  %9567 = vmatprep.subr.bf16.mxu1 %v11063_v44  ;;  %v8078_v39 = vld [vmem:[%s14319_s27 + $0x4e8] sm:$0xff] }
 0x506   : > { %v11103_v44 = vcombine.high %v8074_v37, %v8078_v39 }
 0x508   : > { %9486 = vmatpush1.bf16.msra.mxu0 %v11060_v41  ;;  %9568 = vmatpush1.bf16.msra.mxu1 %v11062_v43  ;;  %v11094_v41 = vcombine.low %v8066_v31, %v8070_v33  ;;  %v11101_v43 = vcombine.high %v8073_v15, %v8077_v36  ;;  %v8121_v31 = vld [vmem:[%s14319_s27 + $0x640] sm:$0xff] }
 0x509   : > { %9487 = vmatprep.subr.bf16.mxu0 %v11069_v32  ;;  %9569 = vmatprep.subr.bf16.mxu1 %v11071_v42  ;;  %v8086_v32 = vld [vmem:[%s14319_s27 + $0x528] sm:$0xff]  ;;  %v8125_v33 = vld [vmem:[%s14319_s27 + $0x660] sm:$0xff] }
 0x50a   : > { %v11111_v42 = vcombine.high %v8082_v47, %v8086_v32  ;;  %v11149_v15 = vcombine.high %v8121_v31, %v8125_v33 }
 0x50c   : > { %9488 = vmatpush1.bf16.msra.mxu0 %v11068_v49  ;;  %9570 = vmatpush1.bf16.msra.mxu1 %v11070_v50  ;;  %v11102_v49 = vcombine.low %v8074_v37, %v8078_v39  ;;  %v11109_v50 = vcombine.high %v8081_v45, %v8085_v46  ;;  %v8129_v37 = vld [vmem:[%s14319_s27 + $0x680] sm:$0xff] }
 0x50d   : > { %9498 = vmatprep.subr.bf16.mxu0 %v11077_v56  ;;  %9580 = vmatprep.subr.bf16.mxu1 %v11079_v60  ;;  %v8094_v56 = vld [vmem:[%s14319_s27 + $0x568] sm:$0xff]  ;;  %v8133_v39 = vld [vmem:[%s14319_s27 + $0x6a0] sm:$0xff] }
 0x50e   : > { %v11119_v60 = vcombine.high %v8090_v54, %v8094_v56  ;;  %v11157_v45 = vcombine.high %v8129_v37, %v8133_v39 }
 0x5a2   : > { %v7371_v8 = vpop.f32.mrb[0].mxu0  ;;  %v15330_v55 = vpop.f32.mrb[0].mxu1 }
 0x5a3   : > { %v11211_v9 = vadd.f32 %v7371_v8, %v2715_v3  ;;  %v7373_v10 = vpop.f32.mrb[1].mxu0  ;;  %v7906_v11 = vpop.f32.mrb[1].mxu1  ;;  %v8097_v3 = vld [vmem:[%s14319_s27 + $0x580] sm:$0xff]  ;;  %v8102_v8 = vld [vmem:[%s14319_s27 + $0x5a8] sm:$0xff] }
 0x5a4   : > { %v11212_v1 = vadd.f32 %v7373_v10, %v2719_v6  ;;  %v11214_v12 = vadd.f32 %v7906_v11, %v2727_v7  ;;  %v7375_v13 = vpop.f32.mrb[2].mxu0  ;;  %v7908_v30 = vpop.f32.mrb[2].mxu1  ;;  %v8101_v6 = vld [vmem:[%s14319_s27 + $0x5a0] sm:$0xff]  ;;  %v8098_v7 = vld [vmem:[%s14319_s27 + $0x588] sm:$0xff]  ;;  %v11118_v10 = vcombine.low %v8090_v54, %v8094_v56 }
 0x5a5   : > { %v7911_v16 = vmax.f32 %v11211_v9, 0.0  ;;  %v7376_v17 = vpop.f32.mrb[3].mxu0  ;;  %v7909_v52 = vpop.f32.mrb[3].mxu1  ;;  %v11116_v9 = vcombine.low %v8089_v51, %v8093_v53  ;;  %v11125_v11 = vcombine.high %v8097_v3, %v8101_v6  ;;  %v8109_v13 = vld [vmem:[%s14319_s27 + $0x5e0] sm:$0xff]  ;;  %v8106_v30 = vld [vmem:[%s14319_s27 + $0x5c8] sm:$0xff] }
 0x5a6   : > { %v7912_v19 = vmax.f32 %v11212_v1, 0.0  ;;  %v7914_v4 = vmax.f32 %v11214_v12, 0.0  ;;  %v11127_v1 = vcombine.high %v8098_v7, %v8102_v8  ;;  %v8105_v12 = vld [vmem:[%s14319_s27 + $0x5c0] sm:$0xff]  ;;  %v11124_v17 = vcombine.low %v8097_v3, %v8101_v6 }
 0x5a7   : > { %v15338_v24 = vpack.c.bf16 %v7911_v16, %v7911_v16  ;;  %v8110_v16 = vld [vmem:[%s14319_s27 + $0x5e8] sm:$0xff]  ;;  %v11126_v52 = vcombine.low %v8098_v7, %v8102_v8  ;;  %v11132_v25 = vcombine.low %v8105_v12, %v8109_v13  ;;  %v8145_v54 = vld [vmem:[%s14319_s27 + $0x700] sm:$0xff] }
 0x5a8   : > { %v15336_v14 = vpack.c.bf16 %v7912_v19, %v7912_v19  ;;  %v15346_v18 = vpack.c.bf16 %v7914_v4, %v7914_v4  ;;  %v11133_v19 = vcombine.high %v8105_v12, %v8109_v13  ;;  %v11135_v20 = vcombine.high %v8106_v30, %v8110_v16  ;;  %v8113_v4 = vld [vmem:[%s14319_s27 + $0x600] sm:$0xff] }
 0x5a9   : > { %v8149_v56 = vld [vmem:[%s14319_s27 + $0x720] sm:$0xff]  ;;  %v2722_v12 = vsub.s32 2, %v14363_v59 }
 0x5aa   : > { %9489 = vmatprep.mubr.bf16.mxu0 %v15336_v14  ;;  %9571 = vmatprep.mubr.bf16.mxu1 %v15336_v14  ;;  %v11173_v3 = vcombine.high %v8145_v54, %v8149_v56  ;;  %v8153_v7 = vld [vmem:[%s14319_s27 + $0x740] sm:$0xff] }
 0x5ab   : > { %9490 = vmatmul.mubr.bf16.vlgmr.msra.gmra.mrb[4].mxu0 %v15338_v24  ;;  %9572 = vmatmul.mubr.bf16.vlgmr.msra.gmra.mrb[4].mxu1 %v15338_v24  ;;  %v8157_v8 = vld [vmem:[%s14319_s27 + $0x760] sm:$0xff] }
 0x5ac   : > { %9499 = vmatpush1.bf16.msra.mxu0 %v11076_v38  ;;  %9581 = vmatpush1.bf16.msra.mxu1 %v11078_v58  ;;  %v11110_v38 = vcombine.low %v8082_v47, %v8086_v32  ;;  %v11117_v58 = vcombine.high %v8089_v51, %v8093_v53  ;;  %v8137_v47 = vld [vmem:[%s14319_s27 + $0x6c0] sm:$0xff]  ;;  %v11181_v13 = vcombine.high %v8153_v7, %v8157_v8 }
 0x5ad   : > { %9530 = vmatprep.mubr.bf16.mxu0 %v15346_v18  ;;  %9612 = vmatprep.mubr.bf16.mxu1 %v15346_v18  ;;  %v8141_v32 = vld [vmem:[%s14319_s27 + $0x6e0] sm:$0xff] }
 0x5ae   : > { %9500 = vmatprep.subr.bf16.mxu0 %v11085_v27  ;;  %9582 = vmatprep.subr.bf16.mxu1 %v11087_v28  ;;  %v11134_v27 = vcombine.low %v8106_v30, %v8110_v16  ;;  %v11141_v28 = vcombine.high %v8113_v4, %v8117_v21  ;;  %v11165_v51 = vcombine.high %v8137_v47, %v8141_v32  ;;  %v8161_v16 = vld [vmem:[%s14319_s27 + $0x780] sm:$0xff] }
 0x5b0   : > { %9501 = vmatpush1.bf16.msra.mxu0 %v11084_v5  ;;  %9583 = vmatpush1.bf16.msra.mxu1 %v11086_v34  ;;  %v8122_v5 = vld [vmem:[%s14319_s27 + $0x648] sm:$0xff] }
 0x5b1   : > { %9502 = vmatprep.subr.bf16.mxu0 %v11093_v35  ;;  %9584 = vmatprep.subr.bf16.mxu1 %v11095_v26  ;;  %v8126_v34 = vld [vmem:[%s14319_s27 + $0x668] sm:$0xff]  ;;  %v11140_v35 = vcombine.low %v8113_v4, %v8117_v21  ;;  %v11142_v26 = vcombine.low %v8114_v22, %v8118_v23  ;;  %v2723_v21 = vrot.slane %v15317_v62, %v2722_v12 }
 0x5b2   : > { %v11151_v36 = vcombine.high %v8122_v5, %v8126_v34 }
 0x5b4   : > { %9503 = vmatpush1.bf16.msra.mxu0 %v11092_v40  ;;  %9585 = vmatpush1.bf16.msra.mxu1 %v11094_v41  ;;  %v8130_v40 = vld [vmem:[%s14319_s27 + $0x688] sm:$0xff] }
 0x5b5   : > { %9504 = vmatprep.subr.bf16.mxu0 %v11101_v43  ;;  %9586 = vmatprep.subr.bf16.mxu1 %v11103_v44  ;;  %v8134_v41 = vld [vmem:[%s14319_s27 + $0x6a8] sm:$0xff]  ;;  %v11148_v43 = vcombine.low %v8121_v31, %v8125_v33  ;;  %v11150_v44 = vcombine.low %v8122_v5, %v8126_v34  ;;  %v11213_v5 = vadd.f32 %v15330_v55, %v2723_v21  ;;  %v7964_v21 = vld [vmem:[%s14319_s27 + $0x158] sm:$0xff] }
 0x5b6   : > { %v11159_v46 = vcombine.high %v8130_v40, %v8134_v41 }
 0x5b8   : > { %9505 = vmatpush1.bf16.msra.mxu0 %v11100_v48  ;;  %9587 = vmatpush1.bf16.msra.mxu1 %v11102_v49  ;;  %v8138_v48 = vld [vmem:[%s14319_s27 + $0x6c8] sm:$0xff] }
 0x5b9   : > { %9506 = vmatprep.subr.bf16.mxu0 %v11109_v50  ;;  %9588 = vmatprep.subr.bf16.mxu1 %v11111_v42  ;;  %v8142_v49 = vld [vmem:[%s14319_s27 + $0x6e8] sm:$0xff]  ;;  %v11156_v50 = vcombine.low %v8129_v37, %v8133_v39  ;;  %v11158_v42 = vcombine.low %v8130_v40, %v8134_v41  ;;  %v7913_v40 = vmax.f32 %v11213_v5, 0.0  ;;  %v7976_v5 = vld [vmem:[%s14319_s27 + $0x1b8] sm:$0xff] }
 0x5ba   : > { %v11167_v53 = vcombine.high %v8138_v48, %v8142_v49 }
 0x5bc   : > { %9507 = vmatpush1.bf16.msra.mxu0 %v11108_v57  ;;  %9589 = vmatpush1.bf16.msra.mxu1 %v11110_v38  ;;  %v8146_v57 = vld [vmem:[%s14319_s27 + $0x708] sm:$0xff] }
 0x5bd   : > { %9508 = vmatprep.subr.bf16.mxu0 %v11117_v58  ;;  %9590 = vmatprep.subr.bf16.mxu1 %v11119_v60  ;;  %v8150_v38 = vld [vmem:[%s14319_s27 + $0x728] sm:$0xff]  ;;  %v11164_v58 = vcombine.low %v8137_v47, %v8141_v32  ;;  %v11166_v60 = vcombine.low %v8138_v48, %v8142_v49  ;;  %v15417_v32 = vpack.c.bf16 %v7913_v40, %v7913_v40 }
 0x5be   : > { %v11175_v6 = vcombine.high %v8146_v57, %v8150_v38 }
 0x5c0   : > { %9509 = vmatpush1.bf16.msra.mxu0 %v11116_v9  ;;  %9591 = vmatpush1.bf16.msra.mxu1 %v11118_v10  ;;  %v8154_v9 = vld [vmem:[%s14319_s27 + $0x748] sm:$0xff] }
 0x5c1   : > { %9510 = vmatprep.subr.bf16.mxu0 %v11125_v11  ;;  %9592 = vmatprep.subr.bf16.mxu1 %v11127_v1  ;;  %v8158_v10 = vld [vmem:[%s14319_s27 + $0x768] sm:$0xff]  ;;  %v11172_v11 = vcombine.low %v8145_v54, %v8149_v56  ;;  %v11174_v1 = vcombine.low %v8146_v57, %v8150_v38  ;;  %v7944_v54 = vld [vmem:[%s14319_s27 + $0xb8] sm:$0xff] }
 0x5c2   : > { %v11183_v30 = vcombine.high %v8154_v9, %v8158_v10  ;;  %v11182_v4 = vcombine.low %v8154_v9, %v8158_v10 }
 0x5c4   : > { %9511 = vmatpush1.bf16.msra.mxu0 %v11124_v17  ;;  %9593 = vmatpush1.bf16.msra.mxu1 %v11126_v52  ;;  %v8165_v17 = vld [vmem:[%s14319_s27 + $0x7a0] sm:$0xff]  ;;  %v8162_v52 = vld [vmem:[%s14319_s27 + $0x788] sm:$0xff] }
 0x5c5   : > { %9512 = vmatprep.subr.bf16.mxu0 %v11133_v19  ;;  %9594 = vmatprep.subr.bf16.mxu1 %v11135_v20  ;;  %v8166_v19 = vld [vmem:[%s14319_s27 + $0x7a8] sm:$0xff]  ;;  %v11180_v20 = vcombine.low %v8153_v7, %v8157_v8  ;;  %v11189_v22 = vcombine.high %v8161_v16, %v8165_v17  ;;  %v11188_v31 = vcombine.low %v8161_v16, %v8165_v17  ;;  %v7952_v7 = vld [vmem:[%s14319_s27 + $0xf8] sm:$0xff] }
 0x5c6   : > { %v11191_v23 = vcombine.high %v8162_v52, %v8166_v19  ;;  %v11190_v33 = vcombine.low %v8162_v52, %v8166_v19 }
 0x5c8   : > { %9513 = vmatpush1.bf16.msra.mxu0 %v11132_v25  ;;  %9595 = vmatpush1.bf16.msra.mxu1 %v11134_v27  ;;  %v8169_v25 = vld [vmem:[%s14319_s27 + $0x7c0] sm:$0xff] }
 0x5c9   : > { %9514 = vmatprep.subr.bf16.mxu0 %v11141_v28  ;;  %9596 = vmatprep.subr.bf16.mxu1 %v11143_v29  ;;  %v8173_v27 = vld [vmem:[%s14319_s27 + $0x7e0] sm:$0xff]  ;;  %v8170_v28 = vld [vmem:[%s14319_s27 + $0x7c8] sm:$0xff] }
 0x5ca   : > { %v8174_v29 = vld [vmem:[%s14319_s27 + $0x7e8] sm:$0xff]  ;;  %v11197_v62 = vcombine.high %v8169_v25, %v8173_v27  ;;  %v11196_v37 = vcombine.low %v8169_v25, %v8173_v27 }
 0x5cb   : > { %v11199_v34 = vcombine.high %v8170_v28, %v8174_v29  ;;  %v11198_v39 = vcombine.low %v8170_v28, %v8174_v29  ;;  %v7971_v29 = vld [vmem:[%s14319_s27 + $0x190] sm:$0xff] }
 0x5cc   : > { %9515 = vmatpush1.bf16.msra.mxu0 %v11140_v35  ;;  %9597 = vmatpush1.bf16.msra.mxu1 %v11142_v26  ;;  %v7923_v35 = vld [vmem:[%s14319_s27 + $0x10] sm:$0xff] }
 0x5cd   : > { %9516 = vmatprep.subr.bf16.mxu0 %v11149_v15  ;;  %9598 = vmatprep.subr.bf16.mxu1 %v11151_v36  ;;  %v7927_v26 = vld [vmem:[%s14319_s27 + $0x30] sm:$0xff]  ;;  %v7924_v15 = vld [vmem:[%s14319_s27 + $0x18] sm:$0xff] }
 0x5ce   : > { %v7928_v36 = vld [vmem:[%s14319_s27 + $0x38] sm:$0xff]  ;;  %v10953_v55 = vcombine.high %v7923_v35, %v7927_v26  ;;  %v10952_v47 = vcombine.low %v7923_v35, %v7927_v26 }
 0x5cf   : > { %v10955_v41 = vcombine.high %v7924_v15, %v7928_v36  ;;  %v10954_v48 = vcombine.low %v7924_v15, %v7928_v36  ;;  %v7979_v15 = vld [vmem:[%s14319_s27 + $0x1d0] sm:$0xff] }
 0x5d0   : > { %9517 = vmatpush1.bf16.msra.mxu0 %v11148_v43  ;;  %9599 = vmatpush1.bf16.msra.mxu1 %v11150_v44  ;;  %v7931_v43 = vld [vmem:[%s14319_s27 + $0x50] sm:$0xff] }
 0x5d1   : > { %9518 = vmatprep.subr.bf16.mxu0 %v11157_v45  ;;  %9600 = vmatprep.subr.bf16.mxu1 %v11159_v46  ;;  %v7935_v44 = vld [vmem:[%s14319_s27 + $0x70] sm:$0xff]  ;;  %v7932_v45 = vld [vmem:[%s14319_s27 + $0x58] sm:$0xff] }
 0x5d2   : > { %v7936_v46 = vld [vmem:[%s14319_s27 + $0x78] sm:$0xff]  ;;  %v10961_v49 = vcombine.high %v7931_v43, %v7935_v44  ;;  %v10960_v56 = vcombine.low %v7931_v43, %v7935_v44  ;;  %v7983_v36 = vld [vmem:[%s14319_s27 + $0x1f0] sm:$0xff] }
 0x5d3   : > { %v10962_v57 = vcombine.low %v7932_v45, %v7936_v46  ;;  %v7987_v44 = vld [vmem:[%s14319_s27 + $0x210] sm:$0xff] }
 0x5d4   : > { %9519 = vmatpush1.bf16.msra.mxu0 %v11156_v50  ;;  %9601 = vmatpush1.bf16.msra.mxu1 %v11158_v42  ;;  %v10963_v50 = vcombine.high %v7932_v45, %v7936_v46  ;;  %v7939_v42 = vld [vmem:[%s14319_s27 + $0x90] sm:$0xff]  ;;  %v7988_v46 = vld [vmem:[%s14319_s27 + $0x218] sm:$0xff] }
 0x5d5   : > { %9520 = vmatprep.subr.bf16.mxu0 %v11165_v51  ;;  %9602 = vmatprep.subr.bf16.mxu1 %v11167_v53  ;;  %v7943_v51 = vld [vmem:[%s14319_s27 + $0xb0] sm:$0xff]  ;;  %v7940_v53 = vld [vmem:[%s14319_s27 + $0x98] sm:$0xff] }
 0x5d6   : > { %v10969_v38 = vcombine.high %v7939_v42, %v7943_v51  ;;  %v10968_v8 = vcombine.low %v7939_v42, %v7943_v51  ;;  %v10970_v9 = vcombine.low %v7940_v53, %v7944_v54  ;;  %v7991_v45 = vld [vmem:[%s14319_s27 + $0x230] sm:$0xff] }
 0x5d7   : > { %v7995_v51 = vld [vmem:[%s14319_s27 + $0x250] sm:$0xff] }
 0x5d8   : > { %9521 = vmatpush1.bf16.msra.mxu0 %v11164_v58  ;;  %9603 = vmatpush1.bf16.msra.mxu1 %v11166_v60  ;;  %v10971_v58 = vcombine.high %v7940_v53, %v7944_v54  ;;  %v7947_v60 = vld [vmem:[%s14319_s27 + $0xd0] sm:$0xff]  ;;  %v7996_v54 = vld [vmem:[%s14319_s27 + $0x258] sm:$0xff] }
 0x5d9   : > { %9522 = vmatprep.subr.bf16.mxu0 %v11173_v3  ;;  %9604 = vmatprep.subr.bf16.mxu1 %v11175_v6  ;;  %v7951_v3 = vld [vmem:[%s14319_s27 + $0xf0] sm:$0xff]  ;;  %v7948_v6 = vld [vmem:[%s14319_s27 + $0xd8] sm:$0xff] }
 0x5da   : > { %v10979_v10 = vcombine.high %v7948_v6, %v7952_v7  ;;  %v10976_v16 = vcombine.low %v7947_v60, %v7951_v3  ;;  %v10978_v17 = vcombine.low %v7948_v6, %v7952_v7  ;;  %v7999_v53 = vld [vmem:[%s14319_s27 + $0x270] sm:$0xff]  ;;  %v8004_v7 = vld [vmem:[%s14319_s27 + $0x298] sm:$0xff] }
 0x5db   : > { %v8007_v6 = vld [vmem:[%s14319_s27 + $0x2b0] sm:$0xff] }
 0x5dc   : > { %9523 = vmatpush1.bf16.msra.mxu0 %v11172_v11  ;;  %9605 = vmatpush1.bf16.msra.mxu1 %v11174_v1  ;;  %v7955_v11 = vld [vmem:[%s14319_s27 + $0x110] sm:$0xff] }
 0x5dd   : > { %9524 = vmatprep.subr.bf16.mxu0 %v11181_v13  ;;  %9606 = vmatprep.subr.bf16.mxu1 %v11183_v30  ;;  %v7959_v1 = vld [vmem:[%s14319_s27 + $0x130] sm:$0xff]  ;;  %v7956_v13 = vld [vmem:[%s14319_s27 + $0x118] sm:$0xff] }
 0x5de   : > { %v7960_v30 = vld [vmem:[%s14319_s27 + $0x138] sm:$0xff]  ;;  %v10985_v52 = vcombine.high %v7955_v11, %v7959_v1 }
 0x5df   : > { %v10987_v19 = vcombine.high %v7956_v13, %v7960_v30  ;;  %v10986_v25 = vcombine.low %v7956_v13, %v7960_v30  ;;  %v8015_v13 = vld [vmem:[%s14319_s27 + $0x2f0] sm:$0xff]  ;;  %v8012_v30 = vld [vmem:[%s14319_s27 + $0x2d8] sm:$0xff] }
 0x5e0   : > { %9525 = vmatpush1.bf16.msra.mxu0 %v11180_v20  ;;  %9607 = vmatpush1.bf16.msra.mxu1 %v11182_v4  ;;  %v7963_v20 = vld [vmem:[%s14319_s27 + $0x150] sm:$0xff] }
 0x5e1   : > { %9526 = vmatprep.subr.bf16.mxu0 %v11189_v22  ;;  %9608 = vmatprep.subr.bf16.mxu1 %v11191_v23  ;;  %v7967_v4 = vld [vmem:[%s14319_s27 + $0x170] sm:$0xff]  ;;  %v7968_v22 = vld [vmem:[%s14319_s27 + $0x178] sm:$0xff]  ;;  %v10984_v23 = vcombine.low %v7955_v11, %v7959_v1 }
 0x5e2   : > { %v10993_v27 = vcombine.high %v7963_v20, %v7967_v4  ;;  %v10995_v28 = vcombine.high %v7964_v21, %v7968_v22  ;;  %v8011_v1 = vld [vmem:[%s14319_s27 + $0x2d0] sm:$0xff] }
 0x5e4   : > { %9527 = vmatpush1.bf16.msra.mxu0 %v11188_v31  ;;  %9609 = vmatpush1.bf16.msra.mxu1 %v11190_v33  ;;  %v7975_v31 = vld [vmem:[%s14319_s27 + $0x1b0] sm:$0xff]  ;;  %v7972_v33 = vld [vmem:[%s14319_s27 + $0x198] sm:$0xff] }
 0x5e5   : > { %9528 = vmatprep.subr.bf16.mxu0 %v11197_v62  ;;  %9610 = vmatprep.subr.bf16.mxu1 %v11199_v34  ;;  %v10992_v62 = vcombine.low %v7963_v20, %v7967_v4  ;;  %v10994_v34 = vcombine.low %v7964_v21, %v7968_v22  ;;  %v11001_v35 = vcombine.high %v7971_v29, %v7975_v31  ;;  %v8019_v4 = vld [vmem:[%s14319_s27 + $0x310] sm:$0xff]  ;;  %v8020_v22 = vld [vmem:[%s14319_s27 + $0x318] sm:$0xff] }
 0x5e6   : > { %v11003_v26 = vcombine.high %v7972_v33, %v7976_v5  ;;  %v11000_v40 = vcombine.low %v7971_v29, %v7975_v31  ;;  %v8023_v21 = vld [vmem:[%s14319_s27 + $0x330] sm:$0xff] }
 0x5e7   : > { %v8027_v31 = vld [vmem:[%s14319_s27 + $0x350] sm:$0xff] }
 0x5e8   : > { %9529 = vmatpush1.bf16.msra.mxu0 %v11196_v37  ;;  %9611 = vmatpush1.bf16.msra.mxu1 %v11198_v39  ;;  %v7980_v37 = vld [vmem:[%s14319_s27 + $0x1d8] sm:$0xff] }
 0x5e9   : > { %9621 = vmatprep.subr.bf16.mxu0 %v10953_v55  ;;  %9703 = vmatprep.subr.bf16.mxu1 %v10955_v41  ;;  %v7984_v39 = vld [vmem:[%s14319_s27 + $0x1f8] sm:$0xff]  ;;  %v11002_v55 = vcombine.low %v7972_v33, %v7976_v5  ;;  %v11009_v41 = vcombine.high %v7979_v15, %v7983_v36  ;;  %v8031_v33 = vld [vmem:[%s14319_s27 + $0x370] sm:$0xff] }
 0x5ea   : > { %v11011_v43 = vcombine.high %v7980_v37, %v7984_v39  ;;  %v8028_v5 = vld [vmem:[%s14319_s27 + $0x358] sm:$0xff] }
 0x5eb   : > { %9531 = vmatmul.mubr.bf16.vlgmr.msra.gmra.mrb[4].mxu0 %v15417_v32  ;;  %9613 = vmatmul.mubr.bf16.vlgmr.msra.gmra.mrb[4].mxu1 %v15417_v32 }
 0x5ec   : > { %9622 = vmatpush1.bf16.msra.mxu0 %v10952_v47  ;;  %9653 = vmatprep.mubr.bf16.mxu0 %v15336_v14  ;;  %v7992_v47 = vld [vmem:[%s14319_s27 + $0x238] sm:$0xff] }
 0x5ed   : > { %9704 = vmatpush1.bf16.msra.mxu1 %v10954_v48  ;;  %9735 = vmatprep.mubr.bf16.mxu1 %v15336_v14  ;;  %v10977_v14 = vcombine.high %v7947_v60, %v7951_v3  ;;  %v11008_v48 = vcombine.low %v7979_v15, %v7983_v36  ;;  %v11019_v42 = vcombine.high %v7988_v46, %v7992_v47  ;;  %v8003_v3 = vld [vmem:[%s14319_s27 + $0x290] sm:$0xff] }
 0x5ee   : > { %9623 = vmatprep.subr.bf16.mxu0 %v10961_v49  ;;  %9705 = vmatprep.subr.bf16.mxu1 %v10963_v50  ;;  %v11010_v49 = vcombine.low %v7980_v37, %v7984_v39  ;;  %v11017_v50 = vcombine.high %v7987_v44, %v7991_v45  ;;  %v8035_v36 = vld [vmem:[%s14319_s27 + $0x390] sm:$0xff]  ;;  %v8036_v39 = vld [vmem:[%s14319_s27 + $0x398] sm:$0xff] }
 0x5ef   : > { %v8039_v37 = vld [vmem:[%s14319_s27 + $0x3b0] sm:$0xff] }
 0x5f0   : > { %9624 = vmatpush1.bf16.msra.mxu0 %v10960_v56  ;;  %v8000_v56 = vld [vmem:[%s14319_s27 + $0x278] sm:$0xff] }
 0x5f1   : > { %9706 = vmatpush1.bf16.msra.mxu1 %v10962_v57  ;;  %9625 = vmatprep.subr.bf16.mxu0 %v10969_v38  ;;  %v11016_v57 = vcombine.low %v7987_v44, %v7991_v45  ;;  %v11018_v38 = vcombine.low %v7988_v46, %v7992_v47  ;;  %v11027_v60 = vcombine.high %v7996_v54, %v8000_v56  ;;  %v8043_v45 = vld [vmem:[%s14319_s27 + $0x3d0] sm:$0xff]  ;;  %v8044_v47 = vld [vmem:[%s14319_s27 + $0x3d8] sm:$0xff] }
 0x5f2   : > { %9707 = vmatprep.subr.bf16.mxu1 %v10971_v58  ;;  %v11025_v58 = vcombine.high %v7995_v51, %v7999_v53  ;;  %v8047_v46 = vld [vmem:[%s14319_s27 + $0x3f0] sm:$0xff] }
 0x5f4   : > { %9626 = vmatpush1.bf16.msra.mxu0 %v10968_v8  ;;  %v8008_v8 = vld [vmem:[%s14319_s27 + $0x2b8] sm:$0xff] }
 0x5f5   : > { %9708 = vmatpush1.bf16.msra.mxu1 %v10970_v9  ;;  %9627 = vmatprep.subr.bf16.mxu0 %v10977_v14  ;;  %v11024_v9 = vcombine.low %v7995_v51, %v7999_v53  ;;  %v11026_v14 = vcombine.low %v7996_v54, %v8000_v56  ;;  %v11035_v11 = vcombine.high %v8004_v7, %v8008_v8  ;;  %v8051_v53 = vld [vmem:[%s14319_s27 + $0x410] sm:$0xff]  ;;  %v8052_v56 = vld [vmem:[%s14319_s27 + $0x418] sm:$0xff] }
 0x5f6   : > { %9709 = vmatprep.subr.bf16.mxu1 %v10979_v10  ;;  %v11033_v10 = vcombine.high %v8003_v3, %v8007_v6  ;;  %v8055_v54 = vld [vmem:[%s14319_s27 + $0x430] sm:$0xff] }
 0x5f8   : > { %9628 = vmatpush1.bf16.msra.mxu0 %v10976_v16  ;;  %v8016_v16 = vld [vmem:[%s14319_s27 + $0x2f8] sm:$0xff] }
 0x5f9   : > { %9710 = vmatpush1.bf16.msra.mxu1 %v10978_v17  ;;  %9629 = vmatprep.subr.bf16.mxu0 %v10985_v52  ;;  %v11032_v17 = vcombine.low %v8003_v3, %v8007_v6  ;;  %v11034_v52 = vcombine.low %v8004_v7, %v8008_v8  ;;  %v11043_v20 = vcombine.high %v8012_v30, %v8016_v16  ;;  %v8059_v6 = vld [vmem:[%s14319_s27 + $0x450] sm:$0xff] }
 0x5fa   : > { %9711 = vmatprep.subr.bf16.mxu1 %v10987_v19  ;;  %v11041_v19 = vcombine.high %v8011_v1, %v8015_v13  ;;  %v8063_v7 = vld [vmem:[%s14319_s27 + $0x470] sm:$0xff]  ;;  %v11080_v8 = vcombine.low %v8051_v53, %v8055_v54 }
 0x5fc   : > { %9630 = vmatpush1.bf16.msra.mxu0 %v10984_v23  ;;  %v8024_v23 = vld [vmem:[%s14319_s27 + $0x338] sm:$0xff] }
 0x5fd   : > { %9712 = vmatpush1.bf16.msra.mxu1 %v10986_v25  ;;  %9631 = vmatprep.subr.bf16.mxu0 %v10993_v27  ;;  %v11040_v25 = vcombine.low %v8011_v1, %v8015_v13  ;;  %v11042_v27 = vcombine.low %v8012_v30, %v8016_v16  ;;  %v11051_v29 = vcombine.high %v8020_v22, %v8024_v23  ;;  %v8067_v1 = vld [vmem:[%s14319_s27 + $0x490] sm:$0xff]  ;;  %v8068_v16 = vld [vmem:[%s14319_s27 + $0x498] sm:$0xff] }
 0x5fe   : > { %9713 = vmatprep.subr.bf16.mxu1 %v10995_v28  ;;  %v11049_v28 = vcombine.high %v8019_v4, %v8023_v21  ;;  %v8071_v13 = vld [vmem:[%s14319_s27 + $0x4b0] sm:$0xff] }
 0x600   : > { %9632 = vmatpush1.bf16.msra.mxu0 %v10992_v62  ;;  %v8032_v62 = vld [vmem:[%s14319_s27 + $0x378] sm:$0xff] }
 0x601   : > { %9714 = vmatpush1.bf16.msra.mxu1 %v10994_v34  ;;  %9633 = vmatprep.subr.bf16.mxu0 %v11001_v35  ;;  %v11048_v34 = vcombine.low %v8019_v4, %v8023_v21  ;;  %v11050_v35 = vcombine.low %v8020_v22, %v8024_v23  ;;  %v11059_v15 = vcombine.high %v8028_v5, %v8032_v62  ;;  %v8075_v21 = vld [vmem:[%s14319_s27 + $0x4d0] sm:$0xff]  ;;  %v8076_v23 = vld [vmem:[%s14319_s27 + $0x4d8] sm:$0xff] }
 0x602   : > { %9715 = vmatprep.subr.bf16.mxu1 %v11003_v26  ;;  %v11057_v26 = vcombine.high %v8027_v31, %v8031_v33  ;;  %v8079_v22 = vld [vmem:[%s14319_s27 + $0x4f0] sm:$0xff] }
 0x604   : > { %9634 = vmatpush1.bf16.msra.mxu0 %v11000_v40  ;;  %v8040_v40 = vld [vmem:[%s14319_s27 + $0x3b8] sm:$0xff] }
 0x605   : > { %9716 = vmatpush1.bf16.msra.mxu1 %v11002_v55  ;;  %9635 = vmatprep.subr.bf16.mxu0 %v11009_v41  ;;  %v11056_v55 = vcombine.low %v8027_v31, %v8031_v33  ;;  %v11058_v41 = vcombine.low %v8028_v5, %v8032_v62  ;;  %v11067_v44 = vcombine.high %v8036_v39, %v8040_v40  ;;  %v8087_v31 = vld [vmem:[%s14319_s27 + $0x530] sm:$0xff]  ;;  %v8084_v33 = vld [vmem:[%s14319_s27 + $0x518] sm:$0xff] }
 0x606   : > { %9717 = vmatprep.subr.bf16.mxu1 %v11011_v43  ;;  %v11065_v43 = vcombine.high %v8035_v36, %v8039_v37  ;;  %v8088_v5 = vld [vmem:[%s14319_s27 + $0x538] sm:$0xff]  ;;  %v11104_v62 = vcombine.low %v8075_v21, %v8079_v22 }
 0x608   : > { %9636 = vmatpush1.bf16.msra.mxu0 %v11008_v48  ;;  %v8048_v48 = vld [vmem:[%s14319_s27 + $0x3f8] sm:$0xff] }
 0x609   : > { %9718 = vmatpush1.bf16.msra.mxu1 %v11010_v49  ;;  %9637 = vmatprep.subr.bf16.mxu0 %v11017_v50  ;;  %v11064_v49 = vcombine.low %v8035_v36, %v8039_v37  ;;  %v11066_v50 = vcombine.low %v8036_v39, %v8040_v40  ;;  %v11075_v51 = vcombine.high %v8044_v47, %v8048_v48  ;;  %v8095_v36 = vld [vmem:[%s14319_s27 + $0x570] sm:$0xff]  ;;  %v8092_v37 = vld [vmem:[%s14319_s27 + $0x558] sm:$0xff] }
 0x60a   : > { %9719 = vmatprep.subr.bf16.mxu1 %v11019_v42  ;;  %v11073_v42 = vcombine.high %v8043_v45, %v8047_v46  ;;  %v8096_v39 = vld [vmem:[%s14319_s27 + $0x578] sm:$0xff] }
 0x60c   : > { %9638 = vmatpush1.bf16.msra.mxu0 %v11016_v57  ;;  %v8056_v57 = vld [vmem:[%s14319_s27 + $0x438] sm:$0xff] }
 0x60d   : > { %9720 = vmatpush1.bf16.msra.mxu1 %v11018_v38  ;;  %9639 = vmatprep.subr.bf16.mxu0 %v11025_v58  ;;  %v11072_v38 = vcombine.low %v8043_v45, %v8047_v46  ;;  %v11074_v58 = vcombine.low %v8044_v47, %v8048_v48  ;;  %v11083_v3 = vcombine.high %v8052_v56, %v8056_v57  ;;  %v8103_v45 = vld [vmem:[%s14319_s27 + $0x5b0] sm:$0xff]  ;;  %v8100_v46 = vld [vmem:[%s14319_s27 + $0x598] sm:$0xff] }
 0x60e   : > { %9721 = vmatprep.subr.bf16.mxu1 %v11027_v60  ;;  %v11081_v60 = vcombine.high %v8051_v53, %v8055_v54  ;;  %v8104_v47 = vld [vmem:[%s14319_s27 + $0x5b8] sm:$0xff]  ;;  %v8111_v53 = vld [vmem:[%s14319_s27 + $0x5f0] sm:$0xff] }
 0x60f   : > { %v8108_v54 = vld [vmem:[%s14319_s27 + $0x5d8] sm:$0xff] }
 0x610   : > { %9640 = vmatpush1.bf16.msra.mxu0 %v11024_v9  ;;  %v8060_v9 = vld [vmem:[%s14319_s27 + $0x458] sm:$0xff] }
 0x611   : > { %9722 = vmatpush1.bf16.msra.mxu1 %v11026_v14  ;;  %9641 = vmatprep.subr.bf16.mxu0 %v11033_v10  ;;  %v8064_v14 = vld [vmem:[%s14319_s27 + $0x478] sm:$0xff]  ;;  %v11082_v10 = vcombine.low %v8052_v56, %v8056_v57 }
 0x612   : > { %9723 = vmatprep.subr.bf16.mxu1 %v11035_v11  ;;  %v11089_v11 = vcombine.high %v8059_v6, %v8063_v7  ;;  %v11091_v30 = vcombine.high %v8060_v9, %v8064_v14  ;;  %v8112_v56 = vld [vmem:[%s14319_s27 + $0x5f8] sm:$0xff] }
 0x614   : > { %9642 = vmatpush1.bf16.msra.mxu0 %v11032_v17  ;;  %v8072_v17 = vld [vmem:[%s14319_s27 + $0x4b8] sm:$0xff] }
 0x615   : > { %9724 = vmatpush1.bf16.msra.mxu1 %v11034_v52  ;;  %9643 = vmatprep.subr.bf16.mxu0 %v11041_v19  ;;  %v11088_v52 = vcombine.low %v8059_v6, %v8063_v7  ;;  %v11090_v19 = vcombine.low %v8060_v9, %v8064_v14  ;;  %v11099_v4 = vcombine.high %v8068_v16, %v8072_v17  ;;  %v8119_v6 = vld [vmem:[%s14319_s27 + $0x630] sm:$0xff]  ;;  %v8116_v7 = vld [vmem:[%s14319_s27 + $0x618] sm:$0xff] }
 0x616   : > { %9725 = vmatprep.subr.bf16.mxu1 %v11043_v20  ;;  %v11097_v20 = vcombine.high %v8067_v1, %v8071_v13  ;;  %v11138_v14 = vcombine.low %v8108_v54, %v8112_v56 }
 0x618   : > { %9644 = vmatpush1.bf16.msra.mxu0 %v11040_v25  ;;  %v11096_v25 = vcombine.low %v8067_v1, %v8071_v13  ;;  %v8123_v1 = vld [vmem:[%s14319_s27 + $0x650] sm:$0xff] }
 0x619   : > { %9726 = vmatpush1.bf16.msra.mxu1 %v11042_v27  ;;  %9645 = vmatprep.subr.bf16.mxu0 %v11049_v28  ;;  %v11098_v27 = vcombine.low %v8068_v16, %v8072_v17  ;;  %v11105_v28 = vcombine.high %v8075_v21, %v8079_v22  ;;  %v8127_v13 = vld [vmem:[%s14319_s27 + $0x670] sm:$0xff]  ;;  %v8128_v16 = vld [vmem:[%s14319_s27 + $0x678] sm:$0xff] }
 0x61a   : > { %9727 = vmatprep.subr.bf16.mxu1 %v11051_v29  ;;  %v8083_v29 = vld [vmem:[%s14319_s27 + $0x510] sm:$0xff]  ;;  %v8132_v22 = vld [vmem:[%s14319_s27 + $0x698] sm:$0xff] }
 0x61b   : > { %v11112_v40 = vcombine.low %v8083_v29, %v8087_v31  ;;  %v8135_v21 = vld [vmem:[%s14319_s27 + $0x6b0] sm:$0xff] }
 0x61c   : > { %9646 = vmatpush1.bf16.msra.mxu0 %v11048_v34 }
 0x61d   : > { %9728 = vmatpush1.bf16.msra.mxu1 %v11050_v35  ;;  %9647 = vmatprep.subr.bf16.mxu0 %v11057_v26  ;;  %v11113_v35 = vcombine.high %v8083_v29, %v8087_v31  ;;  %v11115_v26 = vcombine.high %v8084_v33, %v8088_v5  ;;  %v8143_v29 = vld [vmem:[%s14319_s27 + $0x6f0] sm:$0xff]  ;;  %v8140_v31 = vld [vmem:[%s14319_s27 + $0x6d8] sm:$0xff] }
 0x61e   : > { %9729 = vmatprep.subr.bf16.mxu1 %v11059_v15  ;;  %v8091_v15 = vld [vmem:[%s14319_s27 + $0x550] sm:$0xff] }
 0x61f   : > { %v11120_v48 = vcombine.low %v8091_v15, %v8095_v36 }
 0x620   : > { %9648 = vmatpush1.bf16.msra.mxu0 %v11056_v55  ;;  %v11114_v55 = vcombine.low %v8084_v33, %v8088_v5  ;;  %v8144_v33 = vld [vmem:[%s14319_s27 + $0x6f8] sm:$0xff] }
 0x621   : > { %9730 = vmatpush1.bf16.msra.mxu1 %v11058_v41  ;;  %9649 = vmatprep.subr.bf16.mxu0 %v11065_v43  ;;  %v11121_v41 = vcombine.high %v8091_v15, %v8095_v36  ;;  %v11123_v43 = vcombine.high %v8092_v37, %v8096_v39  ;;  %v8151_v15 = vld [vmem:[%s14319_s27 + $0x730] sm:$0xff]  ;;  %v8148_v36 = vld [vmem:[%s14319_s27 + $0x718] sm:$0xff] }
 0x622   : > { %9731 = vmatprep.subr.bf16.mxu1 %v11067_v44  ;;  %v8099_v44 = vld [vmem:[%s14319_s27 + $0x590] sm:$0xff] }
 0x623   : > { %v11128_v57 = vcombine.low %v8099_v44, %v8103_v45 }
 0x624   : > { %9650 = vmatpush1.bf16.msra.mxu0 %v11064_v49  ;;  %v11122_v49 = vcombine.low %v8092_v37, %v8096_v39  ;;  %v8152_v37 = vld [vmem:[%s14319_s27 + $0x738] sm:$0xff] }
 0x625   : > { %9732 = vmatpush1.bf16.msra.mxu1 %v11066_v50  ;;  %9651 = vmatprep.subr.bf16.mxu0 %v11073_v42  ;;  %v11129_v50 = vcombine.high %v8099_v44, %v8103_v45  ;;  %v11131_v42 = vcombine.high %v8100_v46, %v8104_v47  ;;  %v8159_v44 = vld [vmem:[%s14319_s27 + $0x770] sm:$0xff]  ;;  %v8156_v45 = vld [vmem:[%s14319_s27 + $0x758] sm:$0xff] }
 0x626   : > { %9733 = vmatprep.subr.bf16.mxu1 %v11075_v51  ;;  %v8107_v51 = vld [vmem:[%s14319_s27 + $0x5d0] sm:$0xff] }
 0x627   : > { %v11136_v9 = vcombine.low %v8107_v51, %v8111_v53 }
 0x628   : > { %9652 = vmatpush1.bf16.msra.mxu0 %v11072_v38  ;;  %v11130_v38 = vcombine.low %v8100_v46, %v8104_v47  ;;  %v8160_v46 = vld [vmem:[%s14319_s27 + $0x778] sm:$0xff] }
 0x629   : > { %9734 = vmatpush1.bf16.msra.mxu1 %v11074_v58  ;;  %9662 = vmatprep.subr.bf16.mxu0 %v11081_v60  ;;  %v11137_v58 = vcombine.high %v8107_v51, %v8111_v53  ;;  %v11139_v60 = vcombine.high %v8108_v54, %v8112_v56  ;;  %v8167_v51 = vld [vmem:[%s14319_s27 + $0x7b0] sm:$0xff]  ;;  %v8164_v53 = vld [vmem:[%s14319_s27 + $0x798] sm:$0xff] }
 0x62a   : > { %9744 = vmatprep.subr.bf16.mxu1 %v11083_v3  ;;  %v8115_v3 = vld [vmem:[%s14319_s27 + $0x610] sm:$0xff]  ;;  %v8168_v54 = vld [vmem:[%s14319_s27 + $0x7b8] sm:$0xff] }
 0x62b   : > { %9654 = vmatmul.mubr.bf16.vlgmr.msra.gmra.mrb[8].mxu0 %v15338_v24  ;;  %v11144_v17 = vcombine.low %v8115_v3, %v8119_v6 }
 0x62c   : > { %9736 = vmatmul.mubr.bf16.vlgmr.msra.gmra.mrb[8].mxu1 %v15338_v24  ;;  %9663 = vmatpush1.bf16.msra.mxu0 %v11080_v8  ;;  %v8080_v24 = vld [vmem:[%s14319_s27 + $0x4f8] sm:$0xff] }
 0x62d   : > { %9694 = vmatprep.mubr.bf16.mxu0 %v15346_v18  ;;  %9745 = vmatpush1.bf16.msra.mxu1 %v11082_v10  ;;  %v11106_v34 = vcombine.low %v8076_v23, %v8080_v24  ;;  %v8120_v8 = vld [vmem:[%s14319_s27 + $0x638] sm:$0xff]  ;;  %v11145_v10 = vcombine.high %v8115_v3, %v8119_v6  ;;  %v8175_v3 = vld [vmem:[%s14319_s27 + $0x7f0] sm:$0xff] }
 0x62e   : > { %9776 = vmatprep.mubr.bf16.mxu1 %v15346_v18  ;;  %9664 = vmatprep.subr.bf16.mxu0 %v11089_v11  ;;  %v11107_v18 = vcombine.high %v8076_v23, %v8080_v24  ;;  %v11147_v11 = vcombine.high %v8116_v7, %v8120_v8  ;;  %v8136_v23 = vld [vmem:[%s14319_s27 + $0x6b8] sm:$0xff]  ;;  %v11152_v24 = vcombine.low %v8123_v1, %v8127_v13 }
 0x62f   : > { %9746 = vmatprep.subr.bf16.mxu1 %v11091_v30  ;;  %v8124_v30 = vld [vmem:[%s14319_s27 + $0x658] sm:$0xff] }
 0x630   : > { %9665 = vmatpush1.bf16.msra.mxu0 %v11088_v52  ;;  %v11146_v52 = vcombine.low %v8116_v7, %v8120_v8  ;;  %v8172_v6 = vld [vmem:[%s14319_s27 + $0x7d8] sm:$0xff] }
 0x631   : > { %9747 = vmatpush1.bf16.msra.mxu1 %v11090_v19  ;;  %9666 = vmatprep.subr.bf16.mxu0 %v11097_v20  ;;  %v11153_v19 = vcombine.high %v8123_v1, %v8127_v13  ;;  %v11155_v20 = vcombine.high %v8124_v30, %v8128_v16  ;;  %v8176_v7 = vld [vmem:[%s14319_s27 + $0x7f8] sm:$0xff]  ;;  %v12630_v13 = vmov 1983009808  }
 0x632   : > { %9748 = vmatprep.subr.bf16.mxu1 %v11099_v4  ;;  %v8131_v4 = vld [vmem:[%s14319_s27 + $0x690] sm:$0xff]  ;;  %v11202_v1 = vcombine.low %v8172_v6, %v8176_v7 }
 0x633   : > { %v11160_v5 = vcombine.low %v8131_v4, %v8135_v21 }
 0x634   : > { %9667 = vmatpush1.bf16.msra.mxu0 %v11096_v25  ;;  %v11154_v25 = vcombine.low %v8124_v30, %v8128_v16  ;;  %v9796_v30 = vunpack.c.l.s4 %v12630_v13 }
 0x635   : > { %9749 = vmatpush1.bf16.msra.mxu1 %v11098_v27  ;;  %9668 = vmatprep.subr.bf16.mxu0 %v11105_v28  ;;  %v11161_v27 = vcombine.high %v8131_v4, %v8135_v21  ;;  %v11163_v28 = vcombine.high %v8132_v22, %v8136_v23 }
 0x636   : > { %9750 = vmatprep.subr.bf16.mxu1 %v11107_v18  ;;  %v8139_v18 = vld [vmem:[%s14319_s27 + $0x6d0] sm:$0xff]  ;;  %v9797_v16 = vunpack.c.0.s8 %v9796_v30 }
 0x637   : > { %v11168_v39 = vcombine.low %v8139_v18, %v8143_v29 }
 0x638   : > { %9669 = vmatpush1.bf16.msra.mxu0 %v11104_v62  ;;  %v11162_v62 = vcombine.low %v8132_v22, %v8136_v23 }
 0x639   : > { %9751 = vmatpush1.bf16.msra.mxu1 %v11106_v34  ;;  %9670 = vmatprep.subr.bf16.mxu0 %v11113_v35  ;;  %v11169_v34 = vcombine.high %v8139_v18, %v8143_v29  ;;  %v11171_v35 = vcombine.high %v8140_v31, %v8144_v33  ;;  %v7919_v18 = vld [vmem:[#allocation2] sm:$0xff] }
 0x63a   : > { %9752 = vmatprep.subr.bf16.mxu1 %v11115_v26  ;;  %v8147_v26 = vld [vmem:[%s14319_s27 + $0x710] sm:$0xff] }
 0x63b   : > { %v11176_v47 = vcombine.low %v8147_v26, %v8151_v15 }
 0x63c   : > { %9671 = vmatpush1.bf16.msra.mxu0 %v11112_v40  ;;  %v11170_v40 = vcombine.low %v8140_v31, %v8144_v33 }
 0x63d   : > { %9753 = vmatpush1.bf16.msra.mxu1 %v11114_v55  ;;  %9672 = vmatprep.subr.bf16.mxu0 %v11121_v41  ;;  %v11177_v55 = vcombine.high %v8147_v26, %v8151_v15  ;;  %v11179_v41 = vcombine.high %v8148_v36, %v8152_v37 }
 0x63e   : > { %9754 = vmatprep.subr.bf16.mxu1 %v11123_v43  ;;  %v8155_v43 = vld [vmem:[%s14319_s27 + $0x750] sm:$0xff] }
 0x63f   : > { %v11184_v56 = vcombine.low %v8155_v43, %v8159_v44 }
 0x640   : > { %9673 = vmatpush1.bf16.msra.mxu0 %v11120_v48  ;;  %v11178_v48 = vcombine.low %v8148_v36, %v8152_v37 }
 0x641   : > { %9755 = vmatpush1.bf16.msra.mxu1 %v11122_v49  ;;  %9674 = vmatprep.subr.bf16.mxu0 %v11129_v50  ;;  %v11185_v49 = vcombine.high %v8155_v43, %v8159_v44  ;;  %v11187_v50 = vcombine.high %v8156_v45, %v8160_v46 }
 0x642   : > { %9756 = vmatprep.subr.bf16.mxu1 %v11131_v42  ;;  %v8163_v42 = vld [vmem:[%s14319_s27 + $0x790] sm:$0xff] }
 0x643   : > { %v11192_v8 = vcombine.low %v8163_v42, %v8167_v51 }
 0x644   : > { %9675 = vmatpush1.bf16.msra.mxu0 %v11128_v57  ;;  %v11186_v57 = vcombine.low %v8156_v45, %v8160_v46  ;;  %v9839_v45 = vld [vmem:[%s1910_s11] sm:$0xff] (!%p11204_p0)  ;;  %v9859_v46 = vsub.s32 (!%p11204_p0), 4, %v14363_v59 }
 0x645   : > { %9757 = vmatpush1.bf16.msra.mxu1 %v11130_v38  ;;  %9676 = vmatprep.subr.bf16.mxu0 %v11137_v58  ;;  %v11193_v38 = vcombine.high %v8163_v42, %v8167_v51  ;;  %v11195_v58 = vcombine.high %v8164_v53, %v8168_v54  ;;  %v9852_v42 = vrot.slane (!%p11204_p0), %v9839_v45, %v2722_v12 }
 0x646   : > { %9758 = vmatprep.subr.bf16.mxu1 %v11139_v60  ;;  %v8171_v60 = vld [vmem:[%s14319_s27 + $0x7d0] sm:$0xff]  ;;  %v9856_v51 = vrot.slane (!%p11204_p0), %v9839_v45, %v2726_v0 }
 0x648   : > { %9677 = vmatpush1.bf16.msra.mxu0 %v11136_v9  ;;  %v11194_v9 = vcombine.low %v8164_v53, %v8168_v54  ;;  %v9860_v53 = vrot.slane (!%p11204_p0), %v9839_v45, %v9859_v46 }
 0x649   : > { %9759 = vmatpush1.bf16.msra.mxu1 %v11138_v14  ;;  %9678 = vmatprep.subr.bf16.mxu0 %v11145_v10  ;;  %v11201_v14 = vcombine.high %v8171_v60, %v8175_v3  ;;  %v11203_v10 = vcombine.high %v8172_v6, %v8176_v7 }
 0x64a   : > { %9760 = vmatprep.subr.bf16.mxu1 %v11147_v11  ;;  %v11200_v11 = vcombine.low %v8171_v60, %v8175_v3 }
 0x64c   : > { %9679 = vmatpush1.bf16.msra.mxu0 %v11144_v17 }
 0x64d   : > { %9761 = vmatpush1.bf16.msra.mxu1 %v11146_v52  ;;  %9680 = vmatprep.subr.bf16.mxu0 %v11153_v19  ;;  %v15550_v19 = vsub.s32 %v9797_v16, %v14363_v59 }
 0x64e   : > { %9762 = vmatprep.subr.bf16.mxu1 %v11155_v20 }
 0x650   : > { %9681 = vmatpush1.bf16.msra.mxu0 %v11152_v24 }
 0x651   : > { %9763 = vmatpush1.bf16.msra.mxu1 %v11154_v25  ;;  %9682 = vmatprep.subr.bf16.mxu0 %v11161_v27 }
 0x652   : > { %9764 = vmatprep.subr.bf16.mxu1 %v11163_v28 }
 0x654   : > { %9683 = vmatpush1.bf16.msra.mxu0 %v11160_v5 }
 0x655   : > { %9765 = vmatpush1.bf16.msra.mxu1 %v11162_v62  ;;  %9684 = vmatprep.subr.bf16.mxu0 %v11169_v34 }
 0x656   : > { %9766 = vmatprep.subr.bf16.mxu1 %v11171_v35 }
 0x658   : > { %9685 = vmatpush1.bf16.msra.mxu0 %v11168_v39 }
 0x659   : > { %9767 = vmatpush1.bf16.msra.mxu1 %v11170_v40  ;;  %9686 = vmatprep.subr.bf16.mxu0 %v11177_v55 }
 0x65a   : > { %9768 = vmatprep.subr.bf16.mxu1 %v11179_v41  ;;  %v7920_v41 = vld [vmem:[#allocation2 + $0x8] sm:$0xff] }
 0x65c   : > { %9687 = vmatpush1.bf16.msra.mxu0 %v11176_v47  ;;  %v9863_v47 = vsub.s32 (!%p11204_p0), 5, %v14363_v59 }
 0x65d   : > { %9769 = vmatpush1.bf16.msra.mxu1 %v11178_v48  ;;  %9688 = vmatprep.subr.bf16.mxu0 %v11185_v49  ;;  %v9867_v48 = vsub.s32 (!%p11204_p0), 6, %v14363_v59  ;;  %v9844_v49 = vrot.slane (!%p11204_p0), %v9839_v45, %v2714_v61 }
 0x65e   : > { %9770 = vmatprep.subr.bf16.mxu1 %v11187_v50  ;;  %v9848_v50 = vrot.slane (!%p11204_p0), %v9839_v45, %v2718_v63  ;;  %v9864_v54 = vrot.slane (!%p11204_p0), %v9839_v45, %v9863_v47 }
 0x660   : > { %9689 = vmatpush1.bf16.msra.mxu0 %v11184_v56  ;;  %v9868_v56 = vrot.slane (!%p11204_p0), %v9839_v45, %v9867_v48  ;;  %v9890_v3 = vcombine.low (!%p11204_p0), %v9860_v53, %v9864_v54 }
 0x661   : > { %9771 = vmatpush1.bf16.msra.mxu1 %v11186_v57  ;;  %9690 = vmatprep.subr.bf16.mxu0 %v11193_v38  ;;  %v9871_v57 = vsub.s32 (!%p11204_p0), 7, %v14363_v59  ;;  %v9873_v38 = vcombine.low (!%p11204_p0), %v9844_v49, %v9848_v50 }
 0x662   : > { %9772 = vmatprep.subr.bf16.mxu1 %v11195_v58  ;;  %v9874_v58 = vcombine.low (!%p11204_p0), %v9852_v42, %v9856_v51  ;;  %v9898_v12 = vrot.slane (!%p11204_p0), %v9890_v3, %v15550_v19 }
 0x663   : > { %v9872_v60 = vrot.slane (!%p11204_p0), %v9839_v45, %v9871_v57  ;;  %v9881_v61 = vrot.slane (!%p11204_p0), %v9873_v38, %v15550_v19 }
 0x664   : > { %9691 = vmatpush1.bf16.msra.mxu0 %v11192_v8  ;;  %v9888_v6 = vrot.slane (!%p11204_p0), %v9874_v58, %v15550_v19 }
 0x665   : > { %9773 = vmatpush1.bf16.msra.mxu1 %v11194_v9  ;;  %9692 = vmatprep.subr.bf16.mxu0 %v11201_v14  ;;  %v9891_v7 = vcombine.low (!%p11204_p0), %v9868_v56, %v9872_v60 }
 0x666   : > { %9774 = vmatprep.subr.bf16.mxu1 %v11203_v10  ;;  %v9889_v8 = vcombine.low (!%p11204_p0), %v9881_v61, %v9888_v6 }
 0x667   : > { %v9905_v0 = vrot.slane (!%p11204_p0), %v9891_v7, %v15550_v19 }
 0x668   : > { %9693 = vmatpush1.bf16.msra.mxu0 %v11200_v11 }
 0x669   : > { %9775 = vmatpush1.bf16.msra.mxu1 %v11202_v1  ;;  %v9906_v10 = vcombine.low (!%p11204_p0), %v9898_v12, %v9905_v0 }
 0x66b   : > { %9695 = vmatmul.mubr.bf16.vlgmr.msra.gmra.mrb[8].mxu0 %v15417_v32 }
 0x66c   : > { %9777 = vmatmul.mubr.bf16.vlgmr.msra.gmra.mrb[8].mxu1 %v15417_v32 }
 0x6be   : > { %v9532_v17 = vpop.f32.mrb[4].mxu0  ;;  %v9614_v52 = vpop.f32.mrb[4].mxu1 }
 0x6bf   : > { %v9534_v20 = vpop.f32.mrb[5].mxu0  ;;  %v9616_v4 = vpop.f32.mrb[5].mxu1 }
 0x6c0   : > { %v9793_v21 = vcombine.low %v9532_v17, %v9534_v20  ;;  %v9794_v22 = vcombine.low %v9614_v52, %v9616_v4  ;;  %v9536_v23 = vpop.f32.mrb[6].mxu0  ;;  %v9618_v24 = vpop.f32.mrb[6].mxu1 }
 0x6c1   : > { %v9537_v25 = vpop.f32.mrb[7].mxu0  ;;  %v9619_v27 = vpop.f32.mrb[7].mxu1 }
 0x6c2   : > { %v9801_v28 = vrot.slane %v9793_v21, %v15550_v19  ;;  %v9808_v32 = vrot.slane %v9794_v22, %v15550_v19 }
 0x6c4   : > { %v9809_v29 = vcombine.low %v9801_v28, %v9808_v32 }
 0x6c6   : > { %v9829_v31 = vadd.f32 %v9809_v29, %v7919_v18 }
 0x6c8   : > { %9831 = vst [vmem:[#allocation2] sm:$0xff] %v9829_v31 }
 0x6cf   : > { %v9837_v63 = vld [vmem:[#allocation2] sm:$0xff] (!%p11204_p0) }
 0x6d0   : > { %v9909_v14 = vadd.f32 (!%p11204_p0), %v9889_v8, %v9837_v63 }
 0x6d2   : > { %v9911_v11 = vmax.f32 (!%p11204_p0), %v9909_v14, 0.0 }
 0x6d4   : > { %v9915_v1 = vcombine.high (!%p11204_p0), %v9911_v11, %v9911_v11  ;;  %v9922_v13 = vrot.slane (!%p11204_p0), %v9911_v11, %v15550_v19 }
 0x6d6   : > { %v9929_v16 = vrot.slane (!%p11204_p0), %v9915_v1, %v15550_v19  ;;  %v9930_v17 = vcombine.high (!%p11204_p0), %v9922_v13, %v9922_v13 }
 0x6d8   : > { %v9931_v4 = vcombine.high (!%p11204_p0), %v9929_v16, %v9929_v16  ;;  %v11205_v21 = vpack.c.bf16 (!%p11204_p0), %v9930_v17, %v9922_v13 }
 0x6da   : > { %v11206_v24 = vpack.c.bf16 (!%p11204_p0), %v9931_v4, %v9929_v16  ;;  %v9983_v25 = vrot.slane (!%p11204_p0), %v11205_v21, %v14371_v2 }
 0x6dc   : > { %v9990_v32 = vrot.slane (!%p11204_p0), %v11206_v24, %v14371_v2 }
 0x6de   : > { %v10005_v31 = vcombine.low (!%p11204_p0), %v9983_v25, %v9990_v32 }
 0x73e   : > { %v9696_v33 = vpop.f32.mrb[8].mxu0 }
 0x73f   : > { %v9778_v5 = vpop.f32.mrb[8].mxu1  ;;  %v9698_v62 = vpop.f32.mrb[9].mxu0 }
 0x740   : > { %v9810_v34 = vcombine.low %v9696_v33, %v9698_v62  ;;  %v9780_v35 = vpop.f32.mrb[9].mxu1  ;;  %v9700_v26 = vpop.f32.mrb[10].mxu0  ;;  %v10013_v62 = vrot.slane (!%p11204_p0), %v10005_v31, %v14371_v2 }
 0x741   : > { %v9811_v15 = vcombine.low %v9778_v5, %v9780_v35  ;;  %v9782_v36 = vpop.f32.mrb[10].mxu1  ;;  %v9701_v37 = vpop.f32.mrb[11].mxu0 }
 0x742   : > { %v9818_v39 = vrot.slane %v9810_v34, %v15550_v19  ;;  %v9783_v40 = vpop.f32.mrb[11].mxu1 }
 0x743   : > { %v9825_v55 = vrot.slane %v9811_v15, %v15550_v19  ;;  %9836 = sbr.rel (%p11204_p0) target bundleno = 1894 (0x766), region = 71 }
 0x745   : > { %v9826_v43 = vcombine.low %v9818_v39, %v9825_v55 }
 0x747   : > { %v9830_v44 = vadd.f32 %v9826_v43, %v7920_v41 }
 0x749   : > { %9832 = vst [vmem:[#allocation2 + $0x8] sm:$0xff] %v9830_v44 }
 0x750   : > { %v9838_v9 = vld [vmem:[#allocation2 + $0x8] sm:$0xff] }
 0x751   : > { %v9910_v59 = vadd.f32 %v9906_v10, %v9838_v9 }
 0x753   : > { %v9912_v30 = vmax.f32 %v9910_v59, 0.0 }
 0x755   : > { %v9932_v52 = vcombine.high %v9912_v30, %v9912_v30  ;;  %v9939_v20 = vrot.slane %v9912_v30, %v15550_v19 }
 0x757   : > { %v9946_v22 = vrot.slane %v9932_v52, %v15550_v19  ;;  %v9947_v23 = vcombine.high %v9939_v20, %v9939_v20 }
 0x759   : > { %v9948_v27 = vcombine.high %v9946_v22, %v9946_v22  ;;  %v11207_v28 = vpack.c.bf16 %v9947_v23, %v9939_v20 }
 0x75b   : > { %v11208_v18 = vpack.c.bf16 %v9948_v27, %v9946_v22  ;;  %v9997_v29 = vrot.slane %v11207_v28, %v14371_v2 }
 0x75d   : > { %v10004_v33 = vrot.slane %v11208_v18, %v14371_v2 }
 0x75f   : > { %v10006_v5 = vcombine.low %v9997_v29, %v10004_v33 }
 0x761   : > { %v10020_v34 = vrot.slane %v10006_v5, %v14371_v2 }
 0x763   : > { %v10021_v19 = vcombine.low %v10013_v62, %v10020_v34 }
 0x765   : > { %10023 = vst [vmem:[%s1914_s16] sm:$0xff] %v10021_v19 }
 0x766 PF: > { %s15_s24 = sadd.s32 1, %s12625_s24   ;;  %s15626_s15 = sld [smem:[#allocation4_spill]] }
 0x767   : > { %p12_p1 = scmp.ge.s32.totalorder %s15_s24, 6   ;;  %s15627_s17 = sld [smem:[#allocation5_spill]] }
 0x768   : > { %s15628_s18 = smov %s12605_s19  ;;  %s15629_s19 = smov %s12712_s6 }
 0x769   : > { %s15630_s20 = smov %s12617_s22  ;;  %s15631_s21 = smov %s12621_s23 }
 0x76a   :  { %14 = sbr.rel (!%p12_p1) target bundleno = 6 (0x6), region = 115 }
 0x76c   : > { %s15632_s22 = smov %s15626_s15 }
 0x76d   : > { %s15633_s23 = smov %s15627_s17 }

</bundles_post_ra>
